<compile_context>
chip_gen: v7x
topology: tpu7x:2x2x1
jax: 0.10.0
libtpu: 0.0.40
codegen_flags: <defaults>
</compile_context>

<pallas_src>
import math
from functools import partial

import jax
import jax.numpy as jnp
from jax.experimental import pallas as pl
from jax.experimental.pallas import tpu as pltpu


# ---------------------------------------------------------------------------
# helpers
# ---------------------------------------------------------------------------
def _round_up(x, m):
    return (x + m - 1) // m * m


def _layer_norm(x, gamma, beta, eps=1e-6):
    mu = jnp.mean(x, axis=-1, keepdims=True)
    var = jnp.mean((x - mu) ** 2, axis=-1, keepdims=True)
    return (x - mu) * jax.lax.rsqrt(var + eps) * gamma + beta


def _gelu_tanh(x):
    # tanh-approximate GELU (runs on the EUP); |err| vs exact erf GELU < 1e-3.
    c = math.sqrt(2.0 / math.pi)
    return 0.5 * x * (1.0 + jnp.tanh(c * (x + 0.044715 * x * x * x)))


# ---------------------------------------------------------------------------
# kernels
# ---------------------------------------------------------------------------
def _patch_embed_kernel(p_ref, w_ref, b_ref, out_ref):
    # (TM, C*p*p) bf16 @ (C*p*p, D) bf16 -> f32, + bias  (== stride=k Conv2d)
    out_ref[...] = (jnp.dot(p_ref[...], w_ref[...],
                            preferred_element_type=jnp.float32) + b_ref[...])


def _encoder_layer_kernel(x_ref, ln_ref, wqkv_ref, bqkv_ref, wo_ref, bod_ref,
                          w1_ref, b1_ref, w2_ref, out_ref,
                          *, num_heads, head_dim, seq_pad, seq_real,
                          batch_block):
    NB, Sp, dh, H = batch_block, seq_pad, head_dim, num_heads
    D = H * dh
    S_tot = NB * Sp
    scale = 1.0 / math.sqrt(dh)
    bf16 = jnp.bfloat16

    # fold batch into the matmul row dimension (residual stream stays f32)
    x = x_ref[...].reshape(S_tot, D)

    lnp = ln_ref[...]                                   # (4, D) packed LN params
    ln1_g, ln1_b = lnp[0:1, :], lnp[1:2, :]
    ln2_g, ln2_b = lnp[2:3, :], lnp[3:4, :]
    bo, b2 = bod_ref[0:1, :], bod_ref[1:2, :]           # (2, D) packed biases

    # --- ln_1 + fused QKV projection over all (NB*Sp) rows ------------------
    x1 = _layer_norm(x, ln1_g, ln1_b)
    qkv = jnp.dot(x1.astype(bf16), wqkv_ref[...],
                  preferred_element_type=jnp.float32) + bqkv_ref[...]

    key_mask = None
    if seq_real < Sp:                                   # mask padded keys
        kidx = jax.lax.broadcasted_iota(jnp.int32, (1, Sp), 1)
        key_mask = kidx < seq_real

    # --- attention: per (batch, head) softmax, single full-K out_proj -------
    attn_rows = []
    for b in range(NB):                                 # static unrolled
        r0 = b * Sp
        head_outs = []
        for h in range(H):                              # static unrolled
            c0 = h * dh
            qh = qkv[r0:r0 + Sp, c0:c0 + dh].astype(bf16)
            kh = qkv[r0:r0 + Sp, D + c0:D + c0 + dh].astype(bf16)
            vh = qkv[r0:r0 + Sp, 2 * D + c0:2 * D + c0 + dh].astype(bf16)
            s = jax.lax.dot_general(qh, kh, (((1,), (1,)), ((), ())),
                                    preferred_element_type=jnp.float32) * scale
            if key_mask is not None:
                s = jnp.where(key_mask, s, -1e30)
            s = s - jnp.max(s, axis=-1, keepdims=True)
            p = jnp.exp(s)
            p = p * pl.reciprocal(jnp.sum(p, axis=-1, keepdims=True),
                                  approx=True)
            head_outs.append(jnp.dot(p.astype(bf16), vh,
                                     preferred_element_type=jnp.float32))
        attn_rows.append(head_outs[0] if H == 1
                         else jnp.concatenate(head_outs, axis=-1))
    attn = attn_rows[0] if NB == 1 else jnp.concatenate(attn_rows, axis=0)

    # out_proj(concat(heads)) as one (S_tot, D) @ (D, D) matmul
    attn = jnp.dot(attn.astype(bf16), wo_ref[...],
                   preferred_element_type=jnp.float32) + bo
    x2 = x + attn                                       # residual (dropout p=0)

    # --- ln_2 + MLP ----------------------------------------------------------
    y = _layer_norm(x2, ln2_g, ln2_b)
    h1 = _gelu_tanh(jnp.dot(y.astype(bf16), w1_ref[...],
                            preferred_element_type=jnp.float32) + b1_ref[...])
    y2 = jnp.dot(h1.astype(bf16), w2_ref[...],
                 preferred_element_type=jnp.float32) + b2

    out_ref[...] = (x2 + y2).reshape(NB, Sp, D)         # second residual


def _ln_head_kernel(x_ref, g_ref, b_ref, wh_ref, bh_ref, out_ref):
    # final encoder LayerNorm (on the class token) + classification head
    xn = _layer_norm(x_ref[...], g_ref[...], b_ref[...])
    out_ref[...] = (jnp.dot(xn.astype(jnp.bfloat16), wh_ref[...],
                            preferred_element_type=jnp.float32) + bh_ref[...])


# ---------------------------------------------------------------------------
# wrappers
# ---------------------------------------------------------------------------
_VMEM_LIMIT = 64 * 1024 * 1024


def patch_embed(patches_bf16, w_bf16, b, *, tile_m=256):
    n, k = patches_bf16.shape
    d = w_bf16.shape[1]
    tm = min(tile_m, _round_up(n, 8))
    n_pad = _round_up(n, tm)
    if n_pad != n:
        patches_bf16 = jnp.pad(patches_bf16, ((0, n_pad - n), (0, 0)))
    out = pl.pallas_call(
        _patch_embed_kernel,
        out_shape=jax.ShapeDtypeStruct((n_pad, d), jnp.float32),
        grid=(n_pad // tm,),
        in_specs=[pl.BlockSpec((tm, k), lambda i: (i, 0)),
                  pl.BlockSpec((k, d), lambda i: (0, 0)),
                  pl.BlockSpec((1, d), lambda i: (0, 0))],
        out_specs=pl.BlockSpec((tm, d), lambda i: (i, 0)),
        compiler_params=pltpu.CompilerParams(
            dimension_semantics=("parallel",),
            vmem_limit_bytes=_VMEM_LIMIT),
    )(patches_bf16, w_bf16, b)
    return out[:n]


def encoder_layer(x, lp, *, num_heads, seq_real, batch_block=1):
    B, Sp, D = x.shape
    assert B % batch_block == 0
    head_dim = D // num_heads
    args = (lp["ln"], lp["wqkv_t"], lp["bqkv"], lp["wo_t"], lp["b_od"],
            lp["w1_t"], lp["b1"], lp["w2_t"])

    def full_spec(a):
        return pl.BlockSpec(a.shape, lambda b, _nd=a.ndim: (0,) * _nd)

    in_specs = ([pl.BlockSpec((batch_block, Sp, D), lambda b: (b, 0, 0))]
                + [full_spec(a) for a in args])
    return pl.pallas_call(
        partial(_encoder_layer_kernel, num_heads=num_heads, head_dim=head_dim,
                seq_pad=Sp, seq_real=seq_real, batch_block=batch_block),
        out_shape=jax.ShapeDtypeStruct((B, Sp, D), jnp.float32),
        grid=(B // batch_block,),
        in_specs=in_specs,
        out_specs=pl.BlockSpec((batch_block, Sp, D), lambda b: (b, 0, 0)),
        compiler_params=pltpu.CompilerParams(
            dimension_semantics=("parallel",),
            vmem_limit_bytes=_VMEM_LIMIT),
    )(x, *args)


def ln_head(cls_x, g, b, wh_t, bh):
    B, _ = cls_x.shape
    C = wh_t.shape[1]
    return pl.pallas_call(
        _ln_head_kernel,
        out_shape=jax.ShapeDtypeStruct((B, C), jnp.float32),
    )(cls_x, g, b, wh_t, bh)


def vit_forward(x_nchw, params, *, patch_size, num_heads,
                batch_block=1, seq_pad_multiple=128):
    B, C, H, W = x_nchw.shape
    p = patch_size
    n_h, n_w = H // p, W // p
    D = params["conv_w_t"].shape[1]

    # conv_proj (stride == kernel) == patch extraction + matmul; ordering
    # (c, dy, dx) fastest matches the Conv2d weight flattening exactly.
    patches = x_nchw.reshape(B, C, n_h, p, n_w, p)
    patches = patches.transpose(0, 2, 4, 1, 3, 5).reshape(B * n_h * n_w, C * p * p)
    tok = patch_embed(patches.astype(jnp.bfloat16), params["conv_w_t"],
                      params["conv_b"]).reshape(B, n_h * n_w, D)

    # class token + positional embedding (image branch); dropout p=0 -> identity
    cls = jnp.broadcast_to(params["class_token"], (B, 1, D))
    xseq = jnp.concatenate([cls, tok], axis=1) + params["pos_embedding"]

    # pad sequence to a lane-dense length; padded keys are masked in-kernel
    # and padded rows never feed real rows (row-wise ops only).
    S = xseq.shape[1]
    Sp = _round_up(S, seq_pad_multiple)
    if Sp != S:
        xseq = jnp.pad(xseq, ((0, 0), (0, Sp - S), (0, 0)))

    for lp in params["layers"]:
        xseq = encoder_layer(xseq, lp, num_heads=num_heads, seq_real=S,
                             batch_block=batch_block)

    # encoder final LayerNorm is per-token; LN-then-slice == slice-then-LN.
    cls_out = xseq[:, 0, :]
    return ln_head(cls_out, params["ln_g"], params["ln_b"],
                   params["head_w_t"], params["head_b"])


# ---------------------------------------------------------------------------
# deterministic synthetic parameters (shapes follow VisionTransformer.__init__)
# ---------------------------------------------------------------------------
def init_params(key, *, image_size, patch_size, num_layers, num_heads,
                hidden_dim, mlp_dim, num_classes):
    p = patch_size
    seq_len = (image_size // p) ** 2 + 1
    D, M = hidden_dim, mlp_dim
    keys = iter(jax.random.split(key, 8 + 8 * num_layers))
    nrm = lambda shp, std: std * jax.random.normal(next(keys), shp, jnp.float32)
    bf16 = jnp.bfloat16

    fan_in = 3 * p * p
    conv_w = nrm((D, 3, p, p), math.sqrt(1.0 / fan_in))        # Conv2d weight
    params = {
        "conv_w_t": conv_w.reshape(D, 3 * p * p).T.astype(bf16),
        "conv_b": jnp.zeros((1, D), jnp.float32),
        "class_token": jnp.zeros((1, 1, D), jnp.float32),
        "pos_embedding": nrm((1, seq_len, D), 0.02),
        "ln_g": jnp.ones((1, D), jnp.float32),
        "ln_b": jnp.zeros((1, D), jnp.float32),
        # NOTE: module init zeroes the head; small random values used here so
        # the kernel output is non-trivial (deterministic via PRNGKey(0)).
        "head_w_t": nrm((D, num_classes), 0.02).astype(bf16),  # head.weight.T
        "head_b": jnp.zeros((1, num_classes), jnp.float32),
        "layers": [],
    }
    for _ in range(num_layers):
        params["layers"].append({
            # packed LN params: rows = ln1_g, ln1_b, ln2_g, ln2_b
            "ln": jnp.concatenate([jnp.ones((1, D)), jnp.zeros((1, D)),
                                   jnp.ones((1, D)), jnp.zeros((1, D))],
                                  axis=0).astype(jnp.float32),
            "wqkv_t": nrm((D, 3 * D), math.sqrt(1.0 / D)).astype(bf16),
            "bqkv": jnp.zeros((1, 3 * D), jnp.float32),
            "wo_t": nrm((D, D), math.sqrt(1.0 / D)).astype(bf16),
            # packed biases: row0 = out_proj bias, row1 = linear_2 bias
            "b_od": jnp.concatenate([jnp.zeros((1, D)), nrm((1, D), 1e-6)],
                                    axis=0).astype(jnp.float32),
            "w1_t": nrm((D, M), math.sqrt(2.0 / (D + M))).astype(bf16),
            "b1": nrm((1, M), 1e-6),
            "w2_t": nrm((M, D), math.sqrt(2.0 / (D + M))).astype(bf16),
        })
    return params


if __name__ == "__main__":
    image_size, patch_size = 16, 8          # -> 4 patches + class token = seq 5
    num_layers, num_heads = 2, 4
    hidden_dim, mlp_dim = 32, 64
    num_classes = 10
    batch = 4
    batch_block = 2                         # fold 2 batch elems per grid step;
                                            # grid still has 2 parallel blocks

    key = jax.random.PRNGKey(0)
    k_params, k_x = jax.random.split(key)
    params = init_params(k_params, image_size=image_size, patch_size=patch_size,
                         num_layers=num_layers, num_heads=num_heads,
                         hidden_dim=hidden_dim, mlp_dim=mlp_dim,
                         num_classes=num_classes)
    x = jax.random.normal(k_x, (batch, 3, image_size, image_size), jnp.float32)

    fwd = jax.jit(partial(vit_forward, patch_size=patch_size,
                          num_heads=num_heads, batch_block=batch_block))
    out = fwd(x, params)
    jax.block_until_ready(out)

    assert out.shape == (batch, num_classes), out.shape
    assert bool(jnp.all(jnp.isfinite(out)))
    print("KERNEL_OK")
</pallas_src>

<mosaic_0001>
module attributes {stable_mosaic.version = 11 : i64} {
  func.func @_patch_embed_kernel(%arg0: i32, %arg1: memref<16x192xbf16, #tpu.memory_space<vmem>>, %arg2: memref<192x32xbf16, #tpu.memory_space<vmem>>, %arg3: memref<1x32xf32, #tpu.memory_space<vmem>>, %arg4: memref<16x32xf32, #tpu.memory_space<vmem>>) attributes {dimension_semantics = [#tpu.dimension_semantics<parallel>], iteration_bounds = array<i64: 1>, scalar_prefetch = 0 : i64, scratch_operands = 0 : i64, tpu.core_type = #tpu.core_type<tc>, window_params = [{transform_indices = @transform_0, window_bounds = array<i64: 16, 192>}, {pipeline_mode = #tpu.pipeline_mode<synchronous>, transform_indices = @transform_1, window_bounds = array<i64: 192, 32>}, {pipeline_mode = #tpu.pipeline_mode<synchronous>, transform_indices = @transform_2, window_bounds = array<i64: 1, 32>}, {transform_indices = @transform_3, window_bounds = array<i64: 16, 32>}]} {
    %c0 = arith.constant 0 : index
    %c0_0 = arith.constant 0 : index
    %0 = vector.load %arg1[%c0, %c0_0] : memref<16x192xbf16, #tpu.memory_space<vmem>>, vector<16x192xbf16>
    %c0_1 = arith.constant 0 : index
    %c0_2 = arith.constant 0 : index
    %1 = vector.load %arg2[%c0_1, %c0_2] : memref<192x32xbf16, #tpu.memory_space<vmem>>, vector<192x32xbf16>
    %cst = arith.constant dense<0.000000e+00> : vector<16x32xf32>
    %2 = tpu.matmul %0, %1, %cst {dimension_numbers = #tpu.dot_dimension_numbers<[1], [0], [0], [1], [0, 0, 1, 1], [], []>} : vector<16x192xbf16>, vector<192x32xbf16>, vector<16x32xf32> -> vector<16x32xf32>
    %c0_3 = arith.constant 0 : index
    %c0_4 = arith.constant 0 : index
    %3 = vector.load %arg3[%c0_3, %c0_4] : memref<1x32xf32, #tpu.memory_space<vmem>>, vector<1x32xf32>
    %4 = vector.broadcast %3 : vector<1x32xf32> to vector<16x32xf32>
    %5 = arith.addf %2, %4 : vector<16x32xf32>
    %c0_5 = arith.constant 0 : index
    %c0_6 = arith.constant 0 : index
    %6 = vector.load %arg4[%c0_5, %c0_6] : memref<16x32xf32, #tpu.memory_space<vmem>>, vector<16x32xf32>
    tpu.vector_store %arg4[%c0_5, %c0_6], %5 {strides = array<i32>} : memref<16x32xf32, #tpu.memory_space<vmem>>, vector<16x32xf32>,
    return
  }
  func.func @transform_0(%arg0: i32) -> (i32, i32) {
    %c0_i32 = arith.constant 0 : i32
    %c0_i32_0 = arith.constant 0 : i32
    return %arg0, %c0_i32 : i32, i32
  }
  func.func @transform_1(%arg0: i32) -> (i32, i32) {
    %c0_i32 = arith.constant 0 : i32
    %c0_i32_0 = arith.constant 0 : i32
    %c0_i32_1 = arith.constant 0 : i32
    return %c0_i32, %c0_i32_0 : i32, i32
  }
  func.func @transform_2(%arg0: i32) -> (i32, i32) {
    %c0_i32 = arith.constant 0 : i32
    %c0_i32_0 = arith.constant 0 : i32
    %c0_i32_1 = arith.constant 0 : i32
    return %c0_i32, %c0_i32_0 : i32, i32
  }
  func.func @transform_3(%arg0: i32) -> (i32, i32) {
    %c0_i32 = arith.constant 0 : i32
    %c0_i32_0 = arith.constant 0 : i32
    return %arg0, %c0_i32 : i32, i32
  }
}

module attributes {stable_mosaic.version = 11 : i64} {
  func.func @_encoder_layer_kernel(%arg0: i32, %arg1: memref<2x128x32xf32, #tpu.memory_space<vmem>>, %arg2: memref<4x32xf32, #tpu.memory_space<vmem>>, %arg3: memref<32x96xbf16, #tpu.memory_space<vmem>>, %arg4: memref<1x96xf32, #tpu.memory_space<vmem>>, %arg5: memref<32x32xbf16, #tpu.memory_space<vmem>>, %arg6: memref<2x32xf32, #tpu.memory_space<vmem>>, %arg7: memref<32x64xbf16, #tpu.memory_space<vmem>>, %arg8: memref<1x64xf32, #tpu.memory_space<vmem>>, %arg9: memref<64x32xbf16, #tpu.memory_space<vmem>>, %arg10: memref<2x128x32xf32, #tpu.memory_space<vmem>>) attributes {dimension_semantics = [#tpu.dimension_semantics<parallel>], iteration_bounds = array<i64: 2>, scalar_prefetch = 0 : i64, scratch_operands = 0 : i64, tpu.core_type = #tpu.core_type<tc>, window_params = [{transform_indices = @transform_0, window_bounds = array<i64: 2, 128, 32>}, {pipeline_mode = #tpu.pipeline_mode<synchronous>, transform_indices = @transform_1, window_bounds = array<i64: 4, 32>}, {pipeline_mode = #tpu.pipeline_mode<synchronous>, transform_indices = @transform_2, window_bounds = array<i64: 32, 96>}, {pipeline_mode = #tpu.pipeline_mode<synchronous>, transform_indices = @transform_3, window_bounds = array<i64: 1, 96>}, {pipeline_mode = #tpu.pipeline_mode<synchronous>, transform_indices = @transform_4, window_bounds = array<i64: 32, 32>}, {pipeline_mode = #tpu.pipeline_mode<synchronous>, transform_indices = @transform_5, window_bounds = array<i64: 2, 32>}, {pipeline_mode = #tpu.pipeline_mode<synchronous>, transform_indices = @transform_6, window_bounds = array<i64: 32, 64>}, {pipeline_mode = #tpu.pipeline_mode<synchronous>, transform_indices = @transform_7, window_bounds = array<i64: 1, 64>}, {pipeline_mode = #tpu.pipeline_mode<synchronous>, transform_indices = @transform_8, window_bounds = array<i64: 64, 32>}, {transform_indices = @transform_9, window_bounds = array<i64: 2, 128, 32>}]} {
    %c0 = arith.constant 0 : index
    %c0_0 = arith.constant 0 : index
    %c0_1 = arith.constant 0 : index
    %0 = vector.load %arg1[%c0, %c0_0, %c0_1] : memref<2x128x32xf32, #tpu.memory_space<vmem>>, vector<2x128x32xf32>
    %1 = vector.shape_cast %0 : vector<2x128x32xf32> to vector<256x32xf32>
    %c0_2 = arith.constant 0 : index
    %c0_3 = arith.constant 0 : index
    %2 = vector.load %arg2[%c0_2, %c0_3] : memref<4x32xf32, #tpu.memory_space<vmem>>, vector<4x32xf32>
    %3 = vector.extract_strided_slice %2 {offsets = [0, 0], sizes = [1, 32], strides = [1, 1]} : vector<4x32xf32> to vector<1x32xf32>
    %4 = vector.extract_strided_slice %2 {offsets = [1, 0], sizes = [1, 32], strides = [1, 1]} : vector<4x32xf32> to vector<1x32xf32>
    %5 = vector.extract_strided_slice %2 {offsets = [2, 0], sizes = [1, 32], strides = [1, 1]} : vector<4x32xf32> to vector<1x32xf32>
    %6 = vector.extract_strided_slice %2 {offsets = [3, 0], sizes = [1, 32], strides = [1, 1]} : vector<4x32xf32> to vector<1x32xf32>
    %c0_4 = arith.constant 0 : index
    %c0_5 = arith.constant 0 : index
    %7 = vector.load %arg6[%c0_4, %c0_5] : memref<2x32xf32, #tpu.memory_space<vmem>>, vector<1x32xf32>
    %c1 = arith.constant 1 : index
    %c0_6 = arith.constant 0 : index
    %8 = vector.load %arg6[%c1, %c0_6] : memref<2x32xf32, #tpu.memory_space<vmem>>, vector<1x32xf32>
    %cst = arith.constant dense<0.000000e+00> : vector<256xf32>
    %9 = vector.multi_reduction <add>, %1, %cst [1] : vector<256x32xf32> to vector<256xf32>
    %10 = vector.shape_cast %9 : vector<256xf32> to vector<256x1xf32>
    %cst_7 = arith.constant 3.200000e+01 : f32
    %11 = vector.broadcast %cst_7 : f32 to vector<256x1xf32>
    %12 = arith.divf %10, %11 : vector<256x1xf32>
    %13 = vector.broadcast %12 : vector<256x1xf32> to vector<256x32xf32>
    %14 = arith.subf %1, %13 : vector<256x32xf32>
    %15 = arith.mulf %14, %14 : vector<256x32xf32>
    %cst_8 = arith.constant dense<0.000000e+00> : vector<256xf32>
    %16 = vector.multi_reduction <add>, %15, %cst_8 [1] : vector<256x32xf32> to vector<256xf32>
    %17 = vector.shape_cast %16 : vector<256xf32> to vector<256x1xf32>
    %cst_9 = arith.constant 3.200000e+01 : f32
    %18 = vector.broadcast %cst_9 : f32 to vector<256x1xf32>
    %19 = arith.divf %17, %18 : vector<256x1xf32>
    %20 = vector.broadcast %12 : vector<256x1xf32> to vector<256x32xf32>
    %21 = arith.subf %1, %20 : vector<256x32xf32>
    %cst_10 = arith.constant 9.99999997E-7 : f32
    %22 = vector.broadcast %cst_10 : f32 to vector<256x1xf32>
    %23 = arith.addf %19, %22 : vector<256x1xf32>
    %24 = math.rsqrt %23 : vector<256x1xf32>
    %25 = vector.broadcast %24 : vector<256x1xf32> to vector<256x32xf32>
    %26 = arith.mulf %21, %25 : vector<256x32xf32>
    %27 = vector.broadcast %3 : vector<1x32xf32> to vector<256x32xf32>
    %28 = arith.mulf %26, %27 : vector<256x32xf32>
    %29 = vector.broadcast %4 : vector<1x32xf32> to vector<256x32xf32>
    %30 = arith.addf %28, %29 : vector<256x32xf32>
    %31 = arith.truncf %30 : vector<256x32xf32> to vector<256x32xbf16>
    %c0_11 = arith.constant 0 : index
    %c0_12 = arith.constant 0 : index
    %32 = vector.load %arg3[%c0_11, %c0_12] : memref<32x96xbf16, #tpu.memory_space<vmem>>, vector<32x96xbf16>
    %cst_13 = arith.constant dense<0.000000e+00> : vector<256x96xf32>
    %33 = tpu.matmul %31, %32, %cst_13 {dimension_numbers = #tpu.dot_dimension_numbers<[1], [0], [0], [1], [0, 0, 1, 1], [], []>} : vector<256x32xbf16>, vector<32x96xbf16>, vector<256x96xf32> -> vector<256x96xf32>
    %c0_14 = arith.constant 0 : index
    %c0_15 = arith.constant 0 : index
    %34 = vector.load %arg4[%c0_14, %c0_15] : memref<1x96xf32, #tpu.memory_space<vmem>>, vector<1x96xf32>
    %35 = vector.broadcast %34 : vector<1x96xf32> to vector<256x96xf32>
    %36 = arith.addf %33, %35 : vector<256x96xf32>
    %37 = tpu.iota {dimensions = array<i32: 1>} : vector<1x128xi32>
    %c5_i32 = arith.constant 5 : i32
    %38 = vector.broadcast %c5_i32 : i32 to vector<1x128xi32>
    %39 = arith.cmpi slt, %37, %38 : vector<1x128xi32>
    %40 = vector.extract_strided_slice %36 {offsets = [0, 0], sizes = [128, 8], strides = [1, 1]} : vector<256x96xf32> to vector<128x8xf32>
    %41 = arith.truncf %40 : vector<128x8xf32> to vector<128x8xbf16>
    %42 = vector.extract_strided_slice %36 {offsets = [0, 32], sizes = [128, 8], strides = [1, 1]} : vector<256x96xf32> to vector<128x8xf32>
    %43 = arith.truncf %42 : vector<128x8xf32> to vector<128x8xbf16>
    %44 = vector.extract_strided_slice %36 {offsets = [0, 64], sizes = [128, 8], strides = [1, 1]} : vector<256x96xf32> to vector<128x8xf32>
    %45 = arith.truncf %44 : vector<128x8xf32> to vector<128x8xbf16>
    %cst_16 = arith.constant dense<0.000000e+00> : vector<128x128xf32>
    %46 = tpu.matmul %41, %43, %cst_16 {dimension_numbers = #tpu.dot_dimension_numbers<[1], [1], [0], [0], [0, 0, 1, 0], [], []>} : vector<128x8xbf16>, vector<128x8xbf16>, vector<128x128xf32> -> vector<128x128xf32>
    %cst_17 = arith.constant 0.353553385 : f32
    %47 = vector.broadcast %cst_17 : f32 to vector<128x128xf32>
    %48 = arith.mulf %46, %47 : vector<128x128xf32>
    %cst_18 = arith.constant -1.000000e+30 : f32
    %49 = vector.shape_cast %39 : vector<1x128xi1> to vector<1x128xi1>
    %50 = vector.broadcast %49 : vector<1x128xi1> to vector<128x128xi1>
    %51 = vector.broadcast %cst_18 : f32 to vector<128x128xf32>
    %52 = arith.select %50, %48, %51 : vector<128x128xi1>, vector<128x128xf32>
    %cst_19 = arith.constant dense<0xFF800000> : vector<128xf32>
    %53 = vector.multi_reduction <maximumf>, %52, %cst_19 [1] : vector<128x128xf32> to vector<128xf32>
    %54 = vector.shape_cast %53 : vector<128xf32> to vector<128x1xf32>
    %55 = vector.broadcast %54 : vector<128x1xf32> to vector<128x128xf32>
    %56 = arith.subf %52, %55 : vector<128x128xf32>
    %57 = math.exp %56 : vector<128x128xf32>
    %cst_20 = arith.constant dense<0.000000e+00> : vector<128xf32>
    %58 = vector.multi_reduction <add>, %57, %cst_20 [1] : vector<128x128xf32> to vector<128xf32>
    %59 = vector.shape_cast %58 : vector<128xf32> to vector<128x1xf32>
    %60 = tpu.reciprocal %59 {approx = true} : vector<128x1xf32> -> vector<128x1xf32>
    %61 = vector.broadcast %60 : vector<128x1xf32> to vector<128x128xf32>
    %62 = arith.mulf %57, %61 : vector<128x128xf32>
    %63 = arith.truncf %62 : vector<128x128xf32> to vector<128x128xbf16>
    %cst_21 = arith.constant dense<0.000000e+00> : vector<128x8xf32>
    %64 = tpu.matmul %63, %45, %cst_21 {dimension_numbers = #tpu.dot_dimension_numbers<[1], [0], [0], [1], [0, 0, 1, 1], [], []>} : vector<128x128xbf16>, vector<128x8xbf16>, vector<128x8xf32> -> vector<128x8xf32>
    %65 = vector.extract_strided_slice %36 {offsets = [0, 8], sizes = [128, 8], strides = [1, 1]} : vector<256x96xf32> to vector<128x8xf32>
    %66 = arith.truncf %65 : vector<128x8xf32> to vector<128x8xbf16>
    %67 = vector.extract_strided_slice %36 {offsets = [0, 40], sizes = [128, 8], strides = [1, 1]} : vector<256x96xf32> to vector<128x8xf32>
    %68 = arith.truncf %67 : vector<128x8xf32> to vector<128x8xbf16>
    %69 = vector.extract_strided_slice %36 {offsets = [0, 72], sizes = [128, 8], strides = [1, 1]} : vector<256x96xf32> to vector<128x8xf32>
    %70 = arith.truncf %69 : vector<128x8xf32> to vector<128x8xbf16>
    %cst_22 = arith.constant dense<0.000000e+00> : vector<128x128xf32>
    %71 = tpu.matmul %66, %68, %cst_22 {dimension_numbers = #tpu.dot_dimension_numbers<[1], [1], [0], [0], [0, 0, 1, 0], [], []>} : vector<128x8xbf16>, vector<128x8xbf16>, vector<128x128xf32> -> vector<128x128xf32>
    %cst_23 = arith.constant 0.353553385 : f32
    %72 = vector.broadcast %cst_23 : f32 to vector<128x128xf32>
    %73 = arith.mulf %71, %72 : vector<128x128xf32>
    %cst_24 = arith.constant -1.000000e+30 : f32
    %74 = vector.shape_cast %39 : vector<1x128xi1> to vector<1x128xi1>
    %75 = vector.broadcast %74 : vector<1x128xi1> to vector<128x128xi1>
    %76 = vector.broadcast %cst_24 : f32 to vector<128x128xf32>
    %77 = arith.select %75, %73, %76 : vector<128x128xi1>, vector<128x128xf32>
    %cst_25 = arith.constant dense<0xFF800000> : vector<128xf32>
    %78 = vector.multi_reduction <maximumf>, %77, %cst_25 [1] : vector<128x128xf32> to vector<128xf32>
    %79 = vector.shape_cast %78 : vector<128xf32> to vector<128x1xf32>
    %80 = vector.broadcast %79 : vector<128x1xf32> to vector<128x128xf32>
    %81 = arith.subf %77, %80 : vector<128x128xf32>
    %82 = math.exp %81 : vector<128x128xf32>
    %cst_26 = arith.constant dense<0.000000e+00> : vector<128xf32>
    %83 = vector.multi_reduction <add>, %82, %cst_26 [1] : vector<128x128xf32> to vector<128xf32>
    %84 = vector.shape_cast %83 : vector<128xf32> to vector<128x1xf32>
    %85 = tpu.reciprocal %84 {approx = true} : vector<128x1xf32> -> vector<128x1xf32>
    %86 = vector.broadcast %85 : vector<128x1xf32> to vector<128x128xf32>
    %87 = arith.mulf %82, %86 : vector<128x128xf32>
    %88 = arith.truncf %87 : vector<128x128xf32> to vector<128x128xbf16>
    %cst_27 = arith.constant dense<0.000000e+00> : vector<128x8xf32>
    %89 = tpu.matmul %88, %70, %cst_27 {dimension_numbers = #tpu.dot_dimension_numbers<[1], [0], [0], [1], [0, 0, 1, 1], [], []>} : vector<128x128xbf16>, vector<128x8xbf16>, vector<128x8xf32> -> vector<128x8xf32>
    %90 = vector.extract_strided_slice %36 {offsets = [0, 16], sizes = [128, 8], strides = [1, 1]} : vector<256x96xf32> to vector<128x8xf32>
    %91 = arith.truncf %90 : vector<128x8xf32> to vector<128x8xbf16>
    %92 = vector.extract_strided_slice %36 {offsets = [0, 48], sizes = [128, 8], strides = [1, 1]} : vector<256x96xf32> to vector<128x8xf32>
    %93 = arith.truncf %92 : vector<128x8xf32> to vector<128x8xbf16>
    %94 = vector.extract_strided_slice %36 {offsets = [0, 80], sizes = [128, 8], strides = [1, 1]} : vector<256x96xf32> to vector<128x8xf32>
    %95 = arith.truncf %94 : vector<128x8xf32> to vector<128x8xbf16>
    %cst_28 = arith.constant dense<0.000000e+00> : vector<128x128xf32>
    %96 = tpu.matmul %91, %93, %cst_28 {dimension_numbers = #tpu.dot_dimension_numbers<[1], [1], [0], [0], [0, 0, 1, 0], [], []>} : vector<128x8xbf16>, vector<128x8xbf16>, vector<128x128xf32> -> vector<128x128xf32>
    %cst_29 = arith.constant 0.353553385 : f32
    %97 = vector.broadcast %cst_29 : f32 to vector<128x128xf32>
    %98 = arith.mulf %96, %97 : vector<128x128xf32>
    %cst_30 = arith.constant -1.000000e+30 : f32
    %99 = vector.shape_cast %39 : vector<1x128xi1> to vector<1x128xi1>
    %100 = vector.broadcast %99 : vector<1x128xi1> to vector<128x128xi1>
    %101 = vector.broadcast %cst_30 : f32 to vector<128x128xf32>
    %102 = arith.select %100, %98, %101 : vector<128x128xi1>, vector<128x128xf32>
    %cst_31 = arith.constant dense<0xFF800000> : vector<128xf32>
    %103 = vector.multi_reduction <maximumf>, %102, %cst_31 [1] : vector<128x128xf32> to vector<128xf32>
    %104 = vector.shape_cast %103 : vector<128xf32> to vector<128x1xf32>
    %105 = vector.broadcast %104 : vector<128x1xf32> to vector<128x128xf32>
    %106 = arith.subf %102, %105 : vector<128x128xf32>
    %107 = math.exp %106 : vector<128x128xf32>
    %cst_32 = arith.constant dense<0.000000e+00> : vector<128xf32>
    %108 = vector.multi_reduction <add>, %107, %cst_32 [1] : vector<128x128xf32> to vector<128xf32>
    %109 = vector.shape_cast %108 : vector<128xf32> to vector<128x1xf32>
    %110 = tpu.reciprocal %109 {approx = true} : vector<128x1xf32> -> vector<128x1xf32>
    %111 = vector.broadcast %110 : vector<128x1xf32> to vector<128x128xf32>
    %112 = arith.mulf %107, %111 : vector<128x128xf32>
    %113 = arith.truncf %112 : vector<128x128xf32> to vector<128x128xbf16>
    %cst_33 = arith.constant dense<0.000000e+00> : vector<128x8xf32>
    %114 = tpu.matmul %113, %95, %cst_33 {dimension_numbers = #tpu.dot_dimension_numbers<[1], [0], [0], [1], [0, 0, 1, 1], [], []>} : vector<128x128xbf16>, vector<128x8xbf16>, vector<128x8xf32> -> vector<128x8xf32>
    %115 = vector.extract_strided_slice %36 {offsets = [0, 24], sizes = [128, 8], strides = [1, 1]} : vector<256x96xf32> to vector<128x8xf32>
    %116 = arith.truncf %115 : vector<128x8xf32> to vector<128x8xbf16>
    %117 = vector.extract_strided_slice %36 {offsets = [0, 56], sizes = [128, 8], strides = [1, 1]} : vector<256x96xf32> to vector<128x8xf32>
    %118 = arith.truncf %117 : vector<128x8xf32> to vector<128x8xbf16>
    %119 = vector.extract_strided_slice %36 {offsets = [0, 88], sizes = [128, 8], strides = [1, 1]} : vector<256x96xf32> to vector<128x8xf32>
    %120 = arith.truncf %119 : vector<128x8xf32> to vector<128x8xbf16>
    %cst_34 = arith.constant dense<0.000000e+00> : vector<128x128xf32>
    %121 = tpu.matmul %116, %118, %cst_34 {dimension_numbers = #tpu.dot_dimension_numbers<[1], [1], [0], [0], [0, 0, 1, 0], [], []>} : vector<128x8xbf16>, vector<128x8xbf16>, vector<128x128xf32> -> vector<128x128xf32>
    %cst_35 = arith.constant 0.353553385 : f32
    %122 = vector.broadcast %cst_35 : f32 to vector<128x128xf32>
    %123 = arith.mulf %121, %122 : vector<128x128xf32>
    %cst_36 = arith.constant -1.000000e+30 : f32
    %124 = vector.shape_cast %39 : vector<1x128xi1> to vector<1x128xi1>
    %125 = vector.broadcast %124 : vector<1x128xi1> to vector<128x128xi1>
    %126 = vector.broadcast %cst_36 : f32 to vector<128x128xf32>
    %127 = arith.select %125, %123, %126 : vector<128x128xi1>, vector<128x128xf32>
    %cst_37 = arith.constant dense<0xFF800000> : vector<128xf32>
    %128 = vector.multi_reduction <maximumf>, %127, %cst_37 [1] : vector<128x128xf32> to vector<128xf32>
    %129 = vector.shape_cast %128 : vector<128xf32> to vector<128x1xf32>
    %130 = vector.broadcast %129 : vector<128x1xf32> to vector<128x128xf32>
    %131 = arith.subf %127, %130 : vector<128x128xf32>
    %132 = math.exp %131 : vector<128x128xf32>
    %cst_38 = arith.constant dense<0.000000e+00> : vector<128xf32>
    %133 = vector.multi_reduction <add>, %132, %cst_38 [1] : vector<128x128xf32> to vector<128xf32>
    %134 = vector.shape_cast %133 : vector<128xf32> to vector<128x1xf32>
    %135 = tpu.reciprocal %134 {approx = true} : vector<128x1xf32> -> vector<128x1xf32>
    %136 = vector.broadcast %135 : vector<128x1xf32> to vector<128x128xf32>
    %137 = arith.mulf %132, %136 : vector<128x128xf32>
    %138 = arith.truncf %137 : vector<128x128xf32> to vector<128x128xbf16>
    %cst_39 = arith.constant dense<0.000000e+00> : vector<128x8xf32>
    %139 = tpu.matmul %138, %120, %cst_39 {dimension_numbers = #tpu.dot_dimension_numbers<[1], [0], [0], [1], [0, 0, 1, 1], [], []>} : vector<128x128xbf16>, vector<128x8xbf16>, vector<128x8xf32> -> vector<128x8xf32>
    %140 = tpu.concatenate %64, %89, %114, %139 in 1 : vector<128x8xf32>, vector<128x8xf32>, vector<128x8xf32>, vector<128x8xf32> -> vector<128x32xf32>
    %141 = vector.extract_strided_slice %36 {offsets = [128, 0], sizes = [128, 8], strides = [1, 1]} : vector<256x96xf32> to vector<128x8xf32>
    %142 = arith.truncf %141 : vector<128x8xf32> to vector<128x8xbf16>
    %143 = vector.extract_strided_slice %36 {offsets = [128, 32], sizes = [128, 8], strides = [1, 1]} : vector<256x96xf32> to vector<128x8xf32>
    %144 = arith.truncf %143 : vector<128x8xf32> to vector<128x8xbf16>
    %145 = vector.extract_strided_slice %36 {offsets = [128, 64], sizes = [128, 8], strides = [1, 1]} : vector<256x96xf32> to vector<128x8xf32>
    %146 = arith.truncf %145 : vector<128x8xf32> to vector<128x8xbf16>
    %cst_40 = arith.constant dense<0.000000e+00> : vector<128x128xf32>
    %147 = tpu.matmul %142, %144, %cst_40 {dimension_numbers = #tpu.dot_dimension_numbers<[1], [1], [0], [0], [0, 0, 1, 0], [], []>} : vector<128x8xbf16>, vector<128x8xbf16>, vector<128x128xf32> -> vector<128x128xf32>
    %cst_41 = arith.constant 0.353553385 : f32
    %148 = vector.broadcast %cst_41 : f32 to vector<128x128xf32>
    %149 = arith.mulf %147, %148 : vector<128x128xf32>
    %cst_42 = arith.constant -1.000000e+30 : f32
    %150 = vector.shape_cast %39 : vector<1x128xi1> to vector<1x128xi1>
    %151 = vector.broadcast %150 : vector<1x128xi1> to vector<128x128xi1>
    %152 = vector.broadcast %cst_42 : f32 to vector<128x128xf32>
    %153 = arith.select %151, %149, %152 : vector<128x128xi1>, vector<128x128xf32>
    %cst_43 = arith.constant dense<0xFF800000> : vector<128xf32>
    %154 = vector.multi_reduction <maximumf>, %153, %cst_43 [1] : vector<128x128xf32> to vector<128xf32>
    %155 = vector.shape_cast %154 : vector<128xf32> to vector<128x1xf32>
    %156 = vector.broadcast %155 : vector<128x1xf32> to vector<128x128xf32>
    %157 = arith.subf %153, %156 : vector<128x128xf32>
    %158 = math.exp %157 : vector<128x128xf32>
    %cst_44 = arith.constant dense<0.000000e+00> : vector<128xf32>
    %159 = vector.multi_reduction <add>, %158, %cst_44 [1] : vector<128x128xf32> to vector<128xf32>
    %160 = vector.shape_cast %159 : vector<128xf32> to vector<128x1xf32>
    %161 = tpu.reciprocal %160 {approx = true} : vector<128x1xf32> -> vector<128x1xf32>
    %162 = vector.broadcast %161 : vector<128x1xf32> to vector<128x128xf32>
    %163 = arith.mulf %158, %162 : vector<128x128xf32>
    %164 = arith.truncf %163 : vector<128x128xf32> to vector<128x128xbf16>
    %cst_45 = arith.constant dense<0.000000e+00> : vector<128x8xf32>
    %165 = tpu.matmul %164, %146, %cst_45 {dimension_numbers = #tpu.dot_dimension_numbers<[1], [0], [0], [1], [0, 0, 1, 1], [], []>} : vector<128x128xbf16>, vector<128x8xbf16>, vector<128x8xf32> -> vector<128x8xf32>
    %166 = vector.extract_strided_slice %36 {offsets = [128, 8], sizes = [128, 8], strides = [1, 1]} : vector<256x96xf32> to vector<128x8xf32>
    %167 = arith.truncf %166 : vector<128x8xf32> to vector<128x8xbf16>
    %168 = vector.extract_strided_slice %36 {offsets = [128, 40], sizes = [128, 8], strides = [1, 1]} : vector<256x96xf32> to vector<128x8xf32>
    %169 = arith.truncf %168 : vector<128x8xf32> to vector<128x8xbf16>
    %170 = vector.extract_strided_slice %36 {offsets = [128, 72], sizes = [128, 8], strides = [1, 1]} : vector<256x96xf32> to vector<128x8xf32>
    %171 = arith.truncf %170 : vector<128x8xf32> to vector<128x8xbf16>
    %cst_46 = arith.constant dense<0.000000e+00> : vector<128x128xf32>
    %172 = tpu.matmul %167, %169, %cst_46 {dimension_numbers = #tpu.dot_dimension_numbers<[1], [1], [0], [0], [0, 0, 1, 0], [], []>} : vector<128x8xbf16>, vector<128x8xbf16>, vector<128x128xf32> -> vector<128x128xf32>
    %cst_47 = arith.constant 0.353553385 : f32
    %173 = vector.broadcast %cst_47 : f32 to vector<128x128xf32>
    %174 = arith.mulf %172, %173 : vector<128x128xf32>
    %cst_48 = arith.constant -1.000000e+30 : f32
    %175 = vector.shape_cast %39 : vector<1x128xi1> to vector<1x128xi1>
    %176 = vector.broadcast %175 : vector<1x128xi1> to vector<128x128xi1>
    %177 = vector.broadcast %cst_48 : f32 to vector<128x128xf32>
    %178 = arith.select %176, %174, %177 : vector<128x128xi1>, vector<128x128xf32>
    %cst_49 = arith.constant dense<0xFF800000> : vector<128xf32>
    %179 = vector.multi_reduction <maximumf>, %178, %cst_49 [1] : vector<128x128xf32> to vector<128xf32>
    %180 = vector.shape_cast %179 : vector<128xf32> to vector<128x1xf32>
    %181 = vector.broadcast %180 : vector<128x1xf32> to vector<128x128xf32>
    %182 = arith.subf %178, %181 : vector<128x128xf32>
    %183 = math.exp %182 : vector<128x128xf32>
    %cst_50 = arith.constant dense<0.000000e+00> : vector<128xf32>
    %184 = vector.multi_reduction <add>, %183, %cst_50 [1] : vector<128x128xf32> to vector<128xf32>
    %185 = vector.shape_cast %184 : vector<128xf32> to vector<128x1xf32>
    %186 = tpu.reciprocal %185 {approx = true} : vector<128x1xf32> -> vector<128x1xf32>
    %187 = vector.broadcast %186 : vector<128x1xf32> to vector<128x128xf32>
    %188 = arith.mulf %183, %187 : vector<128x128xf32>
    %189 = arith.truncf %188 : vector<128x128xf32> to vector<128x128xbf16>
    %cst_51 = arith.constant dense<0.000000e+00> : vector<128x8xf32>
    %190 = tpu.matmul %189, %171, %cst_51 {dimension_numbers = #tpu.dot_dimension_numbers<[1], [0], [0], [1], [0, 0, 1, 1], [], []>} : vector<128x128xbf16>, vector<128x8xbf16>, vector<128x8xf32> -> vector<128x8xf32>
    %191 = vector.extract_strided_slice %36 {offsets = [128, 16], sizes = [128, 8], strides = [1, 1]} : vector<256x96xf32> to vector<128x8xf32>
    %192 = arith.truncf %191 : vector<128x8xf32> to vector<128x8xbf16>
    %193 = vector.extract_strided_slice %36 {offsets = [128, 48], sizes = [128, 8], strides = [1, 1]} : vector<256x96xf32> to vector<128x8xf32>
    %194 = arith.truncf %193 : vector<128x8xf32> to vector<128x8xbf16>
    %195 = vector.extract_strided_slice %36 {offsets = [128, 80], sizes = [128, 8], strides = [1, 1]} : vector<256x96xf32> to vector<128x8xf32>
    %196 = arith.truncf %195 : vector<128x8xf32> to vector<128x8xbf16>
    %cst_52 = arith.constant dense<0.000000e+00> : vector<128x128xf32>
    %197 = tpu.matmul %192, %194, %cst_52 {dimension_numbers = #tpu.dot_dimension_numbers<[1], [1], [0], [0], [0, 0, 1, 0], [], []>} : vector<128x8xbf16>, vector<128x8xbf16>, vector<128x128xf32> -> vector<128x128xf32>
    %cst_53 = arith.constant 0.353553385 : f32
    %198 = vector.broadcast %cst_53 : f32 to vector<128x128xf32>
    %199 = arith.mulf %197, %198 : vector<128x128xf32>
    %cst_54 = arith.constant -1.000000e+30 : f32
    %200 = vector.shape_cast %39 : vector<1x128xi1> to vector<1x128xi1>
    %201 = vector.broadcast %200 : vector<1x128xi1> to vector<128x128xi1>
    %202 = vector.broadcast %cst_54 : f32 to vector<128x128xf32>
    %203 = arith.select %201, %199, %202 : vector<128x128xi1>, vector<128x128xf32>
    %cst_55 = arith.constant dense<0xFF800000> : vector<128xf32>
    %204 = vector.multi_reduction <maximumf>, %203, %cst_55 [1] : vector<128x128xf32> to vector<128xf32>
    %205 = vector.shape_cast %204 : vector<128xf32> to vector<128x1xf32>
    %206 = vector.broadcast %205 : vector<128x1xf32> to vector<128x128xf32>
    %207 = arith.subf %203, %206 : vector<128x128xf32>
    %208 = math.exp %207 : vector<128x128xf32>
    %cst_56 = arith.constant dense<0.000000e+00> : vector<128xf32>
    %209 = vector.multi_reduction <add>, %208, %cst_56 [1] : vector<128x128xf32> to vector<128xf32>
    %210 = vector.shape_cast %209 : vector<128xf32> to vector<128x1xf32>
    %211 = tpu.reciprocal %210 {approx = true} : vector<128x1xf32> -> vector<128x1xf32>
    %212 = vector.broadcast %211 : vector<128x1xf32> to vector<128x128xf32>
    %213 = arith.mulf %208, %212 : vector<128x128xf32>
    %214 = arith.truncf %213 : vector<128x128xf32> to vector<128x128xbf16>
    %cst_57 = arith.constant dense<0.000000e+00> : vector<128x8xf32>
    %215 = tpu.matmul %214, %196, %cst_57 {dimension_numbers = #tpu.dot_dimension_numbers<[1], [0], [0], [1], [0, 0, 1, 1], [], []>} : vector<128x128xbf16>, vector<128x8xbf16>, vector<128x8xf32> -> vector<128x8xf32>
    %216 = vector.extract_strided_slice %36 {offsets = [128, 24], sizes = [128, 8], strides = [1, 1]} : vector<256x96xf32> to vector<128x8xf32>
    %217 = arith.truncf %216 : vector<128x8xf32> to vector<128x8xbf16>
    %218 = vector.extract_strided_slice %36 {offsets = [128, 56], sizes = [128, 8], strides = [1, 1]} : vector<256x96xf32> to vector<128x8xf32>
    %219 = arith.truncf %218 : vector<128x8xf32> to vector<128x8xbf16>
    %220 = vector.extract_strided_slice %36 {offsets = [128, 88], sizes = [128, 8], strides = [1, 1]} : vector<256x96xf32> to vector<128x8xf32>
    %221 = arith.truncf %220 : vector<128x8xf32> to vector<128x8xbf16>
    %cst_58 = arith.constant dense<0.000000e+00> : vector<128x128xf32>
    %222 = tpu.matmul %217, %219, %cst_58 {dimension_numbers = #tpu.dot_dimension_numbers<[1], [1], [0], [0], [0, 0, 1, 0], [], []>} : vector<128x8xbf16>, vector<128x8xbf16>, vector<128x128xf32> -> vector<128x128xf32>
    %cst_59 = arith.constant 0.353553385 : f32
    %223 = vector.broadcast %cst_59 : f32 to vector<128x128xf32>
    %224 = arith.mulf %222, %223 : vector<128x128xf32>
    %cst_60 = arith.constant -1.000000e+30 : f32
    %225 = vector.shape_cast %39 : vector<1x128xi1> to vector<1x128xi1>
    %226 = vector.broadcast %225 : vector<1x128xi1> to vector<128x128xi1>
    %227 = vector.broadcast %cst_60 : f32 to vector<128x128xf32>
    %228 = arith.select %226, %224, %227 : vector<128x128xi1>, vector<128x128xf32>
    %cst_61 = arith.constant dense<0xFF800000> : vector<128xf32>
    %229 = vector.multi_reduction <maximumf>, %228, %cst_61 [1] : vector<128x128xf32> to vector<128xf32>
    %230 = vector.shape_cast %229 : vector<128xf32> to vector<128x1xf32>
    %231 = vector.broadcast %230 : vector<128x1xf32> to vector<128x128xf32>
    %232 = arith.subf %228, %231 : vector<128x128xf32>
    %233 = math.exp %232 : vector<128x128xf32>
    %cst_62 = arith.constant dense<0.000000e+00> : vector<128xf32>
    %234 = vector.multi_reduction <add>, %233, %cst_62 [1] : vector<128x128xf32> to vector<128xf32>
    %235 = vector.shape_cast %234 : vector<128xf32> to vector<128x1xf32>
    %236 = tpu.reciprocal %235 {approx = true} : vector<128x1xf32> -> vector<128x1xf32>
    %237 = vector.broadcast %236 : vector<128x1xf32> to vector<128x128xf32>
    %238 = arith.mulf %233, %237 : vector<128x128xf32>
    %239 = arith.truncf %238 : vector<128x128xf32> to vector<128x128xbf16>
    %cst_63 = arith.constant dense<0.000000e+00> : vector<128x8xf32>
    %240 = tpu.matmul %239, %221, %cst_63 {dimension_numbers = #tpu.dot_dimension_numbers<[1], [0], [0], [1], [0, 0, 1, 1], [], []>} : vector<128x128xbf16>, vector<128x8xbf16>, vector<128x8xf32> -> vector<128x8xf32>
    %241 = tpu.concatenate %165, %190, %215, %240 in 1 : vector<128x8xf32>, vector<128x8xf32>, vector<128x8xf32>, vector<128x8xf32> -> vector<128x32xf32>
    %242 = tpu.concatenate %140, %241 in 0 : vector<128x32xf32>, vector<128x32xf32> -> vector<256x32xf32>
    %243 = arith.truncf %242 : vector<256x32xf32> to vector<256x32xbf16>
    %c0_64 = arith.constant 0 : index
    %c0_65 = arith.constant 0 : index
    %244 = vector.load %arg5[%c0_64, %c0_65] : memref<32x32xbf16, #tpu.memory_space<vmem>>, vector<32x32xbf16>
    %cst_66 = arith.constant dense<0.000000e+00> : vector<256x32xf32>
    %245 = tpu.matmul %243, %244, %cst_66 {dimension_numbers = #tpu.dot_dimension_numbers<[1], [0], [0], [1], [0, 0, 1, 1], [], []>} : vector<256x32xbf16>, vector<32x32xbf16>, vector<256x32xf32> -> vector<256x32xf32>
    %246 = vector.broadcast %7 : vector<1x32xf32> to vector<256x32xf32>
    %247 = arith.addf %245, %246 : vector<256x32xf32>
    %248 = arith.addf %1, %247 : vector<256x32xf32>
    %cst_67 = arith.constant dense<0.000000e+00> : vector<256xf32>
    %249 = vector.multi_reduction <add>, %248, %cst_67 [1] : vector<256x32xf32> to vector<256xf32>
    %250 = vector.shape_cast %249 : vector<256xf32> to vector<256x1xf32>
    %cst_68 = arith.constant 3.200000e+01 : f32
    %251 = vector.broadcast %cst_68 : f32 to vector<256x1xf32>
    %252 = arith.divf %250, %251 : vector<256x1xf32>
    %253 = vector.broadcast %252 : vector<256x1xf32> to vector<256x32xf32>
    %254 = arith.subf %248, %253 : vector<256x32xf32>
    %255 = arith.mulf %254, %254 : vector<256x32xf32>
    %cst_69 = arith.constant dense<0.000000e+00> : vector<256xf32>
    %256 = vector.multi_reduction <add>, %255, %cst_69 [1] : vector<256x32xf32> to vector<256xf32>
    %257 = vector.shape_cast %256 : vector<256xf32> to vector<256x1xf32>
    %cst_70 = arith.constant 3.200000e+01 : f32
    %258 = vector.broadcast %cst_70 : f32 to vector<256x1xf32>
    %259 = arith.divf %257, %258 : vector<256x1xf32>
    %260 = vector.broadcast %252 : vector<256x1xf32> to vector<256x32xf32>
    %261 = arith.subf %248, %260 : vector<256x32xf32>
    %cst_71 = arith.constant 9.99999997E-7 : f32
    %262 = vector.broadcast %cst_71 : f32 to vector<256x1xf32>
    %263 = arith.addf %259, %262 : vector<256x1xf32>
    %264 = math.rsqrt %263 : vector<256x1xf32>
    %265 = vector.broadcast %264 : vector<256x1xf32> to vector<256x32xf32>
    %266 = arith.mulf %261, %265 : vector<256x32xf32>
    %267 = vector.broadcast %5 : vector<1x32xf32> to vector<256x32xf32>
    %268 = arith.mulf %266, %267 : vector<256x32xf32>
    %269 = vector.broadcast %6 : vector<1x32xf32> to vector<256x32xf32>
    %270 = arith.addf %268, %269 : vector<256x32xf32>
    %271 = arith.truncf %270 : vector<256x32xf32> to vector<256x32xbf16>
    %c0_72 = arith.constant 0 : index
    %c0_73 = arith.constant 0 : index
    %272 = vector.load %arg7[%c0_72, %c0_73] : memref<32x64xbf16, #tpu.memory_space<vmem>>, vector<32x64xbf16>
    %cst_74 = arith.constant dense<0.000000e+00> : vector<256x64xf32>
    %273 = tpu.matmul %271, %272, %cst_74 {dimension_numbers = #tpu.dot_dimension_numbers<[1], [0], [0], [1], [0, 0, 1, 1], [], []>} : vector<256x32xbf16>, vector<32x64xbf16>, vector<256x64xf32> -> vector<256x64xf32>
    %c0_75 = arith.constant 0 : index
    %c0_76 = arith.constant 0 : index
    %274 = vector.load %arg8[%c0_75, %c0_76] : memref<1x64xf32, #tpu.memory_space<vmem>>, vector<1x64xf32>
    %275 = vector.broadcast %274 : vector<1x64xf32> to vector<256x64xf32>
    %276 = arith.addf %273, %275 : vector<256x64xf32>
    %cst_77 = arith.constant 5.000000e-01 : f32
    %277 = vector.broadcast %cst_77 : f32 to vector<256x64xf32>
    %278 = arith.mulf %277, %276 : vector<256x64xf32>
    %cst_78 = arith.constant 4.471500e-02 : f32
    %279 = vector.broadcast %cst_78 : f32 to vector<256x64xf32>
    %280 = arith.mulf %279, %276 : vector<256x64xf32>
    %281 = arith.mulf %280, %276 : vector<256x64xf32>
    %282 = arith.mulf %281, %276 : vector<256x64xf32>
    %283 = arith.addf %276, %282 : vector<256x64xf32>
    %cst_79 = arith.constant 0.797884583 : f32
    %284 = vector.broadcast %cst_79 : f32 to vector<256x64xf32>
    %285 = arith.mulf %284, %283 : vector<256x64xf32>
    %286 = math.tanh %285 : vector<256x64xf32>
    %cst_80 = arith.constant 1.000000e+00 : f32
    %287 = vector.broadcast %cst_80 : f32 to vector<256x64xf32>
    %288 = arith.addf %287, %286 : vector<256x64xf32>
    %289 = arith.mulf %278, %288 : vector<256x64xf32>
    %290 = arith.truncf %289 : vector<256x64xf32> to vector<256x64xbf16>
    %c0_81 = arith.constant 0 : index
    %c0_82 = arith.constant 0 : index
    %291 = vector.load %arg9[%c0_81, %c0_82] : memref<64x32xbf16, #tpu.memory_space<vmem>>, vector<64x32xbf16>
    %cst_83 = arith.constant dense<0.000000e+00> : vector<256x32xf32>
    %292 = tpu.matmul %290, %291, %cst_83 {dimension_numbers = #tpu.dot_dimension_numbers<[1], [0], [0], [1], [0, 0, 1, 1], [], []>} : vector<256x64xbf16>, vector<64x32xbf16>, vector<256x32xf32> -> vector<256x32xf32>
    %293 = vector.broadcast %8 : vector<1x32xf32> to vector<256x32xf32>
    %294 = arith.addf %292, %293 : vector<256x32xf32>
    %295 = arith.addf %248, %294 : vector<256x32xf32>
    %296 = vector.shape_cast %295 : vector<256x32xf32> to vector<2x128x32xf32>
    %c0_84 = arith.constant 0 : index
    %c0_85 = arith.constant 0 : index
    %c0_86 = arith.constant 0 : index
    %297 = vector.load %arg10[%c0_84, %c0_85, %c0_86] : memref<2x128x32xf32, #tpu.memory_space<vmem>>, vector<2x128x32xf32>
    tpu.vector_store %arg10[%c0_84, %c0_85, %c0_86], %296 {strides = array<i32>} : memref<2x128x32xf32, #tpu.memory_space<vmem>>, vector<2x128x32xf32>,
    return
  }
  func.func @transform_0(%arg0: i32) -> (i32, i32, i32) {
    %c0_i32 = arith.constant 0 : i32
    %c0_i32_0 = arith.constant 0 : i32
    %c0_i32_1 = arith.constant 0 : i32
    return %arg0, %c0_i32, %c0_i32_0 : i32, i32, i32
  }
  func.func @transform_1(%arg0: i32) -> (i32, i32) {
    %c0_i32 = arith.constant 0 : i32
    %c0_i32_0 = arith.constant 0 : i32
    %c0_i32_1 = arith.constant 0 : i32
    return %c0_i32, %c0_i32_0 : i32, i32
  }
  func.func @transform_2(%arg0: i32) -> (i32, i32) {
    %c0_i32 = arith.constant 0 : i32
    %c0_i32_0 = arith.constant 0 : i32
    %c0_i32_1 = arith.constant 0 : i32
    return %c0_i32, %c0_i32_0 : i32, i32
  }
  func.func @transform_3(%arg0: i32) -> (i32, i32) {
    %c0_i32 = arith.constant 0 : i32
    %c0_i32_0 = arith.constant 0 : i32
    %c0_i32_1 = arith.constant 0 : i32
    return %c0_i32, %c0_i32_0 : i32, i32
  }
  func.func @transform_4(%arg0: i32) -> (i32, i32) {
    %c0_i32 = arith.constant 0 : i32
    %c0_i32_0 = arith.constant 0 : i32
    %c0_i32_1 = arith.constant 0 : i32
    return %c0_i32, %c0_i32_0 : i32, i32
  }
  func.func @transform_5(%arg0: i32) -> (i32, i32) {
    %c0_i32 = arith.constant 0 : i32
    %c0_i32_0 = arith.constant 0 : i32
    %c0_i32_1 = arith.constant 0 : i32
    return %c0_i32, %c0_i32_0 : i32, i32
  }
  func.func @transform_6(%arg0: i32) -> (i32, i32) {
    %c0_i32 = arith.constant 0 : i32
    %c0_i32_0 = arith.constant 0 : i32
    %c0_i32_1 = arith.constant 0 : i32
    return %c0_i32, %c0_i32_0 : i32, i32
  }
  func.func @transform_7(%arg0: i32) -> (i32, i32) {
    %c0_i32 = arith.constant 0 : i32
    %c0_i32_0 = arith.constant 0 : i32
    %c0_i32_1 = arith.constant 0 : i32
    return %c0_i32, %c0_i32_0 : i32, i32
  }
  func.func @transform_8(%arg0: i32) -> (i32, i32) {
    %c0_i32 = arith.constant 0 : i32
    %c0_i32_0 = arith.constant 0 : i32
    %c0_i32_1 = arith.constant 0 : i32
    return %c0_i32, %c0_i32_0 : i32, i32
  }
  func.func @transform_9(%arg0: i32) -> (i32, i32, i32) {
    %c0_i32 = arith.constant 0 : i32
    %c0_i32_0 = arith.constant 0 : i32
    %c0_i32_1 = arith.constant 0 : i32
    return %arg0, %c0_i32, %c0_i32_0 : i32, i32, i32
  }
}

module attributes {stable_mosaic.version = 11 : i64} {
  func.func @_ln_head_kernel(%arg0: memref<4x32xf32, #tpu.memory_space<vmem>>, %arg1: memref<1x32xf32, #tpu.memory_space<vmem>>, %arg2: memref<1x32xf32, #tpu.memory_space<vmem>>, %arg3: memref<32x10xbf16, #tpu.memory_space<vmem>>, %arg4: memref<1x10xf32, #tpu.memory_space<vmem>>, %arg5: memref<4x10xf32, #tpu.memory_space<vmem>>) attributes {dimension_semantics = [], scalar_prefetch = 0 : i64, scratch_operands = 0 : i64, tpu.core_type = #tpu.core_type<tc>} {
    %c0 = arith.constant 0 : index
    %c0_0 = arith.constant 0 : index
    %0 = vector.load %arg0[%c0, %c0_0] : memref<4x32xf32, #tpu.memory_space<vmem>>, vector<4x32xf32>
    %c0_1 = arith.constant 0 : index
    %c0_2 = arith.constant 0 : index
    %1 = vector.load %arg1[%c0_1, %c0_2] : memref<1x32xf32, #tpu.memory_space<vmem>>, vector<1x32xf32>
    %c0_3 = arith.constant 0 : index
    %c0_4 = arith.constant 0 : index
    %2 = vector.load %arg2[%c0_3, %c0_4] : memref<1x32xf32, #tpu.memory_space<vmem>>, vector<1x32xf32>
    %cst = arith.constant dense<0.000000e+00> : vector<4xf32>
    %3 = vector.multi_reduction <add>, %0, %cst [1] : vector<4x32xf32> to vector<4xf32>
    %4 = vector.shape_cast %3 : vector<4xf32> to vector<4x1xf32>
    %cst_5 = arith.constant 3.200000e+01 : f32
    %5 = vector.broadcast %cst_5 : f32 to vector<4x1xf32>
    %6 = arith.divf %4, %5 : vector<4x1xf32>
    %7 = vector.broadcast %6 : vector<4x1xf32> to vector<4x32xf32>
    %8 = arith.subf %0, %7 : vector<4x32xf32>
    %9 = arith.mulf %8, %8 : vector<4x32xf32>
    %cst_6 = arith.constant dense<0.000000e+00> : vector<4xf32>
    %10 = vector.multi_reduction <add>, %9, %cst_6 [1] : vector<4x32xf32> to vector<4xf32>
    %11 = vector.shape_cast %10 : vector<4xf32> to vector<4x1xf32>
    %cst_7 = arith.constant 3.200000e+01 : f32
    %12 = vector.broadcast %cst_7 : f32 to vector<4x1xf32>
    %13 = arith.divf %11, %12 : vector<4x1xf32>
    %14 = vector.broadcast %6 : vector<4x1xf32> to vector<4x32xf32>
    %15 = arith.subf %0, %14 : vector<4x32xf32>
    %cst_8 = arith.constant 9.99999997E-7 : f32
    %16 = vector.broadcast %cst_8 : f32 to vector<4x1xf32>
    %17 = arith.addf %13, %16 : vector<4x1xf32>
    %18 = math.rsqrt %17 : vector<4x1xf32>
    %19 = vector.broadcast %18 : vector<4x1xf32> to vector<4x32xf32>
    %20 = arith.mulf %15, %19 : vector<4x32xf32>
    %21 = vector.broadcast %1 : vector<1x32xf32> to vector<4x32xf32>
    %22 = arith.mulf %20, %21 : vector<4x32xf32>
    %23 = vector.broadcast %2 : vector<1x32xf32> to vector<4x32xf32>
    %24 = arith.addf %22, %23 : vector<4x32xf32>
    %25 = arith.truncf %24 : vector<4x32xf32> to vector<4x32xbf16>
    %c0_9 = arith.constant 0 : index
    %c0_10 = arith.constant 0 : index
    %26 = vector.load %arg3[%c0_9, %c0_10] : memref<32x10xbf16, #tpu.memory_space<vmem>>, vector<32x10xbf16>
    %cst_11 = arith.constant dense<0.000000e+00> : vector<4x10xf32>
    %27 = tpu.matmul %25, %26, %cst_11 {dimension_numbers = #tpu.dot_dimension_numbers<[1], [0], [0], [1], [0, 0, 1, 1], [], []>} : vector<4x32xbf16>, vector<32x10xbf16>, vector<4x10xf32> -> vector<4x10xf32>
    %c0_12 = arith.constant 0 : index
    %c0_13 = arith.constant 0 : index
    %28 = vector.load %arg4[%c0_12, %c0_13] : memref<1x10xf32, #tpu.memory_space<vmem>>, vector<1x10xf32>
    %29 = vector.broadcast %28 : vector<1x10xf32> to vector<4x10xf32>
    %30 = arith.addf %27, %29 : vector<4x10xf32>
    %c0_14 = arith.constant 0 : index
    %c0_15 = arith.constant 0 : index
    %31 = vector.load %arg5[%c0_14, %c0_15] : memref<4x10xf32, #tpu.memory_space<vmem>>, vector<4x10xf32>
    tpu.vector_store %arg5[%c0_14, %c0_15], %30 {strides = array<i32>} : memref<4x10xf32, #tpu.memory_space<vmem>>, vector<4x10xf32>,
    return
  }
}

</mosaic_0001>

<bundles_post_ra>
// kernel: vit_forward.4
= control target key start
LH: loop header
LB: loop body
LE: loop exit
PB: predicated region body
PF: predicated region fallthrough
CT: control target
= control target key end

     0   :  { %8 = vsyncpa [#allocation3], 0  ;;  %s452_s0 = inlined_call_operand.hbm [shape: bf16[16,192], index: 0, kind: input, shape index: {}]   ;;  %s453_s1 = inlined_call_operand.hbm [shape: bf16[192,32], index: 1, kind: input, shape index: {}]   ;;  %s454_s2 = inlined_call_operand.hbm [shape: f32[1,32], index: 2, kind: input, shape index: {}]   ;;  %s455_s3 = inlined_call_operand.hbm [shape: f32[16,32], index: 3, kind: output, shape index: {}]  }
   0x1   :  { %9 = vsyncpa [#allocation6], 0 }
   0x2   :  { %10 = vsyncpa [#allocation4], 0  ;;  %s369_s12 = smov [#allocation5]   ;;  %s275_s16 = scalar_lea.hbm %s453_s1, 1536 }
   0x3   :  { %s28_s13 = sshll.u32 %s369_s12, 4  ;;  %p276_p0 = scmp.ne.s32.totalorder %s453_s1, %s275_s16  ;;  %s29_s13 = int_to_ptr.vmem [resolvable:$true] %s28_s13 }
   0x4   :  { %p279_p1 = scmp.lt.u32.totalorder %s275_s16, %s453_s1 }
   0x6   :  { %p281_p2 = pnand %p279_p1, %p276_p0 }
   0x8   :  { %284 = shalt.err (!%p281_p2)
}
   0x9   :  { %s285_s21 = scalar_lea.vmem %s29_s13, 1536  ;;  %p290_p4 = scmp.lt.s32.totalorder %s29_s13, %s29_s13 }
   0xa   :  { %p286_p3 = scmp.ne.s32.totalorder %s29_s13, %s285_s21  ;;  %p291_p5 = scmp.lt.s32.totalorder %s285_s21, %s285_s21 }
   0xc   :  { %p292_p6 = por %p291_p5, %p290_p4 }
   0xe   :  { %p293_p7 = pnand %p292_p6, %p286_p3 }
  0x10   :  { %296 = shalt.err (!%p293_p7)
}
  0x11   :  { %s370_s22 = smov 64   ;;  %s371_s23 = smov 4  }
  0x12   :  { %34 = dma.hbm_to_vmem [thread:$0]  %s453_s1, 1536, %s29_s13, [#allocation6], %s370_s22, %s370_s22, %s371_s23  }
  0x13   :  { %s372_s26 = smov [#allocation2]   ;;  %s297_s30 = scalar_lea.hbm %s452_s0, 256 }
  0x14   :  { %s16_s27 = sshll.u32 %s372_s26, 4  ;;  %p298_p8 = scmp.ne.s32.totalorder %s452_s0, %s297_s30  ;;  %s17_s27 = int_to_ptr.vmem [resolvable:$true] %s16_s27 }
  0x15   :  { %p301_p9 = scmp.lt.u32.totalorder %s297_s30, %s452_s0 }
  0x17   :  { %p303_p10 = pnand %p301_p9, %p298_p8 }
  0x19   :  { %306 = shalt.err (!%p303_p10)
}
  0x1a   :  { %s307_s8 = scalar_lea.vmem %s17_s27, 256  ;;  %p312_p12 = scmp.lt.s32.totalorder %s17_s27, %s17_s27 }
  0x1b   :  { %p308_p11 = scmp.ne.s32.totalorder %s17_s27, %s307_s8  ;;  %p313_p13 = scmp.lt.s32.totalorder %s307_s8, %s307_s8 }
  0x1d   :  { %p314_p0 = por %p313_p13, %p312_p12 }
  0x1f   :  { %p315_p1 = pnand %p314_p0, %p308_p11 }
  0x21   :  { %318 = shalt.err (!%p315_p1)
}
  0x22   :  { %s373_s1 = smov 128   ;;  %s374_s9 = smov 8  }
  0x23   :  { %22 = dma.hbm_to_vmem [thread:$0]  %s452_s0, 256, %s17_s27, [#allocation3], %s373_s1, %s373_s1, %s374_s9  }
  0x24   :  { %s375_s12 = smov [#allocation7]   ;;  %s319_s16 = scalar_lea.hbm %s454_s2, 16 }
  0x25   :  { %s41_s13 = sshll.u32 %s375_s12, 4  ;;  %p320_p2 = scmp.ne.s32.totalorder %s454_s2, %s319_s16  ;;  %s42_s13 = int_to_ptr.vmem [resolvable:$true] %s41_s13 }
  0x26   :  { %p323_p3 = scmp.lt.u32.totalorder %s319_s16, %s454_s2 }
  0x28   :  { %p325_p4 = pnand %p323_p3, %p320_p2 }
  0x2a   :  { %328 = shalt.err (!%p325_p4)
}
  0x2b   :  { %s329_s21 = scalar_lea.vmem %s42_s13, 16  ;;  %s333_s0 = scalar_lea.vmem %s42_s13, 32 }
  0x2c   :  { %p330_p5 = scmp.ne.s32.totalorder %s42_s13, %s329_s21  ;;  %p334_p6 = scmp.lt.s32.totalorder %s42_s13, %s42_s13 }
  0x2d   :  { %p335_p7 = scmp.lt.s32.totalorder %s333_s0, %s329_s21 }
  0x2f   :  { %p336_p8 = por %p335_p7, %p334_p6 }
  0x31   :  { %p337_p9 = pnand %p336_p8, %p330_p5 }
  0x33   :  { %340 = shalt.err (!%p337_p9)
}
  0x34   :  { %44 = dma.hbm_to_vmem [thread:$0]  %s454_s2, 16, %s42_s13, [#allocation6]  }
  0x35   :  { %363 = dma.done.wait [#allocation3], 256  }
  0x36   :  { %364 = vsyncadd [#allocation3], 4294967040 }
  0x37   :  { %365 = dma.done.wait [#allocation6], 1552  }
  0x38   :  { %366 = vsyncadd [#allocation6], 4294965744  ;;  %v376_v0 = vmov 0   ;;  %v260_v1 = vld [vmem:[#allocation5] sm:$0xff]   ;;  %v261_v2 = vld [vmem:[#allocation5 + $0x8] sm:$0xff]   ;;  %vm169_vm0 = vcmask 523264  }
  0x39   :  { %173 = vmatprep.subr.bf16.mxu0 %v376_v0  ;;  %v262_v3 = vld [vmem:[#allocation5 + $0x10] sm:$0xff]   ;;  %v263_v4 = vld [vmem:[#allocation5 + $0x18] sm:$0xff]   ;;  %v264_v6 = vld [vmem:[#allocation5 + $0x20] sm:$0xff]   ;;  %vm214_vm1 = vcmask 261120   ;;  %s377_s2 = smov [#allocation8]  }
  0x3a   :  { %174 = vmatpush1.bf16.msra.mxu0 %v260_v1  ;;  %v274_v5 = vld [vmem:[#allocation2 + $0x4] ss:$8 sps:$4 sm:$0xff]   ;;  %v265_v7 = vld [vmem:[#allocation5 + $0x28] sm:$0xff]   ;;  %v268_v10 = vld [vmem:[#allocation5 + $0x40] sm:$0xff]   ;;  %s222_s24 = sshll.u32 %s377_s2, 4  ;;  %s223_s24 = int_to_ptr.vmem [resolvable:$true] %s222_s24 }
  0x3b   :  { %175 = vmatprep.subr.bf16.mxu0 %v376_v0  ;;  %250 = vmatprep.mubr.msk.bf16.mxu0 %vm169_vm0, %v274_v5  ;;  %v266_v8 = vld [vmem:[#allocation5 + $0x30] sm:$0xff]   ;;  %v267_v9 = vld [vmem:[#allocation5 + $0x38] sm:$0xff]   ;;  %v269_v11 = vld [vmem:[#allocation5 + $0x48] sm:$0xff]   ;;  %s341_s25 = scalar_lea.vmem %s223_s24, 256  ;;  %p346_p11 = scmp.lt.s32.totalorder %s223_s24, %s223_s24 }
  0x3c   :  { %v270_v12 = vld [vmem:[#allocation5 + $0x50] sm:$0xff]   ;;  %v271_v13 = vld [vmem:[#allocation5 + $0x58] sm:$0xff]   ;;  %v235_v15 = vld [vmem:[#allocation7] ss:$0 sm:$0xff]  ;;  %p342_p10 = scmp.ne.s32.totalorder %s223_s24, %s341_s25  ;;  %p347_p12 = scmp.lt.s32.totalorder %s341_s25, %s341_s25 }
  0x3d   :  { %v272_v14 = vld [vmem:[#allocation2] ss:$8 sps:$4 sm:$0xff]  }
  0x3e   :  { %176 = vmatpush1.bf16.msra.mxu0 %v261_v2  ;;  %p348_p13 = por %p347_p12, %p346_p11 }
  0x3f   :  { %177 = vmatprep.subr.bf16.mxu0 %v376_v0 }
  0x40   :  { %p349_p0 = pnand %p348_p13, %p342_p10 }
  0x42   :  { %178 = vmatpush1.bf16.msra.mxu0 %v262_v3 }
  0x43   :  { %179 = vmatprep.subr.bf16.mxu0 %v376_v0 }
  0x46   :  { %180 = vmatpush1.bf16.msra.mxu0 %v263_v4 }
  0x47   :  { %181 = vmatprep.subr.bf16.mxu0 %v376_v0 }
  0x4a   :  { %182 = vmatpush1.bf16.msra.mxu0 %v264_v6 }
  0x4b   :  { %183 = vmatprep.subr.bf16.mxu0 %v376_v0 }
  0x4e   :  { %184 = vmatpush1.bf16.msra.mxu0 %v265_v7 }
  0x4f   :  { %185 = vmatprep.subr.bf16.mxu0 %v376_v0 }
  0x52   :  { %186 = vmatpush1.bf16.msra.mxu0 %v266_v8 }
  0x53   :  { %187 = vmatprep.subr.bf16.mxu0 %v376_v0 }
  0x56   :  { %188 = vmatpush1.bf16.msra.mxu0 %v267_v9 }
  0x57   :  { %189 = vmatprep.subr.bf16.mxu0 %v376_v0 }
  0x5a   :  { %190 = vmatpush1.bf16.msra.mxu0 %v268_v10 }
  0x5b   :  { %191 = vmatprep.subr.bf16.mxu0 %v376_v0 }
  0x5e   :  { %192 = vmatpush1.bf16.msra.mxu0 %v269_v11 }
  0x5f   :  { %193 = vmatprep.subr.bf16.mxu0 %v376_v0 }
  0x62   :  { %194 = vmatpush1.bf16.msra.mxu0 %v270_v12 }
  0x63   :  { %195 = vmatprep.subr.bf16.mxu0 %v376_v0 }
  0x66   :  { %196 = vmatpush1.bf16.msra.mxu0 %v271_v13 }
  0x69   :  { %206 = vmatmul.mubr.bf16.vlgmr.msra.gmra.mrb[0].mxu0 %v272_v14 }
 0x13c   :  { %v207_v16 = vpop.f32.mrb[0].mxu0 }
 0x13d   :  { %v208_v17 = vadd.f32 %v235_v15, %v207_v16  ;;  %v209_v18 = vpop.f32.mrb[1].mxu0 }
 0x13e   :  { %v210_v19 = vpop.f32.mrb[2].mxu0 }
 0x13f   :  { %v211_v20 = vadd.f32 %v235_v15, %v210_v19  ;;  %v212_v21 = vpop.f32.mrb[3].mxu0  ;;  %215 = vst.msk [vmem:[#allocation8] sm:$0xff] %vm214_vm1, %v208_v17 }
 0x141   :  { %216 = vst.msk [vmem:[#allocation8 + $0x8] sm:$0xff] %vm214_vm1, %v211_v20 }
 0x142   :  { %352 = shalt.err (!%p349_p0)
}
 0x143   :  { %s353_s28 = scalar_lea.hbm %s455_s3, 256 }
 0x144   :  { %p354_p1 = scmp.ne.s32.totalorder %s455_s3, %s353_s28  ;;  %p357_p2 = scmp.lt.u32.totalorder %s353_s28, %s455_s3 }
 0x146   :  { %p359_p3 = pnand %p357_p2, %p354_p1 }
 0x148   :  { %362 = shalt.err (!%p359_p3)
}
 0x149   :  { %228 = dma.vmem_to_hbm [thread:$0]  %s223_s24, 256, %s455_s3, [#allocation4], %s373_s1, %s373_s1, %s374_s9  }
 0x14a   :  { %367 = dma.done.wait [#allocation4], 256  }
 0x14b   :  { %368 = vsyncadd [#allocation4], 4294967040 }
 0x14c   :  { %232 = vsyncpa [#allocation3], 1 }
 0x14d   :  { %233 = vsyncpa [#allocation6], 1 }
 0x14e   :  { %234 = vsyncpa [#allocation4], 1 }

// kernel: vit_forward.7
= control target key start
LH: loop header
LB: loop body
LE: loop exit
PB: predicated region body
PF: predicated region fallthrough
CT: control target
= control target key end

     0   :  { %vm25_vm0 = vcmask 257024   ;;  %s249_s0 = inlined_call_operand.vmem [shape: f32[4,32], index: 0, kind: input, shape index: {}]   ;;  %s250_s1 = inlined_call_operand.vmem [shape: f32[1,32], index: 1, kind: input, shape index: {}]   ;;  %s251_s2 = inlined_call_operand.vmem [shape: f32[1,32], index: 2, kind: input, shape index: {}]   ;;  %s252_s3 = inlined_call_operand.vmem [shape: bf16[32,10], index: 3, kind: input, shape index: {}]   ;;  %s253_s4 = inlined_call_operand.vmem [shape: f32[1,10], index: 4, kind: input, shape index: {}]   ;;  %s254_s5 = inlined_call_operand.hbm [shape: f32[4,10], index: 5, kind: output, shape index: {}]  }
   0x1   :  { %v22_v0 = vld [vmem:[%s249_s0] sm:$0xf] }
   0x2   :  { %v26_v1 = vsel %vm25_vm0, %v22_v0, 0.0 }
   0x3   :  { %27 = vadd.xlane.f32.xlu0 %v26_v1 }
   0x4   :  { %10 = vsyncpa [#allocation3], 0  ;;  %v158_v7 = vld [vmem:[%s252_s3] sm:$0xff]   ;;  %v186_v8 = vmov 0.0   ;;  %v159_v9 = vld [vmem:[%s252_s3 + $0x8] sm:$0xff]   ;;  %vm187_vm1 = vmmov 0  }
   0x5   :  { %147 = vmatprep.subr.bf16.mxu0 %v186_v8  ;;  %151 = vmatprep.mubr.msk.bf16.mxu0 %vm187_vm1, %v186_v8  ;;  %v138_v14 = vld [vmem:[%s250_s1] ss:$0 sm:$0xff]  ;;  %vm78_vm2 = vcmask 261120   ;;  %s188_s28 = smov [#allocation2]   ;;  %vm122_vm3 = vcmask 76800  }
   0x6   :  { %148 = vmatpush3.bf16.msra.mxu0 %v158_v7  ;;  %v139_v16 = vld [vmem:[%s251_s2] ss:$0 sm:$0xff]  ;;  %s130_s29 = sshll.u32 %s188_s28, 4  ;;  %s131_s29 = int_to_ptr.vmem [resolvable:$true] %s130_s29 }
   0x7   :  { %149 = vmatprep.subr.bf16.mxu0 %v186_v8  ;;  %v140_v20 = vld [vmem:[%s253_s4] ss:$0 sm:$0xff]  ;;  %s162_s1 = scalar_lea.vmem %s131_s29, 64  ;;  %p167_p1 = scmp.lt.s32.totalorder %s131_s29, %s131_s29 }
   0x8   :  { %p163_p0 = scmp.ne.s32.totalorder %s131_s29, %s162_s1  ;;  %p168_p2 = scmp.lt.s32.totalorder %s162_s1, %s162_s1 }
   0xa   :  { %150 = vmatpush3.bf16.msra.mxu0 %v159_v9  ;;  %p169_p3 = por %p168_p2, %p167_p1 }
   0xc   :  { %p170_p4 = pnand %p169_p3, %p163_p0 }
  0x90   :  { %v28_v2 = vpop.xlane.xlu0 %27 }
  0x91   :  { %v30_v3 = vmul.f32 0.03125, %v28_v2 }
  0x93   :  { %v31_v4 = vsub.f32 %v22_v0, %v30_v3 }
  0x95   :  { %v32_v5 = vmul.f32 %v31_v4, %v31_v4 }
  0x97   :  { %v33_v6 = vsel %vm25_vm0, %v32_v5, 0.0 }
  0x98   :  { %34 = vadd.xlane.f32.xlu0 %v33_v6 }
 0x125   :  { %v35_v10 = vpop.xlane.xlu0 %34 }
 0x126   :  { %v36_v11 = vmul.f32 0.03125, %v35_v10 }
 0x128   :  { %v37_v12 = vadd.f32 1e-06, %v36_v11 }
 0x12a   :  { %160 = vrsqrt.f32 %v37_v12 }
 0x134   :  { %v161_v13 = vpop.eup %160 }
 0x135   :  { %v39_v15 = vmul.f32 %v161_v13, %v31_v4 }
 0x137   :  { %v46_v17 = vmul.f32 %v138_v14, %v39_v15 }
 0x139   :  { %v53_v18 = vadd.f32 %v139_v16, %v46_v17 }
 0x13b   :  { %v54_v19 = vpack.c.bf16 %v53_v18, %v53_v18 }
 0x13d   :  { %152 = vmatmul.mubr.msk.bf16.vlgmr.msra.gmra.mrb[0].mxu0 %vm78_vm2, %v54_v19 }
 0x210   :  { %v116_v21 = vpop.f32.mrb[0].mxu0 }
 0x211   :  { %v117_v22 = vadd.f32 %v140_v20, %v116_v21  ;;  %v153_v23 = vpop.f32.mrb[1].mxu0 }
 0x212   :  { %v119_v24 = vpop.f32.mrb[2].mxu0 }
 0x213   :  { %v154_v25 = vpop.f32.mrb[3].mxu0  ;;  %123 = vst.msk [vmem:[#allocation2] sm:$0xf] %vm122_vm3, %v117_v22 }
 0x214   :  { %173 = shalt.err (!%p170_p4)
}
 0x215   :  { %s174_s4 = scalar_lea.hbm %s254_s5, 64 }
 0x216   :  { %p175_p5 = scmp.ne.s32.totalorder %s254_s5, %s174_s4  ;;  %p178_p6 = scmp.lt.u32.totalorder %s174_s4, %s254_s5 }
 0x218   :  { %p180_p7 = pnand %p178_p6, %p175_p5 }
 0x21a   :  { %183 = shalt.err (!%p180_p7)
}
 0x21b   :  { %133 = dma.vmem_to_hbm [thread:$0]  %s131_s29, 64, %s254_s5, [#allocation3]  }
 0x21c   :  { %184 = dma.done.wait [#allocation3], 64  }
 0x21d   :  { %185 = vsyncadd [#allocation3], 4294967232 }
 0x21e   :  { %137 = vsyncpa [#allocation3], 1 }

// kernel: vit_forward.5
= control target key start
LH: loop header
LB: loop body
LE: loop exit
PB: predicated region body
PF: predicated region fallthrough
CT: control target
= control target key end

     0   :  { %s14639_s0 = inlined_call_operand.hbm [shape: f32[4,128,32], index: 0, kind: input, shape index: {}]   ;;  %s14640_s1 = inlined_call_operand.hbm [shape: f32[4,32], index: 1, kind: input, shape index: {}]   ;;  %s14641_s2 = inlined_call_operand.hbm [shape: bf16[32,96], index: 2, kind: input, shape index: {}]   ;;  %s14642_s3 = inlined_call_operand.hbm [shape: f32[1,96], index: 3, kind: input, shape index: {}]   ;;  %s14643_s4 = inlined_call_operand.hbm [shape: bf16[32,32], index: 4, kind: input, shape index: {}]   ;;  %s14644_s5 = inlined_call_operand.hbm [shape: f32[2,32], index: 5, kind: input, shape index: {}]   ;;  %s14645_s6 = inlined_call_operand.hbm [shape: bf16[32,64], index: 6, kind: input, shape index: {}]   ;;  %s14646_s7 = inlined_call_operand.hbm [shape: f32[1,64], index: 7, kind: input, shape index: {}]   ;;  %s14647_s8 = inlined_call_operand.hbm [shape: bf16[64,32], index: 8, kind: input, shape index: {}]   ;;  %s14648_s9 = inlined_call_operand.hbm [shape: f32[4,128,32], index: 9, kind: output, shape index: {}]  }
   0x1   :  { %14737 = sst [smem:[#allocation108_spill]] %s14640_s1 }
   0x2   :  { %14738 = sst [smem:[#allocation109_spill]] %s14642_s3 }
   0x3   :  { %14739 = sst [smem:[#allocation110_spill]] %s14644_s5 }
   0x4   :  { %14 = vsyncpa [#allocation3], 0 }
   0x5   :  { %16 = vsyncpa [#allocation3 + $0x1], 0 }
   0x6   :  { %17 = vsyncpa [#allocation6], 0 }
   0x7   :  { %18 = vsyncpa [#allocation9], 0 }
   0x8   :  { %19 = vsyncpa [#allocation12], 0 }
   0x9   :  { %20 = vsyncpa [#allocation15], 0 }
   0xa   :  { %21 = vsyncpa [#allocation4], 0 }
   0xb   :  { %23 = vsyncpa [#allocation4 + $0x1], 0  ;;  %s10152_s30 = smov 0   ;;  %s10154_s10 = smov 0  }
   0xc   :  { %s10156_s11 = smov 0   ;;  %s10158_s12 = smov 0  }
   0xd LB: > { %s10073_s13 = smov [#allocation5]   ;;  %s10173_s15 = sadd.s32 4294967295, %s10071_s12   ;;  %s10071_s12 = sphi %s10158_s12, %s15039_s12   ;;  %s10067_s11 = sphi %s10156_s11, %s15038_s11   ;;  %s10063_s10 = sphi %s10154_s10, %s15037_s10   ;;  %s10059_s30 = sphi %s10152_s30, %s15036_s30  }
   0xe   : > { %s267_s14 = sshll.u32 %s10073_s13, 4  ;;  %p7372_p0 = scmp.ge.s32.totalorder %s10071_s12, 1  ;;  %s10178_s14 = int_to_ptr.vmem [resolvable:$true] %s267_s14 }
   0xf   : > { %p14649_p1 = scmp.eq.s32.totalorder %s10173_s15, 0  ;;  %p254_p2 = scmp.lt.s32.totalorder %s10071_s12, 3 }
  0x10   : > { %s10074_s17 = smov [#allocation8]   ;;  %s10075_s19 = smov [#allocation11]  }
  0x11   : > { %p10180_p3 = pnand %p7372_p0, %p254_p2  ;;  %s291_s18 = sshll.u32 %s10074_s17, 4  ;;  %s10187_s18 = int_to_ptr.vmem [resolvable:$true] %s291_s18 }
  0x12   : > { %s315_s20 = sshll.u32 %s10075_s19, 4  ;;  %s10076_s22 = smov [#allocation14]   ;;  %s10195_s20 = int_to_ptr.vmem [resolvable:$true] %s315_s20 }
  0x13   : > { %s14740_s16 = scalar_select %p10180_p3, 1, 0 }
  0x14   : > { %p8639_p5 = pneg %p10180_p3  ;;  %s10197_s23 = sshll.u32 %s10076_s22, 4  ;;  %s340_s23 = int_to_ptr.vmem [resolvable:$true] %s10197_s23 }
  0x15   : > { %s14742_s1 = sld [smem:[#allocation108_spill]] }
  0x16   : > { %p10191_p6 = pnand %p8639_p5, %p14649_p1 }
  0x18   : > { %p10207_p8 = pneg %p10191_p6 }
  0x1b   : > { %s9735_s26 = scalar_lea.hbm %s14742_s1, 64 }
  0x1c   : > { %p9736_p7 = scmp.ne.s32.totalorder %s14742_s1, %s9735_s26  ;;  %p9742_p11 = scmp.lt.u32.totalorder %s9735_s26, %s14742_s1 }
  0x1e   : > { %p9738_p9 = pnand %p10207_p8, %p9736_p7 }
  0x20   : > { %p9739_p10 = pneg %p9738_p9 }
  0x22   : > { %p9744_p12 = pnand %p9742_p11, %p9739_p10 }
  0x24   : > { %9747 = shalt.err (!%p9744_p12)
}
  0x25   : > { %s9748_s19 = scalar_lea.vmem %s10178_s14, 64  ;;  %p9756_p5 = scmp.lt.s32.totalorder %s10178_s14, %s10178_s14 }
  0x26   : > { %p9749_p13 = scmp.ne.s32.totalorder %s10178_s14, %s9748_s19  ;;  %p9757_p4 = scmp.lt.s32.totalorder %s9748_s19, %s9748_s19 }
  0x28   : > { %p9751_p0 = pnand %p9749_p13, %p10207_p8  ;;  %p9758_p7 = por %p9757_p4, %p9756_p5 }
  0x2a   : > { %p9752_p2 = pneg %p9751_p0 }
  0x2c   : > { %p9759_p9 = pnand %p9758_p7, %p9752_p2 }
  0x2e   : > { %9762 = shalt.err (!%p9759_p9)
}
  0x2f   : > { %8642 = dma.hbm_to_vmem [thread:$0]  (!%p10191_p6), %s14742_s1, 64, %s10178_s14, [#allocation6]  }
  0x30   : > { %s14744_s3 = sld [smem:[#allocation109_spill]] }
  0x36   : > { %s9763_s27 = scalar_lea.hbm %s14744_s3, 16 }
  0x37   : > { %p9764_p10 = scmp.ne.s32.totalorder %s14744_s3, %s9763_s27  ;;  %p9770_p12 = scmp.lt.u32.totalorder %s9763_s27, %s14744_s3 }
  0x39   : > { %p9766_p4 = pnand %p9764_p10, %p10207_p8 }
  0x3b   : > { %p9767_p11 = pneg %p9766_p4 }
  0x3d   : > { %p9772_p13 = pnand %p9770_p12, %p9767_p11 }
  0x3f   : > { %9775 = shalt.err (!%p9772_p13)
}
  0x40   : > { %s9776_s14 = scalar_lea.vmem %s10187_s18, 16  ;;  %s9783_s22 = scalar_lea.vmem %s10187_s18, 32 }
  0x41   : > { %p9777_p0 = scmp.ne.s32.totalorder %s10187_s18, %s9776_s14  ;;  %p9784_p7 = scmp.lt.s32.totalorder %s10187_s18, %s10187_s18 }
  0x42   : > { %p9785_p9 = scmp.lt.s32.totalorder %s9783_s22, %s9776_s14 }
  0x43   : > { %p9779_p2 = pnand %p9777_p0, %p10207_p8 }
  0x44   : > { %p9786_p10 = por %p9785_p9, %p9784_p7 }
  0x45   : > { %p9780_p5 = pneg %p9779_p2 }
  0x47   : > { %p9787_p4 = pnand %p9786_p10, %p9780_p5 }
  0x49   : > { %9790 = shalt.err (!%p9787_p4)
}
  0x4a   : > { %8648 = dma.hbm_to_vmem [thread:$0]  (!%p10191_p6), %s14744_s3, 16, %s10187_s18, [#allocation9]  }
  0x4b   : > { %s14745_s5 = sld [smem:[#allocation110_spill]] }
  0x51   : > { %s9791_s28 = scalar_lea.hbm %s14745_s5, 32 }
  0x52   : > { %p9792_p11 = scmp.ne.s32.totalorder %s14745_s5, %s9791_s28  ;;  %p9798_p0 = scmp.lt.u32.totalorder %s9791_s28, %s14745_s5 }
  0x54   : > { %p9794_p12 = pnand %p9792_p11, %p10207_p8 }
  0x56   : > { %p9795_p13 = pneg %p9794_p12 }
  0x58   : > { %p9800_p2 = pnand %p9798_p0, %p9795_p13 }
  0x5a   : > { %9803 = shalt.err (!%p9800_p2)
}
  0x5b   : > { %s9804_s18 = scalar_lea.vmem %s10195_s20, 32  ;;  %p9812_p10 = scmp.lt.s32.totalorder %s10195_s20, %s10195_s20 }
  0x5c   : > { %p9805_p5 = scmp.ne.s32.totalorder %s10195_s20, %s9804_s18  ;;  %p9813_p4 = scmp.lt.s32.totalorder %s9804_s18, %s9804_s18 }
  0x5e   : > { %p9807_p7 = pnand %p9805_p5, %p10207_p8  ;;  %p9814_p11 = por %p9813_p4, %p9812_p10 }
  0x60   : > { %p9808_p9 = pneg %p9807_p7 }
  0x62   : > { %p9815_p12 = pnand %p9814_p11, %p9808_p9 }
  0x64   : > { %9818 = shalt.err (!%p9815_p12)
}
  0x65   : > { %8654 = dma.hbm_to_vmem [thread:$0]  (!%p10191_p6), %s14745_s5, 32, %s10195_s20, [#allocation12]  }
  0x66   : > { %s10077_s25 = smov [#allocation7]   ;;  %s9819_s13 = scalar_lea.hbm %s14646_s7, 16 }
  0x67   : > { %s277_s26 = sshll.u32 %s10077_s25, 4  ;;  %p9820_p13 = scmp.ne.s32.totalorder %s14646_s7, %s9819_s13  ;;  %s278_s26 = int_to_ptr.vmem [resolvable:$true] %s277_s26 }
  0x68   : > { %p9826_p5 = scmp.lt.u32.totalorder %s9819_s13, %s14646_s7 }
  0x69   : > { %p9822_p0 = pnand %p9820_p13, %p10207_p8 }
  0x6b   : > { %p9823_p2 = pneg %p9822_p0 }
  0x6d   : > { %p9828_p7 = pnand %p9826_p5, %p9823_p2 }
  0x6f   : > { %9831 = shalt.err (!%p9828_p7)
}
  0x70   : > { %s9832_s20 = scalar_lea.vmem %s340_s23, 16  ;;  %s9839_s22 = scalar_lea.vmem %s340_s23, 32 }
  0x71   : > { %p9833_p9 = scmp.ne.s32.totalorder %s340_s23, %s9832_s20  ;;  %p9840_p11 = scmp.lt.s32.totalorder %s340_s23, %s340_s23 }
  0x72   : > { %p9841_p12 = scmp.lt.s32.totalorder %s9839_s22, %s9832_s20 }
  0x73   : > { %p9835_p10 = pnand %p9833_p9, %p10207_p8 }
  0x74   : > { %p9842_p1 = por %p9841_p12, %p9840_p11 }
  0x75   : > { %p9836_p4 = pneg %p9835_p10 }
  0x77   : > { %p9843_p3 = pnand %p9842_p1, %p9836_p4 }
  0x79   : > { %9846 = shalt.err (!%p9843_p3)
}
  0x7a   : > { %8660 = dma.hbm_to_vmem [thread:$0]  (!%p10191_p6), %s14646_s7, 16, %s340_s23, [#allocation15]  }
  0x7b   : > { %s9847_s13 = scalar_lea.hbm %s14641_s2, 256 }
  0x7c   : > { %p9848_p13 = scmp.ne.s32.totalorder %s14641_s2, %s9847_s13  ;;  %p9854_p3 = scmp.lt.u32.totalorder %s9847_s13, %s14641_s2 }
  0x7e   : > { %p9850_p0 = pnand %p9848_p13, %p10207_p8 }
  0x80   : > { %p9851_p1 = pneg %p9850_p0 }
  0x82   : > { %p9856_p2 = pnand %p9854_p3, %p9851_p1 }
  0x84   : > { %9859 = shalt.err (!%p9856_p2)
}
  0x85   : > { %s9860_s20 = scalar_lea.vmem %s278_s26, 256  ;;  %p9868_p10 = scmp.lt.s32.totalorder %s278_s26, %s278_s26 }
  0x86   : > { %p9861_p5 = scmp.ne.s32.totalorder %s278_s26, %s9860_s20  ;;  %p9869_p4 = scmp.lt.s32.totalorder %s9860_s20, %s9860_s20 }
  0x88   : > { %p9863_p7 = pnand %p9861_p5, %p10207_p8  ;;  %p9870_p11 = por %p9869_p4, %p9868_p10 }
  0x8a   : > { %p9864_p9 = pneg %p9863_p7 }
  0x8c   : > { %p9871_p12 = pnand %p9870_p11, %p9864_p9 }
  0x8e   : > { %9874 = shalt.err (!%p9871_p12)
}
  0x8f   : > { %s10078_s23 = smov 64   ;;  %s10079_s22 = smov 4  }
  0x90   : > { %8645 = dma.hbm_to_vmem [thread:$0]  (!%p10191_p6), %s14641_s2, 256, %s278_s26, [#allocation6], %s10078_s23, %s10078_s23, %s10079_s22  }
  0x91   : > { %s10080_s27 = smov [#allocation10]   ;;  %s10081_s13 = smov [#allocation13]  }
  0x92   : > { %s301_s28 = sshll.u32 %s10080_s27, 4  ;;  %s325_s17 = sshll.u32 %s10081_s13, 4  ;;  %s302_s28 = int_to_ptr.vmem [resolvable:$true] %s301_s28  ;;  %s326_s17 = int_to_ptr.vmem [resolvable:$true] %s325_s17 }
  0x93   : > { %s9875_s18 = scalar_lea.hbm %s14643_s4, 256 }
  0x94   : > { %p9876_p13 = scmp.ne.s32.totalorder %s14643_s4, %s9875_s18  ;;  %p9882_p3 = scmp.lt.u32.totalorder %s9875_s18, %s14643_s4 }
  0x96   : > { %p9878_p0 = pnand %p9876_p13, %p10207_p8 }
  0x98   : > { %p9879_p1 = pneg %p9878_p0 }
  0x9a   : > { %p9884_p2 = pnand %p9882_p3, %p9879_p1 }
  0x9c   : > { %9887 = shalt.err (!%p9884_p2)
}
  0x9d   : > { %s9888_s26 = scalar_lea.vmem %s302_s28, 256  ;;  %p9896_p10 = scmp.lt.s32.totalorder %s302_s28, %s302_s28 }
  0x9e   : > { %p9889_p5 = scmp.ne.s32.totalorder %s302_s28, %s9888_s26  ;;  %p9897_p4 = scmp.lt.s32.totalorder %s9888_s26, %s9888_s26 }
  0xa0   : > { %p9891_p7 = pnand %p9889_p5, %p10207_p8  ;;  %p9898_p11 = por %p9897_p4, %p9896_p10 }
  0xa2   : > { %p9892_p9 = pneg %p9891_p7 }
  0xa4   : > { %p9899_p12 = pnand %p9898_p11, %p9892_p9 }
  0xa6   : > { %9902 = shalt.err (!%p9899_p12)
}
  0xa7   : > { %8651 = dma.hbm_to_vmem [thread:$0]  (!%p10191_p6), %s14643_s4, 256, %s302_s28, [#allocation9], %s10078_s23, %s10078_s23, %s10079_s22  }
  0xa8   : > { %s9903_s25 = scalar_lea.hbm %s14645_s6, 256 }
  0xa9   : > { %p9904_p13 = scmp.ne.s32.totalorder %s14645_s6, %s9903_s25  ;;  %p9910_p3 = scmp.lt.u32.totalorder %s9903_s25, %s14645_s6 }
  0xab   : > { %p9906_p0 = pnand %p9904_p13, %p10207_p8 }
  0xad   : > { %p9907_p1 = pneg %p9906_p0 }
  0xaf   : > { %p9912_p2 = pnand %p9910_p3, %p9907_p1 }
  0xb1   : > { %9915 = shalt.err (!%p9912_p2)
}
  0xb2   : > { %s9916_s18 = scalar_lea.vmem %s326_s17, 256  ;;  %p9924_p10 = scmp.lt.s32.totalorder %s326_s17, %s326_s17 }
  0xb3   : > { %p9917_p5 = scmp.ne.s32.totalorder %s326_s17, %s9916_s18  ;;  %p9925_p4 = scmp.lt.s32.totalorder %s9916_s18, %s9916_s18 }
  0xb5   : > { %p9919_p7 = pnand %p9917_p5, %p10207_p8  ;;  %p9926_p11 = por %p9925_p4, %p9924_p10 }
  0xb7   : > { %p9920_p9 = pneg %p9919_p7 }
  0xb9   : > { %p9927_p12 = pnand %p9926_p11, %p9920_p9 }
  0xbb   : > { %9930 = shalt.err (!%p9927_p12)
}
  0xbc   : > { %8657 = dma.hbm_to_vmem [thread:$0]  (!%p10191_p6), %s14645_s6, 256, %s326_s17, [#allocation12], %s10078_s23, %s10078_s23, %s10079_s22  }
  0xbd   : > { %s10082_s26 = smov [#allocation16]   ;;  %s9931_s24 = scalar_lea.hbm %s14647_s8, 512 }
  0xbe   : > { %s349_s1 = sshll.u32 %s10082_s26, 4  ;;  %p9932_p13 = scmp.ne.s32.totalorder %s14647_s8, %s9931_s24  ;;  %s350_s1 = int_to_ptr.vmem [resolvable:$true] %s349_s1 }
  0xbf   : > { %p9938_p3 = scmp.lt.u32.totalorder %s9931_s24, %s14647_s8 }
  0xc0   : > { %p9934_p0 = pnand %p9932_p13, %p10207_p8 }
  0xc2   : > { %p9935_p1 = pneg %p9934_p0 }
  0xc4   : > { %p9940_p2 = pnand %p9938_p3, %p9935_p1 }
  0xc6   : > { %9943 = shalt.err (!%p9940_p2)
}
  0xc7   : > { %s9944_s17 = scalar_lea.vmem %s350_s1, 512  ;;  %p9952_p10 = scmp.lt.s32.totalorder %s350_s1, %s350_s1 }
  0xc8   : > { %p9945_p5 = scmp.ne.s32.totalorder %s350_s1, %s9944_s17  ;;  %p9953_p4 = scmp.lt.s32.totalorder %s9944_s17, %s9944_s17 }
  0xca   : > { %p9947_p7 = pnand %p9945_p5, %p10207_p8  ;;  %p9954_p11 = por %p9953_p4, %p9952_p10 }
  0xcc   : > { %p9948_p9 = pneg %p9947_p7 }
  0xce   : > { %p9955_p12 = pnand %p9954_p11, %p9948_p9 }
  0xd0   : > { %9958 = shalt.err (!%p9955_p12)
}
  0xd1   : > { %8663 = dma.hbm_to_vmem [thread:$0]  (!%p10191_p6), %s14647_s8, 512, %s350_s1, [#allocation15], %s10078_s23, %s10078_s23, %s10079_s22  }
  0xd2   : > { %s7371_s21 = sadd.s32 4294967294, %s10071_s12   ;;  %s10380_s29 = sadd.s32 1, %s10071_s12  }
  0xd3   : > { %s33_s28 = ssub.s32 %s10071_s12, %s10380_s29  ;;  %s36_s20 = sadd.s32 1, %s10067_s11 }
  0xd4   : > { %p34_p8 = scmp.eq.s32.totalorder %s33_s28, 0  ;;  %p43_p13 = scmp.ne.s32.totalorder %s10067_s11, %s10063_s10 }
  0xd5   : > { %p44_p0 = scmp.eq.s32.totalorder %s10071_s12, 0  ;;  %p49_p1 = scmp.ne.s32.totalorder %s10063_s10, %s10059_s30 }
  0xd6   : > { %s10391_s26 = scalar_select %p34_p8, %s10067_s11, %s36_s20  }
  0xd7   : > { %p10393_p3 = por %p44_p0, %p43_p13  ;;  %p14747_p2 = scmp.eq.s32.totalorder %s10173_s15, 0 }
  0xd8   : > { %p241_p5 = scmp.eq.s32.totalorder %s10173_s15, 1  ;;  %p247_p7 = scmp.eq.s32.totalorder %s7371_s21, 1 }
  0xd9   : > { %p10399_p6 = por %p14747_p2, %p49_p1  ;;  %p8680_p9 = scmp.lt.s32.totalorder %s10071_s12, 2 }
  0xda   : > { %s363_s22 = sand.u32 1, %s10067_s11   ;;  %p10406_p10 = por %p241_p5, %p43_p13 }
  0xdb   : > { %p10410_p4 = por %p247_p7, %p49_p1  ;;  %s7382_s24 = sshll.u32 %s363_s22, 8 }
  0xdc   : > { %s14749_s1 = scalar_select %p10406_p10, 1, 0 }
  0xdd   : > { %s14750_s5 = scalar_select %p10410_p4, 1, 0 }
  0xde   : > { %s7546_s25 = sshll.u32 %s10071_s12, 12  ;;  %s367_s17 = scalar_lea.vmem [#allocation2], %s7382_s24 }
  0xdf   : > { %s10418_s19 = scalar_lea.hbm %s14639_s0, %s7546_s25  ;;  %s375_s14 = sshll.u32 %s367_s17, 4  ;;  %s10420_s14 = int_to_ptr.vmem [resolvable:$true] %s375_s14 }
  0xe0   : > { %p10424_p11 = pnand %p8680_p9, %p10393_p3  ;;  %s10428_s21 = scalar_lea.sflag [#allocation3], %s363_s22 }
  0xe1   : > { %s9959_s28 = scalar_lea.hbm %s10418_s19, 4096  ;;  %s9964_s3 = scalar_lea.hbm %s14639_s0, 8192 }
  0xe2   : > { %p9960_p12 = scmp.ne.s32.totalorder %s10418_s19, %s9959_s28  ;;  %p9961_p8 = pneg %p10424_p11 }
  0xe3   : > { %p9965_p1 = scmp.lt.u32.totalorder %s10418_s19, %s14639_s0  ;;  %p9966_p3 = scmp.lt.u32.totalorder %s9964_s3, %s9959_s28 }
  0xe4   : > { %p9962_p13 = pnand %p9961_p8, %p9960_p12  ;;  %p9968_p5 = scmp.lt.u32.totalorder %s9959_s28, %s10418_s19 }
  0xe5   : > { %p9967_p2 = por %p9966_p3, %p9965_p1 }
  0xe6   : > { %p9963_p0 = pneg %p9962_p13 }
  0xe7   : > { %p9969_p7 = por %p9968_p5, %p9967_p2 }
  0xe9   : > { %p9970_p9 = pnand %p9969_p7, %p9963_p0 }
  0xeb   : > { %9973 = shalt.err (!%p9970_p9)
}
  0xec   : > { %s9974_s22 = scalar_lea.vmem %s10420_s14, 4096  ;;  %s10083_s13 = smov [#allocation2]  }
  0xed   : > { %p9975_p12 = scmp.ne.s32.totalorder %s10420_s14, %s9974_s22  ;;  %s9979_s17 = sshll.u32 %s10083_s13, 4  ;;  %s9980_s17 = int_to_ptr.vmem [resolvable:$false] %s9979_s17 }
  0xee   : > { %s9981_s20 = scalar_lea.vmem %s9980_s17, 8192  ;;  %p9982_p10 = scmp.lt.s32.totalorder %s10420_s14, %s9980_s17 }
  0xef   : > { %p9977_p13 = pnand %p9975_p12, %p9961_p8  ;;  %p9983_p1 = scmp.lt.s32.totalorder %s9981_s20, %s9974_s22 }
  0xf1   : > { %p9978_p4 = pneg %p9977_p13  ;;  %p9984_p3 = por %p9983_p1, %p9982_p10 }
  0xf3   : > { %p9985_p2 = pnand %p9984_p3, %p9978_p4 }
  0xf5   : > { %9988 = shalt.err (!%p9985_p2)
}
  0xf6   : > { %s10084_s28 = smov 128   ;;  %s10085_s24 = smov 8  }
  0xf7   : > { %8667 = dma.hbm_to_vmem [thread:$0]  (!%p10424_p11), %s10418_s19, 4096, %s10420_s14, %s10428_s21, %s10084_s28, %s10084_s28, %s10085_s24  }
  0xf8   : > { %p14752_p8 = scmp.ne.s32.totalorder %s14740_s16, 0 }
  0xfa   : > { %387 = sbr.rel (%p14752_p8) target bundleno = 6831 (0x1aaf), region = 56 }
 0x101   : > { %s10459_s3 = sand.u32 1, %s10063_s10  }
 0x102   : > { %s7387_s25 = sshll.u32 %s10459_s3, 8  ;;  %s390_s27 = scalar_lea.sflag [#allocation3], %s10459_s3 }
 0x103   : > { %s10465_s22 = scalar_lea.vmem [#allocation2], %s7387_s25 }
 0x104   : > { %10034 = dma.done.wait (%p10399_p6), %s390_s27, 4096  }
 0x105   : > { %10036 = vsyncadd (%p10399_p6), %s390_s27, 4294963200  ;;  %p14753_p10 = scmp.eq.s32.totalorder %s10173_s15, 0 }
 0x107   : > { %10038 = dma.done.wait (%p14753_p10), [#allocation6], 320   ;;  %p14754_p4 = pmov %p14753_p10 }
 0x109   : > { %10040 = vsyncadd (%p14754_p4), [#allocation6], 4294966976  ;;  %p14755_p11 = pmov %p14754_p4 }
 0x10a   : > { %p14756_p0 = pmov %p14754_p4 }
 0x10b   : > { %10042 = dma.done.wait (%p14755_p11), [#allocation9], 272  }
 0x10c   : > { %10044 = vsyncadd (%p14756_p0), [#allocation9], 4294967024  ;;  %p14757_p5 = pmov %p14756_p0 }
 0x10d   : > { %p14758_p7 = pmov %p14756_p0 }
 0x10e   : > { %10046 = dma.done.wait (%p14757_p5), [#allocation12], 288  }
 0x10f   : > { %10048 = vsyncadd (%p14758_p7), [#allocation12], 4294967008  ;;  %p14759_p6 = pmov %p14756_p0 }
 0x110   : > { %p14760_p9 = pmov %p14756_p0 }
 0x111   : > { %10050 = dma.done.wait (%p14759_p6), [#allocation15], 528  }
 0x112   : > { %10052 = vsyncadd (%p14760_p9), [#allocation15], 4294966768  ;;  %vm498_vm0 = vcmask 261120   ;;  %v463_v0 = vld [vmem:[%s10465_s22] sm:$0xff]  ;;  %v465_v1 = vld [vmem:[%s10465_s22 + $0x10] sm:$0xff]  ;;  %s10086_s16 = smov 96  }
 0x113   : > { %v464_v2 = vld [vmem:[%s10465_s22 + $0x8] sm:$0xff]  ;;  %v499_v3 = vsel %vm498_vm0, %v463_v0, 0.0  ;;  %v505_v4 = vsel %vm498_vm0, %v465_v1, 0.0  ;;  %v466_v5 = vld [vmem:[%s10465_s22 + $0x18] sm:$0xff]  ;;  %v10494_v6 = vld [vmem:[%s10465_s22 + $0x20] sm:$0xff]  ;;  %s10087_s23 = smov 88  }
 0x114   : > { %500 = vadd.xlane.f32.xlu0 %v499_v3  ;;  %506 = vadd.xlane.f32.xlu1 %v505_v4  ;;  %v10497_v7 = vld [vmem:[%s10465_s22 + $0x28] sm:$0xff]  ;;  %v502_v8 = vsel %vm498_vm0, %v464_v2, 0.0  ;;  %v508_v9 = vsel %vm498_vm0, %v466_v5, 0.0  ;;  %v10502_v10 = vld [vmem:[%s10465_s22 + $0x30] sm:$0xff]  ;;  %v10505_v11 = vld [vmem:[%s10465_s22 + $0x38] sm:$0xff]  ;;  %v511_v12 = vsel %vm498_vm0, %v10494_v6, 0.0 }
 0x115   : > { %v514_v13 = vsel %vm498_vm0, %v10497_v7, 0.0  ;;  %v517_v14 = vsel %vm498_vm0, %v10502_v10, 0.0  ;;  %v520_v15 = vsel %vm498_vm0, %v10505_v11, 0.0  ;;  %v10516_v16 = vld [vmem:[%s10465_s22 + $0x40] sm:$0xff]  ;;  %v10519_v17 = vld [vmem:[%s10465_s22 + $0x48] sm:$0xff]  ;;  %v10526_v20 = vld [vmem:[%s10465_s22 + $0x50] sm:$0xff] }
 0x116   : > { %v523_v18 = vsel %vm498_vm0, %v10516_v16, 0.0  ;;  %v526_v19 = vsel %vm498_vm0, %v10519_v17, 0.0  ;;  %v10529_v21 = vld [vmem:[%s10465_s22 + $0x58] sm:$0xff]  ;;  %v529_v22 = vsel %vm498_vm0, %v10526_v20, 0.0  ;;  %v10536_v24 = vld [vmem:[%s10465_s22 + $0x60] sm:$0xff]  ;;  %v10539_v25 = vld [vmem:[%s10465_s22 + $0x68] sm:$0xff] }
 0x117   : > { %v532_v23 = vsel %vm498_vm0, %v10529_v21, 0.0  ;;  %v535_v26 = vsel %vm498_vm0, %v10536_v24, 0.0  ;;  %v538_v27 = vsel %vm498_vm0, %v10539_v25, 0.0  ;;  %v10546_v28 = vld [vmem:[%s10465_s22 + $0x70] sm:$0xff]  ;;  %v10549_v29 = vld [vmem:[%s10465_s22 + $0x78] sm:$0xff]  ;;  %s10088_s19 = smov 120  }
 0x118   : > { %503 = vadd.xlane.f32.xlu0 %v502_v8  ;;  %509 = vadd.xlane.f32.xlu1 %v508_v9  ;;  %v541_v30 = vsel %vm498_vm0, %v10546_v28, 0.0  ;;  %v544_v31 = vsel %vm498_vm0, %v10549_v29, 0.0  ;;  %s10089_s14 = smov 64   ;;  %s10090_s18 = smov 56   ;;  %vm1271_vm1 = vcmask 64512   ;;  %vm3378_vm3 = vcmask 130048  }
 0x119   : > { %s10091_s21 = smov 80   ;;  %s10092_s13 = smov 112   ;;  %vm3395_vm4 = vcmask 195584   ;;  %vm6933_vm5 = vcmask 523264  }
 0x11a   : > { %s10093_s17 = smov 48   ;;  %s10094_s20 = smov 72  }
 0x11b   : > { %s10095_s28 = smov 104   ;;  %s10096_s24 = smov 40  }
 0x11c   : > { %512 = vadd.xlane.f32.xlu0 %v511_v12  ;;  %515 = vadd.xlane.f32.xlu1 %v514_v13  ;;  %s10097_s27 = smov 8   ;;  %p15033_p13 = scmp.ne.s32.totalorder %s14749_s1, 0 }
 0x120   : > { %518 = vadd.xlane.f32.xlu0 %v517_v14  ;;  %521 = vadd.xlane.f32.xlu1 %v520_v15 }
 0x124   : > { %524 = vadd.xlane.f32.xlu0 %v523_v18  ;;  %527 = vadd.xlane.f32.xlu1 %v526_v19 }
 0x128   : > { %530 = vadd.xlane.f32.xlu0 %v529_v22  ;;  %533 = vadd.xlane.f32.xlu1 %v532_v23 }
 0x12c   : > { %536 = vadd.xlane.f32.xlu0 %v535_v26  ;;  %539 = vadd.xlane.f32.xlu1 %v538_v27 }
 0x130   : > { %542 = vadd.xlane.f32.xlu0 %v541_v30  ;;  %545 = vadd.xlane.f32.xlu1 %v544_v31 }
 0x1a1   : > { %v501_v32 = vpop.xlane.xlu0 %500  ;;  %v507_v33 = vpop.xlane.xlu1 %506 }
 0x1a2   : > { %v596_v34 = vmul.f32 0.03125, %v501_v32  ;;  %v598_v35 = vmul.f32 0.03125, %v507_v33 }
 0x1a4   : > { %v10555_v36 = vsub.f32 %v463_v0, %v596_v34  ;;  %v10557_v37 = vsub.f32 %v465_v1, %v598_v35 }
 0x1a5   : > { %v504_v38 = vpop.xlane.xlu0 %503  ;;  %v510_v39 = vpop.xlane.xlu1 %509 }
 0x1a6   : > { %v597_v40 = vmul.f32 0.03125, %v504_v38  ;;  %v599_v41 = vmul.f32 0.03125, %v510_v39  ;;  %v660_v42 = vmul.f32 %v10555_v36, %v10555_v36  ;;  %v662_v43 = vmul.f32 %v10557_v37, %v10557_v37 }
 0x1a8   : > { %v10563_v44 = vsub.f32 %v464_v2, %v597_v40  ;;  %v10565_v45 = vsub.f32 %v466_v5, %v599_v41  ;;  %v692_v46 = vsel %vm498_vm0, %v660_v42, 0.0  ;;  %v698_v49 = vsel %vm498_vm0, %v662_v43, 0.0 }
 0x1a9   : > { %693 = vadd.xlane.f32.xlu0 %v692_v46  ;;  %v513_v47 = vpop.xlane.xlu0 %512  ;;  %v516_v48 = vpop.xlane.xlu1 %515 }
 0x1aa   : > { %v600_v50 = vmul.f32 0.03125, %v513_v47  ;;  %v601_v51 = vmul.f32 0.03125, %v516_v48  ;;  %v661_v52 = vmul.f32 %v10563_v44, %v10563_v44  ;;  %v663_v53 = vmul.f32 %v10565_v45, %v10565_v45 }
 0x1ac   : > { %v10574_v54 = vsub.f32 %v10494_v6, %v600_v50  ;;  %v10577_v55 = vsub.f32 %v10497_v7, %v601_v51  ;;  %v695_v56 = vsel %vm498_vm0, %v661_v52, 0.0  ;;  %v701_v59 = vsel %vm498_vm0, %v663_v53, 0.0  ;;  %v10646_v52 = vld [vmem:[%s10465_s22 + $0x80] sm:$0xff] }
 0x1ad   : > { %699 = vadd.xlane.f32.xlu0 %v698_v49  ;;  %696 = vadd.xlane.f32.xlu1 %v695_v56  ;;  %v519_v57 = vpop.xlane.xlu0 %518  ;;  %v522_v58 = vpop.xlane.xlu1 %521  ;;  %v547_v53 = vsel %vm498_vm0, %v10646_v52, 0.0  ;;  %v10653_v56 = vld [vmem:[%s10465_s22 + $0x88] sm:$0xff] }
 0x1ae   : > { %v602_v60 = vmul.f32 0.03125, %v519_v57  ;;  %v603_v61 = vmul.f32 0.03125, %v522_v58  ;;  %v664_v62 = vmul.f32 %v10574_v54, %v10574_v54  ;;  %v665_v63 = vmul.f32 %v10577_v55, %v10577_v55  ;;  %v10656_v57 = vld [vmem:[%s10465_s22 + $0x90] sm:$0xff] }
 0x1af   : > { %v550_v58 = vsel %vm498_vm0, %v10653_v56, 0.0 }
 0x1b0   : > { %v10586_v0 = vsub.f32 %v10502_v10, %v602_v60  ;;  %v10589_v1 = vsub.f32 %v10505_v11, %v603_v61  ;;  %v704_v2 = vsel %vm498_vm0, %v664_v62, 0.0  ;;  %v707_v5 = vsel %vm498_vm0, %v665_v63, 0.0  ;;  %v10663_v60 = vld [vmem:[%s10465_s22 + $0x98] sm:$0xff]  ;;  %v10666_v61 = vld [vmem:[%s10465_s22 + $0xa0] sm:$0xff] }
 0x1b1   : > { %702 = vadd.xlane.f32.xlu1 %v701_v59  ;;  %705 = vadd.xlane.f32.xlu0 %v704_v2  ;;  %v525_v3 = vpop.xlane.xlu0 %524  ;;  %v528_v4 = vpop.xlane.xlu1 %527  ;;  %v553_v59 = vsel %vm498_vm0, %v10656_v57, 0.0  ;;  %v8989_v62 = vld [vmem:[#allocation7] sm:$0xff]   ;;  %v556_v63 = vsel %vm498_vm0, %v10663_v60, 0.0  ;;  %v559_v2 = vsel %vm498_vm0, %v10666_v61, 0.0 }
 0x1b2   : > { %v604_v6 = vmul.f32 0.03125, %v525_v3  ;;  %v605_v7 = vmul.f32 0.03125, %v528_v4  ;;  %v666_v8 = vmul.f32 %v10586_v0, %v10586_v0  ;;  %v667_v9 = vmul.f32 %v10589_v1, %v10589_v1  ;;  %v10673_v3 = vld [vmem:[%s10465_s22 + $0xa8] sm:$0xff]  ;;  %v10676_v4 = vld [vmem:[%s10465_s22 + $0xb0] sm:$0xff]  ;;  %7879 = vmatprep.subr.bf16.mxu1 %v8989_v62 }
 0x1b3   : > { %7880 = vmatpush3.bf16.msra.mxu1 %v8989_v62 }
 0x1b4   : > { %v10598_v10 = vsub.f32 %v10516_v16, %v604_v6  ;;  %v10601_v11 = vsub.f32 %v10519_v17, %v605_v7  ;;  %v710_v12 = vsel %vm498_vm0, %v666_v8, 0.0  ;;  %v713_v15 = vsel %vm498_vm0, %v667_v9, 0.0  ;;  %v10683_v9 = vld [vmem:[%s10465_s22 + $0xb8] sm:$0xff] }
 0x1b5   : > { %708 = vadd.xlane.f32.xlu1 %v707_v5  ;;  %711 = vadd.xlane.f32.xlu0 %v710_v12  ;;  %v531_v13 = vpop.xlane.xlu0 %530  ;;  %v534_v14 = vpop.xlane.xlu1 %533  ;;  %v8990_v5 = vld [vmem:[#allocation7 + $0x8] sm:$0xff]   ;;  %v916_v6 = vlaneseq  ;;  %v562_v7 = vsel %vm498_vm0, %v10673_v3, 0.0  ;;  %v565_v8 = vsel %vm498_vm0, %v10676_v4, 0.0  ;;  %v10686_v12 = vld [vmem:[%s10465_s22 + $0xc0] sm:$0xff] }
 0x1b6   : > { %v606_v18 = vmul.f32 0.03125, %v531_v13  ;;  %v607_v19 = vmul.f32 0.03125, %v534_v14  ;;  %v668_v22 = vmul.f32 %v10598_v10, %v10598_v10  ;;  %v669_v16 = vmul.f32 %v10601_v11, %v10601_v11  ;;  %7881 = vmatprep.subr.bf16.mxu1 %v8990_v5 }
 0x1b7   : > { %7882 = vmatpush3.bf16.msra.mxu1 %v8990_v5  ;;  %v10689_v13 = vshrl.u32 %v916_v6, 7  ;;  %v568_v14 = vsel %vm498_vm0, %v10683_v9, 0.0 }
 0x1b8   : > { %v10610_v23 = vsub.f32 %v10526_v20, %v606_v18  ;;  %v10613_v17 = vsub.f32 %v10529_v21, %v607_v19  ;;  %v716_v26 = vsel %vm498_vm0, %v668_v22, 0.0  ;;  %v719_v31 = vsel %vm498_vm0, %v669_v16, 0.0  ;;  %v10696_v18 = vld [vmem:[%s10465_s22 + $0xc8] sm:$0xff]  ;;  %v10699_v19 = vld [vmem:[%s10465_s22 + $0xd0] sm:$0xff] }
 0x1b9   : > { %714 = vadd.xlane.f32.xlu1 %v713_v15  ;;  %717 = vadd.xlane.f32.xlu0 %v716_v26  ;;  %v537_v27 = vpop.xlane.xlu0 %536  ;;  %v540_v30 = vpop.xlane.xlu1 %539  ;;  %v571_v15 = vsel %vm498_vm0, %v10686_v12, 0.0  ;;  %v6275_v22 = vsub.s32 2, %v10689_v13  ;;  %v6311_v16 = vsub.s32 3, %v10689_v13  ;;  %v10703_v26 = vld [vmem:[#allocation5] sm:$0xf] }
 0x1ba   : > { %v608_v32 = vmul.f32 0.03125, %v537_v27  ;;  %v609_v33 = vmul.f32 0.03125, %v540_v30  ;;  %v670_v34 = vmul.f32 %v10610_v23, %v10610_v23  ;;  %v671_v20 = vmul.f32 %v10613_v17, %v10613_v17 }
 0x1bb   : > { %v10706_v27 = vrot.slane %v10703_v26, %v6275_v22  ;;  %v10709_v30 = vrot.slane %v10703_v26, %v6311_v16 }
 0x1bc   : > { %v10622_v35 = vsub.f32 %v10536_v24, %v608_v32  ;;  %v10625_v21 = vsub.f32 %v10539_v25, %v609_v33  ;;  %v722_v38 = vsel %vm498_vm0, %v670_v34, 0.0  ;;  %v725_v41 = vsel %vm498_vm0, %v671_v20, 0.0  ;;  %v10716_v33 = vld [vmem:[%s10465_s22 + $0xd8] sm:$0xff]  ;;  %v10719_v34 = vld [vmem:[%s10465_s22 + $0xe0] sm:$0xff] }
 0x1bd   : > { %720 = vadd.xlane.f32.xlu1 %v719_v31  ;;  %723 = vadd.xlane.f32.xlu0 %v722_v38  ;;  %v543_v39 = vpop.xlane.xlu0 %542  ;;  %v546_v40 = vpop.xlane.xlu1 %545  ;;  %14761 = vst [vmem:[#allocation24_spill] sm:$0xff] %v10706_v27  ;;  %14762 = vst [vmem:[#allocation25_spill] sm:$0xff] %v10709_v30  ;;  %v574_v31 = vsel %vm498_vm0, %v10696_v18, 0.0  ;;  %v577_v32 = vsel %vm498_vm0, %v10699_v19, 0.0  ;;  %v580_v20 = vsel %vm498_vm0, %v10716_v33, 0.0  ;;  %v583_v38 = vsel %vm498_vm0, %v10719_v34, 0.0 }
 0x1be   : > { %v610_v42 = vmul.f32 0.03125, %v543_v39  ;;  %v611_v43 = vmul.f32 0.03125, %v546_v40  ;;  %v672_v46 = vmul.f32 %v10622_v35, %v10622_v35  ;;  %v673_v24 = vmul.f32 %v10625_v21, %v10625_v21  ;;  %v10726_v39 = vld [vmem:[%s10465_s22 + $0xe8] sm:$0xff]  ;;  %v10729_v40 = vld [vmem:[%s10465_s22 + $0xf0] sm:$0xff] }
 0x1c0   : > { %v10634_v25 = vsub.f32 %v10546_v28, %v610_v42  ;;  %v10637_v47 = vsub.f32 %v10549_v29, %v611_v43  ;;  %v728_v48 = vsel %vm498_vm0, %v672_v46, 0.0  ;;  %v731_v49 = vsel %vm498_vm0, %v673_v24, 0.0  ;;  %v10736_v43 = vld [vmem:[%s10465_s22 + $0xf8] sm:$0xff] }
 0x1c1   : > { %726 = vadd.xlane.f32.xlu1 %v725_v41  ;;  %729 = vadd.xlane.f32.xlu0 %v728_v48  ;;  %v586_v41 = vsel %vm498_vm0, %v10726_v39, 0.0  ;;  %v589_v42 = vsel %vm498_vm0, %v10729_v40, 0.0  ;;  %v592_v46 = vsel %vm498_vm0, %v10736_v43, 0.0 }
 0x1c2   : > { %v674_v50 = vmul.f32 %v10634_v25, %v10634_v25  ;;  %v675_v51 = vmul.f32 %v10637_v47, %v10637_v47 }
 0x1c4   : > { %v734_v28 = vsel %vm498_vm0, %v674_v50, 0.0  ;;  %v737_v29 = vsel %vm498_vm0, %v675_v51, 0.0 }
 0x1c5   : > { %732 = vadd.xlane.f32.xlu1 %v731_v49  ;;  %735 = vadd.xlane.f32.xlu0 %v734_v28 }
 0x1c9   : > { %738 = vadd.xlane.f32.xlu1 %v737_v29  ;;  %548 = vadd.xlane.f32.xlu0 %v547_v53 }
 0x1cd   : > { %551 = vadd.xlane.f32.xlu1 %v550_v58  ;;  %554 = vadd.xlane.f32.xlu0 %v553_v59 }
 0x1d1   : > { %557 = vadd.xlane.f32.xlu1 %v556_v63  ;;  %560 = vadd.xlane.f32.xlu0 %v559_v2 }
 0x1d5   : > { %563 = vadd.xlane.f32.xlu1 %v562_v7  ;;  %566 = vadd.xlane.f32.xlu0 %v565_v8 }
 0x1d9   : > { %569 = vadd.xlane.f32.xlu1 %v568_v14  ;;  %572 = vadd.xlane.f32.xlu0 %v571_v15  ;;  %v918_v15 = vsub.s32 0, %v10689_v13 }
 0x1dd   : > { %575 = vadd.xlane.f32.xlu1 %v574_v31  ;;  %578 = vadd.xlane.f32.xlu0 %v577_v32 }
 0x1e1   : > { %581 = vadd.xlane.f32.xlu1 %v580_v20  ;;  %584 = vadd.xlane.f32.xlu0 %v583_v38 }
 0x1e5   : > { %587 = vadd.xlane.f32.xlu1 %v586_v41  ;;  %590 = vadd.xlane.f32.xlu0 %v589_v42 }
 0x1e9   : > { %593 = vadd.xlane.f32.xlu1 %v592_v46  ;;  %v10743_v46 = vrot.slane %v10703_v26, %v918_v15 }
 0x236   : > { %v694_v24 = vpop.xlane.xlu0 %693 }
 0x237   : > { %v788_v48 = vmul.f32 0.03125, %v694_v24  ;;  %v954_v24 = vsub.s32 1, %v10689_v13 }
 0x239   : > { %v820_v49 = vadd.f32 1e-06, %v788_v48 }
 0x23a   : > { %v697_v50 = vpop.xlane.xlu1 %696  ;;  %v700_v51 = vpop.xlane.xlu0 %699 }
 0x23b   : > { %8999 = vrsqrt.f32 %v820_v49  ;;  %v789_v28 = vmul.f32 0.03125, %v697_v50  ;;  %v790_v29 = vmul.f32 0.03125, %v700_v51 }
 0x23d   : > { %v821_v53 = vadd.f32 1e-06, %v789_v28  ;;  %v822_v58 = vadd.f32 1e-06, %v790_v29 }
 0x23e   : > { %v703_v59 = vpop.xlane.xlu1 %702  ;;  %v706_v62 = vpop.xlane.xlu0 %705 }
 0x23f   : > { %9001 = vrsqrt.f32 %v821_v53  ;;  %v791_v63 = vmul.f32 0.03125, %v703_v59  ;;  %v792_v2 = vmul.f32 0.03125, %v706_v62 }
 0x240   : > { %9003 = vrsqrt.f32 %v822_v58 }
 0x241   : > { %v823_v5 = vadd.f32 1e-06, %v791_v63  ;;  %v824_v7 = vadd.f32 1e-06, %v792_v2 }
 0x242   : > { %v709_v8 = vpop.xlane.xlu1 %708  ;;  %v712_v14 = vpop.xlane.xlu0 %711 }
 0x243   : > { %9005 = vrsqrt.f32 %v823_v5  ;;  %v793_v22 = vmul.f32 0.03125, %v709_v8  ;;  %v794_v16 = vmul.f32 0.03125, %v712_v14 }
 0x244   : > { %9007 = vrsqrt.f32 %v824_v7 }
 0x245   : > { %v9000_v31 = vpop.eup %8999  ;;  %v825_v32 = vadd.f32 1e-06, %v793_v22  ;;  %v826_v20 = vadd.f32 1e-06, %v794_v16 }
 0x246   : > { %v715_v38 = vpop.xlane.xlu1 %714  ;;  %v718_v41 = vpop.xlane.xlu0 %717  ;;  %v884_v42 = vmul.f32 %v9000_v31, %v10555_v36  ;;  %v10749_v36 = vrot.slane %v10703_v26, %v954_v24 }
 0x247   : > { %9009 = vrsqrt.f32 %v825_v32  ;;  %v795_v48 = vmul.f32 0.03125, %v715_v38  ;;  %v796_v49 = vmul.f32 0.03125, %v718_v41 }
 0x248   : > { %9011 = vrsqrt.f32 %v826_v20  ;;  %v920_v62 = vmul.f32 %v10743_v46, %v884_v42 }
 0x249   : > { %v9002_v50 = vpop.eup %9001  ;;  %v827_v51 = vadd.f32 1e-06, %v795_v48  ;;  %v828_v28 = vadd.f32 1e-06, %v796_v49 }
 0x24a   : > { %v9004_v29 = vpop.eup %9003  ;;  %v721_v53 = vpop.xlane.xlu1 %720  ;;  %v885_v59 = vmul.f32 %v9002_v50, %v10563_v44  ;;  %v956_v44 = vadd.f32 %v10749_v36, %v920_v62 }
 0x24b   : > { %v724_v58 = vpop.xlane.xlu0 %723  ;;  %9013 = vrsqrt.f32 %v827_v51  ;;  %v797_v63 = vmul.f32 0.03125, %v721_v53  ;;  %v886_v2 = vmul.f32 %v9004_v29, %v10557_v37 }
 0x24c   : > { %v798_v13 = vmul.f32 0.03125, %v724_v58  ;;  %9015 = vrsqrt.f32 %v828_v28  ;;  %v921_v5 = vmul.f32 %v10743_v46, %v885_v59 }
 0x24d   : > { %v9006_v7 = vpop.eup %9005  ;;  %v829_v8 = vadd.f32 1e-06, %v797_v63  ;;  %v922_v32 = vmul.f32 %v10743_v46, %v886_v2 }
 0x24e   : > { %v830_v14 = vadd.f32 1e-06, %v798_v13  ;;  %v9008_v15 = vpop.eup %9007  ;;  %v727_v22 = vpop.xlane.xlu1 %726  ;;  %v957_v31 = vadd.f32 %v10749_v36, %v921_v5  ;;  %v887_v26 = vmul.f32 %v9006_v7, %v10565_v45 }
 0x24f   : > { %v730_v16 = vpop.xlane.xlu0 %729  ;;  %9017 = vrsqrt.f32 %v829_v8  ;;  %v799_v20 = vmul.f32 0.03125, %v727_v22  ;;  %v888_v42 = vmul.f32 %v9008_v15, %v10574_v54  ;;  %v958_v45 = vadd.f32 %v10749_v36, %v922_v32 }
 0x250   : > { %v800_v37 = vmul.f32 0.03125, %v730_v16  ;;  %9019 = vrsqrt.f32 %v830_v14  ;;  %v988_v38 = vpack.c.bf16 %v957_v31, %v956_v44  ;;  %v923_v41 = vmul.f32 %v10743_v46, %v887_v26 }
 0x251   : > { %v9010_v24 = vpop.eup %9009  ;;  %v831_v48 = vadd.f32 1e-06, %v799_v20  ;;  %v924_v58 = vmul.f32 %v10743_v46, %v888_v42 }
 0x252   : > { %v832_v49 = vadd.f32 1e-06, %v800_v37  ;;  %v9012_v50 = vpop.eup %9011  ;;  %v733_v51 = vpop.xlane.xlu1 %732  ;;  %7883 = vmatprep.mubr.msk.bf16.mxu1 %vm498_vm0, %v988_v38  ;;  %v959_v29 = vadd.f32 %v10749_v36, %v923_v41  ;;  %v889_v53 = vmul.f32 %v9010_v24, %v10577_v55 }
 0x253   : > { %v736_v28 = vpop.xlane.xlu0 %735  ;;  %9021 = vrsqrt.f32 %v831_v48  ;;  %v801_v59 = vmul.f32 0.03125, %v733_v51  ;;  %v890_v54 = vmul.f32 %v9012_v50, %v10586_v0  ;;  %v960_v55 = vadd.f32 %v10749_v36, %v924_v58 }
 0x254   : > { %v802_v62 = vmul.f32 0.03125, %v736_v28  ;;  %9023 = vrsqrt.f32 %v832_v49  ;;  %v989_v63 = vpack.c.bf16 %v959_v29, %v958_v45  ;;  %v925_v13 = vmul.f32 %v10743_v46, %v889_v53 }
 0x255   : > { %v9014_v2 = vpop.eup %9013  ;;  %v833_v5 = vadd.f32 1e-06, %v801_v59  ;;  %v926_v0 = vmul.f32 %v10743_v46, %v890_v54 }
 0x256   : > { %v834_v7 = vadd.f32 1e-06, %v802_v62  ;;  %v9016_v8 = vpop.eup %9015  ;;  %v739_v14 = vpop.xlane.xlu1 %738  ;;  %7884 = vmatmul.mubr.msk.bf16.vlgmr.msra.gmra.mrb[0].mxu1 %vm498_vm0, %v989_v63  ;;  %v961_v15 = vadd.f32 %v10749_v36, %v925_v13  ;;  %v891_v16 = vmul.f32 %v9014_v2, %v10589_v1 }
 0x257   : > { %v549_v22 = vpop.xlane.xlu0 %548  ;;  %9025 = vrsqrt.f32 %v833_v5  ;;  %v803_v44 = vmul.f32 0.03125, %v739_v14  ;;  %v892_v20 = vmul.f32 %v9016_v8, %v10598_v10  ;;  %v962_v1 = vadd.f32 %v10749_v36, %v926_v0 }
 0x258   : > { %v612_v31 = vmul.f32 0.03125, %v549_v22  ;;  %9027 = vrsqrt.f32 %v834_v7  ;;  %v990_v26 = vpack.c.bf16 %v961_v15, %v960_v55  ;;  %v927_v32 = vmul.f32 %v10743_v46, %v891_v16 }
 0x259   : > { %v9018_v37 = vpop.eup %9017  ;;  %v835_v38 = vadd.f32 1e-06, %v803_v44  ;;  %v928_v51 = vmul.f32 %v10743_v46, %v892_v20 }
 0x25a   : > { %v10774_v41 = vsub.f32 %v10646_v52, %v612_v31  ;;  %v9020_v42 = vpop.eup %9019  ;;  %v552_v24 = vpop.xlane.xlu1 %551  ;;  %7887 = vmatprep.mubr.msk.bf16.mxu1 %vm498_vm0, %v990_v26  ;;  %v963_v48 = vadd.f32 %v10749_v36, %v927_v32  ;;  %v893_v50 = vmul.f32 %v9018_v37, %v10601_v11 }
 0x25b   : > { %v555_v49 = vpop.xlane.xlu0 %554  ;;  %9029 = vrsqrt.f32 %v835_v38  ;;  %v613_v10 = vmul.f32 0.03125, %v552_v24  ;;  %v894_v53 = vmul.f32 %v9020_v42, %v10610_v23  ;;  %v964_v11 = vadd.f32 %v10749_v36, %v928_v51 }
 0x25c   : > { %v614_v28 = vmul.f32 0.03125, %v555_v49  ;;  %v676_v52 = vmul.f32 %v10774_v41, %v10774_v41  ;;  %v991_v45 = vpack.c.bf16 %v963_v48, %v962_v1  ;;  %v929_v29 = vmul.f32 %v10743_v46, %v893_v50 }
 0x25d   : > { %v9022_v58 = vpop.eup %9021  ;;  %v10786_v59 = vsub.f32 %v10653_v56, %v613_v10  ;;  %v930_v56 = vmul.f32 %v10743_v46, %v894_v53 }
 0x25e   : > { %v10789_v62 = vsub.f32 %v10656_v57, %v614_v28  ;;  %v740_v54 = vsel %vm498_vm0, %v676_v52, 0.0  ;;  %v9024_v63 = vpop.eup %9023  ;;  %v558_v13 = vpop.xlane.xlu1 %557  ;;  %7888 = vmatmul.mubr.msk.bf16.gmra.mrb[4].mxu1 %vm498_vm0, %v991_v45  ;;  %v965_v2 = vadd.f32 %v10749_v36, %v929_v29  ;;  %v895_v23 = vmul.f32 %v9022_v58, %v10613_v17 }
 0x25f   : > { %v561_v5 = vpop.xlane.xlu0 %560  ;;  %741 = vadd.xlane.f32.xlu0 %v740_v54  ;;  %v615_v7 = vmul.f32 0.03125, %v558_v13  ;;  %v677_v57 = vmul.f32 %v10786_v59, %v10786_v59  ;;  %v966_v22 = vadd.f32 %v10749_v36, %v930_v56  ;;  %v896_v16 = vmul.f32 %v9024_v63, %v10622_v35 }
 0x260   : > { %v616_v8 = vmul.f32 0.03125, %v561_v5  ;;  %v678_v14 = vmul.f32 %v10789_v62, %v10789_v62  ;;  %v992_v55 = vpack.c.bf16 %v965_v2, %v964_v11  ;;  %v931_v15 = vmul.f32 %v10743_v46, %v895_v23 }
 0x261   : > { %v9026_v0 = vpop.eup %9025  ;;  %v10805_v17 = vsub.f32 %v10663_v60, %v615_v7  ;;  %v743_v44 = vsel %vm498_vm0, %v677_v57, 0.0  ;;  %v932_v38 = vmul.f32 %v10743_v46, %v896_v16 }
 0x262   : > { %v10809_v31 = vsub.f32 %v10666_v61, %v616_v8  ;;  %v746_v26 = vsel %vm498_vm0, %v678_v14, 0.0  ;;  %v9028_v32 = vpop.eup %9027  ;;  %744 = vadd.xlane.f32.xlu1 %v743_v44  ;;  %7891 = vmatprep.mubr.msk.bf16.mxu1 %vm498_vm0, %v992_v55  ;;  %v564_v20 = vpop.xlane.xlu1 %563  ;;  %v967_v37 = vadd.f32 %v10749_v36, %v931_v15  ;;  %v897_v35 = vmul.f32 %v9026_v0, %v10625_v21 }
 0x263   : > { %v567_v60 = vpop.xlane.xlu0 %566  ;;  %v679_v42 = vmul.f32 %v10805_v17, %v10805_v17  ;;  %v617_v24 = vmul.f32 0.03125, %v564_v20  ;;  %747 = vadd.xlane.f32.xlu0 %v746_v26  ;;  %v898_v50 = vmul.f32 %v9028_v32, %v10634_v25  ;;  %v968_v28 = vadd.f32 %v10749_v36, %v932_v38 }
 0x264   : > { %v680_v61 = vmul.f32 %v10809_v31, %v10809_v31  ;;  %v618_v1 = vmul.f32 0.03125, %v567_v60  ;;  %v993_v48 = vpack.c.bf16 %v967_v37, %v966_v22  ;;  %v933_v49 = vmul.f32 %v10743_v46, %v897_v35 }
 0x265   : > { %v9030_v51 = vpop.eup %9029  ;;  %v749_v21 = vsel %vm498_vm0, %v679_v42, 0.0  ;;  %v10824_v10 = vsub.f32 %v10673_v3, %v617_v24  ;;  %v934_v25 = vmul.f32 %v10743_v46, %v898_v50 }
 0x266   : > { %v10828_v52 = vsub.f32 %v10676_v4, %v618_v1  ;;  %750 = vadd.xlane.f32.xlu1 %v749_v21  ;;  %7892 = vmatmul.mubr.msk.bf16.gmra.mrb[8].mxu1 %vm498_vm0, %v993_v48  ;;  %v969_v45 = vadd.f32 %v10749_v36, %v933_v49  ;;  %v570_v29 = vpop.xlane.xlu1 %569  ;;  %v899_v53 = vmul.f32 %v9030_v51, %v10637_v47  ;;  %v752_v11 = vsel %vm498_vm0, %v680_v61, 0.0 }
 0x267   : > { %v573_v58 = vpop.xlane.xlu0 %572  ;;  %v619_v3 = vmul.f32 0.03125, %v570_v29  ;;  %v681_v54 = vmul.f32 %v10824_v10, %v10824_v10  ;;  %v970_v23 = vadd.f32 %v10749_v36, %v934_v25 }
 0x268   : > { %v620_v63 = vmul.f32 0.03125, %v573_v58  ;;  %v994_v4 = vpack.c.bf16 %v969_v45, %v968_v28  ;;  %v935_v13 = vmul.f32 %v10743_v46, %v899_v53  ;;  %v682_v5 = vmul.f32 %v10828_v52, %v10828_v52 }
 0x269   : > { %v10845_v47 = vsub.f32 %v10683_v9, %v619_v3  ;;  %v755_v8 = vsel %vm498_vm0, %v681_v54, 0.0 }
 0x26a   : > { %v10839_v2 = vsub.f32 %v10686_v12, %v620_v63  ;;  %7895 = vmatprep.mubr.msk.bf16.mxu1 %vm498_vm0, %v994_v4  ;;  %753 = vadd.xlane.f32.xlu1 %v752_v11  ;;  %v971_v56 = vadd.f32 %v10749_v36, %v935_v13  ;;  %v576_v7 = vpop.xlane.xlu1 %575  ;;  %v758_v0 = vsel %vm498_vm0, %v682_v5, 0.0 }
 0x26b   : > { %v579_v57 = vpop.xlane.xlu0 %578  ;;  %v621_v14 = vmul.f32 0.03125, %v576_v7  ;;  %v683_v44 = vmul.f32 %v10845_v47, %v10845_v47 }
 0x26c   : > { %v622_v12 = vmul.f32 0.03125, %v579_v57  ;;  %v684_v55 = vmul.f32 %v10839_v2, %v10839_v2  ;;  %v995_v15 = vpack.c.bf16 %v971_v56, %v970_v23 }
 0x26d   : > { %v10858_v16 = vsub.f32 %v10696_v18, %v621_v14  ;;  %v761_v32 = vsel %vm498_vm0, %v683_v44, 0.0 }
 0x26e   : > { %v10853_v22 = vsub.f32 %v10699_v19, %v622_v12  ;;  %v764_v9 = vsel %vm498_vm0, %v684_v55, 0.0  ;;  %7896 = vmatmul.mubr.msk.bf16.gmra.mrb[12].mxu1 %vm498_vm0, %v995_v15  ;;  %756 = vadd.xlane.f32.xlu1 %v755_v8  ;;  %v10870_v37 = vpop.xlane.xlu1 %581 }
 0x26f   : > { %765 = vadd.xlane.f32.xlu0 %v764_v9  ;;  %v685_v20 = vmul.f32 %v10858_v16, %v10858_v16  ;;  %v10872_v35 = vpop.xlane.xlu0 %584 }
 0x270   : > { %v686_v26 = vmul.f32 %v10853_v22, %v10853_v22 }
 0x271   : > { %v767_v18 = vsel %vm498_vm0, %v685_v20, 0.0 }
 0x272   : > { %v770_v19 = vsel %vm498_vm0, %v686_v26, 0.0  ;;  %759 = vadd.xlane.f32.xlu1 %v758_v0  ;;  %v10874_v38 = vpop.xlane.xlu1 %587 }
 0x273   : > { %771 = vadd.xlane.f32.xlu0 %v770_v19  ;;  %v10876_v60 = vpop.xlane.xlu0 %590 }
 0x276   : > { %762 = vadd.xlane.f32.xlu1 %v761_v32  ;;  %v10878_v42 = vpop.xlane.xlu1 %593 }
 0x27a   : > { %768 = vadd.xlane.f32.xlu1 %v767_v18 }
 0x2ec   : > { %v742_v24 = vpop.xlane.xlu0 %741 }
 0x2ed   : > { %v804_v61 = vmul.f32 0.03125, %v742_v24 }
 0x2ef   : > { %v836_v1 = vadd.f32 1e-06, %v804_v61  ;;  %v745_v48 = vpop.xlane.xlu1 %744 }
 0x2f0   : > { %v805_v49 = vmul.f32 0.03125, %v745_v48  ;;  %v748_v50 = vpop.xlane.xlu0 %747 }
 0x2f1   : > { %9031 = vrsqrt.f32 %v836_v1  ;;  %v806_v51 = vmul.f32 0.03125, %v748_v50 }
 0x2f2   : > { %v837_v21 = vadd.f32 1e-06, %v805_v49 }
 0x2f3   : > { %v751_v28 = vpop.xlane.xlu1 %750  ;;  %v838_v45 = vadd.f32 1e-06, %v806_v51 }
 0x2f4   : > { %9033 = vrsqrt.f32 %v837_v21  ;;  %v807_v29 = vmul.f32 0.03125, %v751_v28 }
 0x2f5   : > { %9035 = vrsqrt.f32 %v838_v45 }
 0x2f6   : > { %v839_v53 = vadd.f32 1e-06, %v807_v29 }
 0x2f7   : > { %v754_v25 = vpop.xlane.xlu1 %753 }
 0x2f8   : > { %9037 = vrsqrt.f32 %v839_v53  ;;  %v808_v58 = vmul.f32 0.03125, %v754_v25 }
 0x2fa   : > { %v840_v3 = vadd.f32 1e-06, %v808_v58 }
 0x2fb   : > { %v9032_v11 = vpop.eup %9031  ;;  %v757_v54 = vpop.xlane.xlu1 %756 }
 0x2fc   : > { %v900_v63 = vmul.f32 %v9032_v11, %v10774_v41  ;;  %9039 = vrsqrt.f32 %v840_v3  ;;  %v809_v4 = vmul.f32 0.03125, %v757_v54  ;;  %v766_v13 = vpop.xlane.xlu0 %765 }
 0x2fd   : > { %v812_v7 = vmul.f32 0.03125, %v766_v13 }
 0x2fe   : > { %v936_v5 = vmul.f32 %v10743_v46, %v900_v63  ;;  %v9034_v23 = vpop.eup %9033  ;;  %v841_v56 = vadd.f32 1e-06, %v809_v4 }
 0x2ff   : > { %v9036_v57 = vpop.eup %9035  ;;  %v760_v8 = vpop.xlane.xlu1 %759  ;;  %v901_v14 = vmul.f32 %v9034_v23, %v10786_v59  ;;  %v844_v44 = vadd.f32 1e-06, %v812_v7 }
 0x300   : > { %9041 = vrsqrt.f32 %v841_v56  ;;  %v810_v12 = vmul.f32 0.03125, %v760_v8  ;;  %v902_v55 = vmul.f32 %v9036_v57, %v10789_v62  ;;  %v972_v41 = vadd.f32 %v10749_v36, %v936_v5 }
 0x301   : > { %v937_v15 = vmul.f32 %v10743_v46, %v901_v14 }
 0x302   : > { %v9038_v9 = vpop.eup %9037  ;;  %v842_v0 = vadd.f32 1e-06, %v810_v12  ;;  %v938_v26 = vmul.f32 %v10743_v46, %v902_v55 }
 0x303   : > { %v763_v19 = vpop.xlane.xlu1 %762  ;;  %v973_v32 = vadd.f32 %v10749_v36, %v937_v15  ;;  %v903_v20 = vmul.f32 %v9038_v9, %v10805_v17  ;;  %v10915_v15 = vld [vmem:[#allocation8] ss:$0 sm:$0xff] }
 0x304   : > { %9043 = vrsqrt.f32 %v842_v0  ;;  %v811_v59 = vmul.f32 0.03125, %v763_v19  ;;  %v974_v62 = vadd.f32 %v10749_v36, %v938_v26 }
 0x305   : > { %v996_v18 = vpack.c.bf16 %v973_v32, %v972_v41  ;;  %v939_v24 = vmul.f32 %v10743_v46, %v903_v20  ;;  %9045 = vrsqrt.f32 %v844_v44 }
 0x306   : > { %v9040_v61 = vpop.eup %9039  ;;  %v843_v1 = vadd.f32 1e-06, %v811_v59 }
 0x307   : > { %v769_v48 = vpop.xlane.xlu1 %768  ;;  %7899 = vmatprep.mubr.msk.bf16.mxu1 %vm498_vm0, %v996_v18  ;;  %v975_v49 = vadd.f32 %v10749_v36, %v939_v24  ;;  %v904_v50 = vmul.f32 %v9040_v61, %v10809_v31 }
 0x308   : > { %9047 = vrsqrt.f32 %v843_v1  ;;  %v813_v51 = vmul.f32 0.03125, %v769_v48 }
 0x309   : > { %v997_v17 = vpack.c.bf16 %v975_v49, %v974_v62  ;;  %v940_v21 = vmul.f32 %v10743_v46, %v904_v50 }
 0x30a   : > { %v9042_v28 = vpop.eup %9041  ;;  %v845_v45 = vadd.f32 1e-06, %v813_v51 }
 0x30b   : > { %7900 = vmatmul.mubr.msk.bf16.gmra.mrb[16].mxu1 %vm498_vm0, %v997_v17  ;;  %v905_v29 = vmul.f32 %v9042_v28, %v10824_v10  ;;  %v976_v25 = vadd.f32 %v10749_v36, %v940_v21 }
 0x30c   : > { %9049 = vrsqrt.f32 %v845_v45 }
 0x30d   : > { %v941_v53 = vmul.f32 %v10743_v46, %v905_v29 }
 0x30e   : > { %v9044_v58 = vpop.eup %9043 }
 0x30f   : > { %v977_v11 = vadd.f32 %v10749_v36, %v941_v53  ;;  %v906_v31 = vmul.f32 %v9044_v58, %v10828_v52  ;;  %v9046_v3 = vpop.eup %9045 }
 0x310   : > { %v908_v10 = vmul.f32 %v9046_v3, %v10839_v2  ;;  %v623_v3 = vmul.f32 0.03125, %v10870_v37 }
 0x311   : > { %v998_v54 = vpack.c.bf16 %v977_v11, %v976_v25  ;;  %v942_v13 = vmul.f32 %v10743_v46, %v906_v31 }
 0x312   : > { %v9048_v63 = vpop.eup %9047  ;;  %v944_v57 = vmul.f32 %v10743_v46, %v908_v10 }
 0x313   : > { %7903 = vmatprep.mubr.msk.bf16.mxu1 %vm498_vm0, %v998_v54  ;;  %v907_v4 = vmul.f32 %v9048_v63, %v10845_v47  ;;  %v978_v56 = vadd.f32 %v10749_v36, %v942_v13 }
 0x314   : > { %v980_v47 = vadd.f32 %v10749_v36, %v944_v57 }
 0x315   : > { %v943_v5 = vmul.f32 %v10743_v46, %v907_v4 }
 0x316   : > { %v9050_v23 = vpop.eup %9049 }
 0x317   : > { %v979_v7 = vadd.f32 %v10749_v36, %v943_v5  ;;  %v909_v52 = vmul.f32 %v9050_v23, %v10858_v16  ;;  %v10949_v23 = vsub.f32 %v10716_v33, %v623_v3 }
 0x319   : > { %v999_v8 = vpack.c.bf16 %v979_v7, %v978_v56  ;;  %v945_v14 = vmul.f32 %v10743_v46, %v909_v52  ;;  %v624_v56 = vmul.f32 0.03125, %v10872_v35  ;;  %v626_v35 = vmul.f32 0.03125, %v10876_v60 }
 0x31b   : > { %7904 = vmatmul.mubr.msk.bf16.gmra.mrb[20].mxu1 %vm498_vm0, %v999_v8  ;;  %v981_v2 = vadd.f32 %v10749_v36, %v945_v14  ;;  %v625_v8 = vmul.f32 0.03125, %v10874_v38  ;;  %v10960_v14 = vsub.f32 %v10719_v34, %v624_v56  ;;  %v10973_v38 = vsub.f32 %v10729_v40, %v626_v35 }
 0x31d   : > { %v1000_v12 = vpack.c.bf16 %v981_v2, %v980_v47  ;;  %v687_v47 = vmul.f32 %v10949_v23, %v10949_v23  ;;  %v10965_v33 = vsub.f32 %v10726_v39, %v625_v8 }
 0x31f   : > { %7907 = vmatprep.mubr.msk.bf16.mxu1 %vm498_vm0, %v1000_v12  ;;  %v773_v2 = vsel %vm498_vm0, %v687_v47, 0.0  ;;  %v688_v12 = vmul.f32 %v10960_v14, %v10960_v14 }
 0x321   : > { %v776_v34 = vsel %vm498_vm0, %v688_v12, 0.0 }
 0x329   : > { %v7885_v55 = vpop.f32.mrb[0].mxu1 }
 0x32a   : > { %v1109_v41 = vpop.f32.mrb[1].mxu1  ;;  %v1118_v16 = vadd.f32 %v7885_v55, %v10915_v15  ;;  %v627_v55 = vmul.f32 0.03125, %v10878_v42 }
 0x32b   : > { %v7886_v9 = vpop.f32.mrb[2].mxu1  ;;  %v1110_v26 = vadd.f32 %v10915_v15, %v1109_v41  ;;  %v689_v41 = vmul.f32 %v10965_v33, %v10965_v33 }
 0x32c   : > { %v1121_v0 = vadd.f32 %v7886_v9, %v10915_v15  ;;  %v1112_v44 = vpop.f32.mrb[3].mxu1  ;;  %v10979_v39 = vsub.f32 %v10736_v43, %v627_v55  ;;  %v690_v9 = vmul.f32 %v10973_v38, %v10973_v38  ;;  %v772_v43 = vpop.xlane.xlu0 %771 }
 0x32d   : > { %v1113_v19 = vadd.f32 %v10915_v15, %v1112_v44  ;;  %v779_v60 = vsel %vm498_vm0, %v689_v41, 0.0 }
 0x32e   : > { %v10921_v32 = vpack.c.bf16 %v1121_v0, %v1118_v16  ;;  %v782_v42 = vsel %vm498_vm0, %v690_v9, 0.0  ;;  %v691_v40 = vmul.f32 %v10979_v39, %v10979_v39 }
 0x32f   : > { %v10923_v20 = vpack.c.bf16 %v1113_v19, %v1110_v26 }
 0x330   : > { %1257 = vrot.lane.b32.xlu1 %v10921_v32, %s10086_s16  ;;  %v785_v16 = vsel %vm498_vm0, %v691_v40, 0.0 }
 0x331   : > { %v7889_v59 = vpop.f32.mrb[4].mxu1  ;;  %1255 = vrot.lane.b32.xlu0 %v10923_v20, %s10086_s16 }
 0x332   : > { %v1125_v18 = vpop.f32.mrb[5].mxu1  ;;  %v1134_v62 = vadd.f32 %v7889_v59, %v10915_v15  ;;  %v814_v59 = vmul.f32 0.03125, %v772_v43 }
 0x333   : > { %v7890_v24 = vpop.f32.mrb[6].mxu1  ;;  %v1126_v48 = vadd.f32 %v10915_v15, %v1125_v18 }
 0x334   : > { %v1137_v61 = vadd.f32 %v7890_v24, %v10915_v15  ;;  %v1128_v1 = vpop.f32.mrb[7].mxu1  ;;  %v846_v18 = vadd.f32 1e-06, %v814_v59 }
 0x335   : > { %v1129_v49 = vadd.f32 %v10915_v15, %v1128_v1 }
 0x336   : > { %v10933_v50 = vpack.c.bf16 %v1137_v61, %v1134_v62  ;;  %9051 = vrsqrt.f32 %v846_v18 }
 0x337   : > { %v10935_v51 = vpack.c.bf16 %v1129_v49, %v1126_v48 }
 0x339   : > { %v7893_v17 = vpop.f32.mrb[8].mxu1 }
 0x33a   : > { %v1141_v21 = vpop.f32.mrb[9].mxu1  ;;  %v1150_v45 = vadd.f32 %v7893_v17, %v10915_v15 }
 0x33b   : > { %v7894_v28 = vpop.f32.mrb[10].mxu1  ;;  %v1142_v25 = vadd.f32 %v10915_v15, %v1141_v21 }
 0x33c   : > { %v1153_v29 = vadd.f32 %v7894_v28, %v10915_v15  ;;  %v1144_v53 = vpop.f32.mrb[11].mxu1 }
 0x33d   : > { %v1145_v58 = vadd.f32 %v10915_v15, %v1144_v53 }
 0x33e   : > { %v10941_v11 = vpack.c.bf16 %v1153_v29, %v1150_v45 }
 0x33f   : > { %v10943_v31 = vpack.c.bf16 %v1145_v58, %v1142_v25 }
 0x341   : > { %v7897_v54 = vpop.f32.mrb[12].mxu1 }
 0x342   : > { %v1157_v63 = vpop.f32.mrb[13].mxu1  ;;  %v1166_v13 = vadd.f32 %v7897_v54, %v10915_v15 }
 0x343   : > { %v7898_v4 = vpop.f32.mrb[14].mxu1  ;;  %v1158_v7 = vadd.f32 %v10915_v15, %v1157_v63 }
 0x344   : > { %v1169_v10 = vadd.f32 %v7898_v4, %v10915_v15  ;;  %v1160_v5 = vpop.f32.mrb[15].mxu1  ;;  %v9052_v4 = vpop.eup %9051 }
 0x345   : > { %v1161_v52 = vadd.f32 %v10915_v15, %v1160_v5 }
 0x346   : > { %v10954_v57 = vpack.c.bf16 %v1169_v10, %v1166_v13 }
 0x347   : > { %v10956_v37 = vpack.c.bf16 %v1161_v52, %v1158_v7  ;;  %v910_v52 = vmul.f32 %v9052_v4, %v10853_v22 }
 0x350   : > { %774 = vadd.xlane.f32.xlu0 %v773_v2 }
 0x354   : > { %777 = vadd.xlane.f32.xlu1 %v776_v34  ;;  %v946_v34 = vmul.f32 %v10743_v46, %v910_v52 }
 0x358   : > { %780 = vadd.xlane.f32.xlu1 %v779_v60 }
 0x35c   : > { %783 = vadd.xlane.f32.xlu1 %v782_v42 }
 0x360   : > { %786 = vadd.xlane.f32.xlu1 %v785_v16 }
 0x366   : > { %1259 = vrot.lane.b32.xlu0 %v10935_v51, %s10086_s16 }
 0x36a   : > { %1261 = vrot.lane.b32.xlu0 %v10933_v50, %s10086_s16 }
 0x36e   : > { %1265 = vrot.lane.b32.xlu0 %v10941_v11, %s10086_s16 }
 0x371   : > { %1263 = vrot.lane.b32.xlu1 %v10943_v31, %s10086_s16 }
 0x372   : > { %1267 = vrot.lane.b32.xlu0 %v10956_v37, %s10086_s16 }
 0x375   : > { %1742 = vrot.lane.b32.xlu1 %v10921_v32, %s10087_s23 }
 0x376   : > { %1269 = vrot.lane.b32.xlu0 %v10954_v57, %s10086_s16 }
 0x379   : > { %1746 = vrot.lane.b32.xlu1 %v10933_v50, %s10087_s23 }
 0x37a   : > { %1740 = vrot.lane.b32.xlu0 %v10923_v20, %s10087_s23 }
 0x37d   : > { %1750 = vrot.lane.b32.xlu1 %v10941_v11, %s10087_s23 }
 0x37e   : > { %1744 = vrot.lane.b32.xlu0 %v10935_v51, %s10087_s23 }
 0x381   : > { %1754 = vrot.lane.b32.xlu1 %v10954_v57, %s10087_s23 }
 0x382   : > { %1748 = vrot.lane.b32.xlu0 %v10943_v31, %s10087_s23 }
 0x385   : > { %1726 = vrot.lane.b32.xlu1 %v10921_v32, %s10088_s19 }
 0x386   : > { %1752 = vrot.lane.b32.xlu0 %v10956_v37, %s10087_s23 }
 0x389   : > { %1730 = vrot.lane.b32.xlu1 %v10933_v50, %s10088_s19 }
 0x38a   : > { %1724 = vrot.lane.b32.xlu0 %v10923_v20, %s10088_s19 }
 0x38d   : > { %1734 = vrot.lane.b32.xlu1 %v10941_v11, %s10088_s19 }
 0x38e   : > { %1728 = vrot.lane.b32.xlu0 %v10935_v51, %s10088_s19 }
 0x391   : > { %1738 = vrot.lane.b32.xlu1 %v10954_v57, %s10088_s19 }
 0x392   : > { %1732 = vrot.lane.b32.xlu0 %v10943_v31, %s10088_s19 }
 0x395   : > { %1605 = vrot.lane.b32.xlu1 %v10921_v32, %s10089_s14 }
 0x396   : > { %1736 = vrot.lane.b32.xlu0 %v10956_v37, %s10088_s19 }
 0x399   : > { %1607 = vrot.lane.b32.xlu1 %v10935_v51, %s10089_s14 }
 0x39a   : > { %1603 = vrot.lane.b32.xlu0 %v10923_v20, %s10089_s14 }
 0x39d   : > { %1611 = vrot.lane.b32.xlu1 %v10943_v31, %s10089_s14 }
 0x39e   : > { %1609 = vrot.lane.b32.xlu0 %v10933_v50, %s10089_s14 }
 0x3a1   : > { %2085 = vrot.lane.b32.xlu1 %v10923_v20, %s10090_s18 }
 0x3a2   : > { %1613 = vrot.lane.b32.xlu0 %v10941_v11, %s10089_s14  ;;  %v1258_v26 = vpop.permute.xlu1 %1257 }
 0x3a3   : > { %v1256_v0 = vpop.permute.xlu0 %1255  ;;  %v1300_v19 = vsel %vm1271_vm1, %v1258_v26, 0 }
 0x3a4   : > { %8539 = vmatprep.subr.msk.bf16.mxu1 %vm1271_vm1, %v1256_v0  ;;  %v1297_v44 = vsel %vm1271_vm1, %v1256_v0, 0 }
 0x3a5   : > { %2089 = vrot.lane.b32.xlu1 %v10935_v51, %s10090_s18  ;;  %7916 = vmatpush3.bf16.xpose.msra.mxu1 %v1297_v44 }
 0x3a6   : > { %1617 = vrot.lane.b32.xlu0 %v10954_v57, %s10089_s14  ;;  %8540 = vmatprep.subr.msk.bf16.mxu1 %vm1271_vm1, %v1258_v26  ;;  %v982_v26 = vadd.f32 %v10749_v36, %v946_v34 }
 0x3a9   : > { %2093 = vrot.lane.b32.xlu1 %v10943_v31, %s10090_s18 }
 0x3aa   : > { %2087 = vrot.lane.b32.xlu0 %v10921_v32, %s10090_s18 }
 0x3ad   : > { %2224 = vrot.lane.b32.xlu1 %v10921_v32, %s10091_s21  ;;  %7918 = vmatpush3.bf16.xpose.msra.mxu1 %v1300_v19 }
 0x3ae   : > { %2091 = vrot.lane.b32.xlu0 %v10933_v50, %s10090_s18 }
 0x3b1   : > { %1615 = vrot.lane.b32.xlu1 %v10956_v37, %s10089_s14 }
 0x3b2   : > { %2095 = vrot.lane.b32.xlu0 %v10941_v11, %s10090_s18 }
 0x3b6   : > { %2099 = vrot.lane.b32.xlu0 %v10954_v57, %s10090_s18 }
 0x3ba   : > { %2222 = vrot.lane.b32.xlu0 %v10923_v20, %s10091_s21 }
 0x3be   : > { %2097 = vrot.lane.b32.xlu0 %v10956_v37, %s10090_s18 }
 0x3dd   : > { %v775_v24 = vpop.xlane.xlu0 %774 }
 0x3de   : > { %v815_v62 = vmul.f32 0.03125, %v775_v24  ;;  %v7901_v61 = vpop.f32.mrb[16].mxu1 }
 0x3df   : > { %v1182_v1 = vadd.f32 %v7901_v61, %v10915_v15  ;;  %v1173_v48 = vpop.f32.mrb[17].mxu1 }
 0x3e0   : > { %v847_v49 = vadd.f32 1e-06, %v815_v62  ;;  %v7902_v17 = vpop.f32.mrb[18].mxu1  ;;  %v1174_v28 = vadd.f32 %v10915_v15, %v1173_v48 }
 0x3e1   : > { %v778_v21 = vpop.xlane.xlu1 %777  ;;  %v1260_v45 = vpop.permute.xlu0 %1259  ;;  %v1185_v29 = vadd.f32 %v7902_v17, %v10915_v15 }
 0x3e2   : > { %9053 = vrsqrt.f32 %v847_v49  ;;  %v816_v53 = vmul.f32 0.03125, %v778_v21  ;;  %8541 = vmatprep.subr.msk.bf16.mxu1 %vm1271_vm1, %v1260_v45  ;;  %v1176_v25 = vpop.f32.mrb[19].mxu1  ;;  %v1303_v58 = vsel %vm1271_vm1, %v1260_v45, 0 }
 0x3e3   : > { %v11077_v3 = vpack.c.bf16 %v1185_v29, %v1182_v1  ;;  %v1177_v54 = vadd.f32 %v10915_v15, %v1176_v25  ;;  %7920 = vmatpush3.bf16.xpose.msra.mxu1 %v1303_v58 }
 0x3e4   : > { %v848_v63 = vadd.f32 1e-06, %v816_v53 }
 0x3e5   : > { %14763 = vst [vmem:[#allocation26_spill] sm:$0xff] %v11077_v3  ;;  %v11080_v13 = vpack.c.bf16 %v1177_v54, %v1174_v28  ;;  %v781_v10 = vpop.xlane.xlu1 %780  ;;  %v1262_v5 = vpop.permute.xlu0 %1261 }
 0x3e6   : > { %9055 = vrsqrt.f32 %v848_v63  ;;  %v817_v56 = vmul.f32 0.03125, %v781_v10  ;;  %8542 = vmatprep.subr.msk.bf16.mxu1 %vm1271_vm1, %v1262_v5  ;;  %v1306_v2 = vsel %vm1271_vm1, %v1262_v5, 0 }
 0x3e7   : > { %14764 = vst [vmem:[#allocation27_spill] sm:$0xff] %v11080_v13 }
 0x3e8   : > { %v849_v7 = vadd.f32 1e-06, %v817_v56 }
 0x3e9   : > { %v784_v8 = vpop.xlane.xlu1 %783  ;;  %v1266_v47 = vpop.permute.xlu0 %1265 }
 0x3ea   : > { %9057 = vrsqrt.f32 %v849_v7  ;;  %v818_v35 = vmul.f32 0.03125, %v784_v8  ;;  %v1312_v7 = vsel %vm1271_vm1, %v1266_v47, 0 }
 0x3eb   : > { %7922 = vmatpush3.bf16.xpose.msra.mxu1 %v1306_v2 }
 0x3ec   : > { %v9054_v12 = vpop.eup %9053  ;;  %v850_v55 = vadd.f32 1e-06, %v818_v35 }
 0x3ed   : > { %v787_v41 = vpop.xlane.xlu1 %786  ;;  %v1268_v60 = vpop.permute.xlu0 %1267  ;;  %v911_v9 = vmul.f32 %v9054_v12, %v10949_v23 }
 0x3ee   : > { %9059 = vrsqrt.f32 %v850_v55  ;;  %v819_v42 = vmul.f32 0.03125, %v787_v41  ;;  %v7905_v40 = vpop.f32.mrb[20].mxu1 }
 0x3ef   : > { %v1189_v16 = vpop.f32.mrb[21].mxu1  ;;  %v947_v22 = vmul.f32 %v10743_v46, %v911_v9  ;;  %v1198_v19 = vadd.f32 %v7905_v40, %v10915_v15  ;;  %v1315_v9 = vsel %vm1271_vm1, %v1268_v60, 0 }
 0x3f0   : > { %v9056_v43 = vpop.eup %9055  ;;  %v851_v0 = vadd.f32 1e-06, %v819_v42  ;;  %v7906_v44 = vpop.f32.mrb[22].mxu1  ;;  %v1190_v61 = vadd.f32 %v10915_v15, %v1189_v16 }
 0x3f1   : > { %v1201_v59 = vadd.f32 %v7906_v44, %v10915_v15  ;;  %v1264_v18 = vpop.permute.xlu1 %1263  ;;  %v1192_v24 = vpop.f32.mrb[23].mxu1  ;;  %v983_v62 = vadd.f32 %v10749_v36, %v947_v22  ;;  %v912_v23 = vmul.f32 %v9056_v43, %v10960_v14 }
 0x3f2   : > { %9061 = vrsqrt.f32 %v851_v0  ;;  %v1193_v1 = vadd.f32 %v10915_v15, %v1192_v24  ;;  %v1270_v48 = vpop.permute.xlu0 %1269  ;;  %8543 = vmatprep.subr.msk.bf16.mxu1 %vm1271_vm1, %v1264_v18  ;;  %v1309_v49 = vsel %vm1271_vm1, %v1264_v18, 0 }
 0x3f3   : > { %v11097_v17 = vpack.c.bf16 %v1201_v59, %v1198_v19  ;;  %7924 = vmatpush3.bf16.xpose.msra.mxu1 %v1309_v49  ;;  %v1001_v21 = vpack.c.bf16 %v983_v62, %v982_v26  ;;  %v948_v53 = vmul.f32 %v10743_v46, %v912_v23 }
 0x3f4   : > { %v9058_v28 = vpop.eup %9057  ;;  %v11099_v45 = vpack.c.bf16 %v1193_v1, %v1190_v61  ;;  %8544 = vmatprep.subr.msk.bf16.mxu1 %vm1271_vm1, %v1266_v47 }
 0x3f5   : > { %14765 = vst [vmem:[#allocation28_spill] sm:$0xff] %v11097_v17  ;;  %v1743_v14 = vpop.permute.xlu1 %1742  ;;  %7908 = vmatmul.mubr.msk.bf16.gmra.mrb[24].mxu1 %vm498_vm0, %v1001_v21  ;;  %v913_v29 = vmul.f32 %v9058_v28, %v10965_v33  ;;  %v984_v4 = vadd.f32 %v10749_v36, %v948_v53 }
 0x3f6   : > { %14766 = vst [vmem:[#allocation29_spill] sm:$0xff] %v11099_v45  ;;  %v1741_v25 = vpop.permute.xlu0 %1740  ;;  %v1784_v18 = vsel %vm1271_vm1, %v1743_v14, 0 }
 0x3f7   : > { %v949_v58 = vmul.f32 %v10743_v46, %v913_v29  ;;  %v1781_v44 = vsel %vm1271_vm1, %v1741_v25, 0 }
 0x3f8   : > { %v9060_v54 = vpop.eup %9059 }
 0x3f9   : > { %v11106_v63 = vpop.permute.xlu1 %1746  ;;  %v985_v10 = vadd.f32 %v10749_v36, %v949_v58  ;;  %v914_v5 = vmul.f32 %v9060_v54, %v10973_v38 }
 0x3fa   : > { %v1745_v56 = vpop.permute.xlu0 %1744  ;;  %v1790_v21 = vsel %vm1271_vm1, %v11106_v63, 0 }
 0x3fb   : > { %7926 = vmatpush3.bf16.xpose.msra.mxu1 %v1312_v7  ;;  %v1002_v52 = vpack.c.bf16 %v985_v10, %v984_v4  ;;  %v950_v2 = vmul.f32 %v10743_v46, %v914_v5  ;;  %v1787_v61 = vsel %vm1271_vm1, %v1745_v56, 0 }
 0x3fc   : > { %v9062_v33 = vpop.eup %9061  ;;  %8545 = vmatprep.subr.msk.bf16.mxu1 %vm1271_vm1, %v1268_v60 }
 0x3fd   : > { %v11113_v8 = vpop.permute.xlu1 %1750  ;;  %7911 = vmatprep.mubr.msk.bf16.mxu1 %vm498_vm0, %v1002_v52  ;;  %v915_v35 = vmul.f32 %v9062_v33, %v10979_v39  ;;  %v986_v47 = vadd.f32 %v10749_v36, %v950_v2 }
 0x3fe   : > { %v11118_v12 = vpop.permute.xlu0 %1748 }
 0x3ff   : > { %v951_v38 = vmul.f32 %v10743_v46, %v915_v35  ;;  %v1793_v29 = vsel %vm1271_vm1, %v11118_v12, 0 }
 0x401   : > { %v11121_v55 = vpop.permute.xlu1 %1754  ;;  %v987_v34 = vadd.f32 %v10749_v36, %v951_v38  ;;  %v1318_v36 = vsel %vm1271_vm1, %v1270_v48, 0 }
 0x402   : > { %v11125_v41 = vpop.permute.xlu0 %1752  ;;  %v1802_v54 = vsel %vm1271_vm1, %v11121_v55, 0 }
 0x403   : > { %7928 = vmatpush3.bf16.xpose.msra.mxu1 %v1315_v9  ;;  %v1003_v42 = vpack.c.bf16 %v987_v34, %v986_v47  ;;  %v1799_v58 = vsel %vm1271_vm1, %v11125_v41, 0 }
 0x404   : > { %8546 = vmatprep.subr.msk.bf16.mxu1 %vm1271_vm1, %v1270_v48 }
 0x405   : > { %v11129_v39 = vpop.permute.xlu1 %1726  ;;  %7912 = vmatmul.mubr.msk.bf16.gmra.mrb[28].mxu1 %vm498_vm0, %v1003_v42 }
 0x406   : > { %v1725_v40 = vpop.permute.xlu0 %1724  ;;  %7931 = vmatprep.mubr.msk.bf16.mxu1 %vm1271_vm1, %v10923_v20 }
 0x409   : > { %v11134_v46 = vpop.permute.xlu1 %1730 }
 0x40a   : > { %v11136_v16 = vpop.permute.xlu0 %1728 }
 0x40b   : > { %7930 = vmatpush3.bf16.xpose.msra.mxu1 %v1318_v36 }
 0x40c   : > { %8547 = vmatprep.subr.msk.bf16.mxu1 %vm1271_vm1, %v1741_v25  ;;  %v1796_v25 = vsel %vm1271_vm1, %v11113_v8, 0 }
 0x40d   : > { %v11140_v60 = vpop.permute.xlu1 %1734 }
 0x40e   : > { %v11142_v22 = vpop.permute.xlu0 %1732 }
 0x411   : > { %v11144_v43 = vpop.permute.xlu1 %1738 }
 0x412   : > { %v11146_v0 = vpop.permute.xlu0 %1736  ;;  %7932 = vmatmul.mubr.msk.bf16.vlgmr.msra.gmra.mrb[32].mxu1 %vm1271_vm1, %v10921_v32 }
 0x413   : > { %7935 = vmatprep.mubr.msk.bf16.mxu1 %vm1271_vm1, %v10935_v51  ;;  %7980 = vmatpush3.bf16.xpose.msra.mxu1 %v1781_v44 }
 0x414   : > { %8548 = vmatprep.subr.msk.bf16.mxu1 %vm1271_vm1, %v1743_v14 }
 0x415   : > { %v1606_v26 = vpop.permute.xlu1 %1605 }
 0x416   : > { %v1604_v19 = vpop.permute.xlu0 %1603 }
 0x417   : > { %7947 = vmatprep.subr.bf16.mxu0 %v1604_v19 }
 0x418   : > { %7948 = vmatpush3.bf16.msra.mxu0 %v1604_v19 }
 0x419   : > { %7949 = vmatprep.subr.bf16.mxu0 %v1606_v26  ;;  %v1608_v59 = vpop.permute.xlu1 %1607 }
 0x41a   : > { %7936 = vmatmul.mubr.msk.bf16.gmra.mrb[36].mxu1 %vm1271_vm1, %v10933_v50  ;;  %v1610_v62 = vpop.permute.xlu0 %1609 }
 0x41b   : > { %7939 = vmatprep.mubr.msk.bf16.mxu1 %vm1271_vm1, %v10943_v31  ;;  %7982 = vmatpush3.bf16.xpose.msra.mxu1 %v1784_v18 }
 0x41c   : > { %7950 = vmatpush3.bf16.msra.mxu0 %v1606_v26  ;;  %8549 = vmatprep.subr.msk.bf16.mxu1 %vm1271_vm1, %v1745_v56 }
 0x41d   : > { %7951 = vmatprep.subr.bf16.mxu0 %v1608_v59  ;;  %v1612_v24 = vpop.permute.xlu1 %1611 }
 0x41e   : > { %v1614_v48 = vpop.permute.xlu0 %1613 }
 0x420   : > { %7952 = vmatpush3.bf16.msra.mxu0 %v1608_v59 }
 0x421   : > { %7953 = vmatprep.subr.bf16.mxu0 %v1610_v62  ;;  %v11160_v23 = vpop.permute.xlu1 %2085 }
 0x422   : > { %7940 = vmatmul.mubr.msk.bf16.gmra.mrb[40].mxu1 %vm1271_vm1, %v10941_v11  ;;  %v1618_v53 = vpop.permute.xlu0 %1617 }
 0x423   : > { %7943 = vmatprep.mubr.msk.bf16.mxu1 %vm1271_vm1, %v10956_v37  ;;  %7984 = vmatpush3.bf16.xpose.msra.mxu1 %v1787_v61 }
 0x424   : > { %7954 = vmatpush3.bf16.msra.mxu0 %v1610_v62  ;;  %8550 = vmatprep.subr.msk.bf16.mxu1 %vm1271_vm1, %v11106_v63 }
 0x425   : > { %7955 = vmatprep.subr.bf16.mxu0 %v1612_v24  ;;  %v11169_v1 = vpop.permute.xlu1 %2089 }
 0x428   : > { %7956 = vmatpush3.bf16.msra.mxu0 %v1612_v24 }
 0x429   : > { %7957 = vmatprep.subr.bf16.mxu0 %v1614_v48  ;;  %v11171_v49 = vpop.permute.xlu1 %2093 }
 0x42a   : > { %7944 = vmatmul.mubr.msk.bf16.gmra.mrb[44].mxu1 %vm1271_vm1, %v10954_v57 }
 0x42b   : > { %7986 = vmatpush3.bf16.xpose.msra.mxu1 %v1790_v21  ;;  %7995 = vmatprep.mubr.msk.bf16.mxu1 %vm1271_vm1, %v1725_v40  ;;  %v11228_v40 = vand.u32 127, %v916_v6 }
 0x42c   : > { %7958 = vmatpush3.bf16.msra.mxu0 %v1614_v48  ;;  %8551 = vmatprep.subr.msk.bf16.mxu1 %vm1271_vm1, %v11118_v12 }
 0x42d   : > { %v11180_v28 = vpop.permute.xlu1 %2224  ;;  %14772 = vst [vmem:[#allocation35_spill] sm:$0xff] %v11228_v40  ;;  %vm1238_vm2 = vcmp.lt.s32.totalorder %v11228_v40, 5 }
 0x42e   : > { %14767 = vst [vmem:[#allocation30_spill] sm:$0xff] %v11180_v28 }
 0x431   : > { %v1616_v14 = vpop.permute.xlu1 %1615 }
 0x432   : > { %7959 = vmatprep.subr.bf16.mxu0 %v1616_v14 }
 0x433   : > { %7960 = vmatpush3.bf16.msra.mxu0 %v1616_v14  ;;  %7988 = vmatpush3.bf16.xpose.msra.mxu1 %v1793_v29 }
 0x434   : > { %7961 = vmatprep.subr.bf16.mxu0 %v1618_v53  ;;  %8552 = vmatprep.subr.msk.bf16.mxu1 %vm1271_vm1, %v11113_v8 }
 0x437   : > { %7962 = vmatpush3.bf16.msra.mxu0 %v1618_v53 }
 0x438   : > { %8011 = vmatprep.subr.bf16.mxu0 %v11160_v23 }
 0x43b   : > { %7990 = vmatpush3.bf16.xpose.msra.mxu1 %v1796_v25 }
 0x43c   : > { %8553 = vmatprep.subr.msk.bf16.mxu1 %vm1271_vm1, %v11125_v41 }
 0x443   : > { %7992 = vmatpush3.bf16.xpose.msra.mxu1 %v1799_v58 }
 0x444   : > { %8554 = vmatprep.subr.msk.bf16.mxu1 %vm1271_vm1, %v11121_v55 }
 0x44b   : > { %7994 = vmatpush3.bf16.xpose.msra.mxu1 %v1802_v54 }
 0x452   : > { %7996 = vmatmul.mubr.msk.bf16.vlgmr.msra.gmra.mrb[48].mxu1 %vm1271_vm1, %v11129_v39 }
 0x453   : > { %7999 = vmatprep.mubr.msk.bf16.mxu1 %vm1271_vm1, %v11136_v16 }
 0x45a   : > { %8000 = vmatmul.mubr.msk.bf16.gmra.mrb[52].mxu1 %vm1271_vm1, %v11134_v46 }
 0x45b   : > { %8003 = vmatprep.mubr.msk.bf16.mxu1 %vm1271_vm1, %v11142_v22 }
 0x462   : > { %8004 = vmatmul.mubr.msk.bf16.gmra.mrb[56].mxu1 %vm1271_vm1, %v11140_v60 }
 0x463   : > { %8007 = vmatprep.mubr.msk.bf16.mxu1 %vm1271_vm1, %v11146_v0 }
 0x46a   : > { %8008 = vmatmul.mubr.msk.bf16.gmra.mrb[60].mxu1 %vm1271_vm1, %v11144_v43 }
 0x4c8   : > { %v7909_v63 = vpop.f32.mrb[24].mxu1 }
 0x4c9   : > { %v1205_v4 = vpop.f32.mrb[25].mxu1  ;;  %v1214_v5 = vadd.f32 %v7909_v63, %v10915_v15 }
 0x4ca   : > { %v7910_v10 = vpop.f32.mrb[26].mxu1  ;;  %v1206_v52 = vadd.f32 %v10915_v15, %v1205_v4 }
 0x4cb   : > { %v1217_v56 = vadd.f32 %v7910_v10, %v10915_v15  ;;  %v1208_v7 = vpop.f32.mrb[27].mxu1 }
 0x4cc   : > { %v1209_v33 = vadd.f32 %v10915_v15, %v1208_v7 }
 0x4cd   : > { %v11215_v8 = vpack.c.bf16 %v1217_v56, %v1214_v5 }
 0x4ce   : > { %v11217_v35 = vpack.c.bf16 %v1209_v33, %v1206_v52 }
 0x4cf   : > { %14768 = vst [vmem:[#allocation31_spill] sm:$0xff] %v11215_v8 }
 0x4d0   : > { %14769 = vst [vmem:[#allocation32_spill] sm:$0xff] %v11217_v35 }
 0x4d8   : > { %v7913_v2 = vpop.f32.mrb[28].mxu1 }
 0x4d9   : > { %v1221_v12 = vpop.f32.mrb[29].mxu1  ;;  %v1230_v55 = vadd.f32 %v7913_v2, %v10915_v15 }
 0x4da   : > { %v7914_v38 = vpop.f32.mrb[30].mxu1  ;;  %v1222_v41 = vadd.f32 %v10915_v15, %v1221_v12 }
 0x4db   : > { %v1233_v47 = vadd.f32 %v7914_v38, %v10915_v15  ;;  %v1224_v34 = vpop.f32.mrb[31].mxu1 }
 0x4dc   : > { %v1225_v9 = vadd.f32 %v10915_v15, %v1224_v34 }
 0x4dd   : > { %v11223_v42 = vpack.c.bf16 %v1233_v47, %v1230_v55 }
 0x4de   : > { %v11225_v39 = vpack.c.bf16 %v1225_v9, %v1222_v41 }
 0x4df   : > { %14770 = vst [vmem:[#allocation33_spill] sm:$0xff] %v11223_v42 }
 0x4e0   : > { %14771 = vst [vmem:[#allocation34_spill] sm:$0xff] %v11225_v39 }
 0x4e5   : > { %v7933_v46 = vpop.f32.mrb[32].mxu1 }
 0x4e6   : > { %v1419_v16 = vmul.f32 0.35355338, %v7933_v46  ;;  %v1354_v36 = vpop.f32.mrb[33].mxu1 }
 0x4e7   : > { %v7934_v60 = vpop.f32.mrb[34].mxu1  ;;  %v1417_v22 = vmul.f32 0.35355338, %v1354_v36 }
 0x4e8   : > { %v1357_v43 = vpop.f32.mrb[35].mxu1  ;;  %v11233_v0 = vsel %vm1238_vm2, %v1419_v16, -1e+30  ;;  %v1420_v44 = vmul.f32 0.35355338, %v7934_v60 }
 0x4e9   : > { %v1418_v15 = vmul.f32 0.35355338, %v1357_v43  ;;  %1455 = vmax.xlane.f32.xlu0 %v11233_v0  ;;  %v11243_v26 = vsel %vm1238_vm2, %v1417_v22, -1e+30 }
 0x4ea   : > { %v11248_v24 = vsel %vm1238_vm2, %v1420_v44, -1e+30 }
 0x4eb   : > { %v11238_v6 = vsel %vm1238_vm2, %v1418_v15, -1e+30 }
 0x4ec   : > { %1453 = vmax.xlane.f32.xlu1 %v11238_v6 }
 0x4ed   : > { %1451 = vmax.xlane.f32.xlu0 %v11243_v26  ;;  %v7937_v19 = vpop.f32.mrb[36].mxu1 }
 0x4ee   : > { %v1370_v59 = vpop.f32.mrb[37].mxu1  ;;  %v1423_v62 = vmul.f32 0.35355338, %v7937_v19 }
 0x4ef   : > { %v7938_v18 = vpop.f32.mrb[38].mxu1  ;;  %v1421_v29 = vmul.f32 0.35355338, %v1370_v59 }
 0x4f0   : > { %v1424_v61 = vmul.f32 0.35355338, %v7938_v18  ;;  %v1373_v48 = vpop.f32.mrb[39].mxu1  ;;  %v11258_v53 = vsel %vm1238_vm2, %v1423_v62, -1e+30 }
 0x4f1   : > { %1457 = vmax.xlane.f32.xlu0 %v11248_v24  ;;  %v1422_v21 = vmul.f32 0.35355338, %v1373_v48  ;;  %v11268_v4 = vsel %vm1238_vm2, %v1421_v29, -1e+30 }
 0x4f2   : > { %v11253_v14 = vsel %vm1238_vm2, %v1424_v61, -1e+30 }
 0x4f3   : > { %1465 = vmax.xlane.f32.xlu1 %v11253_v14  ;;  %v11263_v54 = vsel %vm1238_vm2, %v1422_v21, -1e+30 }
 0x4f5   : > { %1463 = vmax.xlane.f32.xlu0 %v11258_v53  ;;  %v7941_v25 = vpop.f32.mrb[40].mxu1 }
 0x4f6   : > { %v1386_v58 = vpop.f32.mrb[41].mxu1  ;;  %v1427_v10 = vmul.f32 0.35355338, %v7941_v25 }
 0x4f7   : > { %1461 = vmax.xlane.f32.xlu1 %v11263_v54  ;;  %v7942_v63 = vpop.f32.mrb[42].mxu1  ;;  %v1425_v33 = vmul.f32 0.35355338, %v1386_v58 }
 0x4f8   : > { %v1428_v5 = vmul.f32 0.35355338, %v7942_v63  ;;  %v1389_v56 = vpop.f32.mrb[43].mxu1  ;;  %v11278_v2 = vsel %vm1238_vm2, %v1427_v10, -1e+30 }
 0x4f9   : > { %1459 = vmax.xlane.f32.xlu0 %v11268_v4  ;;  %v1426_v7 = vmul.f32 0.35355338, %v1389_v56  ;;  %v11288_v34 = vsel %vm1238_vm2, %v1425_v33, -1e+30 }
 0x4fa   : > { %v11273_v52 = vsel %vm1238_vm2, %v1428_v5, -1e+30 }
 0x4fb   : > { %1473 = vmax.xlane.f32.xlu1 %v11273_v52  ;;  %v11283_v55 = vsel %vm1238_vm2, %v1426_v7, -1e+30 }
 0x4fd   : > { %1471 = vmax.xlane.f32.xlu0 %v11278_v2  ;;  %v7945_v12 = vpop.f32.mrb[44].mxu1 }
 0x4fe   : > { %v1402_v38 = vpop.f32.mrb[45].mxu1  ;;  %v1431_v41 = vmul.f32 0.35355338, %v7945_v12 }
 0x4ff   : > { %1469 = vmax.xlane.f32.xlu1 %v11283_v55  ;;  %v7946_v47 = vpop.f32.mrb[46].mxu1  ;;  %v1429_v60 = vmul.f32 0.35355338, %v1402_v38 }
 0x500   : > { %v1432_v9 = vmul.f32 0.35355338, %v7946_v47  ;;  %v1405_v46 = vpop.f32.mrb[47].mxu1  ;;  %v11298_v22 = vsel %vm1238_vm2, %v1431_v41, -1e+30 }
 0x501   : > { %1467 = vmax.xlane.f32.xlu0 %v11288_v34  ;;  %v1430_v16 = vmul.f32 0.35355338, %v1405_v46  ;;  %v11308_v15 = vsel %vm1238_vm2, %v1429_v60, -1e+30 }
 0x502   : > { %v11293_v36 = vsel %vm1238_vm2, %v1432_v9, -1e+30 }
 0x503   : > { %1481 = vmax.xlane.f32.xlu1 %v11293_v36  ;;  %v11303_v43 = vsel %vm1238_vm2, %v1430_v16, -1e+30 }
 0x505   : > { %1479 = vmax.xlane.f32.xlu0 %v11298_v22 }
 0x507   : > { %1477 = vmax.xlane.f32.xlu1 %v11303_v43 }
 0x509   : > { %1475 = vmax.xlane.f32.xlu0 %v11308_v15 }
 0x518   : > { %2228 = vrot.lane.b32.xlu1 %v10933_v50, %s10091_s21 }
 0x525   : > { %v7997_v44 = vpop.f32.mrb[48].mxu1 }
 0x526   : > { %v1903_v19 = vmul.f32 0.35355338, %v7997_v44  ;;  %v1838_v59 = vpop.f32.mrb[49].mxu1 }
 0x527   : > { %v7998_v18 = vpop.f32.mrb[50].mxu1  ;;  %v1901_v62 = vmul.f32 0.35355338, %v1838_v59 }
 0x528   : > { %v1841_v61 = vpop.f32.mrb[51].mxu1  ;;  %v11315_v48 = vsel %vm1238_vm2, %v1903_v19, -1e+30  ;;  %v1904_v56 = vmul.f32 0.35355338, %v7998_v18 }
 0x529   : > { %1937 = vmax.xlane.f32.xlu0 %v11315_v48  ;;  %v11320_v21 = vsel %vm1238_vm2, %v1901_v62, -1e+30  ;;  %v1902_v12 = vmul.f32 0.35355338, %v1841_v61 }
 0x52a   : > { %v11325_v38 = vsel %vm1238_vm2, %v1904_v56, -1e+30 }
 0x52b   : > { %v11330_v16 = vsel %vm1238_vm2, %v1902_v12, -1e+30  ;;  %v11359_v12 = vpop.permute.xlu0 %2087 }
 0x52d   : > { %1933 = vmax.xlane.f32.xlu0 %v11320_v21  ;;  %v8001_v29 = vpop.f32.mrb[52].mxu1 }
 0x52e   : > { %v1854_v25 = vpop.f32.mrb[53].mxu1 }
 0x52f   : > { %v8002_v58 = vpop.f32.mrb[54].mxu1 }
 0x530   : > { %v1857_v63 = vpop.f32.mrb[55].mxu1  ;;  %v1908_v9 = vmul.f32 0.35355338, %v8002_v58 }
 0x531   : > { %v1906_v44 = vmul.f32 0.35355338, %v1857_v63 }
 0x532   : > { %v11337_v19 = vsel %vm1238_vm2, %v1908_v9, -1e+30 }
 0x533   : > { %v11342_v18 = vsel %vm1238_vm2, %v1906_v44, -1e+30  ;;  %v1907_v44 = vmul.f32 0.35355338, %v8001_v29 }
 0x535   : > { %v8005_v10 = vpop.f32.mrb[56].mxu1 }
 0x536   : > { %v1870_v5 = vpop.f32.mrb[57].mxu1  ;;  %v1911_v59 = vmul.f32 0.35355338, %v8005_v10 }
 0x537   : > { %v8006_v7 = vpop.f32.mrb[58].mxu1  ;;  %v1909_v62 = vmul.f32 0.35355338, %v1870_v5 }
 0x538   : > { %v1873_v33 = vpop.f32.mrb[59].mxu1  ;;  %v11347_v61 = vsel %vm1238_vm2, %v1911_v59, -1e+30  ;;  %v1912_v58 = vmul.f32 0.35355338, %v8006_v7  ;;  %v11367_v7 = vpop.permute.xlu0 %2091 }
 0x539   : > { %v11352_v63 = vsel %vm1238_vm2, %v1909_v62, -1e+30  ;;  %v1910_v10 = vmul.f32 0.35355338, %v1873_v33  ;;  %v1905_v62 = vmul.f32 0.35355338, %v1854_v25 }
 0x53a   : > { %v11357_v56 = vsel %vm1238_vm2, %v1912_v58, -1e+30 }
 0x53b   : > { %v11364_v9 = vsel %vm1238_vm2, %v1910_v10, -1e+30  ;;  %v11383_v10 = vsel %vm1238_vm2, %v1905_v62, -1e+30 }
 0x53c   : > { %1939 = vmax.xlane.f32.xlu1 %v11325_v38  ;;  %v11374_v59 = vpop.permute.xlu0 %2095 }
 0x53d   : > { %v8009_v47 = vpop.f32.mrb[60].mxu1 }
 0x53e   : > { %v1886_v41 = vpop.f32.mrb[61].mxu1  ;;  %v1915_v58 = vmul.f32 0.35355338, %v8009_v47 }
 0x53f   : > { %v8010_v46 = vpop.f32.mrb[62].mxu1  ;;  %v1913_v5 = vmul.f32 0.35355338, %v1886_v41  ;;  %v11378_v41 = vsel %vm1238_vm2, %v1907_v44, -1e+30 }
 0x540   : > { %1935 = vmax.xlane.f32.xlu1 %v11330_v16  ;;  %v1889_v60 = vpop.f32.mrb[63].mxu1  ;;  %v11385_v30 = vpop.permute.xlu0 %2099  ;;  %v11390_v29 = vsel %vm1238_vm2, %v1915_v58, -1e+30 }
 0x541   : > { %v11371_v33 = vsel %vm1238_vm2, %v1913_v5, -1e+30  ;;  %v1916_v5 = vmul.f32 0.35355338, %v8010_v46  ;;  %v1914_v44 = vmul.f32 0.35355338, %v1889_v60 }
 0x543   : > { %2226 = vrot.lane.b32.xlu0 %v10935_v51, %s10091_s21  ;;  %v11397_v47 = vsel %vm1238_vm2, %v1916_v5, -1e+30  ;;  %v11402_v62 = vsel %vm1238_vm2, %v1914_v44, -1e+30 }
 0x544   : > { %1947 = vmax.xlane.f32.xlu1 %v11337_v19  ;;  %v11393_v25 = vpop.permute.xlu0 %2222 }
 0x548   : > { %1943 = vmax.xlane.f32.xlu1 %v11342_v18  ;;  %v11404_v46 = vpop.permute.xlu0 %2097 }
 0x54c   : > { %1953 = vmax.xlane.f32.xlu1 %v11347_v61 }
 0x550   : > { %1949 = vmax.xlane.f32.xlu1 %v11352_v63 }
 0x554   : > { %1955 = vmax.xlane.f32.xlu1 %v11357_v56 }
 0x558   : > { %1951 = vmax.xlane.f32.xlu1 %v11364_v9 }
 0x55c   : > { %1957 = vmax.xlane.f32.xlu1 %v11371_v33 }
 0x562   : > { %1945 = vmax.xlane.f32.xlu0 %v11378_v41 }
 0x566   : > { %1941 = vmax.xlane.f32.xlu0 %v11383_v10 }
 0x56a   : > { %1961 = vmax.xlane.f32.xlu0 %v11390_v29 }
 0x56e   : > { %1963 = vmax.xlane.f32.xlu0 %v11397_v47 }
 0x572   : > { %1959 = vmax.xlane.f32.xlu0 %v11402_v62 }
 0x576   : > { %v1456_v58 = vpop.xlane.xlu0 %1455 }
 0x577   : > { %v1485_v27 = vsub.f32 %v11233_v0, %v1456_v58 }
 0x579   : > { %v1503_v39 = vmul.f32 1.442695, %v1485_v27  ;;  %v1454_v5 = vpop.xlane.xlu1 %1453 }
 0x57a   : > { %v1452_v42 = vpop.xlane.xlu0 %1451  ;;  %v1484_v45 = vsub.f32 %v11238_v6, %v1454_v5 }
 0x57b   : > { %9063 = vpow2.f32 %v1503_v39  ;;  %v1483_v60 = vsub.f32 %v11243_v26, %v1452_v42 }
 0x57c   : > { %v1501_v28 = vmul.f32 1.442695, %v1484_v45 }
 0x57d   : > { %v1499_v8 = vmul.f32 1.442695, %v1483_v60 }
 0x57e   : > { %v1458_v35 = vpop.xlane.xlu0 %1457 }
 0x57f   : > { %9065 = vpow2.f32 %v1499_v8  ;;  %v1486_v44 = vsub.f32 %v11248_v24, %v1458_v35 }
 0x580   : > { %v1466_v17 = vpop.xlane.xlu1 %1465 }
 0x581   : > { %v1505_v13 = vmul.f32 1.442695, %v1486_v44  ;;  %v1490_v3 = vsub.f32 %v11253_v14, %v1466_v17 }
 0x582   : > { %v1464_v40 = vpop.xlane.xlu0 %1463 }
 0x583   : > { %9067 = vpow2.f32 %v1505_v13  ;;  %v1513_v27 = vmul.f32 1.442695, %v1490_v3  ;;  %v1489_v39 = vsub.f32 %v11258_v53, %v1464_v40 }
 0x584   : > { %v1462_v0 = vpop.xlane.xlu1 %1461 }
 0x585   : > { %v11413_v42 = vpop.eup %9063  ;;  %9069 = vpow2.f32 %v1513_v27  ;;  %v1488_v26 = vsub.f32 %v11263_v54, %v1462_v0  ;;  %v1511_v35 = vmul.f32 1.442695, %v1489_v39 }
 0x586   : > { %1535 = vadd.xlane.f32.xlu0 %v11413_v42  ;;  %v1460_v8 = vpop.xlane.xlu0 %1459  ;;  %9071 = vpow2.f32 %v1501_v28 }
 0x587   : > { %v1509_v6 = vmul.f32 1.442695, %v1488_v26  ;;  %v1487_v17 = vsub.f32 %v11268_v4, %v1460_v8 }
 0x588   : > { %v1474_v24 = vpop.xlane.xlu1 %1473 }
 0x589   : > { %v11418_v45 = vpop.eup %9065  ;;  %9073 = vpow2.f32 %v1509_v6  ;;  %v1494_v3 = vsub.f32 %v11273_v52, %v1474_v24  ;;  %v1507_v40 = vmul.f32 1.442695, %v1487_v17 }
 0x58a   : > { %1531 = vadd.xlane.f32.xlu1 %v11418_v45  ;;  %v1472_v13 = vpop.xlane.xlu0 %1471  ;;  %9075 = vpow2.f32 %v1511_v35 }
 0x58b   : > { %v1521_v14 = vmul.f32 1.442695, %v1494_v3  ;;  %v1493_v53 = vsub.f32 %v11278_v2, %v1472_v13 }
 0x58c   : > { %v1470_v54 = vpop.xlane.xlu1 %1469 }
 0x58d   : > { %v11423_v28 = vpop.eup %9067  ;;  %9077 = vpow2.f32 %v1521_v14  ;;  %v1492_v4 = vsub.f32 %v11283_v55, %v1470_v54  ;;  %v1519_v52 = vmul.f32 1.442695, %v1493_v53 }
 0x58e   : > { %1537 = vadd.xlane.f32.xlu1 %v11423_v28  ;;  %v1468_v58 = vpop.xlane.xlu0 %1467  ;;  %9079 = vpow2.f32 %v1507_v40 }
 0x58f   : > { %v11427_v60 = vpop.eup %9069  ;;  %v1517_v5 = vmul.f32 1.442695, %v1492_v4  ;;  %v1491_v44 = vsub.f32 %v11288_v34, %v1468_v58 }
 0x590   : > { %v1482_v27 = vpop.xlane.xlu1 %1481  ;;  %1545 = vadd.xlane.f32.xlu0 %v11427_v60  ;;  %v11431_v2 = vpop.eup %9071 }
 0x591   : > { %9081 = vpow2.f32 %v1517_v5  ;;  %v1498_v39 = vsub.f32 %v11293_v36, %v1482_v27  ;;  %v1515_v26 = vmul.f32 1.442695, %v1491_v44 }
 0x592   : > { %1533 = vadd.xlane.f32.xlu1 %v11431_v2  ;;  %v1480_v55 = vpop.xlane.xlu0 %1479  ;;  %9083 = vpow2.f32 %v1519_v52 }
 0x593   : > { %v11435_v0 = vpop.eup %9073  ;;  %v1529_v8 = vmul.f32 1.442695, %v1498_v39  ;;  %v1497_v35 = vsub.f32 %v11298_v22, %v1480_v55 }
 0x594   : > { %v1478_v6 = vpop.xlane.xlu1 %1477  ;;  %1541 = vadd.xlane.f32.xlu0 %v11435_v0  ;;  %v11439_v34 = vpop.eup %9075 }
 0x595   : > { %9085 = vpow2.f32 %v1529_v8  ;;  %v1496_v17 = vsub.f32 %v11303_v43, %v1478_v6  ;;  %v1527_v3 = vmul.f32 1.442695, %v1497_v35 }
 0x596   : > { %1543 = vadd.xlane.f32.xlu1 %v11439_v34  ;;  %v1476_v36 = vpop.xlane.xlu0 %1475  ;;  %9087 = vpow2.f32 %v1515_v26 }
 0x597   : > { %v11443_v24 = vpop.eup %9077  ;;  %v1525_v13 = vmul.f32 1.442695, %v1496_v17  ;;  %v1495_v40 = vsub.f32 %v11308_v15, %v1476_v36 }
 0x598   : > { %1553 = vadd.xlane.f32.xlu0 %v11443_v24  ;;  %v11447_v22 = vpop.eup %9079  ;;  %v11475_v35 = vpop.permute.xlu1 %2228 }
 0x599   : > { %9089 = vpow2.f32 %v1525_v13  ;;  %v1523_v43 = vmul.f32 1.442695, %v1495_v40  ;;  %14774 = vst [vmem:[#allocation37_spill] sm:$0xff] %v11475_v35 }
 0x59a   : > { %1539 = vadd.xlane.f32.xlu1 %v11447_v22  ;;  %9091 = vpow2.f32 %v1527_v3 }
 0x59b   : > { %v11450_v14 = vpop.eup %9081  ;;  %9093 = vpow2.f32 %v1523_v43 }
 0x59c   : > { %1549 = vadd.xlane.f32.xlu0 %v11450_v14  ;;  %v11453_v53 = vpop.eup %9083 }
 0x59e   : > { %1551 = vadd.xlane.f32.xlu1 %v11453_v53 }
 0x59f   : > { %v11456_v54 = vpop.eup %9085 }
 0x5a0   : > { %1561 = vadd.xlane.f32.xlu0 %v11456_v54  ;;  %v11459_v15 = vpop.eup %9087 }
 0x5a2   : > { %1547 = vadd.xlane.f32.xlu1 %v11459_v15 }
 0x5a3   : > { %v11462_v4 = vpop.eup %9089 }
 0x5a4   : > { %1557 = vadd.xlane.f32.xlu0 %v11462_v4  ;;  %v11465_v58 = vpop.eup %9091 }
 0x5a5   : > { %v11468_v52 = vpop.eup %9093 }
 0x5a6   : > { %1559 = vadd.xlane.f32.xlu1 %v11465_v58 }
 0x5aa   : > { %1555 = vadd.xlane.f32.xlu1 %v11468_v52 }
 0x5b6   : > { %v1938_v5 = vpop.xlane.xlu0 %1937 }
 0x5b7   : > { %v1967_v44 = vsub.f32 %v11315_v48, %v1938_v5 }
 0x5b9   : > { %v1985_v27 = vmul.f32 1.442695, %v1967_v44 }
 0x5ba   : > { %v1934_v39 = vpop.xlane.xlu0 %1933 }
 0x5bb   : > { %9095 = vpow2.f32 %v1985_v27  ;;  %v1965_v55 = vsub.f32 %v11320_v21, %v1934_v39 }
 0x5bd   : > { %v1981_v26 = vmul.f32 1.442695, %v1965_v55 }
 0x5be   : > { %v11491_v27 = vpop.permute.xlu0 %2226 }
 0x5bf   : > { %9097 = vpow2.f32 %v1981_v26  ;;  %14775 = vst [vmem:[#allocation38_spill] sm:$0xff] %v11491_v27 }
 0x5c5   : > { %v11473_v8 = vpop.eup %9095 }
 0x5c6   : > { %14773 = vst [vmem:[#allocation36_spill] sm:$0xff] %v11473_v8  ;;  %2017 = vadd.xlane.f32.xlu1 %v11473_v8 }
 0x5c9   : > { %v11478_v6 = vpop.eup %9097  ;;  %v1940_v17 = vpop.xlane.xlu1 %1939 }
 0x5ca   : > { %v1968_v36 = vsub.f32 %v11325_v38, %v1940_v17  ;;  %2013 = vadd.xlane.f32.xlu1 %v11478_v6 }
 0x5cc   : > { %v1987_v48 = vmul.f32 1.442695, %v1968_v36 }
 0x5cd   : > { %v1936_v3 = vpop.xlane.xlu1 %1935 }
 0x5ce   : > { %9099 = vpow2.f32 %v1987_v48  ;;  %v1966_v21 = vsub.f32 %v11330_v16, %v1936_v3 }
 0x5d0   : > { %v1983_v13 = vmul.f32 1.442695, %v1966_v21 }
 0x5d1   : > { %v1948_v43 = vpop.xlane.xlu1 %1947 }
 0x5d2   : > { %9101 = vpow2.f32 %v1983_v13 }
 0x5d5   : > { %v1944_v38 = vpop.xlane.xlu1 %1943 }
 0x5d6   : > { %v1970_v16 = vsub.f32 %v11342_v18, %v1944_v38 }
 0x5d8   : > { %v11483_v40 = vpop.eup %9099  ;;  %v1991_v26 = vmul.f32 1.442695, %v1970_v16 }
 0x5d9   : > { %2019 = vadd.xlane.f32.xlu0 %v11483_v40  ;;  %v1954_v44 = vpop.xlane.xlu1 %1953 }
 0x5da   : > { %v1975_v17 = vsub.f32 %v11347_v61, %v1954_v44  ;;  %9103 = vpow2.f32 %v1991_v26 }
 0x5db   : > { %2232 = vrot.lane.b32.xlu1 %v10941_v11, %s10091_s21 }
 0x5dc   : > { %v11488_v5 = vpop.eup %9101  ;;  %v2001_v3 = vmul.f32 1.442695, %v1975_v17 }
 0x5dd   : > { %2015 = vadd.xlane.f32.xlu0 %v11488_v5  ;;  %v1950_v39 = vpop.xlane.xlu1 %1949 }
 0x5de   : > { %v1973_v21 = vsub.f32 %v11352_v63, %v1950_v39  ;;  %9105 = vpow2.f32 %v2001_v3 }
 0x5e0   : > { %v1997_v35 = vmul.f32 1.442695, %v1973_v21 }
 0x5e1   : > { %v1956_v36 = vpop.xlane.xlu1 %1955 }
 0x5e2   : > { %v1976_v27 = vsub.f32 %v11357_v56, %v1956_v36  ;;  %9107 = vpow2.f32 %v1997_v35 }
 0x5e4   : > { %v2003_v16 = vmul.f32 1.442695, %v1976_v27  ;;  %v11500_v44 = vpop.eup %9103 }
 0x5e5   : > { %v1952_v18 = vpop.xlane.xlu1 %1951 }
 0x5e6   : > { %v1974_v61 = vsub.f32 %v11364_v9, %v1952_v18  ;;  %9109 = vpow2.f32 %v2003_v16 }
 0x5e8   : > { %v1999_v63 = vmul.f32 1.442695, %v1974_v61  ;;  %v11505_v17 = vpop.eup %9105 }
 0x5ea   : > { %9111 = vpow2.f32 %v1999_v63 }
 0x5ec   : > { %v11509_v35 = vpop.eup %9107 }
 0x5ef   : > { %v1946_v55 = vpop.xlane.xlu0 %1945 }
 0x5f0   : > { %v1971_v8 = vsub.f32 %v11378_v41, %v1946_v55  ;;  %v1972_v41 = vsub.f32 %v11337_v19, %v1948_v43  ;;  %v11513_v55 = vpop.eup %9109 }
 0x5f2   : > { %v1993_v56 = vmul.f32 1.442695, %v1971_v8 }
 0x5f3   : > { %2230 = vrot.lane.b32.xlu0 %v10943_v31, %s10091_s21  ;;  %v1942_v48 = vpop.xlane.xlu0 %1941 }
 0x5f4   : > { %v1969_v36 = vsub.f32 %v11383_v10, %v1942_v48  ;;  %9113 = vpow2.f32 %v1993_v56  ;;  %v1958_v10 = vpop.xlane.xlu1 %1957  ;;  %v11517_v48 = vpop.eup %9111 }
 0x5f5   : > { %v1977_v3 = vsub.f32 %v11371_v33, %v1958_v10 }
 0x5f6   : > { %v1989_v27 = vmul.f32 1.442695, %v1969_v36 }
 0x5f7   : > { %v1962_v13 = vpop.xlane.xlu0 %1961  ;;  %v2005_v18 = vmul.f32 1.442695, %v1977_v3 }
 0x5f8   : > { %v1979_v8 = vsub.f32 %v11390_v29, %v1962_v13 }
 0x5fa   : > { %v2009_v19 = vmul.f32 1.442695, %v1979_v8 }
 0x5fb   : > { %v1964_v38 = vpop.xlane.xlu0 %1963 }
 0x5fc   : > { %v1980_v29 = vsub.f32 %v11397_v47, %v1964_v38 }
 0x5fe   : > { %v11521_v43 = vpop.eup %9113  ;;  %v2011_v33 = vmul.f32 1.442695, %v1980_v29 }
 0x5ff   : > { %2023 = vadd.xlane.f32.xlu1 %v11500_v44  ;;  %v1960_v26 = vpop.xlane.xlu0 %1959 }
 0x600   : > { %v1978_v39 = vsub.f32 %v11402_v62, %v1960_v26  ;;  %v1995_v62 = vmul.f32 1.442695, %v1972_v41 }
 0x602   : > { %v2007_v9 = vmul.f32 1.442695, %v1978_v39 }
 0x603   : > { %2033 = vadd.xlane.f32.xlu1 %v11505_v17 }
 0x604   : > { %9115 = vpow2.f32 %v2007_v9 }
 0x605   : > { %9117 = vpow2.f32 %v1989_v27 }
 0x606   : > { %9119 = vpow2.f32 %v1995_v62 }
 0x607   : > { %2029 = vadd.xlane.f32.xlu1 %v11509_v35  ;;  %9121 = vpow2.f32 %v2009_v19 }
 0x608   : > { %9123 = vpow2.f32 %v2005_v18 }
 0x609   : > { %9125 = vpow2.f32 %v2011_v33 }
 0x60b   : > { %2035 = vadd.xlane.f32.xlu1 %v11513_v55 }
 0x60e   : > { %v11523_v21 = vpop.eup %9115 }
 0x60f   : > { %2031 = vadd.xlane.f32.xlu1 %v11517_v48  ;;  %v11528_v13 = vpop.eup %9117 }
 0x610   : > { %v11531_v61 = vpop.eup %9119 }
 0x611   : > { %v11534_v39 = vpop.eup %9121 }
 0x612   : > { %2025 = vadd.xlane.f32.xlu0 %v11521_v43  ;;  %v11537_v56 = vpop.eup %9123 }
 0x613   : > { %2039 = vadd.xlane.f32.xlu1 %v11523_v21  ;;  %v1536_v26 = vpop.xlane.xlu0 %1535  ;;  %v11542_v41 = vpop.eup %9125 }
 0x616   : > { %2021 = vadd.xlane.f32.xlu0 %v11528_v13 }
 0x617   : > { %v1532_v16 = vpop.xlane.xlu1 %1531 }
 0x61a   : > { %2027 = vadd.xlane.f32.xlu0 %v11531_v61 }
 0x61b   : > { %v1538_v63 = vpop.xlane.xlu1 %1537 }
 0x61c   : > { %9127 = vrcp.f32 %v1538_v63 }
 0x61d   : > { %v1546_v47 = vpop.xlane.xlu0 %1545  ;;  %9129 = vrcp.f32 %v1532_v16 }
 0x61e   : > { %2041 = vadd.xlane.f32.xlu0 %v11534_v39  ;;  %9131 = vrcp.f32 %v1536_v26 }
 0x61f   : > { %v1534_v38 = vpop.xlane.xlu1 %1533 }
 0x620   : > { %9133 = vrcp.f32 %v1534_v38 }
 0x621   : > { %v1542_v36 = vpop.xlane.xlu0 %1541 }
 0x622   : > { %2037 = vadd.xlane.f32.xlu0 %v11537_v56 }
 0x623   : > { %v1544_v9 = vpop.xlane.xlu1 %1543 }
 0x624   : > { %2236 = vrot.lane.b32.xlu1 %v10954_v57, %s10091_s21  ;;  %9135 = vrcp.f32 %v1544_v9 }
 0x625   : > { %v1554_v27 = vpop.xlane.xlu0 %1553  ;;  %9137 = vrcp.f32 %v1542_v36 }
 0x626   : > { %2043 = vadd.xlane.f32.xlu0 %v11542_v41  ;;  %v9128_v62 = vpop.eup %9127  ;;  %9139 = vrcp.f32 %v1546_v47 }
 0x627   : > { %v1540_v8 = vpop.xlane.xlu1 %1539  ;;  %v9130_v10 = vpop.eup %9129  ;;  %v1582_v29 = vmul.f32 %v9128_v62, %v11423_v28 }
 0x628   : > { %9141 = vrcp.f32 %v1540_v8  ;;  %2208 = vrot.lane.b32.xlu1 %v10921_v32, %s10092_s13  ;;  %v9132_v3 = vpop.eup %9131  ;;  %v1579_v16 = vmul.f32 %v9130_v10, %v11418_v45 }
 0x629   : > { %v1550_v19 = vpop.xlane.xlu0 %1549  ;;  %v1581_v63 = vmul.f32 %v9132_v3, %v11413_v42 }
 0x62a   : > { %v9134_v18 = vpop.eup %9133  ;;  %9143 = vrcp.f32 %v1550_v19 }
 0x62b   : > { %v1552_v33 = vpop.xlane.xlu1 %1551  ;;  %v1580_v26 = vmul.f32 %v9134_v18, %v11431_v2  ;;  %v1596_v36 = vpack.c.bf16 %v1582_v29, %v1581_v63 }
 0x62c   : > { %2212 = vrot.lane.b32.xlu1 %v10933_v50, %s10092_s13  ;;  %9145 = vrcp.f32 %v1552_v33 }
 0x62d   : > { %v1562_v47 = vpop.xlane.xlu0 %1561  ;;  %v1595_v38 = vpack.c.bf16 %v1580_v26, %v1579_v16  ;;  %9147 = vrcp.f32 %v1554_v27 }
 0x62e   : > { %v9136_v9 = vpop.eup %9135 }
 0x62f   : > { %7963 = vmatprep.mubr.bf16.mxu0 %v1595_v38  ;;  %v1548_v8 = vpop.xlane.xlu1 %1547  ;;  %v9138_v28 = vpop.eup %9137  ;;  %v1585_v62 = vmul.f32 %v9136_v9, %v11439_v34 }
 0x630   : > { %9149 = vrcp.f32 %v1548_v8  ;;  %2216 = vrot.lane.b32.xlu1 %v10941_v11, %s10092_s13  ;;  %7964 = vmatmul.mubr.bf16.vlgmr.msra.gmra.mrb[0].mxu0 %v1596_v36  ;;  %v9140_v45 = vpop.eup %9139  ;;  %v1584_v3 = vmul.f32 %v9138_v28, %v11435_v0 }
 0x631   : > { %8012 = vmatpush3.bf16.msra.mxu0 %v11160_v23  ;;  %v1558_v42 = vpop.xlane.xlu0 %1557  ;;  %v1586_v19 = vmul.f32 %v9140_v45, %v11427_v60 }
 0x632   : > { %v9142_v2 = vpop.eup %9141  ;;  %8013 = vmatprep.subr.bf16.mxu0 %v11359_v12  ;;  %9151 = vrcp.f32 %v1558_v42  ;;  %v14776_v42 = vld [vmem:[#allocation36_spill] sm:$0xff] }
 0x633   : > { %v1560_v10 = vpop.xlane.xlu1 %1559  ;;  %v1583_v27 = vmul.f32 %v9142_v2, %v11447_v22  ;;  %v1598_v18 = vpack.c.bf16 %v1586_v19, %v1585_v62  ;;  %v14777_v19 = vld [vmem:[#allocation30_spill] sm:$0xff] }
 0x634   : > { %2220 = vrot.lane.b32.xlu1 %v10954_v57, %s10092_s13  ;;  %9153 = vrcp.f32 %v1560_v10  ;;  %v9144_v29 = vpop.eup %9143 }
 0x635   : > { %8014 = vmatpush3.bf16.msra.mxu0 %v11359_v12  ;;  %v1597_v23 = vpack.c.bf16 %v1584_v3, %v1583_v27  ;;  %9155 = vrcp.f32 %v1562_v47  ;;  %v1588_v33 = vmul.f32 %v9144_v29, %v11450_v14  ;;  %v2263_v3 = vsel %vm1271_vm1, %v11393_v25, 0  ;;  %v14779_v29 = vld [vmem:[#allocation37_spill] sm:$0xff] }
 0x636   : > { %8015 = vmatprep.subr.bf16.mxu0 %v11169_v1  ;;  %v9146_v22 = vpop.eup %9145 }
 0x637   : > { %v1556_v34 = vpop.xlane.xlu1 %1555  ;;  %7967 = vmatprep.mubr.bf16.mxu0 %v1597_v23  ;;  %v9148_v60 = vpop.eup %9147  ;;  %v1589_v16 = vmul.f32 %v9146_v22, %v11453_v53 }
 0x638   : > { %9157 = vrcp.f32 %v1556_v34  ;;  %2569 = vrot.lane.b32.xlu1 %v10921_v32, %s10093_s17  ;;  %7968 = vmatmul.mubr.bf16.gmra.mrb[4].mxu0 %v1598_v18  ;;  %v2272_v34 = vsel %vm1271_vm1, %v14779_v29, 0 }
 0x639   : > { %8016 = vmatpush3.bf16.msra.mxu0 %v11169_v1  ;;  %v1590_v1 = vmul.f32 %v9148_v60, %v11443_v24 }
 0x63a   : > { %v9150_v12 = vpop.eup %9149  ;;  %8017 = vmatprep.subr.bf16.mxu0 %v11367_v7 }
 0x63b   : > { %v1587_v0 = vmul.f32 %v9150_v12, %v11459_v15  ;;  %v1600_v15 = vpack.c.bf16 %v1590_v1, %v1589_v16 }
 0x63c   : > { %2234 = vrot.lane.b32.xlu0 %v10956_v37, %s10091_s21  ;;  %2573 = vrot.lane.b32.xlu1 %v10933_v50, %s10093_s17  ;;  %v9152_v63 = vpop.eup %9151 }
 0x63d   : > { %8018 = vmatpush3.bf16.msra.mxu0 %v11367_v7  ;;  %v1599_v26 = vpack.c.bf16 %v1588_v33, %v1587_v0  ;;  %v1592_v24 = vmul.f32 %v9152_v63, %v11462_v4 }
 0x63e   : > { %8019 = vmatprep.subr.bf16.mxu0 %v11171_v49  ;;  %v9154_v47 = vpop.eup %9153 }
 0x63f   : > { %7971 = vmatprep.mubr.bf16.mxu0 %v1599_v26  ;;  %v9156_v14 = vpop.eup %9155  ;;  %v1593_v38 = vmul.f32 %v9154_v47, %v11465_v58 }
 0x640   : > { %2206 = vrot.lane.b32.xlu0 %v10923_v20, %s10092_s13  ;;  %2577 = vrot.lane.b32.xlu1 %v10941_v11, %s10093_s17  ;;  %v1594_v9 = vmul.f32 %v9156_v14, %v11456_v54 }
 0x641   : > { %7972 = vmatmul.mubr.bf16.gmra.mrb[8].mxu0 %v1600_v15 }
 0x642   : > { %v9158_v53 = vpop.eup %9157  ;;  %8020 = vmatpush3.bf16.msra.mxu0 %v11171_v49  ;;  %v1602_v49 = vpack.c.bf16 %v1594_v9, %v1593_v38 }
 0x643   : > { %8021 = vmatprep.subr.bf16.mxu0 %v11374_v59  ;;  %v1591_v7 = vmul.f32 %v9158_v53, %v11468_v52 }
 0x644   : > { %2210 = vrot.lane.b32.xlu0 %v10935_v51, %s10092_s13  ;;  %2581 = vrot.lane.b32.xlu1 %v10954_v57, %s10093_s17 }
 0x645   : > { %v1601_v36 = vpack.c.bf16 %v1592_v24, %v1591_v7 }
 0x646   : > { %8022 = vmatpush3.bf16.msra.mxu0 %v11374_v59 }
 0x647   : > { %8023 = vmatprep.subr.bf16.mxu0 %v11404_v46  ;;  %7975 = vmatprep.mubr.bf16.mxu0 %v1601_v36 }
 0x648   : > { %2214 = vrot.lane.b32.xlu0 %v10943_v31, %s10092_s13  ;;  %2706 = vrot.lane.b32.xlu1 %v10921_v32, %s10094_s20 }
 0x649   : > { %7976 = vmatmul.mubr.bf16.gmra.mrb[12].mxu0 %v1602_v49 }
 0x64a   : > { %8024 = vmatpush3.bf16.msra.mxu0 %v11404_v46 }
 0x64b   : > { %8025 = vmatprep.subr.bf16.mxu0 %v11385_v30 }
 0x64c   : > { %2218 = vrot.lane.b32.xlu0 %v10956_v37, %s10092_s13 }
 0x64e   : > { %8026 = vmatpush3.bf16.msra.mxu0 %v11385_v30 }
 0x64f   : > { %8555 = vmatprep.subr.msk.bf16.mxu0 %vm1271_vm1, %v11393_v25 }
 0x650   : > { %2567 = vrot.lane.b32.xlu0 %v10923_v20, %s10093_s17 }
 0x653   : > { %v2018_v59 = vpop.xlane.xlu1 %2017 }
 0x654   : > { %2571 = vrot.lane.b32.xlu0 %v10935_v51, %s10093_s17 }
 0x657   : > { %v2014_v30 = vpop.xlane.xlu1 %2013 }
 0x658   : > { %2575 = vrot.lane.b32.xlu0 %v10943_v31, %s10093_s17 }
 0x65c   : > { %2579 = vrot.lane.b32.xlu0 %v10956_v37, %s10093_s17 }
 0x660   : > { %2704 = vrot.lane.b32.xlu0 %v10923_v20, %s10094_s20 }
 0x666   : > { %v2020_v46 = vpop.xlane.xlu0 %2019 }
 0x667   : > { %9159 = vrcp.f32 %v2020_v46 }
 0x668   : > { %9161 = vrcp.f32 %v2014_v30 }
 0x669   : > { %9163 = vrcp.f32 %v2018_v59 }
 0x66a   : > { %v2016_v54 = vpop.xlane.xlu0 %2015 }
 0x66b   : > { %9165 = vrcp.f32 %v2016_v54 }
 0x66e   : > { %v2231_v22 = vpop.permute.xlu0 %2230 }
 0x66f   : > { %v2275_v12 = vsel %vm1271_vm1, %v2231_v22, 0 }
 0x671   : > { %v9160_v4 = vpop.eup %9159 }
 0x672   : > { %v9162_v58 = vpop.eup %9161  ;;  %v2064_v28 = vmul.f32 %v9160_v4, %v11483_v40  ;;  %v2266_v40 = vsel %vm1271_vm1, %v14777_v19, 0 }
 0x673   : > { %v9164_v52 = vpop.eup %9163  ;;  %v2061_v45 = vmul.f32 %v9162_v58, %v11478_v6  ;;  %v14778_v6 = vld [vmem:[#allocation38_spill] sm:$0xff] }
 0x674   : > { %v2063_v62 = vmul.f32 %v9164_v52, %v14776_v42  ;;  %v2269_v23 = vsel %vm1271_vm1, %v14778_v6, 0 }
 0x675   : > { %v9166_v8 = vpop.eup %9165 }
 0x676   : > { %v2062_v2 = vmul.f32 %v9166_v8, %v11488_v5  ;;  %v2078_v27 = vpack.c.bf16 %v2064_v28, %v2063_v62  ;;  %v2233_v5 = vpop.permute.xlu1 %2232 }
 0x677   : > { %v2278_v26 = vsel %vm1271_vm1, %v2233_v5, 0 }
 0x678   : > { %v2077_v10 = vpack.c.bf16 %v2062_v2, %v2061_v45 }
 0x67a   : > { %8027 = vmatprep.mubr.bf16.mxu0 %v2077_v10 }
 0x67b   : > { %8028 = vmatmul.mubr.bf16.vlgmr.msra.gmra.mrb[16].mxu0 %v2078_v27 }
 0x67c   : > { %8044 = vmatpush3.bf16.xpose.msra.mxu0 %v2263_v3 }
 0x67d   : > { %8556 = vmatprep.subr.msk.bf16.mxu0 %vm1271_vm1, %v14777_v19 }
 0x684   : > { %8046 = vmatpush3.bf16.xpose.msra.mxu0 %v2266_v40 }
 0x685   : > { %8557 = vmatprep.subr.msk.bf16.mxu0 %vm1271_vm1, %v14778_v6 }
 0x68c   : > { %8048 = vmatpush3.bf16.xpose.msra.mxu0 %v2269_v23  ;;  %v2024_v18 = vpop.xlane.xlu1 %2023 }
 0x68d   : > { %8558 = vmatprep.subr.msk.bf16.mxu0 %vm1271_vm1, %v14779_v29  ;;  %9167 = vrcp.f32 %v2024_v18 }
 0x690   : > { %v2034_v25 = vpop.xlane.xlu1 %2033 }
 0x694   : > { %8050 = vmatpush3.bf16.xpose.msra.mxu0 %v2272_v34  ;;  %v2030_v60 = vpop.xlane.xlu1 %2029 }
 0x695   : > { %8559 = vmatprep.subr.msk.bf16.mxu0 %vm1271_vm1, %v2231_v22 }
 0x697   : > { %v9168_v14 = vpop.eup %9167 }
 0x698   : > { %v2036_v0 = vpop.xlane.xlu1 %2035  ;;  %v2066_v9 = vmul.f32 %v9168_v14, %v11500_v44 }
 0x69c   : > { %8052 = vmatpush3.bf16.xpose.msra.mxu0 %v2275_v12  ;;  %v2032_v16 = vpop.xlane.xlu1 %2031 }
 0x69d   : > { %8560 = vmatprep.subr.msk.bf16.mxu0 %vm1271_vm1, %v2233_v5 }
 0x69f   : > { %v2026_v33 = vpop.xlane.xlu0 %2025 }
 0x6a0   : > { %v2040_v15 = vpop.xlane.xlu1 %2039 }
 0x6a3   : > { %v2022_v1 = vpop.xlane.xlu0 %2021 }
 0x6a4   : > { %8054 = vmatpush3.bf16.xpose.msra.mxu0 %v2278_v26  ;;  %9169 = vrcp.f32 %v2022_v1  ;;  %v2237_v24 = vpop.permute.xlu1 %2236 }
 0x6a5   : > { %9171 = vrcp.f32 %v2032_v16 }
 0x6a6   : > { %9173 = vrcp.f32 %v2026_v33 }
 0x6a7   : > { %9175 = vrcp.f32 %v2030_v60  ;;  %v2028_v63 = vpop.xlane.xlu0 %2027 }
 0x6a8   : > { %9177 = vrcp.f32 %v2028_v63  ;;  %v2209_v28 = vpop.permute.xlu1 %2208 }
 0x6a9   : > { %9179 = vrcp.f32 %v2036_v0 }
 0x6aa   : > { %9181 = vrcp.f32 %v2034_v25 }
 0x6ab   : > { %v2042_v47 = vpop.xlane.xlu0 %2041  ;;  %9183 = vrcp.f32 %v2040_v15 }
 0x6ae   : > { %v9170_v53 = vpop.eup %9169 }
 0x6af   : > { %v9172_v7 = vpop.eup %9171  ;;  %v2038_v38 = vpop.xlane.xlu0 %2037  ;;  %v2065_v36 = vmul.f32 %v9170_v53, %v11528_v13 }
 0x6b0   : > { %v9174_v49 = vpop.eup %9173  ;;  %9185 = vrcp.f32 %v2038_v38  ;;  %v2070_v54 = vmul.f32 %v9172_v7, %v11517_v48 }
 0x6b1   : > { %v9176_v59 = vpop.eup %9175  ;;  %v2079_v30 = vpack.c.bf16 %v2066_v9, %v2065_v36  ;;  %v2067_v58 = vmul.f32 %v9174_v49, %v11521_v43 }
 0x6b2   : > { %v9178_v46 = vpop.eup %9177  ;;  %v2069_v8 = vmul.f32 %v9176_v59, %v11509_v35  ;;  %v2213_v35 = vpop.permute.xlu1 %2212 }
 0x6b3   : > { %8031 = vmatprep.mubr.bf16.mxu0 %v2079_v30  ;;  %v2044_v4 = vpop.xlane.xlu0 %2043  ;;  %v2068_v52 = vmul.f32 %v9178_v46, %v11531_v61  ;;  %v9180_v45 = vpop.eup %9179 }
 0x6b4   : > { %9187 = vrcp.f32 %v2044_v4  ;;  %v2081_v44 = vpack.c.bf16 %v2070_v54, %v2069_v8  ;;  %v9182_v2 = vpop.eup %9181  ;;  %v2072_v43 = vmul.f32 %v9180_v45, %v11513_v55  ;;  %v2284_v55 = vsel %vm1271_vm1, %v2237_v24, 0 }
 0x6b5   : > { %v2080_v13 = vpack.c.bf16 %v2068_v52, %v2067_v58  ;;  %9189 = vrcp.f32 %v2042_v47  ;;  %v9184_v62 = vpop.eup %9183  ;;  %v2071_v27 = vmul.f32 %v9182_v2, %v11505_v17 }
 0x6b6   : > { %v2074_v19 = vmul.f32 %v9184_v62, %v11523_v21  ;;  %v2217_v29 = vpop.permute.xlu1 %2216 }
 0x6b7   : > { %8032 = vmatmul.mubr.bf16.gmra.mrb[20].mxu0 %v2080_v13  ;;  %v2235_v42 = vpop.permute.xlu0 %2234  ;;  %v2082_v40 = vpack.c.bf16 %v2072_v43, %v2071_v27 }
 0x6b8   : > { %8035 = vmatprep.mubr.bf16.mxu0 %v2081_v44  ;;  %8561 = vmatprep.subr.msk.bf16.mxu0 %vm1271_vm1, %v2235_v42  ;;  %v2281_v48 = vsel %vm1271_vm1, %v2235_v42, 0 }
 0x6b9   : > { %8056 = vmatpush3.bf16.xpose.msra.mxu0 %v2281_v48 }
 0x6ba   : > { %v9186_v61 = vpop.eup %9185  ;;  %8562 = vmatprep.subr.msk.bf16.mxu0 %vm1271_vm1, %v2237_v24 }
 0x6bb   : > { %v2207_v10 = vpop.permute.xlu0 %2206  ;;  %v2073_v3 = vmul.f32 %v9186_v61, %v11537_v56  ;;  %v2221_v56 = vpop.permute.xlu1 %2220 }
 0x6bd   : > { %v2083_v6 = vpack.c.bf16 %v2074_v19, %v2073_v3 }
 0x6be   : > { %v9188_v5 = vpop.eup %9187 }
 0x6bf   : > { %8036 = vmatmul.mubr.bf16.gmra.mrb[24].mxu0 %v2082_v40  ;;  %v2211_v23 = vpop.permute.xlu0 %2210  ;;  %v9190_v18 = vpop.eup %9189  ;;  %v2076_v25 = vmul.f32 %v9188_v5, %v11542_v41 }
 0x6c0   : > { %8039 = vmatprep.mubr.bf16.mxu0 %v2083_v6  ;;  %v2075_v17 = vmul.f32 %v9190_v18, %v11534_v39  ;;  %v2570_v12 = vpop.permute.xlu1 %2569 }
 0x6c1   : > { %8058 = vmatpush3.bf16.xpose.msra.mxu0 %v2284_v55 }
 0x6c2   : > { %v2084_v22 = vpack.c.bf16 %v2076_v25, %v2075_v17 }
 0x6c3   : > { %v2215_v34 = vpop.permute.xlu0 %2214 }
 0x6c4   : > { %v2574_v41 = vpop.permute.xlu1 %2573 }
 0x6c7   : > { %8040 = vmatmul.mubr.bf16.gmra.mrb[28].mxu0 %v2084_v22  ;;  %v2219_v21 = vpop.permute.xlu0 %2218 }
 0x6c8   : > { %8059 = vmatprep.mubr.msk.bf16.mxu0 %vm1271_vm1, %v2207_v10  ;;  %v2578_v33 = vpop.permute.xlu1 %2577 }
 0x6cb   : > { %v2568_v60 = vpop.permute.xlu0 %2567 }
 0x6cc   : > { %8075 = vmatprep.subr.bf16.mxu1 %v2568_v60  ;;  %v2582_v26 = vpop.permute.xlu1 %2581 }
 0x6cd   : > { %8076 = vmatpush3.bf16.msra.mxu1 %v2568_v60 }
 0x6ce   : > { %8077 = vmatprep.subr.bf16.mxu1 %v2570_v12 }
 0x6cf   : > { %8060 = vmatmul.mubr.msk.bf16.vlgmr.msra.gmra.mrb[32].mxu0 %vm1271_vm1, %v2209_v28  ;;  %v2572_v0 = vpop.permute.xlu0 %2571 }
 0x6d0   : > { %8063 = vmatprep.mubr.msk.bf16.mxu0 %vm1271_vm1, %v2211_v23 }
 0x6d1   : > { %8078 = vmatpush3.bf16.msra.mxu1 %v2570_v12 }
 0x6d2   : > { %8079 = vmatprep.subr.bf16.mxu1 %v2572_v0 }
 0x6d3   : > { %v2576_v39 = vpop.permute.xlu0 %2575 }
 0x6d5   : > { %8080 = vmatpush3.bf16.msra.mxu1 %v2572_v0 }
 0x6d6   : > { %8081 = vmatprep.subr.bf16.mxu1 %v2574_v41 }
 0x6d7   : > { %8064 = vmatmul.mubr.msk.bf16.gmra.mrb[36].mxu0 %vm1271_vm1, %v2213_v35  ;;  %v2580_v16 = vpop.permute.xlu0 %2579 }
 0x6d8   : > { %8067 = vmatprep.mubr.msk.bf16.mxu0 %vm1271_vm1, %v2215_v34 }
 0x6d9   : > { %8082 = vmatpush3.bf16.msra.mxu1 %v2574_v41 }
 0x6da   : > { %8083 = vmatprep.subr.bf16.mxu1 %v2576_v39 }
 0x6db   : > { %v11662_v1 = vpop.permute.xlu0 %2704 }
 0x6dd   : > { %8084 = vmatpush3.bf16.msra.mxu1 %v2576_v39 }
 0x6de   : > { %8085 = vmatprep.subr.bf16.mxu1 %v2578_v33 }
 0x6df   : > { %8068 = vmatmul.mubr.msk.bf16.gmra.mrb[40].mxu0 %vm1271_vm1, %v2217_v29 }
 0x6e0   : > { %8071 = vmatprep.mubr.msk.bf16.mxu0 %vm1271_vm1, %v2219_v21 }
 0x6e1   : > { %8086 = vmatpush3.bf16.msra.mxu1 %v2578_v33 }
 0x6e2   : > { %8087 = vmatprep.subr.bf16.mxu1 %v2580_v16 }
 0x6e5   : > { %8088 = vmatpush3.bf16.msra.mxu1 %v2580_v16 }
 0x6e6   : > { %8089 = vmatprep.subr.bf16.mxu1 %v2582_v26 }
 0x6e7   : > { %8072 = vmatmul.mubr.msk.bf16.gmra.mrb[44].mxu0 %vm1271_vm1, %v2221_v56 }
 0x6e9   : > { %8090 = vmatpush3.bf16.msra.mxu1 %v2582_v26 }
 0x6ea   : > { %8563 = vmatprep.subr.msk.bf16.mxu1 %vm1271_vm1, %v11662_v1 }
 0x703   : > { %v11666_v63 = vpop.f32.mrb[0].mxu0 }
 0x704   : > { %14780 = vst [vmem:[#allocation36_spill] sm:$0xff] %v11666_v63  ;;  %v11668_v15 = vpop.f32.mrb[1].mxu0 }
 0x705   : > { %14781 = vst [vmem:[#allocation30_spill] sm:$0xff] %v11668_v15  ;;  %v11670_v47 = vpop.f32.mrb[2].mxu0 }
 0x706   : > { %14782 = vst [vmem:[#allocation38_spill] sm:$0xff] %v11670_v47  ;;  %v11672_v14 = vpop.f32.mrb[3].mxu0 }
 0x707   : > { %14783 = vst [vmem:[#allocation37_spill] sm:$0xff] %v11672_v14 }
 0x70b   : > { %v11674_v53 = vpop.f32.mrb[4].mxu0 }
 0x70c   : > { %14784 = vst [vmem:[#allocation39_spill] sm:$0xff] %v11674_v53  ;;  %v11676_v7 = vpop.f32.mrb[5].mxu0 }
 0x70d   : > { %14785 = vst [vmem:[#allocation40_spill] sm:$0xff] %v11676_v7  ;;  %v11678_v24 = vpop.f32.mrb[6].mxu0 }
 0x70e   : > { %14786 = vst [vmem:[#allocation41_spill] sm:$0xff] %v11678_v24  ;;  %v11680_v38 = vpop.f32.mrb[7].mxu0 }
 0x70f   : > { %14787 = vst [vmem:[#allocation42_spill] sm:$0xff] %v11680_v38 }
 0x714   : > { %v11682_v36 = vpop.f32.mrb[8].mxu0 }
 0x715   : > { %14788 = vst [vmem:[#allocation43_spill] sm:$0xff] %v11682_v36  ;;  %v11684_v9 = vpop.f32.mrb[9].mxu0 }
 0x716   : > { %14789 = vst [vmem:[#allocation44_spill] sm:$0xff] %v11684_v9  ;;  %v11686_v49 = vpop.f32.mrb[10].mxu0 }
 0x717   : > { %14790 = vst [vmem:[#allocation45_spill] sm:$0xff] %v11686_v49  ;;  %v11688_v59 = vpop.f32.mrb[11].mxu0 }
 0x718   : > { %14791 = vst [vmem:[#allocation46_spill] sm:$0xff] %v11688_v59 }
 0x71c   : > { %v11690_v30 = vpop.f32.mrb[12].mxu0 }
 0x71d   : > { %14792 = vst [vmem:[#allocation47_spill] sm:$0xff] %v11690_v30  ;;  %v11692_v46 = vpop.f32.mrb[13].mxu0 }
 0x71e   : > { %14793 = vst [vmem:[#allocation48_spill] sm:$0xff] %v11692_v46  ;;  %v11694_v54 = vpop.f32.mrb[14].mxu0 }
 0x71f   : > { %14794 = vst [vmem:[#allocation49_spill] sm:$0xff] %v11694_v54  ;;  %v11696_v4 = vpop.f32.mrb[15].mxu0 }
 0x720   : > { %14795 = vst [vmem:[#allocation50_spill] sm:$0xff] %v11696_v4 }
 0x74e   : > { %v11698_v58 = vpop.f32.mrb[16].mxu0 }
 0x74f   : > { %v11700_v52 = vpop.f32.mrb[17].mxu0 }
 0x750   : > { %14796 = vst [vmem:[#allocation51_spill] sm:$0xff] %v11700_v52  ;;  %v11702_v8 = vpop.f32.mrb[18].mxu0 }
 0x751   : > { %v11706_v13 = vpop.f32.mrb[19].mxu0 }
 0x752   : > { %14797 = vst [vmem:[#allocation52_spill] sm:$0xff] %v11706_v13 }
 0x78a   : > { %v11710_v44 = vpop.f32.mrb[20].mxu0 }
 0x78b   : > { %v11712_v2 = vpop.f32.mrb[21].mxu0 }
 0x78c   : > { %14798 = vst [vmem:[#allocation53_spill] sm:$0xff] %v11712_v2  ;;  %v11714_v42 = vpop.f32.mrb[22].mxu0 }
 0x78d   : > { %v11718_v48 = vpop.f32.mrb[23].mxu0 }
 0x78e   : > { %14799 = vst [vmem:[#allocation54_spill] sm:$0xff] %v11718_v48 }
 0x792   : > { %v11722_v61 = vpop.f32.mrb[24].mxu0 }
 0x793   : > { %v11724_v35 = vpop.f32.mrb[25].mxu0 }
 0x794   : > { %14800 = vst [vmem:[#allocation55_spill] sm:$0xff] %v11724_v35  ;;  %v11726_v10 = vpop.f32.mrb[26].mxu0 }
 0x795   : > { %v11730_v3 = vpop.f32.mrb[27].mxu0 }
 0x796   : > { %14801 = vst [vmem:[#allocation56_spill] sm:$0xff] %v11730_v3 }
 0x79a   : > { %v11734_v40 = vpop.f32.mrb[28].mxu0 }
 0x79b   : > { %14802 = vst [vmem:[#allocation57_spill] sm:$0xff] %v11734_v40  ;;  %v11736_v6 = vpop.f32.mrb[29].mxu0 }
 0x79c   : > { %14803 = vst [vmem:[#allocation58_spill] sm:$0xff] %v11736_v6  ;;  %v11738_v5 = vpop.f32.mrb[30].mxu0 }
 0x79d   : > { %14804 = vst [vmem:[#allocation59_spill] sm:$0xff] %v11738_v5  ;;  %v11742_v18 = vpop.f32.mrb[31].mxu0 }
 0x79e   : > { %14805 = vst [vmem:[#allocation60_spill] sm:$0xff] %v11742_v18 }
 0x7a2   : > { %v8061_v29 = vpop.f32.mrb[32].mxu0 }
 0x7a3   : > { %v2385_v25 = vmul.f32 0.35355338, %v8061_v29  ;;  %v2320_v34 = vpop.f32.mrb[33].mxu0 }
 0x7a4   : > { %v8062_v17 = vpop.f32.mrb[34].mxu0  ;;  %v2383_v22 = vmul.f32 0.35355338, %v2320_v34 }
 0x7a5   : > { %v2323_v56 = vpop.f32.mrb[35].mxu0  ;;  %v11748_v60 = vsel %vm1238_vm2, %v2385_v25, -1e+30  ;;  %v2386_v0 = vmul.f32 0.35355338, %v8062_v17 }
 0x7a6   : > { %v2384_v12 = vmul.f32 0.35355338, %v2323_v56  ;;  %2419 = vmax.xlane.f32.xlu0 %v11748_v60  ;;  %v11758_v39 = vsel %vm1238_vm2, %v2383_v22, -1e+30 }
 0x7a7   : > { %v11763_v29 = vsel %vm1238_vm2, %v2386_v0, -1e+30 }
 0x7a8   : > { %v11753_v41 = vsel %vm1238_vm2, %v2384_v12, -1e+30 }
 0x7a9   : > { %2417 = vmax.xlane.f32.xlu1 %v11753_v41 }
 0x7aa   : > { %2415 = vmax.xlane.f32.xlu0 %v11758_v39  ;;  %v8065_v33 = vpop.f32.mrb[36].mxu0 }
 0x7ab   : > { %v2336_v16 = vpop.f32.mrb[37].mxu0  ;;  %v2389_v25 = vmul.f32 0.35355338, %v8065_v33 }
 0x7ac   : > { %v8066_v26 = vpop.f32.mrb[38].mxu0  ;;  %v2387_v22 = vmul.f32 0.35355338, %v2336_v16 }
 0x7ad   : > { %v2390_v34 = vmul.f32 0.35355338, %v8066_v26  ;;  %v2339_v17 = vpop.f32.mrb[39].mxu0  ;;  %v11773_v55 = vsel %vm1238_vm2, %v2389_v25, -1e+30 }
 0x7ae   : > { %2421 = vmax.xlane.f32.xlu0 %v11763_v29  ;;  %v2388_v56 = vmul.f32 0.35355338, %v2339_v17  ;;  %v11783_v16 = vsel %vm1238_vm2, %v2387_v22, -1e+30 }
 0x7af   : > { %v11768_v12 = vsel %vm1238_vm2, %v2390_v34, -1e+30 }
 0x7b0   : > { %2429 = vmax.xlane.f32.xlu1 %v11768_v12  ;;  %v11778_v26 = vsel %vm1238_vm2, %v2388_v56, -1e+30 }
 0x7b2   : > { %2427 = vmax.xlane.f32.xlu0 %v11773_v55  ;;  %v8069_v0 = vpop.f32.mrb[40].mxu0 }
 0x7b3   : > { %v2352_v33 = vpop.f32.mrb[41].mxu0  ;;  %v2393_v34 = vmul.f32 0.35355338, %v8069_v0 }
 0x7b4   : > { %2425 = vmax.xlane.f32.xlu1 %v11778_v26  ;;  %v8070_v17 = vpop.f32.mrb[42].mxu0  ;;  %v2391_v56 = vmul.f32 0.35355338, %v2352_v33 }
 0x7b5   : > { %v2394_v19 = vmul.f32 0.35355338, %v8070_v17  ;;  %v2355_v43 = vpop.f32.mrb[43].mxu0  ;;  %v11793_v23 = vsel %vm1238_vm2, %v2393_v34, -1e+30 }
 0x7b6   : > { %2423 = vmax.xlane.f32.xlu0 %v11783_v16  ;;  %v2392_v25 = vmul.f32 0.35355338, %v2355_v43  ;;  %v11803_v33 = vsel %vm1238_vm2, %v2391_v56, -1e+30 }
 0x7b7   : > { %v11788_v45 = vsel %vm1238_vm2, %v2394_v19, -1e+30 }
 0x7b8   : > { %2437 = vmax.xlane.f32.xlu1 %v11788_v45  ;;  %v11798_v17 = vsel %vm1238_vm2, %v2392_v25, -1e+30 }
 0x7ba   : > { %2435 = vmax.xlane.f32.xlu0 %v11793_v23  ;;  %v8073_v22 = vpop.f32.mrb[44].mxu0 }
 0x7bb   : > { %v2368_v0 = vpop.f32.mrb[45].mxu0  ;;  %v2397_v19 = vmul.f32 0.35355338, %v8073_v22 }
 0x7bc   : > { %2433 = vmax.xlane.f32.xlu1 %v11798_v17  ;;  %v8074_v43 = vpop.f32.mrb[46].mxu0  ;;  %v2395_v34 = vmul.f32 0.35355338, %v2368_v0 }
 0x7bd   : > { %v2371_v27 = vpop.f32.mrb[47].mxu0  ;;  %v11808_v62 = vsel %vm1238_vm2, %v2397_v19, -1e+30  ;;  %v2398_v56 = vmul.f32 0.35355338, %v8074_v43 }
 0x7be   : > { %2431 = vmax.xlane.f32.xlu0 %v11803_v33  ;;  %v11813_v25 = vsel %vm1238_vm2, %v2395_v34, -1e+30  ;;  %v2396_v22 = vmul.f32 0.35355338, %v2371_v27  ;;  %v11830_v34 = vpop.permute.xlu1 %2706 }
 0x7bf   : > { %v11822_v0 = vsel %vm1238_vm2, %v2398_v56, -1e+30 }
 0x7c0   : > { %v11827_v19 = vsel %vm1238_vm2, %v2396_v22, -1e+30 }
 0x7c2   : > { %2443 = vmax.xlane.f32.xlu0 %v11808_v62 }
 0x7c6   : > { %2439 = vmax.xlane.f32.xlu0 %v11813_v25 }
 0x7cd   : > { %2710 = vrot.lane.b32.xlu1 %v10933_v50, %s10094_s20 }
 0x7dc   : > { %2708 = vrot.lane.b32.xlu0 %v10935_v51, %s10094_s20 }
 0x7f1   : > { %2445 = vmax.xlane.f32.xlu1 %v11822_v0 }
 0x7f5   : > { %2441 = vmax.xlane.f32.xlu1 %v11827_v19 }
 0x833   : > { %v2420_v28 = vpop.xlane.xlu0 %2419 }
 0x834   : > { %v2449_v46 = vsub.f32 %v11748_v60, %v2420_v28 }
 0x836   : > { %v2467_v4 = vmul.f32 1.442695, %v2449_v46  ;;  %v2418_v43 = vpop.xlane.xlu1 %2417 }
 0x837   : > { %v2448_v27 = vsub.f32 %v11753_v41, %v2418_v43  ;;  %v2416_v9 = vpop.xlane.xlu0 %2415 }
 0x838   : > { %9191 = vpow2.f32 %v2467_v4  ;;  %v2447_v56 = vsub.f32 %v11758_v39, %v2416_v9 }
 0x839   : > { %v2465_v59 = vmul.f32 1.442695, %v2448_v27 }
 0x83a   : > { %v2463_v7 = vmul.f32 1.442695, %v2447_v56 }
 0x83b   : > { %9193 = vpow2.f32 %v2465_v59  ;;  %v2422_v22 = vpop.xlane.xlu0 %2421 }
 0x83c   : > { %9195 = vpow2.f32 %v2463_v7  ;;  %v2450_v38 = vsub.f32 %v11763_v29, %v2422_v22 }
 0x83e   : > { %v2469_v15 = vmul.f32 1.442695, %v2450_v38  ;;  %v2430_v38 = vpop.xlane.xlu1 %2429 }
 0x83f   : > { %v2428_v7 = vpop.xlane.xlu0 %2427  ;;  %v2454_v22 = vsub.f32 %v11768_v12, %v2430_v38 }
 0x840   : > { %9197 = vpow2.f32 %v2469_v15  ;;  %v2453_v4 = vsub.f32 %v11773_v55, %v2428_v7 }
 0x841   : > { %v2477_v49 = vmul.f32 1.442695, %v2454_v22 }
 0x842   : > { %v11836_v14 = vpop.eup %9191  ;;  %v2426_v60 = vpop.xlane.xlu1 %2425  ;;  %v2475_v39 = vmul.f32 1.442695, %v2453_v4 }
 0x843   : > { %2499 = vadd.xlane.f32.xlu1 %v11836_v14  ;;  %v2424_v15 = vpop.xlane.xlu0 %2423  ;;  %v2452_v43 = vsub.f32 %v11778_v26, %v2426_v60 }
 0x844   : > { %v2451_v29 = vsub.f32 %v11783_v16, %v2424_v15  ;;  %9199 = vpow2.f32 %v2475_v39 }
 0x845   : > { %v11839_v46 = vpop.eup %9193  ;;  %v2473_v54 = vmul.f32 1.442695, %v2452_v43 }
 0x846   : > { %v11841_v28 = vpop.eup %9195  ;;  %2497 = vadd.xlane.f32.xlu0 %v11839_v46  ;;  %v2438_v27 = vpop.xlane.xlu1 %2437  ;;  %v2471_v30 = vmul.f32 1.442695, %v2451_v29 }
 0x847   : > { %2495 = vadd.xlane.f32.xlu1 %v11841_v28  ;;  %v2436_v59 = vpop.xlane.xlu0 %2435  ;;  %v2458_v12 = vsub.f32 %v11788_v45, %v2438_v27 }
 0x848   : > { %v2457_v36 = vsub.f32 %v11793_v23, %v2436_v59  ;;  %9201 = vpow2.f32 %v2471_v30 }
 0x849   : > { %9203 = vpow2.f32 %v2473_v54 }
 0x84a   : > { %v11845_v9 = vpop.eup %9197  ;;  %v2434_v53 = vpop.xlane.xlu1 %2433  ;;  %v2483_v7 = vmul.f32 1.442695, %v2457_v36  ;;  %9205 = vpow2.f32 %v2477_v49  ;;  %v2485_v36 = vmul.f32 1.442695, %v2458_v12 }
 0x84b   : > { %2501 = vadd.xlane.f32.xlu1 %v11845_v9  ;;  %v2432_v41 = vpop.xlane.xlu0 %2431  ;;  %v2456_v54 = vsub.f32 %v11798_v17, %v2434_v53 }
 0x84c   : > { %v2455_v16 = vsub.f32 %v11803_v33, %v2432_v41  ;;  %9207 = vpow2.f32 %v2483_v7 }
 0x84e   : > { %v2479_v38 = vmul.f32 1.442695, %v2455_v16  ;;  %v11861_v60 = vpop.eup %9199  ;;  %v11863_v23 = vpop.permute.xlu1 %2710 }
 0x84f   : > { %v2444_v56 = vpop.xlane.xlu0 %2443 }
 0x850   : > { %v2461_v55 = vsub.f32 %v11808_v62, %v2444_v56 }
 0x852   : > { %v2491_v26 = vmul.f32 1.442695, %v2461_v55  ;;  %v11867_v49 = vpop.eup %9201 }
 0x853   : > { %v2440_v15 = vpop.xlane.xlu0 %2439  ;;  %v11869_v33 = vpop.eup %9203 }
 0x854   : > { %v2459_v4 = vsub.f32 %v11813_v25, %v2440_v15  ;;  %9209 = vpow2.f32 %v2491_v26  ;;  %v2481_v25 = vmul.f32 1.442695, %v2456_v54  ;;  %v11874_v41 = vpop.eup %9205  ;;  %v2745_v54 = vsel %vm1271_vm1, %v11662_v1, 0 }
 0x855   : > { %9211 = vpow2.f32 %v2479_v38 }
 0x856   : > { %v2487_v30 = vmul.f32 1.442695, %v2459_v4  ;;  %v11876_v53 = vpop.eup %9207 }
 0x858   : > { %9213 = vpow2.f32 %v2487_v30 }
 0x859   : > { %9215 = vpow2.f32 %v2485_v36 }
 0x85c   : > { %2712 = vrot.lane.b32.xlu0 %v10943_v31, %s10094_s20  ;;  %2714 = vrot.lane.b32.xlu1 %v10941_v11, %s10094_s20 }
 0x85e   : > { %v11881_v29 = vpop.eup %9209 }
 0x85f   : > { %v11883_v43 = vpop.eup %9211 }
 0x862   : > { %v11887_v27 = vpop.eup %9213 }
 0x863   : > { %v11889_v56 = vpop.eup %9215 }
 0x87b   : > { %2507 = vadd.xlane.f32.xlu0 %v11861_v60 }
 0x87e   : > { %v2446_v62 = vpop.xlane.xlu1 %2445 }
 0x87f   : > { %v2462_v45 = vsub.f32 %v11822_v0, %v2446_v62  ;;  %2503 = vadd.xlane.f32.xlu0 %v11867_v49 }
 0x880   : > { %2505 = vadd.xlane.f32.xlu1 %v11869_v33 }
 0x881   : > { %v2493_v59 = vmul.f32 1.442695, %v2462_v45 }
 0x882   : > { %v2442_v39 = vpop.xlane.xlu1 %2441 }
 0x883   : > { %9217 = vpow2.f32 %v2493_v59  ;;  %v2460_v17 = vsub.f32 %v11827_v19, %v2442_v39  ;;  %2509 = vadd.xlane.f32.xlu0 %v11874_v41 }
 0x884   : > { %2515 = vadd.xlane.f32.xlu1 %v11876_v53  ;;  %9219 = vpow2.f32 %v2481_v25 }
 0x885   : > { %v2489_v0 = vmul.f32 1.442695, %v2460_v17 }
 0x887   : > { %2523 = vadd.xlane.f32.xlu0 %v11881_v29  ;;  %9221 = vpow2.f32 %v2489_v0 }
 0x888   : > { %2511 = vadd.xlane.f32.xlu1 %v11883_v43 }
 0x88b   : > { %2519 = vadd.xlane.f32.xlu0 %v11887_v27 }
 0x88c   : > { %2517 = vadd.xlane.f32.xlu1 %v11889_v56 }
 0x88d   : > { %v11893_v19 = vpop.eup %9217 }
 0x88e   : > { %v11895_v22 = vpop.eup %9219 }
 0x88f   : > { %2525 = vadd.xlane.f32.xlu0 %v11893_v19 }
 0x890   : > { %2513 = vadd.xlane.f32.xlu1 %v11895_v22 }
 0x891   : > { %v11899_v55 = vpop.eup %9221 }
 0x894   : > { %2521 = vadd.xlane.f32.xlu1 %v11899_v55 }
 0x8a5   : > { %2718 = vrot.lane.b32.xlu1 %v10954_v57, %s10094_s20  ;;  %2716 = vrot.lane.b32.xlu0 %v10956_v37, %s10094_s20 }
 0x8a9   : > { %2690 = vrot.lane.b32.xlu1 %v10921_v32, %s10095_s28  ;;  %2688 = vrot.lane.b32.xlu0 %v10923_v20, %s10095_s28 }
 0x8ad   : > { %2694 = vrot.lane.b32.xlu1 %v10933_v50, %s10095_s28  ;;  %2692 = vrot.lane.b32.xlu0 %v10935_v51, %s10095_s28 }
 0x8b1   : > { %2698 = vrot.lane.b32.xlu1 %v10941_v11, %s10095_s28  ;;  %2696 = vrot.lane.b32.xlu0 %v10943_v31, %s10095_s28 }
 0x8b5   : > { %2702 = vrot.lane.b32.xlu1 %v10954_v57, %s10095_s28  ;;  %2700 = vrot.lane.b32.xlu0 %v10956_v37, %s10095_s28 }
 0x8b9   : > { %3051 = vrot.lane.b32.xlu1 %v10921_v32, %s10096_s24  ;;  %3049 = vrot.lane.b32.xlu0 %v10923_v20, %s10096_s24  ;;  %v14807_v32 = vld [vmem:[#allocation26_spill] sm:$0xff]  ;;  %v14808_v20 = vld [vmem:[#allocation27_spill] sm:$0xff] }
 0x8bd   : > { %3055 = vrot.lane.b32.xlu1 %v10933_v50, %s10096_s24  ;;  %3053 = vrot.lane.b32.xlu0 %v10935_v51, %s10096_s24  ;;  %v2709_v50 = vpop.permute.xlu0 %2708 }
 0x8c1   : > { %3059 = vrot.lane.b32.xlu1 %v10941_v11, %s10096_s24  ;;  %3057 = vrot.lane.b32.xlu0 %v10943_v31, %s10096_s24 }
 0x8c5   : > { %3063 = vrot.lane.b32.xlu1 %v10954_v57, %s10096_s24  ;;  %3061 = vrot.lane.b32.xlu0 %v10956_v37, %s10096_s24 }
 0x8c9   : > { %3430 = vrot.lane.b32.xlu1 %v14807_v32, %s10086_s16  ;;  %3428 = vrot.lane.b32.xlu0 %v14808_v20, %s10086_s16 }
 0x8d0   : > { %v2500_v51 = vpop.xlane.xlu1 %2499 }
 0x8d3   : > { %v2498_v7 = vpop.xlane.xlu0 %2497 }
 0x8d4   : > { %9223 = vrcp.f32 %v2498_v7  ;;  %v2496_v11 = vpop.xlane.xlu1 %2495 }
 0x8d5   : > { %9225 = vrcp.f32 %v2496_v11 }
 0x8d6   : > { %9227 = vrcp.f32 %v2500_v51 }
 0x8d7   : > { %v2713_v1 = vpop.permute.xlu0 %2712 }
 0x8d8   : > { %v2502_v31 = vpop.xlane.xlu1 %2501 }
 0x8d9   : > { %9229 = vrcp.f32 %v2502_v31 }
 0x8de   : > { %v9224_v16 = vpop.eup %9223 }
 0x8df   : > { %v9226_v57 = vpop.eup %9225  ;;  %v2544_v15 = vmul.f32 %v9224_v16, %v11839_v46  ;;  %v2748_v46 = vsel %vm1271_vm1, %v11830_v34, 0 }
 0x8e0   : > { %v2543_v37 = vmul.f32 %v9226_v57, %v11841_v28  ;;  %v9228_v26 = vpop.eup %9227  ;;  %v2754_v28 = vsel %vm1271_vm1, %v11863_v23, 0 }
 0x8e1   : > { %v2545_v38 = vmul.f32 %v9228_v26, %v11836_v14  ;;  %v2751_v14 = vsel %vm1271_vm1, %v2709_v50, 0 }
 0x8e2   : > { %v2559_v4 = vpack.c.bf16 %v2544_v15, %v2543_v37 }
 0x8e3   : > { %v9230_v12 = vpop.eup %9229 }
 0x8e4   : > { %v2546_v30 = vmul.f32 %v9230_v12, %v11845_v9  ;;  %8091 = vmatprep.mubr.bf16.mxu1 %v2559_v4  ;;  %v2757_v9 = vsel %vm1271_vm1, %v2713_v1, 0 }
 0x8e6   : > { %v2560_v36 = vpack.c.bf16 %v2546_v30, %v2545_v38 }
 0x8e8   : > { %8092 = vmatmul.mubr.bf16.vlgmr.msra.gmra.mrb[64].mxu1 %v2560_v36 }
 0x8e9   : > { %8108 = vmatpush3.bf16.xpose.msra.mxu1 %v2745_v54 }
 0x8ea   : > { %8564 = vmatprep.subr.msk.bf16.mxu1 %vm1271_vm1, %v11830_v34  ;;  %v2715_v34 = vpop.permute.xlu1 %2714 }
 0x8eb   : > { %v2760_v59 = vsel %vm1271_vm1, %v2715_v34, 0 }
 0x8f1   : > { %8110 = vmatpush3.bf16.xpose.msra.mxu1 %v2748_v46 }
 0x8f2   : > { %8565 = vmatprep.subr.msk.bf16.mxu1 %vm1271_vm1, %v2709_v50 }
 0x8f9   : > { %8112 = vmatpush3.bf16.xpose.msra.mxu1 %v2751_v14 }
 0x8fa   : > { %8566 = vmatprep.subr.msk.bf16.mxu1 %vm1271_vm1, %v11863_v23 }
 0x901   : > { %8114 = vmatpush3.bf16.xpose.msra.mxu1 %v2754_v28 }
 0x902   : > { %8567 = vmatprep.subr.msk.bf16.mxu1 %vm1271_vm1, %v2713_v1 }
 0x908   : > { %v2508_v62 = vpop.xlane.xlu0 %2507 }
 0x909   : > { %8116 = vmatpush3.bf16.xpose.msra.mxu1 %v2757_v9 }
 0x90a   : > { %8568 = vmatprep.subr.msk.bf16.mxu1 %vm1271_vm1, %v2715_v34 }
 0x90c   : > { %v2504_v45 = vpop.xlane.xlu0 %2503 }
 0x90d   : > { %9231 = vrcp.f32 %v2504_v45  ;;  %v2506_v25 = vpop.xlane.xlu1 %2505 }
 0x90e   : > { %9233 = vrcp.f32 %v2506_v25 }
 0x90f   : > { %9235 = vrcp.f32 %v2508_v62 }
 0x910   : > { %v2510_v39 = vpop.xlane.xlu0 %2509 }
 0x911   : > { %8118 = vmatpush3.bf16.xpose.msra.mxu1 %v2760_v59  ;;  %9237 = vrcp.f32 %v2510_v39  ;;  %v2516_v23 = vpop.xlane.xlu1 %2515 }
 0x914   : > { %v2524_v17 = vpop.xlane.xlu0 %2523 }
 0x915   : > { %v2512_v0 = vpop.xlane.xlu1 %2511 }
 0x917   : > { %v9232_v50 = vpop.eup %9231 }
 0x918   : > { %v9234_v51 = vpop.eup %9233  ;;  %v2520_v7 = vpop.xlane.xlu0 %2519  ;;  %v2547_v11 = vmul.f32 %v9232_v50, %v11867_v49 }
 0x919   : > { %v9236_v31 = vpop.eup %9235  ;;  %v2518_v16 = vpop.xlane.xlu1 %2517  ;;  %v2548_v57 = vmul.f32 %v9234_v51, %v11869_v33 }
 0x91a   : > { %9239 = vrcp.f32 %v2518_v16  ;;  %v2549_v4 = vmul.f32 %v9236_v31, %v11861_v60 }
 0x91b   : > { %v9238_v15 = vpop.eup %9237  ;;  %v2561_v37 = vpack.c.bf16 %v2548_v57, %v2547_v11  ;;  %9241 = vrcp.f32 %v2512_v0 }
 0x91c   : > { %v2526_v26 = vpop.xlane.xlu0 %2525  ;;  %v2550_v12 = vmul.f32 %v9238_v15, %v11874_v41  ;;  %9243 = vrcp.f32 %v2516_v23 }
 0x91d   : > { %v2514_v38 = vpop.xlane.xlu1 %2513  ;;  %8095 = vmatprep.mubr.bf16.mxu1 %v2561_v37 }
 0x91e   : > { %9245 = vrcp.f32 %v2514_v38  ;;  %v2562_v30 = vpack.c.bf16 %v2550_v12, %v2549_v4 }
 0x91f   : > { %9247 = vrcp.f32 %v2520_v7 }
 0x920   : > { %8096 = vmatmul.mubr.bf16.gmra.mrb[68].mxu1 %v2562_v30  ;;  %v2717_v49 = vpop.permute.xlu0 %2716 }
 0x921   : > { %v2522_v36 = vpop.xlane.xlu1 %2521  ;;  %8569 = vmatprep.subr.msk.bf16.mxu1 %vm1271_vm1, %v2717_v49  ;;  %v2763_v33 = vsel %vm1271_vm1, %v2717_v49, 0 }
 0x922   : > { %9249 = vrcp.f32 %v2522_v36  ;;  %8120 = vmatpush3.bf16.xpose.msra.mxu1 %v2763_v33 }
 0x923   : > { %9251 = vrcp.f32 %v2526_v26 }
 0x924   : > { %v2689_v54 = vpop.permute.xlu0 %2688  ;;  %v9240_v60 = vpop.eup %9239  ;;  %9253 = vrcp.f32 %v2524_v17 }
 0x925   : > { %v2719_v41 = vpop.permute.xlu1 %2718  ;;  %v9242_v46 = vpop.eup %9241  ;;  %v2554_v9 = vmul.f32 %v9240_v60, %v11889_v56 }
 0x926   : > { %8570 = vmatprep.subr.msk.bf16.mxu1 %vm1271_vm1, %v2719_v41  ;;  %v9244_v14 = vpop.eup %9243  ;;  %v2766_v34 = vsel %vm1271_vm1, %v2719_v41, 0  ;;  %v2551_v45 = vmul.f32 %v9242_v46, %v11883_v43 }
 0x927   : > { %v2553_v39 = vmul.f32 %v9244_v14, %v11876_v53 }
 0x928   : > { %v9246_v28 = vpop.eup %9245  ;;  %v2693_v1 = vpop.permute.xlu0 %2692 }
 0x929   : > { %v2691_v62 = vpop.permute.xlu1 %2690  ;;  %v2552_v25 = vmul.f32 %v9246_v28, %v11895_v22  ;;  %v9248_v59 = vpop.eup %9247  ;;  %v2564_v50 = vpack.c.bf16 %v2554_v9, %v2553_v39 }
 0x92a   : > { %8122 = vmatpush3.bf16.xpose.msra.mxu1 %v2766_v34  ;;  %v2555_v56 = vmul.f32 %v9248_v59, %v11887_v27 }
 0x92b   : > { %v2563_v23 = vpack.c.bf16 %v2552_v25, %v2551_v45 }
 0x92c   : > { %v9250_v17 = vpop.eup %9249  ;;  %v2697_v0 = vpop.permute.xlu0 %2696 }
 0x92d   : > { %v9252_v51 = vpop.eup %9251  ;;  %v2695_v7 = vpop.permute.xlu1 %2694  ;;  %8099 = vmatprep.mubr.bf16.mxu1 %v2563_v23  ;;  %v2556_v11 = vmul.f32 %v9250_v17, %v11899_v55 }
 0x92e   : > { %8100 = vmatmul.mubr.bf16.gmra.mrb[72].mxu1 %v2564_v50  ;;  %v9254_v31 = vpop.eup %9253  ;;  %v2558_v22 = vmul.f32 %v9252_v51, %v11893_v19 }
 0x92f   : > { %v2565_v43 = vpack.c.bf16 %v2556_v11, %v2555_v56  ;;  %v2557_v53 = vmul.f32 %v9254_v31, %v11881_v29 }
 0x930   : > { %v2701_v16 = vpop.permute.xlu0 %2700 }
 0x931   : > { %v2699_v57 = vpop.permute.xlu1 %2698  ;;  %8103 = vmatprep.mubr.bf16.mxu1 %v2565_v43  ;;  %v2566_v37 = vpack.c.bf16 %v2558_v22, %v2557_v53 }
 0x934   : > { %v3050_v15 = vpop.permute.xlu0 %3049 }
 0x935   : > { %v2703_v26 = vpop.permute.xlu1 %2702  ;;  %8139 = vmatprep.subr.bf16.mxu0 %v3050_v15 }
 0x936   : > { %8104 = vmatmul.mubr.bf16.gmra.mrb[76].mxu1 %v2566_v37  ;;  %8140 = vmatpush3.bf16.msra.mxu0 %v3050_v15 }
 0x937   : > { %8123 = vmatprep.mubr.msk.bf16.mxu1 %vm1271_vm1, %v2689_v54 }
 0x938   : > { %v3054_v55 = vpop.permute.xlu0 %3053 }
 0x939   : > { %v3052_v27 = vpop.permute.xlu1 %3051 }
 0x93a   : > { %8141 = vmatprep.subr.bf16.mxu0 %v3052_v27 }
 0x93b   : > { %8142 = vmatpush3.bf16.msra.mxu0 %v3052_v27 }
 0x93c   : > { %8143 = vmatprep.subr.bf16.mxu0 %v3054_v55  ;;  %v3058_v29 = vpop.permute.xlu0 %3057 }
 0x93d   : > { %v3056_v19 = vpop.permute.xlu1 %3055 }
 0x93e   : > { %8124 = vmatmul.mubr.msk.bf16.vlgmr.msra.gmra.mrb[80].mxu1 %vm1271_vm1, %v2691_v62 }
 0x93f   : > { %8127 = vmatprep.mubr.msk.bf16.mxu1 %vm1271_vm1, %v2693_v1  ;;  %8144 = vmatpush3.bf16.msra.mxu0 %v3054_v55 }
 0x940   : > { %8145 = vmatprep.subr.bf16.mxu0 %v3056_v19  ;;  %v3062_v12 = vpop.permute.xlu0 %3061 }
 0x941   : > { %v3060_v4 = vpop.permute.xlu1 %3059 }
 0x943   : > { %8146 = vmatpush3.bf16.msra.mxu0 %v3056_v19 }
 0x944   : > { %8147 = vmatprep.subr.bf16.mxu0 %v3058_v29  ;;  %v11985_v30 = vpop.permute.xlu0 %3428 }
 0x945   : > { %v3064_v38 = vpop.permute.xlu1 %3063 }
 0x946   : > { %8128 = vmatmul.mubr.msk.bf16.gmra.mrb[84].mxu1 %vm1271_vm1, %v2695_v7 }
 0x947   : > { %8131 = vmatprep.mubr.msk.bf16.mxu1 %vm1271_vm1, %v2697_v0  ;;  %8148 = vmatpush3.bf16.msra.mxu0 %v3058_v29 }
 0x948   : > { %8149 = vmatprep.subr.bf16.mxu0 %v3060_v4 }
 0x949   : > { %v12122_v1 = vpop.permute.xlu1 %3430 }
 0x94b   : > { %8150 = vmatpush3.bf16.msra.mxu0 %v3060_v4 }
 0x94c   : > { %8151 = vmatprep.subr.bf16.mxu0 %v3062_v12 }
 0x94e   : > { %8132 = vmatmul.mubr.msk.bf16.gmra.mrb[88].mxu1 %vm1271_vm1, %v2699_v57 }
 0x94f   : > { %8135 = vmatprep.mubr.msk.bf16.mxu1 %vm1271_vm1, %v2701_v16  ;;  %8152 = vmatpush3.bf16.msra.mxu0 %v3062_v12 }
 0x950   : > { %8153 = vmatprep.subr.bf16.mxu0 %v3064_v38 }
 0x953   : > { %8154 = vmatpush3.bf16.msra.mxu0 %v3064_v38 }
 0x954   : > { %8571 = vmatprep.subr.msk.bf16.mxu0 %vm1271_vm1, %v11985_v30 }
 0x956   : > { %8136 = vmatmul.mubr.msk.bf16.gmra.mrb[92].mxu1 %vm1271_vm1, %v2703_v26 }
 0x9bb   : > { %v11990_v49 = vpop.f32.mrb[64].mxu1 }
 0x9bc   : > { %v11992_v36 = vpop.f32.mrb[65].mxu1 }
 0x9bd   : > { %v11994_v33 = vpop.f32.mrb[66].mxu1 }
 0x9be   : > { %v11998_v60 = vpop.f32.mrb[67].mxu1 }
 0x9f3   : > { %v12002_v46 = vpop.f32.mrb[68].mxu1 }
 0x9f4   : > { %v12004_v14 = vpop.f32.mrb[69].mxu1 }
 0x9f5   : > { %14809 = vst [vmem:[#allocation35_spill] sm:$0xff] %v12004_v14  ;;  %v12006_v28 = vpop.f32.mrb[70].mxu1 }
 0x9f6   : > { %v12010_v9 = vpop.f32.mrb[71].mxu1 }
 0x9f7   : > { %14810 = vst [vmem:[#allocation26_spill] sm:$0xff] %v12010_v9 }
 0xa01   : > { %v12014_v34 = vpop.f32.mrb[72].mxu1 }
 0xa02   : > { %v12016_v45 = vpop.f32.mrb[73].mxu1 }
 0xa03   : > { %14811 = vst [vmem:[#allocation27_spill] sm:$0xff] %v12016_v45  ;;  %v12018_v25 = vpop.f32.mrb[74].mxu1 }
 0xa04   : > { %v12022_v39 = vpop.f32.mrb[75].mxu1 }
 0xa05   : > { %14812 = vst [vmem:[#allocation61_spill] sm:$0xff] %v12022_v39 }
 0xa09   : > { %v12026_v17 = vpop.f32.mrb[76].mxu1 }
 0xa0a   : > { %14813 = vst [vmem:[#allocation62_spill] sm:$0xff] %v12026_v17  ;;  %v12028_v0 = vpop.f32.mrb[77].mxu1 }
 0xa0b   : > { %14814 = vst [vmem:[#allocation63_spill] sm:$0xff] %v12028_v0  ;;  %v12030_v50 = vpop.f32.mrb[78].mxu1 }
 0xa0c   : > { %14815 = vst [vmem:[#allocation64_spill] sm:$0xff] %v12030_v50  ;;  %v12034_v7 = vpop.f32.mrb[79].mxu1 }
 0xa0d   : > { %14816 = vst [vmem:[#allocation65_spill] sm:$0xff] %v12034_v7 }
 0xa11   : > { %v8125_v11 = vpop.f32.mrb[80].mxu1 }
 0xa12   : > { %v2867_v31 = vmul.f32 0.35355338, %v8125_v11  ;;  %v2802_v43 = vpop.f32.mrb[81].mxu1 }
 0xa13   : > { %v8126_v16 = vpop.f32.mrb[82].mxu1  ;;  %v2865_v22 = vmul.f32 0.35355338, %v2802_v43 }
 0xa14   : > { %v2805_v57 = vpop.f32.mrb[83].mxu1  ;;  %v12040_v53 = vsel %vm1238_vm2, %v2867_v31, -1e+30  ;;  %v2868_v37 = vmul.f32 0.35355338, %v8126_v16 }
 0xa15   : > { %v2866_v15 = vmul.f32 0.35355338, %v2805_v57  ;;  %2901 = vmax.xlane.f32.xlu0 %v12040_v53  ;;  %v12050_v27 = vsel %vm1238_vm2, %v2865_v22, -1e+30 }
 0xa16   : > { %v12055_v4 = vsel %vm1238_vm2, %v2868_v37, -1e+30 }
 0xa17   : > { %v12045_v26 = vsel %vm1238_vm2, %v2866_v15, -1e+30 }
 0xa18   : > { %2899 = vmax.xlane.f32.xlu1 %v12045_v26 }
 0xa19   : > { %2897 = vmax.xlane.f32.xlu0 %v12050_v27  ;;  %v8129_v55 = vpop.f32.mrb[84].mxu1 }
 0xa1a   : > { %v2818_v19 = vpop.f32.mrb[85].mxu1  ;;  %v2871_v12 = vmul.f32 0.35355338, %v8129_v55 }
 0xa1b   : > { %v8130_v29 = vpop.f32.mrb[86].mxu1  ;;  %v2869_v16 = vmul.f32 0.35355338, %v2818_v19 }
 0xa1c   : > { %v2872_v38 = vmul.f32 0.35355338, %v8130_v29  ;;  %v2821_v11 = vpop.f32.mrb[87].mxu1  ;;  %v12065_v22 = vsel %vm1238_vm2, %v2871_v12, -1e+30 }
 0xa1d   : > { %2903 = vmax.xlane.f32.xlu0 %v12055_v4  ;;  %v2870_v31 = vmul.f32 0.35355338, %v2821_v11  ;;  %v12075_v19 = vsel %vm1238_vm2, %v2869_v16, -1e+30 }
 0xa1e   : > { %v12060_v43 = vsel %vm1238_vm2, %v2872_v38, -1e+30 }
 0xa1f   : > { %2911 = vmax.xlane.f32.xlu1 %v12060_v43  ;;  %v12070_v37 = vsel %vm1238_vm2, %v2870_v31, -1e+30 }
 0xa21   : > { %2909 = vmax.xlane.f32.xlu0 %v12065_v22  ;;  %v8133_v57 = vpop.f32.mrb[88].mxu1 }
 0xa22   : > { %v2834_v15 = vpop.f32.mrb[89].mxu1  ;;  %v2875_v29 = vmul.f32 0.35355338, %v8133_v57 }
 0xa23   : > { %2907 = vmax.xlane.f32.xlu1 %v12070_v37  ;;  %v8134_v55 = vpop.f32.mrb[90].mxu1  ;;  %v2873_v31 = vmul.f32 0.35355338, %v2834_v15 }
 0xa24   : > { %v2876_v38 = vmul.f32 0.35355338, %v8134_v55  ;;  %v2837_v11 = vpop.f32.mrb[91].mxu1  ;;  %v12085_v23 = vsel %vm1238_vm2, %v2875_v29, -1e+30 }
 0xa25   : > { %2905 = vmax.xlane.f32.xlu0 %v12075_v19  ;;  %v2874_v12 = vmul.f32 0.35355338, %v2837_v11  ;;  %v12095_v15 = vsel %vm1238_vm2, %v2873_v31, -1e+30  ;;  %v14818_v31 = vld [vmem:[#allocation29_spill] sm:$0xff] }
 0xa26   : > { %v12080_v56 = vsel %vm1238_vm2, %v2876_v38, -1e+30 }
 0xa27   : > { %2919 = vmax.xlane.f32.xlu1 %v12080_v56  ;;  %v12090_v55 = vsel %vm1238_vm2, %v2874_v12, -1e+30 }
 0xa29   : > { %2917 = vmax.xlane.f32.xlu0 %v12085_v23  ;;  %v8137_v16 = vpop.f32.mrb[92].mxu1 }
 0xa2a   : > { %v2850_v57 = vpop.f32.mrb[93].mxu1  ;;  %v2879_v38 = vmul.f32 0.35355338, %v8137_v16  ;;  %v14817_v16 = vld [vmem:[#allocation28_spill] sm:$0xff] }
 0xa2b   : > { %2915 = vmax.xlane.f32.xlu1 %v12090_v55  ;;  %v8138_v11 = vpop.f32.mrb[94].mxu1  ;;  %v2877_v29 = vmul.f32 0.35355338, %v2850_v57 }
 0xa2c   : > { %v2853_v62 = vpop.f32.mrb[95].mxu1  ;;  %v12100_v51 = vsel %vm1238_vm2, %v2879_v38, -1e+30  ;;  %v2880_v59 = vmul.f32 0.35355338, %v8138_v11 }
 0xa2d   : > { %2913 = vmax.xlane.f32.xlu0 %v12095_v15  ;;  %v12105_v12 = vsel %vm1238_vm2, %v2877_v29, -1e+30  ;;  %v2878_v57 = vmul.f32 0.35355338, %v2853_v62 }
 0xa2e   : > { %v12114_v38 = vsel %vm1238_vm2, %v2880_v59, -1e+30 }
 0xa2f   : > { %v12119_v29 = vsel %vm1238_vm2, %v2878_v57, -1e+30 }
 0xa31   : > { %2925 = vmax.xlane.f32.xlu0 %v12100_v51 }
 0xa35   : > { %2921 = vmax.xlane.f32.xlu0 %v12105_v12 }
 0xa3c   : > { %3434 = vrot.lane.b32.xlu1 %v14817_v16, %s10086_s16 }
 0xa4b   : > { %3432 = vrot.lane.b32.xlu0 %v14818_v31, %s10086_s16 }
 0xa60   : > { %2927 = vmax.xlane.f32.xlu1 %v12114_v38 }
 0xa64   : > { %2923 = vmax.xlane.f32.xlu1 %v12119_v29 }
 0xaa2   : > { %v2902_v54 = vpop.xlane.xlu0 %2901 }
 0xaa3   : > { %v2931_v41 = vsub.f32 %v12040_v53, %v2902_v54 }
 0xaa5   : > { %v2949_v24 = vmul.f32 1.442695, %v2931_v41  ;;  %v2900_v11 = vpop.xlane.xlu1 %2899 }
 0xaa6   : > { %v2930_v62 = vsub.f32 %v12045_v26, %v2900_v11  ;;  %v2898_v63 = vpop.xlane.xlu0 %2897 }
 0xaa7   : > { %9255 = vpow2.f32 %v2949_v24  ;;  %v2929_v59 = vsub.f32 %v12050_v27, %v2898_v63  ;;  %v14819_v24 = vld [vmem:[#allocation32_spill] sm:$0xff] }
 0xaa8   : > { %v2947_v47 = vmul.f32 1.442695, %v2930_v62 }
 0xaa9   : > { %v2945_v0 = vmul.f32 1.442695, %v2929_v59 }
 0xaaa   : > { %9257 = vpow2.f32 %v2947_v47  ;;  %v2904_v57 = vpop.xlane.xlu0 %2903 }
 0xaab   : > { %9259 = vpow2.f32 %v2945_v0  ;;  %v2932_v7 = vsub.f32 %v12055_v4, %v2904_v57 }
 0xaad   : > { %v2951_v6 = vmul.f32 1.442695, %v2932_v7  ;;  %v2912_v7 = vpop.xlane.xlu1 %2911 }
 0xaae   : > { %v2910_v47 = vpop.xlane.xlu0 %2909  ;;  %v2936_v39 = vsub.f32 %v12060_v43, %v2912_v7 }
 0xaaf   : > { %9261 = vpow2.f32 %v2951_v6  ;;  %v14820_v6 = vld [vmem:[#allocation31_spill] sm:$0xff]  ;;  %v2935_v26 = vsub.f32 %v12065_v22, %v2910_v47 }
 0xab0   : > { %v2959_v9 = vmul.f32 1.442695, %v2936_v39 }
 0xab1   : > { %v12128_v18 = vpop.eup %9255  ;;  %v2908_v27 = vpop.xlane.xlu1 %2907  ;;  %v2957_v11 = vmul.f32 1.442695, %v2935_v26 }
 0xab2   : > { %2981 = vadd.xlane.f32.xlu1 %v12128_v18  ;;  %v2906_v0 = vpop.xlane.xlu0 %2905  ;;  %v2934_v59 = vsub.f32 %v12070_v37, %v2908_v27 }
 0xab3   : > { %v2933_v62 = vsub.f32 %v12075_v19, %v2906_v0  ;;  %9263 = vpow2.f32 %v2957_v11 }
 0xab4   : > { %v12131_v54 = vpop.eup %9257  ;;  %v2955_v3 = vmul.f32 1.442695, %v2934_v59 }
 0xab5   : > { %v12133_v41 = vpop.eup %9259  ;;  %2979 = vadd.xlane.f32.xlu0 %v12131_v54  ;;  %v2920_v57 = vpop.xlane.xlu1 %2919  ;;  %v2953_v35 = vmul.f32 1.442695, %v2933_v62 }
 0xab6   : > { %2977 = vadd.xlane.f32.xlu1 %v12133_v41  ;;  %v2918_v53 = vpop.xlane.xlu0 %2917  ;;  %v2940_v43 = vsub.f32 %v12080_v56, %v2920_v57 }
 0xab7   : > { %v2939_v14 = vsub.f32 %v12085_v23, %v2918_v53  ;;  %9265 = vpow2.f32 %v2953_v35 }
 0xab8   : > { %9267 = vpow2.f32 %v2955_v3  ;;  %v2967_v3 = vmul.f32 1.442695, %v2940_v43 }
 0xab9   : > { %v12137_v63 = vpop.eup %9261  ;;  %v2916_v2 = vpop.xlane.xlu1 %2915  ;;  %v2965_v47 = vmul.f32 1.442695, %v2939_v14  ;;  %9269 = vpow2.f32 %v2959_v9 }
 0xaba   : > { %2983 = vadd.xlane.f32.xlu1 %v12137_v63  ;;  %v2914_v4 = vpop.xlane.xlu0 %2913  ;;  %v2938_v14 = vsub.f32 %v12090_v55, %v2916_v2 }
 0xabb   : > { %v2937_v19 = vsub.f32 %v12095_v15, %v2914_v4  ;;  %9271 = vpow2.f32 %v2965_v47  ;;  %v14821_v47 = vld [vmem:[#allocation33_spill] sm:$0xff] }
 0xabc   : > { %v2963_v56 = vmul.f32 1.442695, %v2938_v14 }
 0xabd   : > { %v2961_v7 = vmul.f32 1.442695, %v2937_v19  ;;  %v12153_v27 = vpop.eup %9263  ;;  %v12155_v39 = vpop.permute.xlu1 %3434  ;;  %v14822_v19 = vld [vmem:[#allocation34_spill] sm:$0xff] }
 0xabe   : > { %v2926_v45 = vpop.xlane.xlu0 %2925 }
 0xabf   : > { %v2943_v22 = vsub.f32 %v12100_v51, %v2926_v45 }
 0xac1   : > { %v2973_v37 = vmul.f32 1.442695, %v2943_v22  ;;  %v12159_v9 = vpop.eup %9265 }
 0xac2   : > { %v2922_v0 = vpop.xlane.xlu0 %2921  ;;  %v12161_v23 = vpop.eup %9267 }
 0xac3   : > { %v2941_v26 = vsub.f32 %v12105_v12, %v2922_v0  ;;  %9273 = vpow2.f32 %v2973_v37  ;;  %v12166_v12 = vpop.eup %9269 }
 0xac4   : > { %9275 = vpow2.f32 %v2961_v7 }
 0xac5   : > { %v2969_v35 = vmul.f32 1.442695, %v2941_v26  ;;  %v12168_v2 = vpop.eup %9271 }
 0xac6   : > { %v3433_v0 = vpop.permute.xlu0 %3432 }
 0xac7   : > { %9277 = vpow2.f32 %v2969_v35 }
 0xac8   : > { %9279 = vpow2.f32 %v2967_v3 }
 0xacb   : > { %3436 = vrot.lane.b32.xlu0 %v14819_v24, %s10086_s16  ;;  %3438 = vrot.lane.b32.xlu1 %v14820_v6, %s10086_s16 }
 0xacd   : > { %v12173_v4 = vpop.eup %9273 }
 0xace   : > { %v12175_v11 = vpop.eup %9275 }
 0xad1   : > { %v12179_v62 = vpop.eup %9277 }
 0xad2   : > { %v12181_v59 = vpop.eup %9279 }
 0xaea   : > { %2989 = vadd.xlane.f32.xlu0 %v12153_v27 }
 0xaed   : > { %v2928_v45 = vpop.xlane.xlu1 %2927 }
 0xaee   : > { %v2944_v51 = vsub.f32 %v12114_v38, %v2928_v45  ;;  %2985 = vadd.xlane.f32.xlu0 %v12159_v9 }
 0xaef   : > { %2987 = vadd.xlane.f32.xlu1 %v12161_v23 }
 0xaf0   : > { %v2975_v15 = vmul.f32 1.442695, %v2944_v51 }
 0xaf1   : > { %v2924_v53 = vpop.xlane.xlu1 %2923 }
 0xaf2   : > { %9281 = vpow2.f32 %v2975_v15  ;;  %v2942_v55 = vsub.f32 %v12119_v29, %v2924_v53  ;;  %2991 = vadd.xlane.f32.xlu0 %v12166_v12 }
 0xaf3   : > { %2997 = vadd.xlane.f32.xlu1 %v12168_v2  ;;  %9283 = vpow2.f32 %v2963_v56 }
 0xaf4   : > { %v2971_v38 = vmul.f32 1.442695, %v2942_v55 }
 0xaf6   : > { %3005 = vadd.xlane.f32.xlu0 %v12173_v4  ;;  %9285 = vpow2.f32 %v2971_v38 }
 0xaf7   : > { %2993 = vadd.xlane.f32.xlu1 %v12175_v11 }
 0xafa   : > { %3001 = vadd.xlane.f32.xlu0 %v12179_v62 }
 0xafb   : > { %2999 = vadd.xlane.f32.xlu1 %v12181_v59 }
 0xafc   : > { %v12185_v29 = vpop.eup %9281 }
 0xafd   : > { %v12187_v57 = vpop.eup %9283 }
 0xafe   : > { %3007 = vadd.xlane.f32.xlu0 %v12185_v29 }
 0xaff   : > { %2995 = vadd.xlane.f32.xlu1 %v12187_v57 }
 0xb00   : > { %v12191_v22 = vpop.eup %9285 }
 0xb03   : > { %3003 = vadd.xlane.f32.xlu1 %v12191_v22 }
 0xb14   : > { %3442 = vrot.lane.b32.xlu1 %v14821_v47, %s10086_s16  ;;  %3440 = vrot.lane.b32.xlu0 %v14822_v19, %s10086_s16  ;;  %s10098_s16 = smov 16  }
 0xb18   : > { %3775 = vrot.lane.b32.xlu1 %v14807_v32, %s10089_s14  ;;  %3773 = vrot.lane.b32.xlu0 %v14808_v20, %s10089_s14 }
 0xb1c   : > { %3779 = vrot.lane.b32.xlu1 %v14817_v16, %s10089_s14  ;;  %3777 = vrot.lane.b32.xlu0 %v14818_v31, %s10089_s14 }
 0xb20   : > { %3783 = vrot.lane.b32.xlu1 %v14820_v6, %s10089_s14  ;;  %3781 = vrot.lane.b32.xlu0 %v14819_v24, %s10089_s14 }
 0xb24   : > { %3787 = vrot.lane.b32.xlu1 %v14821_v47, %s10089_s14  ;;  %3785 = vrot.lane.b32.xlu0 %v14822_v19, %s10089_s14 }
 0xb28   : > { %3912 = vrot.lane.b32.xlu1 %v14807_v32, %s10087_s23  ;;  %3910 = vrot.lane.b32.xlu0 %v14808_v20, %s10087_s23 }
 0xb3f   : > { %v2982_v37 = vpop.xlane.xlu1 %2981 }
 0xb42   : > { %v2980_v26 = vpop.xlane.xlu0 %2979 }
 0xb43   : > { %9287 = vrcp.f32 %v2980_v26  ;;  %v2978_v43 = vpop.xlane.xlu1 %2977 }
 0xb44   : > { %9289 = vrcp.f32 %v2978_v43 }
 0xb45   : > { %9291 = vrcp.f32 %v2982_v37  ;;  %v3469_v37 = vsel %vm1271_vm1, %v11985_v30, 0 }
 0xb46   : > { %v3437_v30 = vpop.permute.xlu0 %3436 }
 0xb47   : > { %v2984_v7 = vpop.xlane.xlu1 %2983 }
 0xb48   : > { %9293 = vrcp.f32 %v2984_v7 }
 0xb4d   : > { %v9288_v35 = vpop.eup %9287 }
 0xb4e   : > { %v9290_v3 = vpop.eup %9289  ;;  %v3026_v14 = vmul.f32 %v9288_v35, %v12131_v54  ;;  %v3472_v54 = vsel %vm1271_vm1, %v12122_v1, 0 }
 0xb4f   : > { %v3025_v45 = vmul.f32 %v9290_v3, %v12133_v41  ;;  %v9292_v51 = vpop.eup %9291  ;;  %v3478_v41 = vsel %vm1271_vm1, %v12155_v39, 0 }
 0xb50   : > { %v3027_v53 = vmul.f32 %v9292_v51, %v12128_v18  ;;  %v3475_v18 = vsel %vm1271_vm1, %v3433_v0, 0 }
 0xb51   : > { %v3041_v56 = vpack.c.bf16 %v3026_v14, %v3025_v45 }
 0xb52   : > { %v9294_v15 = vpop.eup %9293 }
 0xb53   : > { %v3028_v55 = vmul.f32 %v9294_v15, %v12137_v63  ;;  %8155 = vmatprep.mubr.bf16.mxu0 %v3041_v56  ;;  %v3481_v63 = vsel %vm1271_vm1, %v3437_v30, 0 }
 0xb55   : > { %v3042_v38 = vpack.c.bf16 %v3028_v55, %v3027_v53 }
 0xb57   : > { %8156 = vmatmul.mubr.bf16.vlgmr.msra.gmra.mrb[48].mxu0 %v3042_v38 }
 0xb58   : > { %8172 = vmatpush3.bf16.xpose.msra.mxu0 %v3469_v37 }
 0xb59   : > { %8572 = vmatprep.subr.msk.bf16.mxu0 %vm1271_vm1, %v12122_v1  ;;  %v3439_v1 = vpop.permute.xlu1 %3438 }
 0xb5a   : > { %v3484_v7 = vsel %vm1271_vm1, %v3439_v1, 0 }
 0xb60   : > { %8174 = vmatpush3.bf16.xpose.msra.mxu0 %v3472_v54 }
 0xb61   : > { %8573 = vmatprep.subr.msk.bf16.mxu0 %vm1271_vm1, %v3433_v0 }
 0xb68   : > { %8176 = vmatpush3.bf16.xpose.msra.mxu0 %v3475_v18 }
 0xb69   : > { %8574 = vmatprep.subr.msk.bf16.mxu0 %vm1271_vm1, %v12155_v39 }
 0xb70   : > { %8178 = vmatpush3.bf16.xpose.msra.mxu0 %v3478_v41 }
 0xb71   : > { %8575 = vmatprep.subr.msk.bf16.mxu0 %vm1271_vm1, %v3437_v30 }
 0xb77   : > { %v2990_v26 = vpop.xlane.xlu0 %2989 }
 0xb78   : > { %8180 = vmatpush3.bf16.xpose.msra.mxu0 %v3481_v63 }
 0xb79   : > { %8576 = vmatprep.subr.msk.bf16.mxu0 %vm1271_vm1, %v3439_v1 }
 0xb7b   : > { %v2986_v43 = vpop.xlane.xlu0 %2985 }
 0xb7c   : > { %9295 = vrcp.f32 %v2986_v43  ;;  %v2988_v0 = vpop.xlane.xlu1 %2987 }
 0xb7d   : > { %9297 = vrcp.f32 %v2988_v0 }
 0xb7e   : > { %9299 = vrcp.f32 %v2990_v26 }
 0xb7f   : > { %v2992_v35 = vpop.xlane.xlu0 %2991 }
 0xb80   : > { %8182 = vmatpush3.bf16.xpose.msra.mxu0 %v3484_v7  ;;  %9301 = vrcp.f32 %v2992_v35  ;;  %v2998_v39 = vpop.xlane.xlu1 %2997 }
 0xb83   : > { %v3006_v3 = vpop.xlane.xlu0 %3005 }
 0xb84   : > { %v2994_v14 = vpop.xlane.xlu1 %2993 }
 0xb86   : > { %v9296_v45 = vpop.eup %9295 }
 0xb87   : > { %v9298_v51 = vpop.eup %9297  ;;  %v3002_v56 = vpop.xlane.xlu0 %3001  ;;  %v3029_v15 = vmul.f32 %v9296_v45, %v12159_v9 }
 0xb88   : > { %v9300_v53 = vpop.eup %9299  ;;  %v3000_v55 = vpop.xlane.xlu1 %2999  ;;  %v3030_v38 = vmul.f32 %v9298_v51, %v12161_v23 }
 0xb89   : > { %9303 = vrcp.f32 %v3000_v55  ;;  %v3031_v41 = vmul.f32 %v9300_v53, %v12153_v27 }
 0xb8a   : > { %v9302_v37 = vpop.eup %9301  ;;  %v3043_v54 = vpack.c.bf16 %v3030_v38, %v3029_v15  ;;  %9305 = vrcp.f32 %v2994_v14 }
 0xb8b   : > { %v3008_v18 = vpop.xlane.xlu0 %3007  ;;  %v3032_v30 = vmul.f32 %v9302_v37, %v12166_v12  ;;  %9307 = vrcp.f32 %v2998_v39 }
 0xb8c   : > { %v2996_v63 = vpop.xlane.xlu1 %2995  ;;  %8159 = vmatprep.mubr.bf16.mxu0 %v3043_v54 }
 0xb8d   : > { %9309 = vrcp.f32 %v2996_v63  ;;  %v3044_v26 = vpack.c.bf16 %v3032_v30, %v3031_v41 }
 0xb8e   : > { %9311 = vrcp.f32 %v3002_v56 }
 0xb8f   : > { %8160 = vmatmul.mubr.bf16.gmra.mrb[52].mxu0 %v3044_v26  ;;  %v3441_v9 = vpop.permute.xlu0 %3440 }
 0xb90   : > { %v3004_v1 = vpop.xlane.xlu1 %3003  ;;  %8577 = vmatprep.subr.msk.bf16.mxu0 %vm1271_vm1, %v3441_v9  ;;  %v3487_v23 = vsel %vm1271_vm1, %v3441_v9, 0 }
 0xb91   : > { %9313 = vrcp.f32 %v3004_v1  ;;  %8184 = vmatpush3.bf16.xpose.msra.mxu0 %v3487_v23 }
 0xb92   : > { %9315 = vrcp.f32 %v3008_v18 }
 0xb93   : > { %v3774_v43 = vpop.permute.xlu0 %3773  ;;  %v9304_v27 = vpop.eup %9303  ;;  %9317 = vrcp.f32 %v3006_v3 }
 0xb94   : > { %v3443_v12 = vpop.permute.xlu1 %3442  ;;  %8203 = vmatprep.subr.bf16.mxu1 %v3774_v43  ;;  %v9306_v0 = vpop.eup %9305  ;;  %v3036_v39 = vmul.f32 %v9304_v27, %v12181_v59 }
 0xb95   : > { %8578 = vmatprep.subr.msk.bf16.mxu0 %vm1271_vm1, %v3443_v12  ;;  %8204 = vmatpush3.bf16.msra.mxu1 %v3774_v43  ;;  %v9308_v7 = vpop.eup %9307  ;;  %v3490_v45 = vsel %vm1271_vm1, %v3443_v12, 0  ;;  %v3033_v51 = vmul.f32 %v9306_v0, %v12175_v11 }
 0xb96   : > { %v3035_v3 = vmul.f32 %v9308_v7, %v12168_v2 }
 0xb97   : > { %v9310_v35 = vpop.eup %9309  ;;  %v3778_v53 = vpop.permute.xlu0 %3777 }
 0xb98   : > { %v3776_v14 = vpop.permute.xlu1 %3775  ;;  %v3034_v56 = vmul.f32 %v9310_v35, %v12187_v57  ;;  %v9312_v15 = vpop.eup %9311  ;;  %v3046_v37 = vpack.c.bf16 %v3036_v39, %v3035_v3 }
 0xb99   : > { %8186 = vmatpush3.bf16.xpose.msra.mxu0 %v3490_v45  ;;  %8205 = vmatprep.subr.bf16.mxu1 %v3776_v14  ;;  %v3037_v59 = vmul.f32 %v9312_v15, %v12179_v62 }
 0xb9a   : > { %8206 = vmatpush3.bf16.msra.mxu1 %v3776_v14  ;;  %v3045_v55 = vpack.c.bf16 %v3034_v56, %v3033_v51 }
 0xb9b   : > { %v9314_v38 = vpop.eup %9313  ;;  %8207 = vmatprep.subr.bf16.mxu1 %v3778_v53  ;;  %v3782_v63 = vpop.permute.xlu0 %3781 }
 0xb9c   : > { %v9316_v54 = vpop.eup %9315  ;;  %8163 = vmatprep.mubr.bf16.mxu0 %v3045_v55  ;;  %v3038_v18 = vmul.f32 %v9314_v38, %v12191_v22  ;;  %v3780_v57 = vpop.permute.xlu1 %3779 }
 0xb9d   : > { %8164 = vmatmul.mubr.bf16.gmra.mrb[56].mxu0 %v3046_v37  ;;  %v9318_v11 = vpop.eup %9317  ;;  %v3040_v2 = vmul.f32 %v9316_v54, %v12185_v29 }
 0xb9e   : > { %8208 = vmatpush3.bf16.msra.mxu1 %v3778_v53  ;;  %v3047_v41 = vpack.c.bf16 %v3038_v18, %v3037_v59  ;;  %v3039_v30 = vmul.f32 %v9318_v11, %v12173_v4 }
 0xb9f   : > { %8209 = vmatprep.subr.bf16.mxu1 %v3780_v57  ;;  %v3786_v62 = vpop.permute.xlu0 %3785 }
 0xba0   : > { %8167 = vmatprep.mubr.bf16.mxu0 %v3047_v41  ;;  %v3048_v26 = vpack.c.bf16 %v3040_v2, %v3039_v30  ;;  %v3784_v9 = vpop.permute.xlu1 %3783 }
 0xba2   : > { %8210 = vmatpush3.bf16.msra.mxu1 %v3780_v57 }
 0xba3   : > { %8211 = vmatprep.subr.bf16.mxu1 %v3782_v63  ;;  %v12260_v4 = vpop.permute.xlu0 %3910 }
 0xba4   : > { %v3788_v29 = vpop.permute.xlu1 %3787 }
 0xba5   : > { %8168 = vmatmul.mubr.bf16.gmra.mrb[60].mxu0 %v3048_v26 }
 0xba6   : > { %8187 = vmatprep.mubr.msk.bf16.mxu0 %vm1271_vm1, %v14808_v20  ;;  %8212 = vmatpush3.bf16.msra.mxu1 %v3782_v63 }
 0xba7   : > { %8213 = vmatprep.subr.bf16.mxu1 %v3784_v9 }
 0xbaa   : > { %8214 = vmatpush3.bf16.msra.mxu1 %v3784_v9 }
 0xbab   : > { %8215 = vmatprep.subr.bf16.mxu1 %v3786_v62 }
 0xbad   : > { %8188 = vmatmul.mubr.msk.bf16.vlgmr.msra.gmra.mrb[64].mxu0 %vm1271_vm1, %v14807_v32 }
 0xbae   : > { %8191 = vmatprep.mubr.msk.bf16.mxu0 %vm1271_vm1, %v14818_v31  ;;  %8216 = vmatpush3.bf16.msra.mxu1 %v3786_v62 }
 0xbaf   : > { %8217 = vmatprep.subr.bf16.mxu1 %v3788_v29 }
 0xbb2   : > { %8218 = vmatpush3.bf16.msra.mxu1 %v3788_v29 }
 0xbb3   : > { %8579 = vmatprep.subr.msk.bf16.mxu1 %vm1271_vm1, %v12260_v4 }
 0xbb5   : > { %8192 = vmatmul.mubr.msk.bf16.gmra.mrb[68].mxu0 %vm1271_vm1, %v14817_v16 }
 0xbb6   : > { %8195 = vmatprep.mubr.msk.bf16.mxu0 %vm1271_vm1, %v14819_v24 }
 0xbbd   : > { %8196 = vmatmul.mubr.msk.bf16.gmra.mrb[72].mxu0 %vm1271_vm1, %v14820_v6 }
 0xbbe   : > { %8199 = vmatprep.mubr.msk.bf16.mxu0 %vm1271_vm1, %v14822_v19 }
 0xbc5   : > { %8200 = vmatmul.mubr.msk.bf16.gmra.mrb[76].mxu0 %vm1271_vm1, %v14821_v47 }
 0xc2a   : > { %v12274_v22 = vpop.f32.mrb[48].mxu0 }
 0xc2b   : > { %v12276_v1 = vpop.f32.mrb[49].mxu0 }
 0xc2c   : > { %14823 = vst [vmem:[#allocation28_spill] sm:$0xff] %v12276_v1  ;;  %v12278_v23 = vpop.f32.mrb[50].mxu0 }
 0xc2d   : > { %v12282_v27 = vpop.f32.mrb[51].mxu0 }
 0xc2e   : > { %14824 = vst [vmem:[#allocation29_spill] sm:$0xff] %v12282_v27 }
 0xc62   : > { %v12286_v0 = vpop.f32.mrb[52].mxu0 }
 0xc63   : > { %v12288_v7 = vpop.f32.mrb[53].mxu0 }
 0xc64   : > { %14825 = vst [vmem:[#allocation32_spill] sm:$0xff] %v12288_v7  ;;  %v12290_v35 = vpop.f32.mrb[54].mxu0 }
 0xc65   : > { %v12294_v14 = vpop.f32.mrb[55].mxu0 }
 0xc66   : > { %14826 = vst [vmem:[#allocation31_spill] sm:$0xff] %v12294_v14 }
 0xc70   : > { %v12298_v51 = vpop.f32.mrb[56].mxu0 }
 0xc71   : > { %14827 = vst [vmem:[#allocation33_spill] sm:$0xff] %v12298_v51  ;;  %v12300_v56 = vpop.f32.mrb[57].mxu0 }
 0xc72   : > { %14828 = vst [vmem:[#allocation34_spill] sm:$0xff] %v12300_v56  ;;  %v12302_v15 = vpop.f32.mrb[58].mxu0 }
 0xc73   : > { %v12306_v53 = vpop.f32.mrb[59].mxu0 }
 0xc74   : > { %14829 = vst [vmem:[#allocation66_spill] sm:$0xff] %v12306_v53 }
 0xc78   : > { %v12310_v38 = vpop.f32.mrb[60].mxu0 }
 0xc79   : > { %14830 = vst [vmem:[#allocation67_spill] sm:$0xff] %v12310_v38  ;;  %v12312_v37 = vpop.f32.mrb[61].mxu0 }
 0xc7a   : > { %14831 = vst [vmem:[#allocation68_spill] sm:$0xff] %v12312_v37  ;;  %v12314_v54 = vpop.f32.mrb[62].mxu0 }
 0xc7b   : > { %14832 = vst [vmem:[#allocation69_spill] sm:$0xff] %v12314_v54  ;;  %v12318_v18 = vpop.f32.mrb[63].mxu0 }
 0xc7c   : > { %14833 = vst [vmem:[#allocation70_spill] sm:$0xff] %v12318_v18 }
 0xc80   : > { %v8189_v57 = vpop.f32.mrb[64].mxu0 }
 0xc81   : > { %v3591_v41 = vmul.f32 0.35355338, %v8189_v57  ;;  %v3526_v2 = vpop.f32.mrb[65].mxu0 }
 0xc82   : > { %v8190_v30 = vpop.f32.mrb[66].mxu0  ;;  %v3589_v63 = vmul.f32 0.35355338, %v3526_v2 }
 0xc83   : > { %v3529_v26 = vpop.f32.mrb[67].mxu0  ;;  %v12324_v9 = vsel %vm1238_vm2, %v3591_v41, -1e+30  ;;  %v3592_v29 = vmul.f32 0.35355338, %v8190_v30 }
 0xc84   : > { %v3590_v62 = vmul.f32 0.35355338, %v3529_v26  ;;  %3625 = vmax.xlane.f32.xlu0 %v12324_v9  ;;  %v12334_v57 = vsel %vm1238_vm2, %v3589_v63, -1e+30 }
 0xc85   : > { %v12339_v26 = vsel %vm1238_vm2, %v3592_v29, -1e+30 }
 0xc86   : > { %v12329_v55 = vsel %vm1238_vm2, %v3590_v62, -1e+30 }
 0xc87   : > { %3623 = vmax.xlane.f32.xlu1 %v12329_v55 }
 0xc88   : > { %3621 = vmax.xlane.f32.xlu0 %v12334_v57  ;;  %v8193_v2 = vpop.f32.mrb[68].mxu0 }
 0xc89   : > { %v3542_v11 = vpop.f32.mrb[69].mxu0  ;;  %v3595_v30 = vmul.f32 0.35355338, %v8193_v2 }
 0xc8a   : > { %v8194_v41 = vpop.f32.mrb[70].mxu0  ;;  %v3593_v63 = vmul.f32 0.35355338, %v3542_v11 }
 0xc8b   : > { %v3596_v45 = vmul.f32 0.35355338, %v8194_v41  ;;  %v3545_v12 = vpop.f32.mrb[71].mxu0  ;;  %v12349_v3 = vsel %vm1238_vm2, %v3595_v30, -1e+30 }
 0xc8c   : > { %3627 = vmax.xlane.f32.xlu0 %v12339_v26  ;;  %v3594_v62 = vmul.f32 0.35355338, %v3545_v12 }
 0xc8d   : > { %v12344_v59 = vsel %vm1238_vm2, %v3596_v45, -1e+30  ;;  %v12359_v45 = vsel %vm1238_vm2, %v3593_v63, -1e+30 }
 0xc8e   : > { %3635 = vmax.xlane.f32.xlu1 %v12344_v59  ;;  %v12354_v41 = vsel %vm1238_vm2, %v3594_v62, -1e+30 }
 0xc90   : > { %3633 = vmax.xlane.f32.xlu0 %v12349_v3  ;;  %v8197_v29 = vpop.f32.mrb[72].mxu0 }
 0xc91   : > { %v3558_v2 = vpop.f32.mrb[73].mxu0  ;;  %v3599_v11 = vmul.f32 0.35355338, %v8197_v29 }
 0xc92   : > { %3631 = vmax.xlane.f32.xlu1 %v12354_v41  ;;  %v8198_v12 = vpop.f32.mrb[74].mxu0  ;;  %v3597_v62 = vmul.f32 0.35355338, %v3558_v2 }
 0xc93   : > { %v3600_v39 = vmul.f32 0.35355338, %v8198_v12  ;;  %v3561_v43 = vpop.f32.mrb[75].mxu0  ;;  %v12369_v18 = vsel %vm1238_vm2, %v3599_v11, -1e+30 }
 0xc94   : > { %3629 = vmax.xlane.f32.xlu0 %v12359_v45  ;;  %v3598_v30 = vmul.f32 0.35355338, %v3561_v43  ;;  %v12379_v2 = vsel %vm1238_vm2, %v3597_v62, -1e+30 }
 0xc95   : > { %v12364_v37 = vsel %vm1238_vm2, %v3600_v39, -1e+30 }
 0xc96   : > { %3643 = vmax.xlane.f32.xlu1 %v12364_v37  ;;  %v12374_v12 = vsel %vm1238_vm2, %v3598_v30, -1e+30 }
 0xc98   : > { %3641 = vmax.xlane.f32.xlu0 %v12369_v18  ;;  %v8201_v63 = vpop.f32.mrb[76].mxu0 }
 0xc99   : > { %v3574_v29 = vpop.f32.mrb[77].mxu0  ;;  %v3603_v39 = vmul.f32 0.35355338, %v8201_v63 }
 0xc9a   : > { %3639 = vmax.xlane.f32.xlu1 %v12374_v12  ;;  %v8202_v43 = vpop.f32.mrb[78].mxu0  ;;  %v3601_v11 = vmul.f32 0.35355338, %v3574_v29 }
 0xc9b   : > { %v3577_v56 = vpop.f32.mrb[79].mxu0  ;;  %v12384_v53 = vsel %vm1238_vm2, %v3603_v39, -1e+30  ;;  %v3604_v62 = vmul.f32 0.35355338, %v8202_v43 }
 0xc9c   : > { %3637 = vmax.xlane.f32.xlu0 %v12379_v2  ;;  %v12389_v30 = vsel %vm1238_vm2, %v3601_v11, -1e+30  ;;  %v3602_v63 = vmul.f32 0.35355338, %v3577_v56  ;;  %v12406_v11 = vpop.permute.xlu1 %3912 }
 0xc9d   : > { %v12398_v29 = vsel %vm1238_vm2, %v3604_v62, -1e+30 }
 0xc9e   : > { %v12403_v39 = vsel %vm1238_vm2, %v3602_v63, -1e+30 }
 0xca0   : > { %3649 = vmax.xlane.f32.xlu0 %v12384_v53 }
 0xca4   : > { %3645 = vmax.xlane.f32.xlu0 %v12389_v30 }
 0xcab   : > { %3916 = vrot.lane.b32.xlu1 %v14817_v16, %s10087_s23 }
 0xcba   : > { %3914 = vrot.lane.b32.xlu0 %v14818_v31, %s10087_s23 }
 0xccf   : > { %3651 = vmax.xlane.f32.xlu1 %v12398_v29 }
 0xcd3   : > { %3647 = vmax.xlane.f32.xlu1 %v12403_v39 }
 0xd11   : > { %v3626_v7 = vpop.xlane.xlu0 %3625 }
 0xd12   : > { %v3655_v14 = vsub.f32 %v12324_v9, %v3626_v7 }
 0xd14   : > { %v3673_v48 = vmul.f32 1.442695, %v3655_v14  ;;  %v3624_v43 = vpop.xlane.xlu1 %3623 }
 0xd15   : > { %v3654_v56 = vsub.f32 %v12329_v55, %v3624_v43  ;;  %v3622_v1 = vpop.xlane.xlu0 %3621 }
 0xd16   : > { %9319 = vpow2.f32 %v3673_v48  ;;  %v3653_v62 = vsub.f32 %v12334_v57, %v3622_v1 }
 0xd17   : > { %v3671_v27 = vmul.f32 1.442695, %v3654_v56 }
 0xd18   : > { %v3669_v52 = vmul.f32 1.442695, %v3653_v62 }
 0xd19   : > { %9321 = vpow2.f32 %v3671_v27  ;;  %v3628_v63 = vpop.xlane.xlu0 %3627 }
 0xd1a   : > { %9323 = vpow2.f32 %v3669_v52  ;;  %v3656_v13 = vsub.f32 %v12339_v26, %v3628_v63 }
 0xd1b   : > { %v3636_v1 = vpop.xlane.xlu1 %3635 }
 0xd1c   : > { %v3675_v38 = vmul.f32 1.442695, %v3656_v13  ;;  %v3660_v63 = vsub.f32 %v12344_v59, %v3636_v1 }
 0xd1d   : > { %v3634_v52 = vpop.xlane.xlu0 %3633 }
 0xd1e   : > { %9325 = vpow2.f32 %v3675_v38  ;;  %v3659_v55 = vsub.f32 %v12349_v3, %v3634_v52  ;;  %v3683_v5 = vmul.f32 1.442695, %v3660_v63 }
 0xd1f   : > { %v3632_v38 = vpop.xlane.xlu1 %3631 }
 0xd20   : > { %v12412_v54 = vpop.eup %9319  ;;  %v3681_v57 = vmul.f32 1.442695, %v3659_v55  ;;  %v3658_v43 = vsub.f32 %v12354_v41, %v3632_v38 }
 0xd21   : > { %3705 = vadd.xlane.f32.xlu1 %v12412_v54  ;;  %v3630_v13 = vpop.xlane.xlu0 %3629 }
 0xd22   : > { %v3657_v26 = vsub.f32 %v12359_v45, %v3630_v13  ;;  %9327 = vpow2.f32 %v3681_v57  ;;  %v3679_v50 = vmul.f32 1.442695, %v3658_v43 }
 0xd23   : > { %v12415_v7 = vpop.eup %9321  ;;  %v3644_v56 = vpop.xlane.xlu1 %3643 }
 0xd24   : > { %v12417_v14 = vpop.eup %9323  ;;  %3703 = vadd.xlane.f32.xlu0 %v12415_v7  ;;  %v3677_v17 = vmul.f32 1.442695, %v3657_v26  ;;  %v3664_v59 = vsub.f32 %v12364_v37, %v3644_v56 }
 0xd25   : > { %3701 = vadd.xlane.f32.xlu1 %v12417_v14  ;;  %v3642_v27 = vpop.xlane.xlu0 %3641 }
 0xd26   : > { %v3663_v40 = vsub.f32 %v12369_v18, %v3642_v27  ;;  %9329 = vpow2.f32 %v3677_v17 }
 0xd27   : > { %v3640_v51 = vpop.xlane.xlu1 %3639  ;;  %9331 = vpow2.f32 %v3679_v50 }
 0xd28   : > { %v12421_v48 = vpop.eup %9325  ;;  %v3689_v52 = vmul.f32 1.442695, %v3663_v40  ;;  %9333 = vpow2.f32 %v3683_v5  ;;  %v3691_v40 = vmul.f32 1.442695, %v3664_v59  ;;  %v3662_v50 = vsub.f32 %v12374_v12, %v3640_v51 }
 0xd29   : > { %3707 = vadd.xlane.f32.xlu1 %v12421_v48  ;;  %v3638_v9 = vpop.xlane.xlu0 %3637 }
 0xd2a   : > { %v3661_v45 = vsub.f32 %v12379_v2, %v3638_v9  ;;  %9335 = vpow2.f32 %v3689_v52 }
 0xd2b   : > { %v12439_v18 = vpop.permute.xlu1 %3916 }
 0xd2c   : > { %v3685_v1 = vmul.f32 1.442695, %v3661_v45  ;;  %v12437_v38 = vpop.eup %9327 }
 0xd2d   : > { %v3650_v62 = vpop.xlane.xlu0 %3649 }
 0xd2e   : > { %v3667_v3 = vsub.f32 %v12384_v53, %v3650_v62 }
 0xd30   : > { %v3697_v41 = vmul.f32 1.442695, %v3667_v3  ;;  %v12443_v5 = vpop.eup %9329 }
 0xd31   : > { %v3646_v13 = vpop.xlane.xlu0 %3645  ;;  %v12445_v2 = vpop.eup %9331 }
 0xd32   : > { %v3665_v55 = vsub.f32 %v12389_v30, %v3646_v13  ;;  %9337 = vpow2.f32 %v3697_v41  ;;  %v3687_v30 = vmul.f32 1.442695, %v3662_v50  ;;  %v12450_v9 = vpop.eup %9333 }
 0xd33   : > { %9339 = vpow2.f32 %v3685_v1 }
 0xd34   : > { %v3693_v17 = vmul.f32 1.442695, %v3665_v55  ;;  %v12452_v51 = vpop.eup %9335 }
 0xd35   : > { %v3915_v52 = vpop.permute.xlu0 %3914 }
 0xd36   : > { %9341 = vpow2.f32 %v3693_v17 }
 0xd37   : > { %9343 = vpow2.f32 %v3691_v40 }
 0xd3a   : > { %3918 = vrot.lane.b32.xlu0 %v14819_v24, %s10087_s23  ;;  %3920 = vrot.lane.b32.xlu1 %v14820_v6, %s10087_s23 }
 0xd3c   : > { %v12457_v26 = vpop.eup %9337 }
 0xd3d   : > { %v12459_v43 = vpop.eup %9339 }
 0xd40   : > { %v12463_v56 = vpop.eup %9341 }
 0xd41   : > { %v12465_v62 = vpop.eup %9343 }
 0xd59   : > { %3713 = vadd.xlane.f32.xlu0 %v12437_v38 }
 0xd5c   : > { %v3652_v53 = vpop.xlane.xlu1 %3651 }
 0xd5d   : > { %v3668_v37 = vsub.f32 %v12398_v29, %v3652_v53  ;;  %3709 = vadd.xlane.f32.xlu0 %v12443_v5 }
 0xd5e   : > { %3711 = vadd.xlane.f32.xlu1 %v12445_v2 }
 0xd5f   : > { %v3699_v27 = vmul.f32 1.442695, %v3668_v37 }
 0xd60   : > { %v3648_v57 = vpop.xlane.xlu1 %3647 }
 0xd61   : > { %9345 = vpow2.f32 %v3699_v27  ;;  %v3666_v12 = vsub.f32 %v12403_v39, %v3648_v57  ;;  %3715 = vadd.xlane.f32.xlu0 %v12450_v9 }
 0xd62   : > { %3721 = vadd.xlane.f32.xlu1 %v12452_v51  ;;  %9347 = vpow2.f32 %v3687_v30 }
 0xd63   : > { %v3695_v29 = vmul.f32 1.442695, %v3666_v12  ;;  %v3951_v12 = vsel %vm1271_vm1, %v12260_v4, 0 }
 0xd65   : > { %3729 = vadd.xlane.f32.xlu0 %v12457_v26  ;;  %9349 = vpow2.f32 %v3695_v29 }
 0xd66   : > { %3717 = vadd.xlane.f32.xlu1 %v12459_v43 }
 0xd69   : > { %3725 = vadd.xlane.f32.xlu0 %v12463_v56 }
 0xd6a   : > { %3723 = vadd.xlane.f32.xlu1 %v12465_v62 }
 0xd6b   : > { %v12469_v39 = vpop.eup %9345 }
 0xd6c   : > { %v12471_v63 = vpop.eup %9347 }
 0xd6d   : > { %3731 = vadd.xlane.f32.xlu0 %v12469_v39 }
 0xd6e   : > { %3719 = vadd.xlane.f32.xlu1 %v12471_v63 }
 0xd6f   : > { %v12475_v3 = vpop.eup %9349 }
 0xd72   : > { %3727 = vadd.xlane.f32.xlu1 %v12475_v3 }
 0xd83   : > { %3924 = vrot.lane.b32.xlu1 %v14821_v47, %s10087_s23  ;;  %3922 = vrot.lane.b32.xlu0 %v14822_v19, %s10087_s23  ;;  %s10099_s23 = smov 24  }
 0xd87   : > { %3896 = vrot.lane.b32.xlu1 %v14807_v32, %s10088_s19  ;;  %3894 = vrot.lane.b32.xlu0 %v14808_v20, %s10088_s19 }
 0xd8b   : > { %3900 = vrot.lane.b32.xlu1 %v14817_v16, %s10088_s19  ;;  %3898 = vrot.lane.b32.xlu0 %v14818_v31, %s10088_s19 }
 0xd8f   : > { %3904 = vrot.lane.b32.xlu1 %v14820_v6, %s10088_s19  ;;  %3902 = vrot.lane.b32.xlu0 %v14819_v24, %s10088_s19 }
 0xd93   : > { %3908 = vrot.lane.b32.xlu1 %v14821_v47, %s10088_s19  ;;  %3906 = vrot.lane.b32.xlu0 %v14822_v19, %s10088_s19 }
 0xd97   : > { %4257 = vrot.lane.b32.xlu1 %v14807_v32, %s10090_s18  ;;  %4255 = vrot.lane.b32.xlu0 %v14808_v20, %s10090_s18 }
 0xd9b   : > { %4261 = vrot.lane.b32.xlu1 %v14817_v16, %s10090_s18  ;;  %4259 = vrot.lane.b32.xlu0 %v14818_v31, %s10090_s18 }
 0xd9f   : > { %4265 = vrot.lane.b32.xlu1 %v14820_v6, %s10090_s18  ;;  %4263 = vrot.lane.b32.xlu0 %v14819_v24, %s10090_s18 }
 0xda3   : > { %4269 = vrot.lane.b32.xlu1 %v14821_v47, %s10090_s18  ;;  %4267 = vrot.lane.b32.xlu0 %v14822_v19, %s10090_s18 }
 0xda7   : > { %4394 = vrot.lane.b32.xlu1 %v14807_v32, %s10091_s21  ;;  %4392 = vrot.lane.b32.xlu0 %v14808_v20, %s10091_s21 }
 0xdae   : > { %v3706_v45 = vpop.xlane.xlu1 %3705 }
 0xdb1   : > { %v3704_v13 = vpop.xlane.xlu0 %3703 }
 0xdb2   : > { %9351 = vrcp.f32 %v3704_v13  ;;  %v3702_v41 = vpop.xlane.xlu1 %3701 }
 0xdb3   : > { %9353 = vrcp.f32 %v3702_v41 }
 0xdb4   : > { %9355 = vrcp.f32 %v3706_v45 }
 0xdb5   : > { %v3919_v4 = vpop.permute.xlu0 %3918 }
 0xdb6   : > { %v3708_v55 = vpop.xlane.xlu1 %3707 }
 0xdb7   : > { %9357 = vrcp.f32 %v3708_v55 }
 0xdbc   : > { %v9352_v59 = vpop.eup %9351 }
 0xdbd   : > { %v9354_v1 = vpop.eup %9353  ;;  %v3750_v17 = vmul.f32 %v9352_v59, %v12415_v7  ;;  %v3954_v7 = vsel %vm1271_vm1, %v12406_v11, 0 }
 0xdbe   : > { %v3749_v40 = vmul.f32 %v9354_v1, %v12417_v14  ;;  %v9356_v50 = vpop.eup %9355  ;;  %v3960_v14 = vsel %vm1271_vm1, %v12439_v18, 0 }
 0xdbf   : > { %v3751_v30 = vmul.f32 %v9356_v50, %v12412_v54  ;;  %v3957_v54 = vsel %vm1271_vm1, %v3915_v52, 0 }
 0xdc0   : > { %v3765_v53 = vpack.c.bf16 %v3750_v17, %v3749_v40 }
 0xdc1   : > { %v9358_v37 = vpop.eup %9357 }
 0xdc2   : > { %v3752_v27 = vmul.f32 %v9358_v37, %v12421_v48  ;;  %8219 = vmatprep.mubr.bf16.mxu1 %v3765_v53  ;;  %v3963_v48 = vsel %vm1271_vm1, %v3919_v4, 0 }
 0xdc4   : > { %v3766_v57 = vpack.c.bf16 %v3752_v27, %v3751_v30 }
 0xdc6   : > { %8220 = vmatmul.mubr.bf16.vlgmr.msra.gmra.mrb[96].mxu1 %v3766_v57 }
 0xdc7   : > { %8236 = vmatpush3.bf16.xpose.msra.mxu1 %v3951_v12 }
 0xdc8   : > { %8580 = vmatprep.subr.msk.bf16.mxu1 %vm1271_vm1, %v12406_v11  ;;  %v3921_v11 = vpop.permute.xlu1 %3920 }
 0xdc9   : > { %v3966_v13 = vsel %vm1271_vm1, %v3921_v11, 0 }
 0xdcf   : > { %8238 = vmatpush3.bf16.xpose.msra.mxu1 %v3954_v7 }
 0xdd0   : > { %8581 = vmatprep.subr.msk.bf16.mxu1 %vm1271_vm1, %v3915_v52 }
 0xdd7   : > { %8240 = vmatpush3.bf16.xpose.msra.mxu1 %v3957_v54 }
 0xdd8   : > { %8582 = vmatprep.subr.msk.bf16.mxu1 %vm1271_vm1, %v12439_v18 }
 0xddf   : > { %8242 = vmatpush3.bf16.xpose.msra.mxu1 %v3960_v14 }
 0xde0   : > { %8583 = vmatprep.subr.msk.bf16.mxu1 %vm1271_vm1, %v3919_v4 }
 0xde6   : > { %v3714_v29 = vpop.xlane.xlu0 %3713 }
 0xde7   : > { %8244 = vmatpush3.bf16.xpose.msra.mxu1 %v3963_v48 }
 0xde8   : > { %8584 = vmatprep.subr.msk.bf16.mxu1 %vm1271_vm1, %v3921_v11 }
 0xdea   : > { %v3710_v45 = vpop.xlane.xlu0 %3709 }
 0xdeb   : > { %9359 = vrcp.f32 %v3710_v45  ;;  %v3712_v52 = vpop.xlane.xlu1 %3711 }
 0xdec   : > { %9361 = vrcp.f32 %v3712_v52 }
 0xded   : > { %9363 = vrcp.f32 %v3714_v29 }
 0xdee   : > { %v3716_v41 = vpop.xlane.xlu0 %3715 }
 0xdef   : > { %8246 = vmatpush3.bf16.xpose.msra.mxu1 %v3966_v13  ;;  %9365 = vrcp.f32 %v3716_v41  ;;  %v3722_v18 = vpop.xlane.xlu1 %3721 }
 0xdf2   : > { %v3730_v55 = vpop.xlane.xlu0 %3729 }
 0xdf3   : > { %v3718_v59 = vpop.xlane.xlu1 %3717 }
 0xdf5   : > { %v9360_v1 = vpop.eup %9359 }
 0xdf6   : > { %v9362_v17 = vpop.eup %9361  ;;  %v3726_v40 = vpop.xlane.xlu0 %3725  ;;  %v3753_v50 = vmul.f32 %v9360_v1, %v12443_v5 }
 0xdf7   : > { %v9364_v53 = vpop.eup %9363  ;;  %v3724_v37 = vpop.xlane.xlu1 %3723  ;;  %v3754_v30 = vmul.f32 %v9362_v17, %v12445_v2 }
 0xdf8   : > { %9367 = vrcp.f32 %v3724_v37  ;;  %v3755_v7 = vmul.f32 %v9364_v53, %v12437_v38 }
 0xdf9   : > { %v9366_v27 = vpop.eup %9365  ;;  %v3767_v57 = vpack.c.bf16 %v3754_v30, %v3753_v50  ;;  %9369 = vrcp.f32 %v3718_v59 }
 0xdfa   : > { %v3732_v12 = vpop.xlane.xlu0 %3731  ;;  %v3756_v54 = vmul.f32 %v9366_v27, %v12450_v9  ;;  %9371 = vrcp.f32 %v3722_v18 }
 0xdfb   : > { %v3720_v14 = vpop.xlane.xlu1 %3719  ;;  %8223 = vmatprep.mubr.bf16.mxu1 %v3767_v57 }
 0xdfc   : > { %9373 = vrcp.f32 %v3720_v14  ;;  %v3768_v4 = vpack.c.bf16 %v3756_v54, %v3755_v7 }
 0xdfd   : > { %9375 = vrcp.f32 %v3726_v40 }
 0xdfe   : > { %8224 = vmatmul.mubr.bf16.gmra.mrb[100].mxu1 %v3768_v4  ;;  %v3923_v5 = vpop.permute.xlu0 %3922 }
 0xdff   : > { %v3728_v48 = vpop.xlane.xlu1 %3727  ;;  %8585 = vmatprep.subr.msk.bf16.mxu1 %vm1271_vm1, %v3923_v5  ;;  %v3969_v2 = vsel %vm1271_vm1, %v3923_v5, 0 }
 0xe00   : > { %9377 = vrcp.f32 %v3728_v48  ;;  %8248 = vmatpush3.bf16.xpose.msra.mxu1 %v3969_v2 }
 0xe01   : > { %9379 = vrcp.f32 %v3732_v12 }
 0xe02   : > { %v3895_v29 = vpop.permute.xlu0 %3894  ;;  %v9368_v38 = vpop.eup %9367  ;;  %9381 = vrcp.f32 %v3730_v55 }
 0xe03   : > { %v3925_v9 = vpop.permute.xlu1 %3924  ;;  %v9370_v11 = vpop.eup %9369  ;;  %v3760_v41 = vmul.f32 %v9368_v38, %v12465_v62 }
 0xe04   : > { %8586 = vmatprep.subr.msk.bf16.mxu1 %vm1271_vm1, %v3925_v9  ;;  %v9372_v45 = vpop.eup %9371  ;;  %v3972_v59 = vsel %vm1271_vm1, %v3925_v9, 0  ;;  %v3757_v1 = vmul.f32 %v9370_v11, %v12459_v43 }
 0xe05   : > { %v3759_v55 = vmul.f32 %v9372_v45, %v12452_v51 }
 0xe06   : > { %v9374_v52 = vpop.eup %9373  ;;  %v3899_v13 = vpop.permute.xlu0 %3898 }
 0xe07   : > { %v3897_v18 = vpop.permute.xlu1 %3896  ;;  %v3758_v17 = vmul.f32 %v9374_v52, %v12471_v63  ;;  %v9376_v40 = vpop.eup %9375  ;;  %v3770_v30 = vpack.c.bf16 %v3760_v41, %v3759_v55 }
 0xe08   : > { %8250 = vmatpush3.bf16.xpose.msra.mxu1 %v3972_v59  ;;  %v3761_v62 = vmul.f32 %v9376_v40, %v12463_v56 }
 0xe09   : > { %v3769_v50 = vpack.c.bf16 %v3758_v17, %v3757_v1 }
 0xe0a   : > { %v9378_v53 = vpop.eup %9377  ;;  %v3903_v37 = vpop.permute.xlu0 %3902 }
 0xe0b   : > { %v9380_v27 = vpop.eup %9379  ;;  %v3901_v57 = vpop.permute.xlu1 %3900  ;;  %8227 = vmatprep.mubr.bf16.mxu1 %v3769_v50  ;;  %v3762_v12 = vmul.f32 %v9378_v53, %v12475_v3 }
 0xe0c   : > { %8228 = vmatmul.mubr.bf16.gmra.mrb[104].mxu1 %v3770_v30  ;;  %v9382_v7 = vpop.eup %9381  ;;  %v3764_v63 = vmul.f32 %v9380_v27, %v12469_v39 }
 0xe0d   : > { %v3771_v43 = vpack.c.bf16 %v3762_v12, %v3761_v62  ;;  %v3763_v51 = vmul.f32 %v9382_v7, %v12457_v26 }
 0xe0e   : > { %v3907_v54 = vpop.permute.xlu0 %3906 }
 0xe0f   : > { %v3905_v14 = vpop.permute.xlu1 %3904  ;;  %8231 = vmatprep.mubr.bf16.mxu1 %v3771_v43  ;;  %v3772_v5 = vpack.c.bf16 %v3764_v63, %v3763_v51 }
 0xe12   : > { %v4256_v4 = vpop.permute.xlu0 %4255 }
 0xe13   : > { %v3909_v48 = vpop.permute.xlu1 %3908  ;;  %8267 = vmatprep.subr.bf16.mxu0 %v4256_v4 }
 0xe14   : > { %8232 = vmatmul.mubr.bf16.gmra.mrb[108].mxu1 %v3772_v5  ;;  %8268 = vmatpush3.bf16.msra.mxu0 %v4256_v4 }
 0xe15   : > { %8251 = vmatprep.mubr.msk.bf16.mxu1 %vm1271_vm1, %v3895_v29 }
 0xe16   : > { %v4260_v3 = vpop.permute.xlu0 %4259 }
 0xe17   : > { %v4258_v56 = vpop.permute.xlu1 %4257 }
 0xe18   : > { %8269 = vmatprep.subr.bf16.mxu0 %v4258_v56 }
 0xe19   : > { %8270 = vmatpush3.bf16.msra.mxu0 %v4258_v56 }
 0xe1a   : > { %8271 = vmatprep.subr.bf16.mxu0 %v4260_v3  ;;  %v4264_v26 = vpop.permute.xlu0 %4263 }
 0xe1b   : > { %v4262_v39 = vpop.permute.xlu1 %4261 }
 0xe1c   : > { %8252 = vmatmul.mubr.msk.bf16.vlgmr.msra.gmra.mrb[112].mxu1 %vm1271_vm1, %v3897_v18 }
 0xe1d   : > { %8255 = vmatprep.mubr.msk.bf16.mxu1 %vm1271_vm1, %v3899_v13  ;;  %8272 = vmatpush3.bf16.msra.mxu0 %v4260_v3 }
 0xe1e   : > { %8273 = vmatprep.subr.bf16.mxu0 %v4262_v39  ;;  %v4268_v29 = vpop.permute.xlu0 %4267 }
 0xe1f   : > { %v4266_v2 = vpop.permute.xlu1 %4265 }
 0xe21   : > { %8274 = vmatpush3.bf16.msra.mxu0 %v4262_v39 }
 0xe22   : > { %8275 = vmatprep.subr.bf16.mxu0 %v4264_v26  ;;  %v12561_v9 = vpop.permute.xlu0 %4392 }
 0xe23   : > { %v4270_v38 = vpop.permute.xlu1 %4269 }
 0xe24   : > { %8256 = vmatmul.mubr.msk.bf16.gmra.mrb[116].mxu1 %vm1271_vm1, %v3901_v57 }
 0xe25   : > { %8259 = vmatprep.mubr.msk.bf16.mxu1 %vm1271_vm1, %v3903_v37  ;;  %8276 = vmatpush3.bf16.msra.mxu0 %v4264_v26 }
 0xe26   : > { %8277 = vmatprep.subr.bf16.mxu0 %v4266_v2 }
 0xe29   : > { %8278 = vmatpush3.bf16.msra.mxu0 %v4266_v2 }
 0xe2a   : > { %8279 = vmatprep.subr.bf16.mxu0 %v4268_v29 }
 0xe2c   : > { %8260 = vmatmul.mubr.msk.bf16.gmra.mrb[120].mxu1 %vm1271_vm1, %v3905_v14 }
 0xe2d   : > { %8263 = vmatprep.mubr.msk.bf16.mxu1 %vm1271_vm1, %v3907_v54  ;;  %8280 = vmatpush3.bf16.msra.mxu0 %v4268_v29 }
 0xe2e   : > { %8281 = vmatprep.subr.bf16.mxu0 %v4270_v38 }
 0xe31   : > { %8282 = vmatpush3.bf16.msra.mxu0 %v4270_v38 }
 0xe32   : > { %8587 = vmatprep.subr.msk.bf16.mxu0 %vm1271_vm1, %v12561_v9 }
 0xe34   : > { %8264 = vmatmul.mubr.msk.bf16.gmra.mrb[124].mxu1 %vm1271_vm1, %v3909_v48 }
 0xe99   : > { %v12566_v11 = vpop.f32.mrb[96].mxu1 }
 0xe9a   : > { %14834 = vst [vmem:[#allocation71_spill] sm:$0xff] %v12566_v11  ;;  %v12568_v45 = vpop.f32.mrb[97].mxu1 }
 0xe9b   : > { %14835 = vst [vmem:[#allocation72_spill] sm:$0xff] %v12568_v45  ;;  %v12570_v52 = vpop.f32.mrb[98].mxu1 }
 0xe9c   : > { %14836 = vst [vmem:[#allocation73_spill] sm:$0xff] %v12570_v52  ;;  %v12572_v13 = vpop.f32.mrb[99].mxu1 }
 0xe9d   : > { %14837 = vst [vmem:[#allocation74_spill] sm:$0xff] %v12572_v13 }
 0xed1   : > { %v12574_v41 = vpop.f32.mrb[100].mxu1 }
 0xed2   : > { %14838 = vst [vmem:[#allocation75_spill] sm:$0xff] %v12574_v41  ;;  %v12576_v18 = vpop.f32.mrb[101].mxu1 }
 0xed3   : > { %14839 = vst [vmem:[#allocation76_spill] sm:$0xff] %v12576_v18  ;;  %v12578_v59 = vpop.f32.mrb[102].mxu1 }
 0xed4   : > { %14840 = vst [vmem:[#allocation77_spill] sm:$0xff] %v12578_v59  ;;  %v12580_v1 = vpop.f32.mrb[103].mxu1 }
 0xed5   : > { %14841 = vst [vmem:[#allocation78_spill] sm:$0xff] %v12580_v1 }
 0xedf   : > { %v12582_v17 = vpop.f32.mrb[104].mxu1 }
 0xee0   : > { %14842 = vst [vmem:[#allocation79_spill] sm:$0xff] %v12582_v17  ;;  %v12584_v40 = vpop.f32.mrb[105].mxu1 }
 0xee1   : > { %14843 = vst [vmem:[#allocation80_spill] sm:$0xff] %v12584_v40  ;;  %v12586_v55 = vpop.f32.mrb[106].mxu1 }
 0xee2   : > { %14844 = vst [vmem:[#allocation81_spill] sm:$0xff] %v12586_v55  ;;  %v12588_v50 = vpop.f32.mrb[107].mxu1 }
 0xee3   : > { %14845 = vst [vmem:[#allocation82_spill] sm:$0xff] %v12588_v50 }
 0xee7   : > { %v12590_v53 = vpop.f32.mrb[108].mxu1 }
 0xee8   : > { %14846 = vst [vmem:[#allocation83_spill] sm:$0xff] %v12590_v53  ;;  %v12592_v37 = vpop.f32.mrb[109].mxu1 }
 0xee9   : > { %14847 = vst [vmem:[#allocation84_spill] sm:$0xff] %v12592_v37  ;;  %v12594_v30 = vpop.f32.mrb[110].mxu1 }
 0xeea   : > { %14848 = vst [vmem:[#allocation85_spill] sm:$0xff] %v12594_v30  ;;  %v12596_v27 = vpop.f32.mrb[111].mxu1 }
 0xeeb   : > { %14849 = vst [vmem:[#allocation86_spill] sm:$0xff] %v12596_v27 }
 0xeef   : > { %v8253_v57 = vpop.f32.mrb[112].mxu1 }
 0xef0   : > { %v4073_v62 = vmul.f32 0.35355338, %v8253_v57  ;;  %v4008_v12 = vpop.f32.mrb[113].mxu1 }
 0xef1   : > { %v8254_v7 = vpop.f32.mrb[114].mxu1  ;;  %v4071_v43 = vmul.f32 0.35355338, %v4008_v12 }
 0xef2   : > { %v4011_v54 = vpop.f32.mrb[115].mxu1  ;;  %v12600_v63 = vsel %vm1238_vm2, %v4073_v62, -1e+30  ;;  %v4074_v51 = vmul.f32 0.35355338, %v8254_v7 }
 0xef3   : > { %v4072_v14 = vmul.f32 0.35355338, %v4011_v54  ;;  %4107 = vmax.xlane.f32.xlu0 %v12600_v63  ;;  %v12610_v5 = vsel %vm1238_vm2, %v4071_v43, -1e+30 }
 0xef4   : > { %v12615_v39 = vsel %vm1238_vm2, %v4074_v51, -1e+30 }
 0xef5   : > { %v12605_v4 = vsel %vm1238_vm2, %v4072_v14, -1e+30 }
 0xef6   : > { %4105 = vmax.xlane.f32.xlu1 %v12605_v4 }
 0xef7   : > { %4103 = vmax.xlane.f32.xlu0 %v12610_v5  ;;  %v8257_v48 = vpop.f32.mrb[116].mxu1 }
 0xef8   : > { %v4024_v56 = vpop.f32.mrb[117].mxu1  ;;  %v4077_v26 = vmul.f32 0.35355338, %v8257_v48 }
 0xef9   : > { %v8258_v3 = vpop.f32.mrb[118].mxu1  ;;  %v4075_v62 = vmul.f32 0.35355338, %v4024_v56 }
 0xefa   : > { %v4078_v2 = vmul.f32 0.35355338, %v8258_v3  ;;  %v4027_v29 = vpop.f32.mrb[119].mxu1  ;;  %v12625_v12 = vsel %vm1238_vm2, %v4077_v26, -1e+30 }
 0xefb   : > { %4109 = vmax.xlane.f32.xlu0 %v12615_v39  ;;  %v4076_v38 = vmul.f32 0.35355338, %v4027_v29  ;;  %v12635_v51 = vsel %vm1238_vm2, %v4075_v62, -1e+30 }
 0xefc   : > { %v12620_v57 = vsel %vm1238_vm2, %v4078_v2, -1e+30 }
 0xefd   : > { %4117 = vmax.xlane.f32.xlu1 %v12620_v57  ;;  %v12630_v54 = vsel %vm1238_vm2, %v4076_v38, -1e+30 }
 0xeff   : > { %4115 = vmax.xlane.f32.xlu0 %v12625_v12  ;;  %v8261_v7 = vpop.f32.mrb[120].mxu1 }
 0xf00   : > { %v4040_v43 = vpop.f32.mrb[121].mxu1  ;;  %v4081_v48 = vmul.f32 0.35355338, %v8261_v7 }
 0xf01   : > { %4113 = vmax.xlane.f32.xlu1 %v12630_v54  ;;  %v8262_v14 = vpop.f32.mrb[122].mxu1  ;;  %v4079_v29 = vmul.f32 0.35355338, %v4040_v43 }
 0xf02   : > { %v4082_v56 = vmul.f32 0.35355338, %v8262_v14  ;;  %v4043_v3 = vpop.f32.mrb[123].mxu1  ;;  %v12645_v38 = vsel %vm1238_vm2, %v4081_v48, -1e+30 }
 0xf03   : > { %4111 = vmax.xlane.f32.xlu0 %v12635_v51  ;;  %v4080_v26 = vmul.f32 0.35355338, %v4043_v3  ;;  %v12655_v43 = vsel %vm1238_vm2, %v4079_v29, -1e+30 }
 0xf04   : > { %v12640_v2 = vsel %vm1238_vm2, %v4082_v56, -1e+30 }
 0xf05   : > { %4125 = vmax.xlane.f32.xlu1 %v12640_v2  ;;  %v12650_v14 = vsel %vm1238_vm2, %v4080_v26, -1e+30 }
 0xf07   : > { %4123 = vmax.xlane.f32.xlu0 %v12645_v38  ;;  %v8265_v62 = vpop.f32.mrb[124].mxu1 }
 0xf08   : > { %v4056_v7 = vpop.f32.mrb[125].mxu1  ;;  %v4085_v56 = vmul.f32 0.35355338, %v8265_v62 }
 0xf09   : > { %4121 = vmax.xlane.f32.xlu1 %v12650_v14  ;;  %v8266_v3 = vpop.f32.mrb[126].mxu1  ;;  %v4083_v48 = vmul.f32 0.35355338, %v4056_v7 }
 0xf0a   : > { %v4059_v37 = vpop.f32.mrb[127].mxu1  ;;  %v12660_v27 = vsel %vm1238_vm2, %v4085_v56, -1e+30  ;;  %v4086_v29 = vmul.f32 0.35355338, %v8266_v3 }
 0xf0b   : > { %4119 = vmax.xlane.f32.xlu0 %v12655_v43  ;;  %v12665_v26 = vsel %vm1238_vm2, %v4083_v48, -1e+30  ;;  %v4084_v62 = vmul.f32 0.35355338, %v4059_v37  ;;  %v12682_v48 = vpop.permute.xlu1 %4394 }
 0xf0c   : > { %v12674_v7 = vsel %vm1238_vm2, %v4086_v29, -1e+30 }
 0xf0d   : > { %v12679_v56 = vsel %vm1238_vm2, %v4084_v62, -1e+30 }
 0xf0f   : > { %4131 = vmax.xlane.f32.xlu0 %v12660_v27 }
 0xf13   : > { %4127 = vmax.xlane.f32.xlu0 %v12665_v26 }
 0xf1a   : > { %4398 = vrot.lane.b32.xlu1 %v14817_v16, %s10091_s21 }
 0xf29   : > { %4396 = vrot.lane.b32.xlu0 %v14818_v31, %s10091_s21 }
 0xf3e   : > { %4133 = vmax.xlane.f32.xlu1 %v12674_v7 }
 0xf42   : > { %4129 = vmax.xlane.f32.xlu1 %v12679_v56 }
 0xf80   : > { %v4108_v53 = vpop.xlane.xlu0 %4107 }
 0xf81   : > { %v4137_v30 = vsub.f32 %v12600_v63, %v4108_v53 }
 0xf83   : > { %v4155_v40 = vmul.f32 1.442695, %v4137_v30  ;;  %v4106_v3 = vpop.xlane.xlu1 %4105 }
 0xf84   : > { %v4136_v37 = vsub.f32 %v12605_v4, %v4106_v3  ;;  %v4104_v50 = vpop.xlane.xlu0 %4103 }
 0xf85   : > { %9383 = vpow2.f32 %v4155_v40  ;;  %v4135_v29 = vsub.f32 %v12610_v5, %v4104_v50 }
 0xf86   : > { %v4153_v17 = vmul.f32 1.442695, %v4136_v37 }
 0xf87   : > { %v4151_v55 = vmul.f32 1.442695, %v4135_v29 }
 0xf88   : > { %9385 = vpow2.f32 %v4153_v17  ;;  %v4110_v62 = vpop.xlane.xlu0 %4109 }
 0xf89   : > { %9387 = vpow2.f32 %v4151_v55  ;;  %v4138_v18 = vsub.f32 %v12615_v39, %v4110_v62 }
 0xf8b   : > { %v4157_v1 = vmul.f32 1.442695, %v4138_v18 }
 0xf8c   : > { %v4116_v17 = vpop.xlane.xlu0 %4115 }
 0xf8d   : > { %9389 = vpow2.f32 %v4157_v1  ;;  %v4118_v1 = vpop.xlane.xlu1 %4117  ;;  %v4141_v50 = vsub.f32 %v12625_v12, %v4116_v17 }
 0xf8e   : > { %v4142_v62 = vsub.f32 %v12620_v57, %v4118_v1 }
 0xf8f   : > { %v12688_v41 = vpop.eup %9383  ;;  %v4163_v5 = vmul.f32 1.442695, %v4141_v50 }
 0xf90   : > { %4187 = vadd.xlane.f32.xlu1 %v12688_v41  ;;  %v4112_v18 = vpop.xlane.xlu0 %4111  ;;  %v4165_v11 = vmul.f32 1.442695, %v4142_v62 }
 0xf91   : > { %v4114_v63 = vpop.xlane.xlu1 %4113  ;;  %v4139_v39 = vsub.f32 %v12635_v51, %v4112_v18  ;;  %9391 = vpow2.f32 %v4163_v5 }
 0xf92   : > { %v12691_v53 = vpop.eup %9385  ;;  %v4140_v3 = vsub.f32 %v12630_v54, %v4114_v63 }
 0xf93   : > { %v12693_v30 = vpop.eup %9387  ;;  %4185 = vadd.xlane.f32.xlu0 %v12691_v53  ;;  %v4159_v59 = vmul.f32 1.442695, %v4139_v39 }
 0xf94   : > { %4183 = vadd.xlane.f32.xlu1 %v12693_v30  ;;  %v4124_v55 = vpop.xlane.xlu0 %4123  ;;  %v4161_v45 = vmul.f32 1.442695, %v4140_v3 }
 0xf95   : > { %v4126_v37 = vpop.xlane.xlu1 %4125  ;;  %v4145_v13 = vsub.f32 %v12645_v38, %v4124_v55  ;;  %9393 = vpow2.f32 %v4159_v59 }
 0xf96   : > { %9395 = vpow2.f32 %v4161_v45  ;;  %v4146_v57 = vsub.f32 %v12640_v2, %v4126_v37 }
 0xf97   : > { %v12697_v40 = vpop.eup %9389  ;;  %v4171_v17 = vmul.f32 1.442695, %v4145_v13  ;;  %9397 = vpow2.f32 %v4165_v11 }
 0xf98   : > { %4189 = vadd.xlane.f32.xlu1 %v12697_v40  ;;  %v4120_v4 = vpop.xlane.xlu0 %4119  ;;  %v4173_v13 = vmul.f32 1.442695, %v4146_v57 }
 0xf99   : > { %v4122_v52 = vpop.xlane.xlu1 %4121  ;;  %v4143_v51 = vsub.f32 %v12655_v43, %v4120_v4  ;;  %9399 = vpow2.f32 %v4171_v17 }
 0xf9a   : > { %v4144_v59 = vsub.f32 %v12650_v14, %v4122_v52 }
 0xf9b   : > { %v4167_v1 = vmul.f32 1.442695, %v4143_v51  ;;  %v12713_v63 = vpop.eup %9391 }
 0xf9c   : > { %v4132_v29 = vpop.xlane.xlu0 %4131 }
 0xf9d   : > { %v4149_v12 = vsub.f32 %v12660_v27, %v4132_v29  ;;  %v12715_v38 = vpop.permute.xlu1 %4398 }
 0xf9f   : > { %v4179_v54 = vmul.f32 1.442695, %v4149_v12  ;;  %v12719_v11 = vpop.eup %9393 }
 0xfa0   : > { %v4128_v18 = vpop.xlane.xlu0 %4127  ;;  %v12721_v43 = vpop.eup %9395 }
 0xfa1   : > { %v4147_v50 = vsub.f32 %v12665_v26, %v4128_v18  ;;  %9401 = vpow2.f32 %v4179_v54  ;;  %v4169_v26 = vmul.f32 1.442695, %v4144_v59  ;;  %v12726_v4 = vpop.eup %9397 }
 0xfa2   : > { %9403 = vpow2.f32 %v4167_v1 }
 0xfa3   : > { %v4175_v45 = vmul.f32 1.442695, %v4147_v50  ;;  %v12728_v52 = vpop.eup %9399 }
 0xfa4   : > { %v4397_v17 = vpop.permute.xlu0 %4396 }
 0xfa5   : > { %9405 = vpow2.f32 %v4175_v45 }
 0xfa6   : > { %9407 = vpow2.f32 %v4173_v13 }
 0xfa9   : > { %4400 = vrot.lane.b32.xlu0 %v14819_v24, %s10091_s21  ;;  %4402 = vrot.lane.b32.xlu1 %v14820_v6, %s10091_s21 }
 0xfab   : > { %v12733_v39 = vpop.eup %9401 }
 0xfac   : > { %v12735_v3 = vpop.eup %9403 }
 0xfaf   : > { %v12739_v37 = vpop.eup %9405 }
 0xfb0   : > { %v12741_v29 = vpop.eup %9407 }
 0xfc8   : > { %4195 = vadd.xlane.f32.xlu0 %v12713_v63 }
 0xfcb   : > { %v4134_v27 = vpop.xlane.xlu1 %4133 }
 0xfcc   : > { %v4150_v2 = vsub.f32 %v12674_v7, %v4134_v27  ;;  %4191 = vadd.xlane.f32.xlu0 %v12719_v11 }
 0xfcd   : > { %4193 = vadd.xlane.f32.xlu1 %v12721_v43 }
 0xfce   : > { %v4181_v55 = vmul.f32 1.442695, %v4150_v2 }
 0xfcf   : > { %v4130_v5 = vpop.xlane.xlu1 %4129 }
 0xfd0   : > { %9409 = vpow2.f32 %v4181_v55  ;;  %v4148_v14 = vsub.f32 %v12679_v56, %v4130_v5  ;;  %4197 = vadd.xlane.f32.xlu0 %v12726_v4 }
 0xfd1   : > { %4203 = vadd.xlane.f32.xlu1 %v12728_v52  ;;  %9411 = vpow2.f32 %v4169_v26 }
 0xfd2   : > { %v4177_v7 = vmul.f32 1.442695, %v4148_v14  ;;  %v4433_v14 = vsel %vm1271_vm1, %v12561_v9, 0 }
 0xfd4   : > { %4211 = vadd.xlane.f32.xlu0 %v12733_v39  ;;  %9413 = vpow2.f32 %v4177_v7 }
 0xfd5   : > { %4199 = vadd.xlane.f32.xlu1 %v12735_v3 }
 0xfd8   : > { %4207 = vadd.xlane.f32.xlu0 %v12739_v37 }
 0xfd9   : > { %4205 = vadd.xlane.f32.xlu1 %v12741_v29 }
 0xfda   : > { %v12745_v56 = vpop.eup %9409 }
 0xfdb   : > { %v12747_v62 = vpop.eup %9411 }
 0xfdc   : > { %4213 = vadd.xlane.f32.xlu0 %v12745_v56 }
 0xfdd   : > { %4201 = vadd.xlane.f32.xlu1 %v12747_v62 }
 0xfde   : > { %v12751_v12 = vpop.eup %9413 }
 0xfe1   : > { %4209 = vadd.xlane.f32.xlu1 %v12751_v12 }
 0xff2   : > { %4406 = vrot.lane.b32.xlu1 %v14821_v47, %s10091_s21  ;;  %4404 = vrot.lane.b32.xlu0 %v14822_v19, %s10091_s21 }
 0xff6   : > { %4378 = vrot.lane.b32.xlu1 %v14807_v32, %s10092_s13  ;;  %4376 = vrot.lane.b32.xlu0 %v14808_v20, %s10092_s13 }
 0xffa   : > { %4382 = vrot.lane.b32.xlu1 %v14817_v16, %s10092_s13  ;;  %4380 = vrot.lane.b32.xlu0 %v14818_v31, %s10092_s13 }
 0xffe   : > { %4386 = vrot.lane.b32.xlu1 %v14820_v6, %s10092_s13  ;;  %4384 = vrot.lane.b32.xlu0 %v14819_v24, %s10092_s13 }
0x1002   : > { %4390 = vrot.lane.b32.xlu1 %v14821_v47, %s10092_s13  ;;  %4388 = vrot.lane.b32.xlu0 %v14822_v19, %s10092_s13 }
0x1006   : > { %4739 = vrot.lane.b32.xlu1 %v14807_v32, %s10093_s17  ;;  %4737 = vrot.lane.b32.xlu0 %v14808_v20, %s10093_s17 }
0x100a   : > { %4743 = vrot.lane.b32.xlu1 %v14817_v16, %s10093_s17  ;;  %4741 = vrot.lane.b32.xlu0 %v14818_v31, %s10093_s17 }
0x100e   : > { %4747 = vrot.lane.b32.xlu1 %v14820_v6, %s10093_s17  ;;  %4745 = vrot.lane.b32.xlu0 %v14819_v24, %s10093_s17 }
0x1012   : > { %4751 = vrot.lane.b32.xlu1 %v14821_v47, %s10093_s17  ;;  %4749 = vrot.lane.b32.xlu0 %v14822_v19, %s10093_s17  ;;  %s10100_s17 = smov [#allocation17]  }
0x1016   : > { %4876 = vrot.lane.b32.xlu1 %v14807_v32, %s10094_s20  ;;  %4874 = vrot.lane.b32.xlu0 %v14808_v20, %s10094_s20 }
0x101d   : > { %v4188_v51 = vpop.xlane.xlu1 %4187 }
0x1020   : > { %v4186_v18 = vpop.xlane.xlu0 %4185 }
0x1021   : > { %9415 = vrcp.f32 %v4186_v18  ;;  %v4184_v54 = vpop.xlane.xlu1 %4183 }
0x1022   : > { %9417 = vrcp.f32 %v4184_v54 }
0x1023   : > { %9419 = vrcp.f32 %v4188_v51 }
0x1024   : > { %v4401_v9 = vpop.permute.xlu0 %4400 }
0x1025   : > { %v4190_v50 = vpop.xlane.xlu1 %4189 }
0x1026   : > { %9421 = vrcp.f32 %v4190_v50 }
0x102b   : > { %v9416_v57 = vpop.eup %9415 }
0x102c   : > { %v9418_v1 = vpop.eup %9417  ;;  %v4232_v45 = vmul.f32 %v9416_v57, %v12691_v53  ;;  %v4436_v53 = vsel %vm1271_vm1, %v12682_v48, 0 }
0x102d   : > { %v4231_v13 = vmul.f32 %v9418_v1, %v12693_v30  ;;  %v9420_v59 = vpop.eup %9419  ;;  %v4442_v30 = vsel %vm1271_vm1, %v12715_v38, 0 }
0x102e   : > { %v4233_v26 = vmul.f32 %v9420_v59, %v12688_v41  ;;  %v4439_v41 = vsel %vm1271_vm1, %v4397_v17, 0 }
0x102f   : > { %v4247_v27 = vpack.c.bf16 %v4232_v45, %v4231_v13 }
0x1030   : > { %v9422_v2 = vpop.eup %9421 }
0x1031   : > { %v4234_v55 = vmul.f32 %v9422_v2, %v12697_v40  ;;  %8283 = vmatprep.mubr.bf16.mxu0 %v4247_v27  ;;  %v4445_v40 = vsel %vm1271_vm1, %v4401_v9, 0 }
0x1033   : > { %v4248_v5 = vpack.c.bf16 %v4234_v55, %v4233_v26 }
0x1035   : > { %8284 = vmatmul.mubr.bf16.vlgmr.msra.gmra.mrb[80].mxu0 %v4248_v5 }
0x1036   : > { %8300 = vmatpush3.bf16.xpose.msra.mxu0 %v4433_v14 }
0x1037   : > { %8588 = vmatprep.subr.msk.bf16.mxu0 %vm1271_vm1, %v12682_v48  ;;  %v4403_v48 = vpop.permute.xlu1 %4402 }
0x1038   : > { %v4448_v18 = vsel %vm1271_vm1, %v4403_v48, 0 }
0x103e   : > { %8302 = vmatpush3.bf16.xpose.msra.mxu0 %v4436_v53 }
0x103f   : > { %8589 = vmatprep.subr.msk.bf16.mxu0 %vm1271_vm1, %v4397_v17 }
0x1046   : > { %8304 = vmatpush3.bf16.xpose.msra.mxu0 %v4439_v41 }
0x1047   : > { %8590 = vmatprep.subr.msk.bf16.mxu0 %vm1271_vm1, %v12715_v38 }
0x104e   : > { %8306 = vmatpush3.bf16.xpose.msra.mxu0 %v4442_v30 }
0x104f   : > { %8591 = vmatprep.subr.msk.bf16.mxu0 %vm1271_vm1, %v4401_v9 }
0x1055   : > { %v4196_v7 = vpop.xlane.xlu0 %4195 }
0x1056   : > { %8308 = vmatpush3.bf16.xpose.msra.mxu0 %v4445_v40 }
0x1057   : > { %8592 = vmatprep.subr.msk.bf16.mxu0 %vm1271_vm1, %v4403_v48 }
0x1059   : > { %v4192_v51 = vpop.xlane.xlu0 %4191 }
0x105a   : > { %9423 = vrcp.f32 %v4192_v51  ;;  %v4194_v17 = vpop.xlane.xlu1 %4193 }
0x105b   : > { %9425 = vrcp.f32 %v4194_v17 }
0x105c   : > { %9427 = vrcp.f32 %v4196_v7 }
0x105d   : > { %v4198_v54 = vpop.xlane.xlu0 %4197 }
0x105e   : > { %8310 = vmatpush3.bf16.xpose.msra.mxu0 %v4448_v18  ;;  %9429 = vrcp.f32 %v4198_v54  ;;  %v4204_v38 = vpop.xlane.xlu1 %4203 }
0x1061   : > { %v4212_v50 = vpop.xlane.xlu0 %4211 }
0x1062   : > { %v4200_v57 = vpop.xlane.xlu1 %4199 }
0x1064   : > { %v9424_v1 = vpop.eup %9423 }
0x1065   : > { %v9426_v45 = vpop.eup %9425  ;;  %v4208_v13 = vpop.xlane.xlu0 %4207  ;;  %v4235_v59 = vmul.f32 %v9424_v1, %v12719_v11 }
0x1066   : > { %v9428_v27 = vpop.eup %9427  ;;  %v4206_v2 = vpop.xlane.xlu1 %4205  ;;  %v4236_v26 = vmul.f32 %v9426_v45, %v12721_v43 }
0x1067   : > { %9431 = vrcp.f32 %v4206_v2  ;;  %v4237_v53 = vmul.f32 %v9428_v27, %v12713_v63 }
0x1068   : > { %v9430_v55 = vpop.eup %9429  ;;  %v4249_v5 = vpack.c.bf16 %v4236_v26, %v4235_v59  ;;  %9433 = vrcp.f32 %v4200_v57 }
0x1069   : > { %v4214_v14 = vpop.xlane.xlu0 %4213  ;;  %v4238_v41 = vmul.f32 %v9430_v55, %v12726_v4  ;;  %9435 = vrcp.f32 %v4204_v38 }
0x106a   : > { %v4202_v30 = vpop.xlane.xlu1 %4201  ;;  %8287 = vmatprep.mubr.bf16.mxu0 %v4249_v5 }
0x106b   : > { %9437 = vrcp.f32 %v4202_v30  ;;  %v4250_v9 = vpack.c.bf16 %v4238_v41, %v4237_v53 }
0x106c   : > { %9439 = vrcp.f32 %v4208_v13 }
0x106d   : > { %8288 = vmatmul.mubr.bf16.gmra.mrb[84].mxu0 %v4250_v9  ;;  %v4405_v11 = vpop.permute.xlu0 %4404 }
0x106e   : > { %v4210_v40 = vpop.xlane.xlu1 %4209  ;;  %8593 = vmatprep.subr.msk.bf16.mxu0 %vm1271_vm1, %v4405_v11  ;;  %v4451_v43 = vsel %vm1271_vm1, %v4405_v11, 0 }
0x106f   : > { %9441 = vrcp.f32 %v4210_v40  ;;  %8312 = vmatpush3.bf16.xpose.msra.mxu0 %v4451_v43 }
0x1070   : > { %9443 = vrcp.f32 %v4214_v14 }
0x1071   : > { %v4377_v7 = vpop.permute.xlu0 %4376  ;;  %v9432_v63 = vpop.eup %9431  ;;  %9445 = vrcp.f32 %v4212_v50 }
0x1072   : > { %v4407_v4 = vpop.permute.xlu1 %4406  ;;  %v9434_v48 = vpop.eup %9433  ;;  %v4242_v54 = vmul.f32 %v9432_v63, %v12741_v29 }
0x1073   : > { %8594 = vmatprep.subr.msk.bf16.mxu0 %vm1271_vm1, %v4407_v4  ;;  %v9436_v51 = vpop.eup %9435  ;;  %v4454_v57 = vsel %vm1271_vm1, %v4407_v4, 0  ;;  %v4239_v1 = vmul.f32 %v9434_v48, %v12735_v3 }
0x1074   : > { %v4241_v50 = vmul.f32 %v9436_v51, %v12728_v52 }
0x1075   : > { %v9438_v17 = vpop.eup %9437  ;;  %v4381_v18 = vpop.permute.xlu0 %4380 }
0x1076   : > { %v4379_v38 = vpop.permute.xlu1 %4378  ;;  %v4240_v45 = vmul.f32 %v9438_v17, %v12747_v62  ;;  %v9440_v13 = vpop.eup %9439  ;;  %v4252_v26 = vpack.c.bf16 %v4242_v54, %v4241_v50 }
0x1077   : > { %8314 = vmatpush3.bf16.xpose.msra.mxu0 %v4454_v57  ;;  %v4243_v29 = vmul.f32 %v9440_v13, %v12739_v37 }
0x1078   : > { %v4251_v59 = vpack.c.bf16 %v4240_v45, %v4239_v1 }
0x1079   : > { %v9442_v27 = vpop.eup %9441  ;;  %v4385_v2 = vpop.permute.xlu0 %4384 }
0x107a   : > { %v9444_v55 = vpop.eup %9443  ;;  %v4383_v5 = vpop.permute.xlu1 %4382  ;;  %8291 = vmatprep.mubr.bf16.mxu0 %v4251_v59  ;;  %v4244_v14 = vmul.f32 %v9442_v27, %v12751_v12 }
0x107b   : > { %8292 = vmatmul.mubr.bf16.gmra.mrb[88].mxu0 %v4252_v26  ;;  %v9446_v53 = vpop.eup %9445  ;;  %v4246_v62 = vmul.f32 %v9444_v55, %v12745_v56 }
0x107c   : > { %v4253_v3 = vpack.c.bf16 %v4244_v14, %v4243_v29  ;;  %v4245_v52 = vmul.f32 %v9446_v53, %v12733_v39 }
0x107d   : > { %v4389_v41 = vpop.permute.xlu0 %4388 }
0x107e   : > { %v4387_v30 = vpop.permute.xlu1 %4386  ;;  %8295 = vmatprep.mubr.bf16.mxu0 %v4253_v3  ;;  %v4254_v11 = vpack.c.bf16 %v4246_v62, %v4245_v52 }
0x1081   : > { %v4738_v9 = vpop.permute.xlu0 %4737 }
0x1082   : > { %v4391_v40 = vpop.permute.xlu1 %4390  ;;  %8331 = vmatprep.subr.bf16.mxu1 %v4738_v9 }
0x1083   : > { %8296 = vmatmul.mubr.bf16.gmra.mrb[92].mxu0 %v4254_v11  ;;  %8332 = vmatpush3.bf16.msra.mxu1 %v4738_v9 }
0x1084   : > { %8315 = vmatprep.mubr.msk.bf16.mxu0 %vm1271_vm1, %v4377_v7 }
0x1085   : > { %v4742_v12 = vpop.permute.xlu0 %4741 }
0x1086   : > { %v4740_v37 = vpop.permute.xlu1 %4739 }
0x1087   : > { %8333 = vmatprep.subr.bf16.mxu1 %v4740_v37 }
0x1088   : > { %8334 = vmatpush3.bf16.msra.mxu1 %v4740_v37 }
0x1089   : > { %8335 = vmatprep.subr.bf16.mxu1 %v4742_v12  ;;  %v4746_v39 = vpop.permute.xlu0 %4745 }
0x108a   : > { %v4744_v56 = vpop.permute.xlu1 %4743 }
0x108b   : > { %8316 = vmatmul.mubr.msk.bf16.vlgmr.msra.gmra.mrb[96].mxu0 %vm1271_vm1, %v4379_v38 }
0x108c   : > { %8319 = vmatprep.mubr.msk.bf16.mxu0 %vm1271_vm1, %v4381_v18  ;;  %8336 = vmatpush3.bf16.msra.mxu1 %v4742_v12 }
0x108d   : > { %8337 = vmatprep.subr.bf16.mxu1 %v4744_v56  ;;  %v4750_v7 = vpop.permute.xlu0 %4749 }
0x108e   : > { %v4748_v43 = vpop.permute.xlu1 %4747 }
0x1090   : > { %8338 = vmatpush3.bf16.msra.mxu1 %v4744_v56 }
0x1091   : > { %8339 = vmatprep.subr.bf16.mxu1 %v4746_v39  ;;  %v12837_v4 = vpop.permute.xlu0 %4874 }
0x1092   : > { %v4752_v63 = vpop.permute.xlu1 %4751 }
0x1093   : > { %8320 = vmatmul.mubr.msk.bf16.gmra.mrb[100].mxu0 %vm1271_vm1, %v4383_v5 }
0x1094   : > { %8323 = vmatprep.mubr.msk.bf16.mxu0 %vm1271_vm1, %v4385_v2  ;;  %8340 = vmatpush3.bf16.msra.mxu1 %v4746_v39 }
0x1095   : > { %8341 = vmatprep.subr.bf16.mxu1 %v4748_v43 }
0x1098   : > { %8342 = vmatpush3.bf16.msra.mxu1 %v4748_v43 }
0x1099   : > { %8343 = vmatprep.subr.bf16.mxu1 %v4750_v7 }
0x109b   : > { %8324 = vmatmul.mubr.msk.bf16.gmra.mrb[104].mxu0 %vm1271_vm1, %v4387_v30 }
0x109c   : > { %8327 = vmatprep.mubr.msk.bf16.mxu0 %vm1271_vm1, %v4389_v41  ;;  %8344 = vmatpush3.bf16.msra.mxu1 %v4750_v7 }
0x109d   : > { %8345 = vmatprep.subr.bf16.mxu1 %v4752_v63 }
0x10a0   : > { %8346 = vmatpush3.bf16.msra.mxu1 %v4752_v63 }
0x10a1   : > { %8595 = vmatprep.subr.msk.bf16.mxu1 %vm1271_vm1, %v12837_v4 }
0x10a3   : > { %8328 = vmatmul.mubr.msk.bf16.gmra.mrb[108].mxu0 %vm1271_vm1, %v4391_v40 }
0x1108   : > { %v12842_v48 = vpop.f32.mrb[80].mxu0 }
0x1109   : > { %14850 = vst [vmem:[#allocation87_spill] sm:$0xff] %v12842_v48  ;;  %v12844_v51 = vpop.f32.mrb[81].mxu0 }
0x110a   : > { %14851 = vst [vmem:[#allocation88_spill] sm:$0xff] %v12844_v51  ;;  %v12846_v17 = vpop.f32.mrb[82].mxu0 }
0x110b   : > { %14852 = vst [vmem:[#allocation89_spill] sm:$0xff] %v12846_v17  ;;  %v12850_v54 = vpop.f32.mrb[83].mxu0 }
0x110c   : > { %14853 = vst [vmem:[#allocation90_spill] sm:$0xff] %v12850_v54 }
0x1140   : > { %v12854_v57 = vpop.f32.mrb[84].mxu0 }
0x1141   : > { %14854 = vst [vmem:[#allocation91_spill] sm:$0xff] %v12854_v57  ;;  %v12856_v1 = vpop.f32.mrb[85].mxu0 }
0x1142   : > { %14855 = vst [vmem:[#allocation92_spill] sm:$0xff] %v12856_v1  ;;  %v12858_v45 = vpop.f32.mrb[86].mxu0 }
0x1143   : > { %14856 = vst [vmem:[#allocation93_spill] sm:$0xff] %v12858_v45  ;;  %v12862_v50 = vpop.f32.mrb[87].mxu0 }
0x1144   : > { %14857 = vst [vmem:[#allocation94_spill] sm:$0xff] %v12862_v50 }
0x114e   : > { %v12866_v27 = vpop.f32.mrb[88].mxu0 }
0x114f   : > { %14858 = vst [vmem:[#allocation95_spill] sm:$0xff] %v12866_v27  ;;  %v12868_v2 = vpop.f32.mrb[89].mxu0 }
0x1150   : > { %14859 = vst [vmem:[#allocation96_spill] sm:$0xff] %v12868_v2  ;;  %v12870_v26 = vpop.f32.mrb[90].mxu0 }
0x1151   : > { %14860 = vst [vmem:[#allocation97_spill] sm:$0xff] %v12870_v26  ;;  %v12874_v5 = vpop.f32.mrb[91].mxu0 }
0x1152   : > { %14861 = vst [vmem:[#allocation98_spill] sm:$0xff] %v12874_v5 }
0x1156   : > { %v12878_v14 = vpop.f32.mrb[92].mxu0 }
0x1157   : > { %14862 = vst [vmem:[#allocation99_spill] sm:$0xff] %v12878_v14  ;;  %v12880_v53 = vpop.f32.mrb[93].mxu0 }
0x1158   : > { %14863 = vst [vmem:[#allocation100_spill] sm:$0xff] %v12880_v53  ;;  %v12882_v3 = vpop.f32.mrb[94].mxu0 }
0x1159   : > { %14864 = vst [vmem:[#allocation101_spill] sm:$0xff] %v12882_v3  ;;  %v12886_v62 = vpop.f32.mrb[95].mxu0 }
0x115a   : > { %14865 = vst [vmem:[#allocation102_spill] sm:$0xff] %v12886_v62 }
0x115e   : > { %v8317_v52 = vpop.f32.mrb[96].mxu0 }
0x115f   : > { %v4555_v9 = vmul.f32 0.35355338, %v8317_v52  ;;  %v4490_v11 = vpop.f32.mrb[97].mxu0 }
0x1160   : > { %v8318_v40 = vpop.f32.mrb[98].mxu0  ;;  %v4553_v37 = vmul.f32 0.35355338, %v4490_v11 }
0x1161   : > { %v4493_v12 = vpop.f32.mrb[99].mxu0  ;;  %v12892_v56 = vsel %vm1238_vm2, %v4555_v9, -1e+30  ;;  %v4556_v43 = vmul.f32 0.35355338, %v8318_v40 }
0x1162   : > { %v4554_v39 = vmul.f32 0.35355338, %v4493_v12  ;;  %4589 = vmax.xlane.f32.xlu0 %v12892_v56  ;;  %v12902_v63 = vsel %vm1238_vm2, %v4553_v37, -1e+30 }
0x1163   : > { %v12907_v12 = vsel %vm1238_vm2, %v4556_v43, -1e+30 }
0x1164   : > { %v12897_v7 = vsel %vm1238_vm2, %v4554_v39, -1e+30 }
0x1165   : > { %4587 = vmax.xlane.f32.xlu1 %v12897_v7 }
0x1166   : > { %4585 = vmax.xlane.f32.xlu0 %v12902_v63  ;;  %v8321_v52 = vpop.f32.mrb[100].mxu0 }
0x1167   : > { %v4506_v11 = vpop.f32.mrb[101].mxu0  ;;  %v4559_v40 = vmul.f32 0.35355338, %v8321_v52 }
0x1168   : > { %v8322_v9 = vpop.f32.mrb[102].mxu0  ;;  %v4557_v37 = vmul.f32 0.35355338, %v4506_v11 }
0x1169   : > { %v4560_v30 = vmul.f32 0.35355338, %v8322_v9  ;;  %v4509_v41 = vpop.f32.mrb[103].mxu0  ;;  %v12917_v59 = vsel %vm1238_vm2, %v4559_v40, -1e+30 }
0x116a   : > { %4591 = vmax.xlane.f32.xlu0 %v12907_v12  ;;  %v4558_v39 = vmul.f32 0.35355338, %v4509_v41 }
0x116b   : > { %v12912_v29 = vsel %vm1238_vm2, %v4560_v30, -1e+30  ;;  %v12927_v30 = vsel %vm1238_vm2, %v4557_v37, -1e+30 }
0x116c   : > { %4599 = vmax.xlane.f32.xlu1 %v12912_v29  ;;  %v12922_v9 = vsel %vm1238_vm2, %v4558_v39, -1e+30 }
0x116e   : > { %4597 = vmax.xlane.f32.xlu0 %v12917_v59  ;;  %v8325_v43 = vpop.f32.mrb[104].mxu0 }
0x116f   : > { %v4522_v52 = vpop.f32.mrb[105].mxu0  ;;  %v4563_v11 = vmul.f32 0.35355338, %v8325_v43 }
0x1170   : > { %4595 = vmax.xlane.f32.xlu1 %v12922_v9  ;;  %v8326_v41 = vpop.f32.mrb[106].mxu0  ;;  %v4561_v39 = vmul.f32 0.35355338, %v4522_v52 }
0x1171   : > { %v4564_v38 = vmul.f32 0.35355338, %v8326_v41  ;;  %v4525_v55 = vpop.f32.mrb[107].mxu0  ;;  %v12937_v18 = vsel %vm1238_vm2, %v4563_v11, -1e+30 }
0x1172   : > { %4593 = vmax.xlane.f32.xlu0 %v12927_v30  ;;  %v4562_v40 = vmul.f32 0.35355338, %v4525_v55  ;;  %v12947_v52 = vsel %vm1238_vm2, %v4561_v39, -1e+30 }
0x1173   : > { %v12932_v13 = vsel %vm1238_vm2, %v4564_v38, -1e+30 }
0x1174   : > { %4607 = vmax.xlane.f32.xlu1 %v12932_v13  ;;  %v12942_v41 = vsel %vm1238_vm2, %v4562_v40, -1e+30 }
0x1176   : > { %4605 = vmax.xlane.f32.xlu0 %v12937_v18  ;;  %v8329_v37 = vpop.f32.mrb[108].mxu0 }
0x1177   : > { %v4538_v43 = vpop.f32.mrb[109].mxu0  ;;  %v4567_v38 = vmul.f32 0.35355338, %v8329_v37 }
0x1178   : > { %4603 = vmax.xlane.f32.xlu1 %v12942_v41  ;;  %v8330_v55 = vpop.f32.mrb[110].mxu0  ;;  %v4565_v11 = vmul.f32 0.35355338, %v4538_v43 }
0x1179   : > { %v4541_v53 = vpop.f32.mrb[111].mxu0  ;;  %v12952_v62 = vsel %vm1238_vm2, %v4567_v38, -1e+30  ;;  %v4568_v39 = vmul.f32 0.35355338, %v8330_v55 }
0x117a   : > { %4601 = vmax.xlane.f32.xlu0 %v12947_v52  ;;  %v12957_v40 = vsel %vm1238_vm2, %v4565_v11, -1e+30  ;;  %v4566_v37 = vmul.f32 0.35355338, %v4541_v53  ;;  %v12974_v11 = vpop.permute.xlu1 %4876 }
0x117b   : > { %v12966_v43 = vsel %vm1238_vm2, %v4568_v39, -1e+30 }
0x117c   : > { %v12971_v38 = vsel %vm1238_vm2, %v4566_v37, -1e+30 }
0x117e   : > { %4613 = vmax.xlane.f32.xlu0 %v12952_v62 }
0x1182   : > { %4609 = vmax.xlane.f32.xlu0 %v12957_v40 }
0x1189   : > { %4880 = vrot.lane.b32.xlu1 %v14817_v16, %s10094_s20 }
0x1198   : > { %4878 = vrot.lane.b32.xlu0 %v14818_v31, %s10094_s20 }
0x11ad   : > { %4615 = vmax.xlane.f32.xlu1 %v12966_v43 }
0x11b1   : > { %4611 = vmax.xlane.f32.xlu1 %v12971_v38 }
0x11ef   : > { %v4590_v14 = vpop.xlane.xlu0 %4589 }
0x11f0   : > { %v4619_v3 = vsub.f32 %v12892_v56, %v4590_v14 }
0x11f2   : > { %v4637_v2 = vmul.f32 1.442695, %v4619_v3  ;;  %v4588_v55 = vpop.xlane.xlu1 %4587 }
0x11f3   : > { %v4618_v53 = vsub.f32 %v12897_v7, %v4588_v55  ;;  %v4586_v5 = vpop.xlane.xlu0 %4585 }
0x11f4   : > { %9447 = vpow2.f32 %v4637_v2  ;;  %v4617_v39 = vsub.f32 %v12902_v63, %v4586_v5 }
0x11f5   : > { %v4635_v1 = vmul.f32 1.442695, %v4618_v53 }
0x11f6   : > { %v4633_v50 = vmul.f32 1.442695, %v4617_v39 }
0x11f7   : > { %9449 = vpow2.f32 %v4635_v1  ;;  %v4592_v37 = vpop.xlane.xlu0 %4591 }
0x11f8   : > { %9451 = vpow2.f32 %v4633_v50  ;;  %v4620_v51 = vsub.f32 %v12907_v12, %v4592_v37 }
0x11fa   : > { %v4639_v54 = vmul.f32 1.442695, %v4620_v51 }
0x11fb   : > { %v4598_v1 = vpop.xlane.xlu0 %4597 }
0x11fc   : > { %9453 = vpow2.f32 %v4639_v54  ;;  %v4600_v54 = vpop.xlane.xlu1 %4599  ;;  %v4623_v5 = vsub.f32 %v12917_v59, %v4598_v1 }
0x11fd   : > { %v4624_v37 = vsub.f32 %v12912_v29, %v4600_v54 }
0x11fe   : > { %v12980_v27 = vpop.eup %9447  ;;  %v4645_v63 = vmul.f32 1.442695, %v4623_v5 }
0x11ff   : > { %4669 = vadd.xlane.f32.xlu1 %v12980_v27  ;;  %v4594_v51 = vpop.xlane.xlu0 %4593  ;;  %v4647_v48 = vmul.f32 1.442695, %v4624_v37 }
0x1200   : > { %v4596_v56 = vpop.xlane.xlu1 %4595  ;;  %v4621_v12 = vsub.f32 %v12927_v30, %v4594_v51  ;;  %9455 = vpow2.f32 %v4645_v63 }
0x1201   : > { %v12983_v14 = vpop.eup %9449  ;;  %v4622_v55 = vsub.f32 %v12922_v9, %v4596_v56 }
0x1202   : > { %v12985_v3 = vpop.eup %9451  ;;  %4667 = vadd.xlane.f32.xlu0 %v12983_v14  ;;  %v4641_v26 = vmul.f32 1.442695, %v4621_v12 }
0x1203   : > { %4665 = vadd.xlane.f32.xlu1 %v12985_v3  ;;  %v4606_v50 = vpop.xlane.xlu0 %4605  ;;  %v4643_v57 = vmul.f32 1.442695, %v4622_v55 }
0x1204   : > { %v4608_v53 = vpop.xlane.xlu1 %4607  ;;  %v4627_v45 = vsub.f32 %v12937_v18, %v4606_v50  ;;  %9457 = vpow2.f32 %v4641_v26 }
0x1205   : > { %9459 = vpow2.f32 %v4643_v57  ;;  %v4628_v29 = vsub.f32 %v12932_v13, %v4608_v53 }
0x1206   : > { %v12989_v2 = vpop.eup %9453  ;;  %v4653_v1 = vmul.f32 1.442695, %v4627_v45  ;;  %9461 = vpow2.f32 %v4647_v48 }
0x1207   : > { %4671 = vadd.xlane.f32.xlu1 %v12989_v2  ;;  %v4602_v7 = vpop.xlane.xlu0 %4601  ;;  %v4655_v45 = vmul.f32 1.442695, %v4628_v29 }
0x1208   : > { %v4604_v17 = vpop.xlane.xlu1 %4603  ;;  %v4625_v30 = vsub.f32 %v12947_v52, %v4602_v7  ;;  %9463 = vpow2.f32 %v4653_v1 }
0x1209   : > { %v4626_v26 = vsub.f32 %v12942_v41, %v4604_v17 }
0x120a   : > { %v4649_v54 = vmul.f32 1.442695, %v4625_v30  ;;  %v13005_v56 = vpop.eup %9455 }
0x120b   : > { %v4614_v39 = vpop.xlane.xlu0 %4613 }
0x120c   : > { %v4631_v59 = vsub.f32 %v12952_v62, %v4614_v39  ;;  %v13007_v18 = vpop.permute.xlu1 %4880 }
0x120e   : > { %v4661_v9 = vmul.f32 1.442695, %v4631_v59  ;;  %v13011_v48 = vpop.eup %9457 }
0x120f   : > { %v4610_v51 = vpop.xlane.xlu0 %4609  ;;  %v13013_v52 = vpop.eup %9459 }
0x1210   : > { %v4629_v5 = vsub.f32 %v12957_v40, %v4610_v51  ;;  %9465 = vpow2.f32 %v4661_v9  ;;  %v4651_v40 = vmul.f32 1.442695, %v4626_v26  ;;  %v13018_v7 = vpop.eup %9461 }
0x1211   : > { %9467 = vpow2.f32 %v4649_v54 }
0x1212   : > { %v4657_v57 = vmul.f32 1.442695, %v4629_v5  ;;  %v13020_v17 = vpop.eup %9463 }
0x1213   : > { %v4879_v1 = vpop.permute.xlu0 %4878 }
0x1214   : > { %9469 = vpow2.f32 %v4657_v57 }
0x1215   : > { %9471 = vpow2.f32 %v4655_v45 }
0x1218   : > { %4882 = vrot.lane.b32.xlu0 %v14819_v24, %s10094_s20  ;;  %4884 = vrot.lane.b32.xlu1 %v14820_v6, %s10094_s20 }
0x121a   : > { %v13025_v12 = vpop.eup %9465 }
0x121b   : > { %v13027_v55 = vpop.eup %9467 }
0x121e   : > { %v13031_v53 = vpop.eup %9469 }
0x121f   : > { %v13033_v39 = vpop.eup %9471 }
0x1237   : > { %4677 = vadd.xlane.f32.xlu0 %v13005_v56 }
0x123a   : > { %v4616_v62 = vpop.xlane.xlu1 %4615 }
0x123b   : > { %v4632_v13 = vsub.f32 %v12966_v43, %v4616_v62  ;;  %4673 = vadd.xlane.f32.xlu0 %v13011_v48 }
0x123c   : > { %4675 = vadd.xlane.f32.xlu1 %v13013_v52 }
0x123d   : > { %v4663_v50 = vmul.f32 1.442695, %v4632_v13 }
0x123e   : > { %v4612_v63 = vpop.xlane.xlu1 %4611 }
0x123f   : > { %9473 = vpow2.f32 %v4663_v50  ;;  %v4630_v41 = vsub.f32 %v12971_v38, %v4612_v63  ;;  %4679 = vadd.xlane.f32.xlu0 %v13018_v7 }
0x1240   : > { %4685 = vadd.xlane.f32.xlu1 %v13020_v17  ;;  %9475 = vpow2.f32 %v4651_v40  ;;  %v4915_v40 = vsel %vm1271_vm1, %v12837_v4, 0 }
0x1241   : > { %v4659_v43 = vmul.f32 1.442695, %v4630_v41 }
0x1243   : > { %4693 = vadd.xlane.f32.xlu0 %v13025_v12  ;;  %9477 = vpow2.f32 %v4659_v43 }
0x1244   : > { %4681 = vadd.xlane.f32.xlu1 %v13027_v55 }
0x1247   : > { %4689 = vadd.xlane.f32.xlu0 %v13031_v53 }
0x1248   : > { %4687 = vadd.xlane.f32.xlu1 %v13033_v39 }
0x1249   : > { %v13037_v38 = vpop.eup %9473 }
0x124a   : > { %v13039_v37 = vpop.eup %9475 }
0x124b   : > { %4695 = vadd.xlane.f32.xlu0 %v13037_v38 }
0x124c   : > { %4683 = vadd.xlane.f32.xlu1 %v13039_v37 }
0x124d   : > { %v13043_v59 = vpop.eup %9477 }
0x1250   : > { %4691 = vadd.xlane.f32.xlu1 %v13043_v59 }
0x1261   : > { %4888 = vrot.lane.b32.xlu1 %v14821_v47, %s10094_s20  ;;  %4886 = vrot.lane.b32.xlu0 %v14822_v19, %s10094_s20  ;;  %s9993_s20 = sshll.u32 %s10100_s17, 4  ;;  %s9994_s20 = int_to_ptr.vmem [resolvable:$false] %s9993_s20 }
0x1265   : > { %4860 = vrot.lane.b32.xlu1 %v14807_v32, %s10095_s28  ;;  %4858 = vrot.lane.b32.xlu0 %v14808_v20, %s10095_s28 }
0x1269   : > { %4864 = vrot.lane.b32.xlu1 %v14817_v16, %s10095_s28  ;;  %4862 = vrot.lane.b32.xlu0 %v14818_v31, %s10095_s28 }
0x126d   : > { %4868 = vrot.lane.b32.xlu1 %v14820_v6, %s10095_s28  ;;  %4866 = vrot.lane.b32.xlu0 %v14819_v24, %s10095_s28 }
0x1271   : > { %4872 = vrot.lane.b32.xlu1 %v14821_v47, %s10095_s28  ;;  %4870 = vrot.lane.b32.xlu0 %v14822_v19, %s10095_s28  ;;  %s9995_s28 = scalar_lea.vmem %s9994_s20, 8192 }
0x1275   : > { %5221 = vrot.lane.b32.xlu1 %v14807_v32, %s10096_s24  ;;  %5219 = vrot.lane.b32.xlu0 %v14808_v20, %s10096_s24 }
0x1279   : > { %5223 = vrot.lane.b32.xlu0 %v14818_v31, %s10096_s24 }
0x128c   : > { %v4670_v30 = vpop.xlane.xlu1 %4669 }
0x128f   : > { %v4668_v51 = vpop.xlane.xlu0 %4667 }
0x1290   : > { %9479 = vrcp.f32 %v4668_v51  ;;  %v4666_v9 = vpop.xlane.xlu1 %4665 }
0x1291   : > { %9481 = vrcp.f32 %v4666_v9 }
0x1292   : > { %9483 = vrcp.f32 %v4670_v30 }
0x1293   : > { %v4883_v4 = vpop.permute.xlu0 %4882 }
0x1294   : > { %v4672_v5 = vpop.xlane.xlu1 %4671 }
0x1295   : > { %9485 = vrcp.f32 %v4672_v5 }
0x129a   : > { %v9480_v29 = vpop.eup %9479 }
0x129b   : > { %v9482_v54 = vpop.eup %9481  ;;  %v4714_v57 = vmul.f32 %v9480_v29, %v12983_v14  ;;  %v4918_v14 = vsel %vm1271_vm1, %v12974_v11, 0 }
0x129c   : > { %v4713_v32 = vmul.f32 %v9482_v54, %v12985_v3  ;;  %v9484_v45 = vpop.eup %9483  ;;  %v4924_v3 = vsel %vm1271_vm1, %v13007_v18, 0 }
0x129d   : > { %v4715_v31 = vmul.f32 %v9484_v45, %v12980_v27  ;;  %v4921_v27 = vsel %vm1271_vm1, %v4879_v1, 0 }
0x129e   : > { %v4729_v20 = vpack.c.bf16 %v4714_v57, %v4713_v32 }
0x129f   : > { %v9486_v26 = vpop.eup %9485 }
0x12a0   : > { %v4716_v62 = vmul.f32 %v9486_v26, %v12989_v2  ;;  %8347 = vmatprep.mubr.bf16.mxu1 %v4729_v20  ;;  %v4927_v2 = vsel %vm1271_vm1, %v4883_v4, 0 }
0x12a2   : > { %v4730_v13 = vpack.c.bf16 %v4716_v62, %v4715_v31 }
0x12a4   : > { %8348 = vmatmul.mubr.bf16.vlgmr.msra.gmra.mrb[128].mxu1 %v4730_v13 }
0x12a5   : > { %8364 = vmatpush3.bf16.xpose.msra.mxu1 %v4915_v40 }
0x12a6   : > { %8596 = vmatprep.subr.msk.bf16.mxu1 %vm1271_vm1, %v12974_v11  ;;  %v4885_v11 = vpop.permute.xlu1 %4884 }
0x12a7   : > { %v4930_v43 = vsel %vm1271_vm1, %v4885_v11, 0 }
0x12ad   : > { %8366 = vmatpush3.bf16.xpose.msra.mxu1 %v4918_v14 }
0x12ae   : > { %8597 = vmatprep.subr.msk.bf16.mxu1 %vm1271_vm1, %v4879_v1 }
0x12b5   : > { %8368 = vmatpush3.bf16.xpose.msra.mxu1 %v4921_v27 }
0x12b6   : > { %8598 = vmatprep.subr.msk.bf16.mxu1 %vm1271_vm1, %v13007_v18 }
0x12bd   : > { %8370 = vmatpush3.bf16.xpose.msra.mxu1 %v4924_v3 }
0x12be   : > { %8599 = vmatprep.subr.msk.bf16.mxu1 %vm1271_vm1, %v4883_v4 }
0x12c4   : > { %v4678_v50 = vpop.xlane.xlu0 %4677 }
0x12c5   : > { %8372 = vmatpush3.bf16.xpose.msra.mxu1 %v4927_v2 }
0x12c6   : > { %8600 = vmatprep.subr.msk.bf16.mxu1 %vm1271_vm1, %v4885_v11 }
0x12c8   : > { %v4674_v63 = vpop.xlane.xlu0 %4673 }
0x12c9   : > { %9487 = vrcp.f32 %v4674_v63  ;;  %v4676_v41 = vpop.xlane.xlu1 %4675 }
0x12ca   : > { %9489 = vrcp.f32 %v4676_v41 }
0x12cb   : > { %9491 = vrcp.f32 %v4678_v50 }
0x12cc   : > { %v4680_v1 = vpop.xlane.xlu0 %4679 }
0x12cd   : > { %8374 = vmatpush3.bf16.xpose.msra.mxu1 %v4930_v43  ;;  %9493 = vrcp.f32 %v4680_v1  ;;  %v4686_v18 = vpop.xlane.xlu1 %4685 }
0x12d0   : > { %v4694_v30 = vpop.xlane.xlu0 %4693 }
0x12d1   : > { %v4682_v51 = vpop.xlane.xlu1 %4681 }
0x12d3   : > { %v9488_v9 = vpop.eup %9487 }
0x12d4   : > { %v9490_v5 = vpop.eup %9489  ;;  %v4690_v29 = vpop.xlane.xlu0 %4689  ;;  %v4717_v54 = vmul.f32 %v9488_v9, %v13011_v48 }
0x12d5   : > { %v9492_v57 = vpop.eup %9491  ;;  %v4688_v32 = vpop.xlane.xlu1 %4687  ;;  %v4718_v45 = vmul.f32 %v9490_v5, %v13013_v52 }
0x12d6   : > { %9495 = vrcp.f32 %v4688_v32  ;;  %v4719_v62 = vmul.f32 %v9492_v57, %v13005_v56 }
0x12d7   : > { %v9494_v20 = vpop.eup %9493  ;;  %v4731_v26 = vpack.c.bf16 %v4718_v45, %v4717_v54  ;;  %9497 = vrcp.f32 %v4682_v51 }
0x12d8   : > { %v4696_v31 = vpop.xlane.xlu0 %4695  ;;  %v4720_v13 = vmul.f32 %v9494_v20, %v13018_v7  ;;  %9499 = vrcp.f32 %v4686_v18 }
0x12d9   : > { %v4684_v40 = vpop.xlane.xlu1 %4683  ;;  %8351 = vmatprep.mubr.bf16.mxu1 %v4731_v26 }
0x12da   : > { %9501 = vrcp.f32 %v4684_v40  ;;  %v4732_v14 = vpack.c.bf16 %v4720_v13, %v4719_v62 }
0x12db   : > { %9503 = vrcp.f32 %v4690_v29 }
0x12dc   : > { %8352 = vmatmul.mubr.bf16.gmra.mrb[132].mxu1 %v4732_v14  ;;  %v4887_v48 = vpop.permute.xlu0 %4886 }
0x12dd   : > { %v4692_v27 = vpop.xlane.xlu1 %4691  ;;  %8601 = vmatprep.subr.msk.bf16.mxu1 %vm1271_vm1, %v4887_v48  ;;  %v4933_v52 = vsel %vm1271_vm1, %v4887_v48, 0 }
0x12de   : > { %9505 = vrcp.f32 %v4692_v27  ;;  %8376 = vmatpush3.bf16.xpose.msra.mxu1 %v4933_v52 }
0x12df   : > { %9507 = vrcp.f32 %v4696_v31 }
0x12e0   : > { %v4859_v3 = vpop.permute.xlu0 %4858  ;;  %v9496_v56 = vpop.eup %9495  ;;  %9509 = vrcp.f32 %v4694_v30 }
0x12e1   : > { %v4889_v7 = vpop.permute.xlu1 %4888  ;;  %v9498_v4 = vpop.eup %9497  ;;  %v4724_v63 = vmul.f32 %v9496_v56, %v13033_v39 }
0x12e2   : > { %8602 = vmatprep.subr.msk.bf16.mxu1 %vm1271_vm1, %v4889_v7  ;;  %v9500_v2 = vpop.eup %9499  ;;  %v4936_v43 = vsel %vm1271_vm1, %v4889_v7, 0  ;;  %v4721_v1 = vmul.f32 %v9498_v4, %v13027_v55 }
0x12e3   : > { %v4723_v30 = vmul.f32 %v9500_v2, %v13020_v17 }
0x12e4   : > { %v9502_v50 = vpop.eup %9501  ;;  %v4863_v11 = vpop.permute.xlu0 %4862 }
0x12e5   : > { %v4861_v41 = vpop.permute.xlu1 %4860  ;;  %v4722_v18 = vmul.f32 %v9502_v50, %v13039_v37  ;;  %v9504_v51 = vpop.eup %9503  ;;  %v4734_v54 = vpack.c.bf16 %v4724_v63, %v4723_v30 }
0x12e6   : > { %8378 = vmatpush3.bf16.xpose.msra.mxu1 %v4936_v43  ;;  %v4725_v39 = vmul.f32 %v9504_v51, %v13031_v53 }
0x12e7   : > { %v4733_v9 = vpack.c.bf16 %v4722_v18, %v4721_v1 }
0x12e8   : > { %v9506_v5 = vpop.eup %9505  ;;  %v4867_v29 = vpop.permute.xlu0 %4866 }
0x12e9   : > { %v9508_v57 = vpop.eup %9507  ;;  %v4865_v32 = vpop.permute.xlu1 %4864  ;;  %8355 = vmatprep.mubr.bf16.mxu1 %v4733_v9  ;;  %v4726_v45 = vmul.f32 %v9506_v5, %v13043_v59 }
0x12ea   : > { %8356 = vmatmul.mubr.bf16.gmra.mrb[136].mxu1 %v4734_v54  ;;  %v9510_v20 = vpop.eup %9509  ;;  %v4728_v37 = vmul.f32 %v9508_v57, %v13037_v38 }
0x12eb   : > { %v4735_v55 = vpack.c.bf16 %v4726_v45, %v4725_v39  ;;  %v4727_v17 = vmul.f32 %v9510_v20, %v13025_v12 }
0x12ec   : > { %v4871_v26 = vpop.permute.xlu0 %4870 }
0x12ed   : > { %v4869_v31 = vpop.permute.xlu1 %4868  ;;  %8359 = vmatprep.mubr.bf16.mxu1 %v4735_v55  ;;  %v4736_v13 = vpack.c.bf16 %v4728_v37, %v4727_v17 }
0x12f0   : > { %v5220_v62 = vpop.permute.xlu0 %5219 }
0x12f1   : > { %v4873_v40 = vpop.permute.xlu1 %4872  ;;  %8395 = vmatprep.subr.bf16.mxu0 %v5220_v62 }
0x12f2   : > { %8360 = vmatmul.mubr.bf16.gmra.mrb[140].mxu1 %v4736_v13  ;;  %8396 = vmatpush3.bf16.msra.mxu0 %v5220_v62 }
0x12f3   : > { %8379 = vmatprep.mubr.msk.bf16.mxu1 %vm1271_vm1, %v4859_v3 }
0x12f4   : > { %v5224_v59 = vpop.permute.xlu0 %5223 }
0x12f5   : > { %v5222_v53 = vpop.permute.xlu1 %5221 }
0x12f6   : > { %8397 = vmatprep.subr.bf16.mxu0 %v5222_v53 }
0x12f7   : > { %8398 = vmatpush3.bf16.msra.mxu0 %v5222_v53 }
0x12f8   : > { %8399 = vmatprep.subr.bf16.mxu0 %v5224_v59 }
0x12fa   : > { %8380 = vmatmul.mubr.msk.bf16.vlgmr.msra.gmra.mrb[144].mxu1 %vm1271_vm1, %v4861_v41 }
0x12fb   : > { %8383 = vmatprep.mubr.msk.bf16.mxu1 %vm1271_vm1, %v4863_v11  ;;  %8400 = vmatpush3.bf16.msra.mxu0 %v5224_v59 }
0x1302   : > { %8384 = vmatmul.mubr.msk.bf16.gmra.mrb[148].mxu1 %vm1271_vm1, %v4865_v32 }
0x1303   : > { %8387 = vmatprep.mubr.msk.bf16.mxu1 %vm1271_vm1, %v4867_v29 }
0x130a   : > { %8388 = vmatmul.mubr.msk.bf16.gmra.mrb[152].mxu1 %vm1271_vm1, %v4869_v31 }
0x130b   : > { %8391 = vmatprep.mubr.msk.bf16.mxu1 %vm1271_vm1, %v4871_v26 }
0x1312   : > { %8392 = vmatmul.mubr.msk.bf16.gmra.mrb[156].mxu1 %vm1271_vm1, %v4873_v40 }
0x1377   : > { %v13116_v12 = vpop.f32.mrb[128].mxu1 }
0x1378   : > { %v13118_v38 = vpop.f32.mrb[129].mxu1 }
0x1379   : > { %v13120_v14 = vpop.f32.mrb[130].mxu1 }
0x137a   : > { %v13124_v27 = vpop.f32.mrb[131].mxu1 }
0x13af   : > { %v13128_v3 = vpop.f32.mrb[132].mxu1 }
0x13b0   : > { %v13130_v56 = vpop.f32.mrb[133].mxu1 }
0x13b1   : > { %v13132_v7 = vpop.f32.mrb[134].mxu1 }
0x13b2   : > { %v13136_v2 = vpop.f32.mrb[135].mxu1 }
0x13bd   : > { %v13140_v11 = vpop.f32.mrb[136].mxu1 }
0x13be   : > { %v13142_v63 = vpop.f32.mrb[137].mxu1 }
0x13bf   : > { %14866 = vst [vmem:[#allocation103_spill] sm:$0xff] %v13142_v63  ;;  %v13144_v41 = vpop.f32.mrb[138].mxu1 }
0x13c0   : > { %v13148_v1 = vpop.f32.mrb[139].mxu1 }
0x13c5   : > { %v13152_v51 = vpop.f32.mrb[140].mxu1 }
0x13c6   : > { %14867 = vst [vmem:[#allocation104_spill] sm:$0xff] %v13152_v51  ;;  %v13154_v30 = vpop.f32.mrb[141].mxu1 }
0x13c7   : > { %14868 = vst [vmem:[#allocation105_spill] sm:$0xff] %v13154_v30  ;;  %v13156_v9 = vpop.f32.mrb[142].mxu1 }
0x13c8   : > { %14869 = vst [vmem:[#allocation106_spill] sm:$0xff] %v13156_v9  ;;  %v13160_v29 = vpop.f32.mrb[143].mxu1 }
0x13c9   : > { %14870 = vst [vmem:[#allocation107_spill] sm:$0xff] %v13160_v29 }
0x13cd   : > { %v8381_v57 = vpop.f32.mrb[144].mxu1 }
0x13ce   : > { %v5037_v32 = vmul.f32 0.35355338, %v8381_v57  ;;  %v4972_v39 = vpop.f32.mrb[145].mxu1 }
0x13cf   : > { %v8382_v45 = vpop.f32.mrb[146].mxu1  ;;  %v5035_v20 = vmul.f32 0.35355338, %v4972_v39 }
0x13d0   : > { %v4975_v55 = vpop.f32.mrb[147].mxu1  ;;  %v13166_v26 = vsel %vm1238_vm2, %v5037_v32, -1e+30  ;;  %v5038_v31 = vmul.f32 0.35355338, %v8382_v45 }
0x13d1   : > { %v5036_v37 = vmul.f32 0.35355338, %v4975_v55  ;;  %5071 = vmax.xlane.f32.xlu0 %v13166_v26  ;;  %v5051_v62 = vsel %vm1238_vm2, %v5035_v20, -1e+30 }
0x13d2   : > { %v13178_v59 = vsel %vm1238_vm2, %v5038_v31, -1e+30 }
0x13d3   : > { %v13171_v17 = vsel %vm1238_vm2, %v5036_v37, -1e+30 }
0x13d4   : > { %5069 = vmax.xlane.f32.xlu1 %v13171_v17 }
0x13d5   : > { %5067 = vmax.xlane.f32.xlu0 %v5051_v62  ;;  %v8385_v13 = vpop.f32.mrb[148].mxu1 }
0x13d6   : > { %v4988_v40 = vpop.f32.mrb[149].mxu1  ;;  %v5041_v57 = vmul.f32 0.35355338, %v8385_v13 }
0x13d7   : > { %v8386_v53 = vpop.f32.mrb[150].mxu1  ;;  %v5039_v37 = vmul.f32 0.35355338, %v4988_v40 }
0x13d8   : > { %v5042_v32 = vmul.f32 0.35355338, %v8386_v53  ;;  %v4991_v39 = vpop.f32.mrb[151].mxu1  ;;  %v5057_v20 = vsel %vm1238_vm2, %v5041_v57, -1e+30 }
0x13d9   : > { %5073 = vmax.xlane.f32.xlu0 %v13178_v59  ;;  %v5040_v45 = vmul.f32 0.35355338, %v4991_v39 }
0x13da   : > { %v13183_v55 = vsel %vm1238_vm2, %v5042_v32, -1e+30  ;;  %v13195_v32 = vsel %vm1238_vm2, %v5039_v37, -1e+30 }
0x13db   : > { %5081 = vmax.xlane.f32.xlu1 %v13183_v55  ;;  %v13190_v13 = vsel %vm1238_vm2, %v5040_v45, -1e+30 }
0x13dd   : > { %5079 = vmax.xlane.f32.xlu0 %v5057_v20  ;;  %v8389_v54 = vpop.f32.mrb[152].mxu1 }
0x13de   : > { %v5004_v31 = vpop.f32.mrb[153].mxu1  ;;  %v5045_v40 = vmul.f32 0.35355338, %v8389_v54 }
0x13df   : > { %5077 = vmax.xlane.f32.xlu1 %v13190_v13  ;;  %v8390_v53 = vpop.f32.mrb[154].mxu1  ;;  %v5043_v45 = vmul.f32 0.35355338, %v5004_v31 }
0x13e0   : > { %v5046_v39 = vmul.f32 0.35355338, %v8390_v53  ;;  %v5007_v5 = vpop.f32.mrb[155].mxu1  ;;  %v13205_v43 = vsel %vm1238_vm2, %v5045_v40, -1e+30 }
0x13e1   : > { %5075 = vmax.xlane.f32.xlu0 %v13195_v32  ;;  %v5044_v57 = vmul.f32 0.35355338, %v5007_v5  ;;  %v13215_v31 = vsel %vm1238_vm2, %v5043_v45, -1e+30 }
0x13e2   : > { %v13200_v18 = vsel %vm1238_vm2, %v5046_v39, -1e+30 }
0x13e3   : > { %5089 = vmax.xlane.f32.xlu1 %v13200_v18  ;;  %v13210_v53 = vsel %vm1238_vm2, %v5044_v57, -1e+30 }
0x13e5   : > { %5087 = vmax.xlane.f32.xlu0 %v13205_v43  ;;  %v8393_v37 = vpop.f32.mrb[156].mxu1 }
0x13e6   : > { %v5020_v54 = vpop.f32.mrb[157].mxu1  ;;  %v5049_v39 = vmul.f32 0.35355338, %v8393_v37 }
0x13e7   : > { %5085 = vmax.xlane.f32.xlu1 %v13210_v53  ;;  %v8394_v5 = vpop.f32.mrb[158].mxu1  ;;  %v5047_v40 = vmul.f32 0.35355338, %v5020_v54 }
0x13e8   : > { %v5023_v50 = vpop.f32.mrb[159].mxu1  ;;  %v13220_v52 = vsel %vm1238_vm2, %v5049_v39, -1e+30  ;;  %v5050_v45 = vmul.f32 0.35355338, %v8394_v5 }
0x13e9   : > { %5083 = vmax.xlane.f32.xlu0 %v13215_v31  ;;  %v13225_v57 = vsel %vm1238_vm2, %v5047_v40, -1e+30  ;;  %v5048_v37 = vmul.f32 0.35355338, %v5023_v50 }
0x13ea   : > { %v13234_v54 = vsel %vm1238_vm2, %v5050_v45, -1e+30 }
0x13eb   : > { %v13239_v39 = vsel %vm1238_vm2, %v5048_v37, -1e+30 }
0x13ed   : > { %5095 = vmax.xlane.f32.xlu0 %v13220_v52 }
0x13f1   : > { %5091 = vmax.xlane.f32.xlu0 %v13225_v57 }
0x13f8   : > { %5227 = vrot.lane.b32.xlu1 %v14819_v24, %s10096_s24 }
0x1407   : > { %5225 = vrot.lane.b32.xlu0 %v14817_v16, %s10096_s24 }
0x141c   : > { %5097 = vmax.xlane.f32.xlu1 %v13234_v54 }
0x1420   : > { %5093 = vmax.xlane.f32.xlu1 %v13239_v39 }
0x1431   : > { %5229 = vrot.lane.b32.xlu1 %v14820_v6, %s10096_s24 }
0x145e   : > { %v5072_v24 = vpop.xlane.xlu0 %5071 }
0x145f   : > { %v5101_v16 = vsub.f32 %v13166_v26, %v5072_v24 }
0x1461   : > { %v5119_v5 = vmul.f32 1.442695, %v5101_v16  ;;  %v5070_v40 = vpop.xlane.xlu1 %5069 }
0x1462   : > { %v5068_v50 = vpop.xlane.xlu0 %5067  ;;  %v5100_v48 = vsub.f32 %v13171_v17, %v5070_v40 }
0x1463   : > { %9511 = vpow2.f32 %v5119_v5  ;;  %v5099_v45 = vsub.f32 %v5051_v62, %v5068_v50 }
0x1464   : > { %v5117_v51 = vmul.f32 1.442695, %v5100_v48 }
0x1465   : > { %v5115_v4 = vmul.f32 1.442695, %v5099_v45 }
0x1466   : > { %v5074_v30 = vpop.xlane.xlu0 %5073 }
0x1467   : > { %9513 = vpow2.f32 %v5115_v4  ;;  %v5102_v21 = vsub.f32 %v13178_v59, %v5074_v30 }
0x1468   : > { %v5082_v37 = vpop.xlane.xlu1 %5081 }
0x1469   : > { %v5121_v29 = vmul.f32 1.442695, %v5102_v21  ;;  %v5106_v4 = vsub.f32 %v13183_v55, %v5082_v37 }
0x146a   : > { %v5080_v9 = vpop.xlane.xlu0 %5079 }
0x146b   : > { %9515 = vpow2.f32 %v5121_v29  ;;  %v5105_v6 = vsub.f32 %v5057_v20, %v5080_v9  ;;  %v5129_v20 = vmul.f32 1.442695, %v5106_v4 }
0x146c   : > { %v5078_v63 = vpop.xlane.xlu1 %5077  ;;  %9517 = vpow2.f32 %v5117_v51 }
0x146d   : > { %v13247_v26 = vpop.eup %9511  ;;  %v5127_v24 = vmul.f32 1.442695, %v5105_v6  ;;  %v5104_v16 = vsub.f32 %v13190_v13, %v5078_v63 }
0x146e   : > { %5151 = vadd.xlane.f32.xlu1 %v13247_v26  ;;  %v5076_v17 = vpop.xlane.xlu0 %5075 }
0x146f   : > { %9519 = vpow2.f32 %v5127_v24  ;;  %v5125_v30 = vmul.f32 1.442695, %v5104_v16  ;;  %v5103_v62 = vsub.f32 %v13195_v32, %v5076_v17 }
0x1470   : > { %v5090_v9 = vpop.xlane.xlu1 %5089 }
0x1471   : > { %v13253_v48 = vpop.eup %9513  ;;  %v5123_v29 = vmul.f32 1.442695, %v5103_v62  ;;  %9521 = vpow2.f32 %v5125_v30  ;;  %v5110_v55 = vsub.f32 %v13200_v18, %v5090_v9 }
0x1472   : > { %5147 = vadd.xlane.f32.xlu1 %v13253_v48  ;;  %v5088_v59 = vpop.xlane.xlu0 %5087 }
0x1473   : > { %9523 = vpow2.f32 %v5123_v29  ;;  %v5109_v63 = vsub.f32 %v13205_v43, %v5088_v59  ;;  %v5137_v37 = vmul.f32 1.442695, %v5110_v55 }
0x1474   : > { %9525 = vpow2.f32 %v5129_v20  ;;  %v5086_v5 = vpop.xlane.xlu1 %5085 }
0x1475   : > { %v13257_v51 = vpop.eup %9515  ;;  %v5135_v13 = vmul.f32 1.442695, %v5109_v63  ;;  %v5108_v43 = vsub.f32 %v13210_v53, %v5086_v5 }
0x1476   : > { %5153 = vadd.xlane.f32.xlu1 %v13257_v51  ;;  %v5084_v32 = vpop.xlane.xlu0 %5083  ;;  %v13262_v40 = vpop.eup %9517 }
0x1477   : > { %v5107_v50 = vsub.f32 %v13215_v31, %v5084_v32  ;;  %9527 = vpow2.f32 %v5135_v13  ;;  %v5133_v17 = vmul.f32 1.442695, %v5108_v43  ;;  %v14871_v13 = vpack.i.bf16 %v11702_v8, %v11698_v58 }
0x1478   : > { %v5228_v9 = vpop.permute.xlu1 %5227  ;;  %v14872_v32 = vpack.i.bf16 %v11998_v60, %v11992_v36  ;;  %v14874_v58 = vpack.i.bf16 %v12278_v23, %v12274_v22  ;;  %v14875_v36 = vpack.i.bf16 %v11714_v42, %v11710_v44  ;;  %v14876_v60 = vpack.i.bf16 %v12006_v28, %v12002_v46 }
0x1479   : > { %v13264_v45 = vpop.eup %9519  ;;  %v5131_v21 = vmul.f32 1.442695, %v5107_v50  ;;  %v14877_v23 = vpack.i.bf16 %v12290_v35, %v12286_v0  ;;  %v14878_v44 = vpack.i.bf16 %v11726_v10, %v11722_v61  ;;  %v14879_v46 = vpack.i.bf16 %v12018_v25, %v12014_v34  ;;  %v14880_v0 = vld [vmem:[#allocation33_spill] sm:$0xff]  ;;  %v14882_v61 = vld [vmem:[#allocation59_spill] sm:$0xff] }
0x147a   : > { %5149 = vadd.xlane.f32.xlu1 %v13262_v40  ;;  %5159 = vadd.xlane.f32.xlu0 %v13264_v45  ;;  %v5096_v18 = vpop.xlane.xlu0 %5095  ;;  %v14881_v35 = vpack.i.bf16 %v12302_v15, %v14880_v0  ;;  %v14883_v10 = vld [vmem:[#allocation57_spill] sm:$0xff]  ;;  %v14889_v25 = vld [vmem:[#allocation67_spill] sm:$0xff] }
0x147b   : > { %9529 = vpow2.f32 %v5131_v21  ;;  %v5113_v6 = vsub.f32 %v13220_v52, %v5096_v18  ;;  %v13270_v24 = vpop.eup %9521  ;;  %v14886_v21 = vld [vmem:[#allocation62_spill] sm:$0xff]  ;;  %v14888_v34 = vld [vmem:[#allocation69_spill] sm:$0xff]  ;;  %v14921_v0 = vld [vmem:[#allocation27_spill] sm:$0xff] }
0x147c   : > { %9531 = vpow2.f32 %v5137_v37  ;;  %v14890_v43 = vpack.i.bf16 %v14888_v34, %v14889_v25  ;;  %v14891_v18 = vld [vmem:[#allocation89_spill] sm:$0xff] }
0x147d   : > { %v13272_v31 = vpop.eup %9523  ;;  %v5143_v16 = vmul.f32 1.442695, %v5113_v6  ;;  %v14892_v6 = vld [vmem:[#allocation87_spill] sm:$0xff] }
0x147e   : > { %5157 = vadd.xlane.f32.xlu1 %v13270_v24  ;;  %5155 = vadd.xlane.f32.xlu0 %v13272_v31  ;;  %v5092_v53 = vpop.xlane.xlu0 %5091  ;;  %v13277_v30 = vpop.eup %9525  ;;  %v14893_v15 = vpack.i.bf16 %v14891_v18, %v14892_v6  ;;  %v14930_v18 = vld [vmem:[#allocation63_spill] sm:$0xff] }
0x147f   : > { %9533 = vpow2.f32 %v5143_v16  ;;  %v5111_v4 = vsub.f32 %v13225_v57, %v5092_v53  ;;  %v14894_v16 = vpack.i.bf16 %v13120_v14, %v13116_v12  ;;  %v14896_v53 = vld [vmem:[#allocation51_spill] sm:$0xff]  ;;  %v14904_v12 = vpack.i.bf16 %v13132_v7, %v13128_v3  ;;  %v14905_v14 = vld [vmem:[#allocation54_spill] sm:$0xff]  ;;  %v14917_v7 = vld [vmem:[#allocation56_spill] sm:$0xff] }
0x1480   : > { %9535 = vpow2.f32 %v5133_v17  ;;  %v14895_v17 = vld [vmem:[#allocation52_spill] sm:$0xff] }
0x1481   : > { %v5139_v62 = vmul.f32 1.442695, %v5111_v4  ;;  %v13280_v29 = vpop.eup %9527  ;;  %v14897_v4 = vpack.i.bf16 %v14895_v17, %v14896_v53  ;;  %v14933_v17 = vld [vmem:[#allocation68_spill] sm:$0xff] }
0x1482   : > { %5161 = vadd.xlane.f32.xlu0 %v13277_v30  ;;  %v5226_v52 = vpop.permute.xlu0 %5225 }
0x1483   : > { %9537 = vpow2.f32 %v5139_v62  ;;  %8401 = vmatprep.subr.bf16.mxu0 %v5226_v52  ;;  %v14898_v62 = vld [vmem:[#allocation93_spill] sm:$0xff] }
0x1484   : > { %8402 = vmatpush3.bf16.msra.mxu0 %v5226_v52  ;;  %v14899_v52 = vld [vmem:[#allocation91_spill] sm:$0xff] }
0x1485   : > { %v13282_v59 = vpop.eup %9529  ;;  %8403 = vmatprep.subr.bf16.mxu0 %v5228_v9 }
0x1486   : > { %5167 = vadd.xlane.f32.xlu0 %v13280_v29  ;;  %5163 = vadd.xlane.f32.xlu1 %v13282_v59  ;;  %v13286_v57 = vpop.eup %9531 }
0x1488   : > { %8404 = vmatpush3.bf16.msra.mxu0 %v5228_v9  ;;  %v14900_v9 = vpack.i.bf16 %v14898_v62, %v14899_v52  ;;  %v14935_v52 = vld [vmem:[#allocation90_spill] sm:$0xff] }
0x1489   : > { %v13288_v20 = vpop.eup %9533 }
0x148a   : > { %5169 = vadd.xlane.f32.xlu0 %v13286_v57  ;;  %5175 = vadd.xlane.f32.xlu1 %v13288_v20  ;;  %v13292_v63 = vpop.eup %9535 }
0x148d   : > { %v13294_v55 = vpop.eup %9537 }
0x148e   : > { %5165 = vadd.xlane.f32.xlu0 %v13292_v63  ;;  %5171 = vadd.xlane.f32.xlu1 %v13294_v55 }
0x149f   : > { %5233 = vrot.lane.b32.xlu1 %v14821_v47, %s10096_s24  ;;  %v14873_v47 = vpack.i.bf16 %v11994_v33, %v11990_v49 }
0x14a3   : > { %8755 = vrot.lane.b32.xlu1 %v14871_v13, %s10097_s27  ;;  %v14901_v13 = vld [vmem:[#allocation29_spill] sm:$0xff] }
0x14a4   : > { %5231 = vrot.lane.b32.xlu0 %v14822_v19, %s10096_s24 }
0x14a7   : > { %8760 = vrot.lane.b32.xlu1 %v14872_v32, %s10098_s16  ;;  %v14902_v32 = vld [vmem:[#allocation28_spill] sm:$0xff] }
0x14a9   : > { %v5098_v5 = vpop.xlane.xlu1 %5097 }
0x14aa   : > { %v5114_v49 = vsub.f32 %v13234_v54, %v5098_v5  ;;  %v14884_v54 = vpack.i.bf16 %v14882_v61, %v14883_v10  ;;  %v14903_v5 = vpack.i.bf16 %v14901_v13, %v14902_v32  ;;  %v14923_v61 = vld [vmem:[#allocation66_spill] sm:$0xff] }
0x14ab   : > { %8765 = vrot.lane.b32.xlu1 %v14873_v47, %s10098_s16  ;;  %v14906_v47 = vld [vmem:[#allocation53_spill] sm:$0xff]  ;;  %v14924_v10 = vld [vmem:[#allocation34_spill] sm:$0xff] }
0x14ac   : > { %v5145_v22 = vmul.f32 1.442695, %v5114_v49  ;;  %v14912_v49 = vld [vmem:[#allocation35_spill] sm:$0xff] }
0x14ad   : > { %v5094_v50 = vpop.xlane.xlu1 %5093 }
0x14ae   : > { %v5112_v8 = vsub.f32 %v13239_v39, %v5094_v50  ;;  %v14885_v39 = vld [vmem:[#allocation64_spill] sm:$0xff]  ;;  %v14907_v50 = vpack.i.bf16 %v14905_v14, %v14906_v47 }
0x14af   : > { %8775 = vrot.lane.b32.xlu1 %v14874_v58, %s10099_s23  ;;  %v14887_v37 = vpack.i.bf16 %v14885_v39, %v14886_v21  ;;  %v14908_v58 = vld [vmem:[#allocation97_spill] sm:$0xff]  ;;  %v14926_v21 = vld [vmem:[#allocation60_spill] sm:$0xff] }
0x14b0   : > { %v5141_v33 = vmul.f32 1.442695, %v5112_v8  ;;  %v14909_v8 = vld [vmem:[#allocation95_spill] sm:$0xff] }
0x14b1   : > { %v5230_v19 = vpop.permute.xlu1 %5229 }
0x14b2   : > { %8405 = vmatprep.subr.bf16.mxu0 %v5230_v19  ;;  %9539 = vpow2.f32 %v5141_v33 }
0x14b3   : > { %8785 = vrot.lane.b32.xlu1 %v14875_v36, %s10097_s27  ;;  %8406 = vmatpush3.bf16.msra.mxu0 %v5230_v19  ;;  %9541 = vpow2.f32 %v5145_v22  ;;  %v14910_v19 = vpack.i.bf16 %v14908_v58, %v14909_v8  ;;  %v14911_v36 = vld [vmem:[#allocation26_spill] sm:$0xff]  ;;  %v14915_v22 = vld [vmem:[#allocation32_spill] sm:$0xff] }
0x14b4   : > { %v14913_v33 = vpack.i.bf16 %v14911_v36, %v14912_v49  ;;  %v14940_v58 = vld [vmem:[#allocation92_spill] sm:$0xff] }
0x14b7   : > { %8795 = vrot.lane.b32.xlu1 %v14876_v60, %s10098_s16  ;;  %v14914_v60 = vld [vmem:[#allocation31_spill] sm:$0xff] }
0x14b8   : > { %v14916_v3 = vpack.i.bf16 %v14914_v60, %v14915_v22 }
0x14bb   : > { %8805 = vrot.lane.b32.xlu1 %v14877_v23, %s10099_s23  ;;  %v14918_v23 = vld [vmem:[#allocation55_spill] sm:$0xff] }
0x14bc   : > { %v13336_v42 = vpop.eup %9539 }
0x14bd   : > { %v13343_v28 = vpop.eup %9541 }
0x14bf   : > { %8815 = vrot.lane.b32.xlu1 %v14878_v44, %s10097_s27  ;;  %v14919_v44 = vpack.i.bf16 %v14917_v7, %v14918_v23  ;;  %v14943_v7 = vld [vmem:[#allocation98_spill] sm:$0xff]  ;;  %v14944_v23 = vld [vmem:[#allocation96_spill] sm:$0xff] }
0x14c3   : > { %5173 = vadd.xlane.f32.xlu0 %v13336_v42  ;;  %8825 = vrot.lane.b32.xlu1 %v14879_v46, %s10098_s16  ;;  %v14920_v46 = vld [vmem:[#allocation61_spill] sm:$0xff] }
0x14c7   : > { %5177 = vadd.xlane.f32.xlu0 %v13343_v28  ;;  %8835 = vrot.lane.b32.xlu1 %v14881_v35, %s10099_s23  ;;  %v14922_v35 = vpack.i.bf16 %v14920_v46, %v14921_v0 }
0x14cb   : > { %8845 = vrot.lane.b32.xlu1 %v14884_v54, %s10097_s27  ;;  %v14925_v54 = vpack.i.bf16 %v14923_v61, %v14924_v10 }
0x14cf   : > { %8855 = vrot.lane.b32.xlu1 %v14887_v37, %s10098_s16  ;;  %v14927_v37 = vld [vmem:[#allocation58_spill] sm:$0xff] }
0x14d0   : > { %v14928_v34 = vpack.i.bf16 %v14926_v21, %v14927_v37 }
0x14d3   : > { %8865 = vrot.lane.b32.xlu1 %v14890_v43, %s10099_s23  ;;  %v14929_v43 = vld [vmem:[#allocation65_spill] sm:$0xff] }
0x14d4   : > { %v14931_v6 = vpack.i.bf16 %v14929_v43, %v14930_v18  ;;  %v8992_v43 = vld [vmem:[#allocation10 + $0x8] sm:$0xff]  }
0x14d7   : > { %8875 = vrot.lane.b32.xlu1 %v14893_v15, %s10097_s27 }
0x14db   : > { %8885 = vrot.lane.b32.xlu1 %v14894_v16, %s10098_s16  ;;  %v14932_v16 = vld [vmem:[#allocation70_spill] sm:$0xff] }
0x14dc   : > { %v14934_v53 = vpack.i.bf16 %v14932_v16, %v14933_v17 }
0x14dd   : > { %8750 = vrot.lane.b32.xlu0 %v14897_v4, %s10097_s27 }
0x14df   : > { %8895 = vrot.lane.b32.xlu1 %v14900_v9, %s10097_s27  ;;  %v14936_v9 = vld [vmem:[#allocation88_spill] sm:$0xff] }
0x14e0   : > { %v14937_v13 = vpack.i.bf16 %v14935_v52, %v14936_v9 }
0x14e1   : > { %8770 = vrot.lane.b32.xlu0 %v14903_v5, %s10099_s23  ;;  %v14938_v5 = vpack.i.bf16 %v13124_v27, %v13118_v38  ;;  %v14942_v38 = vpack.i.bf16 %v13136_v2, %v13130_v56 }
0x14e3   : > { %8905 = vrot.lane.b32.xlu1 %v14904_v12, %s10098_s16 }
0x14e5   : > { %8780 = vrot.lane.b32.xlu0 %v14907_v50, %s10097_s27  ;;  %v14939_v50 = vld [vmem:[#allocation94_spill] sm:$0xff] }
0x14e6   : > { %v14941_v8 = vpack.i.bf16 %v14939_v50, %v14940_v58  ;;  %v14947_v50 = vld [vmem:[#allocation36_spill] sm:$0xff] }
0x14e7   : > { %8915 = vrot.lane.b32.xlu1 %v14910_v19, %s10097_s27 }
0x14e9   : > { %8790 = vrot.lane.b32.xlu0 %v14913_v33, %s10098_s16 }
0x14ed   : > { %8800 = vrot.lane.b32.xlu0 %v14916_v3, %s10099_s23 }
0x14f1   : > { %8810 = vrot.lane.b32.xlu0 %v14919_v44, %s10097_s27 }
0x14f5   : > { %8820 = vrot.lane.b32.xlu0 %v14922_v35, %s10098_s16 }
0x14f9   : > { %8830 = vrot.lane.b32.xlu0 %v14925_v54, %s10099_s23  ;;  %v8991_v54 = vld [vmem:[#allocation10] sm:$0xff]  }
0x14fb   : > { %v5152_v39 = vpop.xlane.xlu1 %5151 }
0x14fd   : > { %8840 = vrot.lane.b32.xlu0 %v14928_v34, %s10097_s27 }
0x14ff   : > { %v5148_v25 = vpop.xlane.xlu1 %5147 }
0x1500   : > { %9543 = vrcp.f32 %v5148_v25 }
0x1501   : > { %8850 = vrot.lane.b32.xlu0 %v14931_v6, %s10098_s16 }
0x1503   : > { %v5154_v15 = vpop.xlane.xlu1 %5153 }
0x1505   : > { %8860 = vrot.lane.b32.xlu0 %v14934_v53, %s10099_s23 }
0x1507   : > { %v5150_v4 = vpop.xlane.xlu1 %5149  ;;  %v5160_v62 = vpop.xlane.xlu0 %5159 }
0x1508   : > { %9545 = vrcp.f32 %v5150_v4 }
0x1509   : > { %8870 = vrot.lane.b32.xlu0 %v14937_v13, %s10097_s27  ;;  %9547 = vrcp.f32 %v5154_v15 }
0x150a   : > { %v9544_v47 = vpop.eup %9543 }
0x150b   : > { %v5156_v32 = vpop.xlane.xlu0 %5155  ;;  %v5158_v12 = vpop.xlane.xlu1 %5157  ;;  %v5195_v33 = vmul.f32 %v9544_v47, %v13253_v48  ;;  %v14945_v48 = vpack.i.bf16 %v14943_v7, %v14944_v23 }
0x150c   : > { %9549 = vrcp.f32 %v5158_v12 }
0x150d   : > { %8880 = vrot.lane.b32.xlu0 %v14938_v5, %s10098_s16  ;;  %9551 = vrcp.f32 %v5156_v32 }
0x150e   : > { %9553 = vrcp.f32 %v5152_v39 }
0x150f   : > { %v5162_v14 = vpop.xlane.xlu0 %5161 }
0x1510   : > { %9555 = vrcp.f32 %v5162_v14 }
0x1511   : > { %8890 = vrot.lane.b32.xlu0 %v14941_v8, %s10097_s27 }
0x1512   : > { %v9546_v19 = vpop.eup %9545 }
0x1513   : > { %v5164_v36 = vpop.xlane.xlu1 %5163  ;;  %v5168_v49 = vpop.xlane.xlu0 %5167  ;;  %v5196_v60 = vmul.f32 %v9546_v19, %v13262_v40 }
0x1514   : > { %v9548_v46 = vpop.eup %9547 }
0x1515   : > { %8900 = vrot.lane.b32.xlu0 %v14942_v38, %s10098_s16  ;;  %v5211_v27 = vpack.c.bf16 %v5196_v60, %v5195_v33  ;;  %v5198_v10 = vmul.f32 %v9548_v46, %v13257_v51 }
0x1516   : > { %v9550_v56 = vpop.eup %9549 }
0x1517   : > { %8411 = vmatprep.mubr.bf16.mxu0 %v5211_v27  ;;  %v13444_v22 = vpop.xlane.xlu1 %5175  ;;  %v5170_v3 = vpop.xlane.xlu0 %5169  ;;  %v5200_v37 = vmul.f32 %v9550_v56, %v13270_v24 }
0x1518   : > { %v9552_v35 = vpop.eup %9551 }
0x1519   : > { %8910 = vrot.lane.b32.xlu0 %v14945_v48, %s10097_s27  ;;  %v9554_v61 = vpop.eup %9553  ;;  %v5199_v21 = vmul.f32 %v9552_v35, %v13272_v31  ;;  %v14949_v35 = vld [vmem:[#allocation39_spill] sm:$0xff] }
0x151a   : > { %v5197_v34 = vmul.f32 %v9554_v61, %v13247_v26  ;;  %v9556_v18 = vpop.eup %9555 }
0x151b   : > { %v13450_v40 = vpop.xlane.xlu1 %5171  ;;  %v5166_v44 = vpop.xlane.xlu0 %5165  ;;  %v5213_v15 = vpack.c.bf16 %v5200_v37, %v5199_v21  ;;  %v5202_v24 = vmul.f32 %v9556_v18, %v13277_v30  ;;  %v14946_v30 = vld [vmem:[#allocation38_spill] sm:$0xff] }
0x151c   : > { %9557 = vrcp.f32 %v5166_v44  ;;  %v5212_v25 = vpack.c.bf16 %v5198_v10, %v5197_v34 }
0x151d   : > { %9559 = vrcp.f32 %v5160_v62 }
0x151e   : > { %9561 = vrcp.f32 %v5164_v36 }
0x151f   : > { %v5234_v2 = vpop.permute.xlu1 %5233  ;;  %v5232_v0 = vpop.permute.xlu0 %5231  ;;  %9563 = vrcp.f32 %v5170_v3 }
0x1520   : > { %8407 = vmatprep.subr.bf16.mxu0 %v5232_v0  ;;  %9565 = vrcp.f32 %v5168_v49 }
0x1521   : > { %8408 = vmatpush3.bf16.msra.mxu0 %v5232_v0  ;;  %9567 = vrcp.f32 %v13450_v40 }
0x1522   : > { %8409 = vmatprep.subr.bf16.mxu0 %v5234_v2 }
0x1523   : > { %v8756_v39 = vpop.permute.xlu1 %8755 }
0x1524   : > { %v8758_v53 = vunpack.i.h.bf16 %v8756_v39  ;;  %v8757_v4 = vunpack.i.l.bf16 %v8756_v39 }
0x1525   : > { %8410 = vmatpush3.bf16.msra.mxu0 %v5234_v2  ;;  %v14948_v2 = vld [vmem:[#allocation41_spill] sm:$0xff] }
0x1526   : > { %8427 = vmatprep.subr.bf16.mxu0 %v8991_v54  ;;  %v9558_v51 = vpop.eup %9557  ;;  %v3365_v47 = vsel %vm1271_vm1, %v14946_v30, %v8758_v53 }
0x1527   : > { %v13456_v6 = vpop.permute.xlu1 %8760  ;;  %v9560_v16 = vpop.eup %9559  ;;  %v5204_v17 = vmul.f32 %v9558_v51, %v13292_v63  ;;  %v3364_v63 = vsel %vm1271_vm1, %v14947_v50, %v8757_v4 }
0x1528   : > { %8412 = vmatmul.mubr.bf16.vlgmr.msra.gmra.mrb[112].mxu0 %v5212_v25  ;;  %v9562_v31 = vpop.eup %9561  ;;  %v5201_v62 = vmul.f32 %v9560_v16, %v13264_v45 }
0x1529   : > { %8415 = vmatprep.mubr.bf16.mxu0 %v5213_v15  ;;  %8428 = vmatpush3.bf16.msra.mxu0 %v8991_v54  ;;  %v5203_v13 = vmul.f32 %v9562_v31, %v13282_v59  ;;  %v9564_v5 = vpop.eup %9563  ;;  %v14950_v31 = vld [vmem:[#allocation45_spill] sm:$0xff] }
0x152a   : > { %8429 = vmatprep.subr.bf16.mxu0 %v8992_v43  ;;  %v5214_v32 = vpack.c.bf16 %v5202_v24, %v5201_v62  ;;  %v9566_v45 = vpop.eup %9565  ;;  %v5206_v33 = vmul.f32 %v9564_v5, %v13286_v57 }
0x152b   : > { %v8766_v26 = vpop.permute.xlu1 %8765  ;;  %v5215_v14 = vpack.c.bf16 %v5204_v17, %v5203_v13  ;;  %v5205_v27 = vmul.f32 %v9566_v45, %v13280_v29 }
0x152c   : > { %v8768_v52 = vunpack.i.h.bf16 %v8766_v26  ;;  %v8767_v9 = vunpack.i.l.bf16 %v8766_v26  ;;  %v14951_v26 = vld [vmem:[#allocation43_spill] sm:$0xff] }
0x152d   : > { %8430 = vmatpush3.bf16.msra.mxu0 %v8992_v43  ;;  %v5216_v3 = vpack.c.bf16 %v5206_v33, %v5205_v27 }
0x152e   : > { %v3381_v19 = vsel %vm3378_vm3, %v3364_v63, %v8767_v9  ;;  %v3382_v59 = vsel %vm3378_vm3, %v3365_v47, %v8768_v52 }
0x152f   : > { %v8776_v12 = vpop.permute.xlu1 %8775 }
0x1530   : > { %v8778_v58 = vunpack.i.h.bf16 %v8776_v12  ;;  %v8777_v8 = vunpack.i.l.bf16 %v8776_v12  ;;  %8416 = vmatmul.mubr.bf16.gmra.mrb[116].mxu0 %v5214_v32 }
0x1531   : > { %8419 = vmatprep.mubr.bf16.mxu0 %v5215_v14 }
0x1532   : > { %v13469_v36 = vsel %vm3395_vm4, %v3381_v19, %v8777_v8  ;;  %v13472_v49 = vsel %vm3395_vm4, %v3382_v59, %v8778_v58  ;;  %v14952_v8 = vld [vmem:[#allocation49_spill] sm:$0xff]  ;;  %v14953_v19 = vld [vmem:[#allocation47_spill] sm:$0xff] }
0x1533   : > { %v5581_v60 = vpack.c.bf16 %v13472_v49, %v13469_v36  ;;  %v8786_v38 = vpop.permute.xlu1 %8785  ;;  %v14959_v36 = vld [vmem:[#allocation44_spill] sm:$0xff] }
0x1534   : > { %v8788_v23 = vunpack.i.h.bf16 %v8786_v38  ;;  %v8787_v48 = vunpack.i.l.bf16 %v8786_v38 }
0x1536   : > { %v3369_v0 = vsel %vm1271_vm1, %v14948_v2, %v8788_v23  ;;  %v3368_v57 = vsel %vm1271_vm1, %v14949_v35, %v8787_v48 }
0x1537   : > { %v8796_v7 = vpop.permute.xlu1 %8795 }
0x1538   : > { %8420 = vmatmul.mubr.bf16.gmra.mrb[120].mxu0 %v5216_v3  ;;  %v8798_v44 = vunpack.i.h.bf16 %v8796_v7  ;;  %v8797_v46 = vunpack.i.l.bf16 %v8796_v7 }
0x153a   : > { %v3385_v54 = vsel %vm3378_vm3, %v3368_v57, %v8797_v46  ;;  %v3386_v29 = vsel %vm3378_vm3, %v3369_v0, %v8798_v44  ;;  %v14954_v0 = vld [vmem:[#allocation37_spill] sm:$0xff]  ;;  %v14955_v57 = vld [vmem:[#allocation30_spill] sm:$0xff] }
0x153b   : > { %v8806_v56 = vpop.permute.xlu1 %8805 }
0x153c   : > { %v8808_v61 = vunpack.i.h.bf16 %v8806_v56  ;;  %v8807_v10 = vunpack.i.l.bf16 %v8806_v56  ;;  %v9568_v56 = vpop.eup %9567 }
0x153e   : > { %v13485_v39 = vsel %vm3395_vm4, %v3385_v54, %v8807_v10  ;;  %v13488_v21 = vsel %vm3395_vm4, %v3386_v29, %v8808_v61  ;;  %v8763_v10 = vunpack.i.h.bf16 %v13456_v6  ;;  %v8762_v54 = vunpack.i.l.bf16 %v13456_v6 }
0x153f   : > { %v8816_v37 = vpop.permute.xlu1 %8815  ;;  %v5583_v34 = vpack.c.bf16 %v13488_v21, %v13485_v39 }
0x1540   : > { %v8818_v43 = vunpack.i.h.bf16 %v8816_v37  ;;  %v8817_v18 = vunpack.i.l.bf16 %v8816_v37 }
0x1542   : > { %v3373_v24 = vsel %vm1271_vm1, %v14950_v31, %v8818_v43  ;;  %v3372_v17 = vsel %vm1271_vm1, %v14951_v26, %v8817_v18  ;;  %v5207_v18 = vmul.f32 %v9568_v56, %v13294_v55  ;;  %v14958_v56 = vld [vmem:[#allocation46_spill] sm:$0xff] }
0x1543   : > { %v8826_v25 = vpop.permute.xlu1 %8825 }
0x1544   : > { %v8828_v15 = vunpack.i.h.bf16 %v8826_v25  ;;  %v8827_v51 = vunpack.i.l.bf16 %v8826_v25 }
0x1546   : > { %v3389_v62 = vsel %vm3378_vm3, %v3372_v17, %v8827_v51  ;;  %v3390_v52 = vsel %vm3378_vm3, %v3373_v24, %v8828_v15 }
0x1547   : > { %v8836_v16 = vpop.permute.xlu1 %8835 }
0x1548   : > { %v8838_v53 = vunpack.i.h.bf16 %v8836_v16  ;;  %v8837_v4 = vunpack.i.l.bf16 %v8836_v16 }
0x154a   : > { %v13499_v9 = vsel %vm3395_vm4, %v3389_v62, %v8837_v4  ;;  %v13502_v13 = vsel %vm3395_vm4, %v3390_v52, %v8838_v53 }
0x154b   : > { %v5585_v32 = vpack.c.bf16 %v13502_v13, %v13499_v9  ;;  %v8846_v5 = vpop.permute.xlu1 %8845 }
0x154c   : > { %v8848_v14 = vunpack.i.h.bf16 %v8846_v5  ;;  %v8847_v30 = vunpack.i.l.bf16 %v8846_v5 }
0x154e   : > { %v3377_v45 = vsel %vm1271_vm1, %v14952_v8, %v8848_v14  ;;  %v3376_v59 = vsel %vm1271_vm1, %v14953_v19, %v8847_v30 }
0x154f   : > { %v8856_v12 = vpop.permute.xlu1 %8855 }
0x1550   : > { %v5174_v47 = vpop.xlane.xlu0 %5173  ;;  %v8858_v50 = vunpack.i.h.bf16 %v8856_v12  ;;  %v8857_v63 = vunpack.i.l.bf16 %v8856_v12 }
0x1551   : > { %9569 = vrcp.f32 %v5174_v47  ;;  %v14956_v47 = vld [vmem:[#allocation42_spill] sm:$0xff] }
0x1552   : > { %9571 = vrcp.f32 %v13444_v22  ;;  %v3393_v40 = vsel %vm3378_vm3, %v3376_v59, %v8857_v63  ;;  %v3394_v3 = vsel %vm3378_vm3, %v3377_v45, %v8858_v50  ;;  %v14957_v63 = vld [vmem:[#allocation40_spill] sm:$0xff] }
0x1553   : > { %v8866_v58 = vpop.permute.xlu1 %8865 }
0x1554   : > { %v8868_v33 = vunpack.i.h.bf16 %v8866_v58  ;;  %v8867_v38 = vunpack.i.l.bf16 %v8866_v58  ;;  %v5178_v27 = vpop.xlane.xlu0 %5177 }
0x1555   : > { %9573 = vrcp.f32 %v5178_v27 }
0x1556   : > { %v13515_v7 = vsel %vm3395_vm4, %v3393_v40, %v8867_v38  ;;  %v13518_v22 = vsel %vm3395_vm4, %v3394_v3, %v8868_v33 }
0x1557   : > { %v5587_v23 = vpack.c.bf16 %v13518_v22, %v13515_v7  ;;  %v14963_v7 = vld [vmem:[#allocation103_spill] sm:$0xff] }
0x1558   : > { %v8751_v48 = vpop.permute.xlu0 %8750  ;;  %v14964_v22 = vpack.i.bf16 %v13148_v1, %v14963_v7 }
0x1559   : > { %v8753_v44 = vunpack.i.h.bf16 %v8751_v48  ;;  %v8752_v46 = vunpack.i.l.bf16 %v8751_v48 }
0x155b   : > { %v9570_v2 = vpop.eup %9569  ;;  %v3363_v35 = vsel %vm1271_vm1, %v14954_v0, %v8753_v44  ;;  %v3362_v61 = vsel %vm1271_vm1, %v14955_v57, %v8752_v46 }
0x155c   : > { %v8771_v29 = vpop.permute.xlu0 %8770  ;;  %v9572_v37 = vpop.eup %9571  ;;  %v5208_v15 = vmul.f32 %v9570_v2, %v13336_v42  ;;  %v3379_v51 = vsel %vm3378_vm3, %v3362_v61, %v8762_v54  ;;  %v3380_v16 = vsel %vm3378_vm3, %v3363_v35, %v8763_v10 }
0x155d   : > { %v8773_v25 = vunpack.i.h.bf16 %v8771_v29  ;;  %v8772_v43 = vunpack.i.l.bf16 %v8771_v29  ;;  %v5209_v6 = vmul.f32 %v9572_v37, %v13288_v20 }
0x155e   : > { %v5217_v17 = vpack.c.bf16 %v5208_v15, %v5207_v18  ;;  %v14960_v18 = vld [vmem:[#allocation50_spill] sm:$0xff] }
0x155f   : > { %v9574_v31 = vpop.eup %9573  ;;  %v3396_v24 = vsel %vm3395_vm4, %v3379_v51, %v8772_v43  ;;  %v3397_v26 = vsel %vm3395_vm4, %v3380_v16, %v8773_v25  ;;  %v14961_v51 = vld [vmem:[#allocation48_spill] sm:$0xff] }
0x1560   : > { %v8781_v53 = vpop.permute.xlu0 %8780  ;;  %v5210_v4 = vmul.f32 %v9574_v31, %v13343_v28  ;;  %v5580_v62 = vpack.c.bf16 %v3397_v26, %v3396_v24  ;;  %8423 = vmatprep.mubr.bf16.mxu0 %v5217_v17 }
0x1561   : > { %v8783_v52 = vunpack.i.h.bf16 %v8781_v53  ;;  %v8782_v5 = vunpack.i.l.bf16 %v8781_v53 }
0x1562   : > { %v5218_v55 = vpack.c.bf16 %v5210_v4, %v5209_v6 }
0x1563   : > { %v3367_v50 = vsel %vm1271_vm1, %v14956_v47, %v8783_v52  ;;  %v3366_v20 = vsel %vm1271_vm1, %v14957_v63, %v8782_v5  ;;  %v14962_v5 = vpack.i.bf16 %v13144_v41, %v13140_v11  ;;  %v14965_v63 = vld [vmem:[#allocation101_spill] sm:$0xff] }
0x1564   : > { %8424 = vmatmul.mubr.bf16.gmra.mrb[124].mxu0 %v5218_v55  ;;  %v8791_v42 = vpop.permute.xlu0 %8790 }
0x1565   : > { %8431 = vmatprep.mubr.msk.bf16.mxu0 %vm498_vm0, %v5580_v62  ;;  %v8793_v12 = vunpack.i.h.bf16 %v8791_v42  ;;  %v8792_v14 = vunpack.i.l.bf16 %v8791_v42 }
0x1567   : > { %v3383_v8 = vsel %vm3378_vm3, %v3366_v20, %v8792_v14  ;;  %v3384_v45 = vsel %vm3378_vm3, %v3367_v50, %v8793_v12  ;;  %v14966_v20 = vld [vmem:[#allocation99_spill] sm:$0xff] }
0x1568   : > { %v8801_v30 = vpop.permute.xlu0 %8800  ;;  %v14967_v11 = vpack.i.bf16 %v14965_v63, %v14966_v20 }
0x1569   : > { %v8803_v58 = vunpack.i.h.bf16 %v8801_v30  ;;  %v8802_v28 = vunpack.i.l.bf16 %v8801_v30 }
0x156b   : > { %v3400_v19 = vsel %vm3395_vm4, %v3383_v8, %v8802_v28  ;;  %v3401_v59 = vsel %vm3395_vm4, %v3384_v45, %v8803_v58  ;;  %v14968_v58 = vld [vmem:[#allocation102_spill] sm:$0xff]  ;;  %v14969_v28 = vld [vmem:[#allocation100_spill] sm:$0xff] }
0x156c   : > { %v8811_v33 = vpop.permute.xlu0 %8810  ;;  %8432 = vmatmul.mubr.msk.bf16.vlgmr.msra.gmra.mrb[128].mxu0 %vm498_vm0, %v5581_v60  ;;  %v5582_v38 = vpack.c.bf16 %v3401_v59, %v3400_v19  ;;  %v14970_v1 = vpack.i.bf16 %v14968_v58, %v14969_v28  ;;  %v9709_v28 = vld [vmem:[%s10465_s22 + $0x38] sm:$0xff] }
0x156d   : > { %v8813_v40 = vunpack.i.h.bf16 %v8811_v33  ;;  %v8812_v3 = vunpack.i.l.bf16 %v8811_v33  ;;  %v14971_v33 = vld [vmem:[#allocation106_spill] sm:$0xff] }
0x156e   : > { %8435 = vmatprep.mubr.msk.bf16.mxu0 %vm498_vm0, %v5582_v38  ;;  %v14972_v38 = vld [vmem:[#allocation104_spill] sm:$0xff] }
0x156f   : > { %v3371_v2 = vsel %vm1271_vm1, %v14958_v56, %v8813_v40  ;;  %v3370_v49 = vsel %vm1271_vm1, %v14959_v36, %v8812_v3  ;;  %v14974_v40 = vld [vmem:[#allocation107_spill] sm:$0xff]  ;;  %v14975_v3 = vld [vmem:[#allocation105_spill] sm:$0xff] }
0x1570   : > { %v8821_v27 = vpop.permute.xlu0 %8820 }
0x1571   : > { %v8823_v48 = vunpack.i.h.bf16 %v8821_v27  ;;  %v8822_v44 = vunpack.i.l.bf16 %v8821_v27  ;;  %v14973_v27 = vpack.i.bf16 %v14971_v33, %v14972_v38 }
0x1573   : > { %v3387_v35 = vsel %vm3378_vm3, %v3370_v49, %v8822_v44  ;;  %v3388_v57 = vsel %vm3378_vm3, %v3371_v2, %v8823_v48  ;;  %v14976_v48 = vpack.i.bf16 %v14974_v40, %v14975_v3  ;;  %v9711_v3 = vld [vmem:[%s10465_s22 + $0x48] sm:$0xff] }
0x1574   : > { %v8831_v46 = vpop.permute.xlu0 %8830  ;;  %8436 = vmatmul.mubr.msk.bf16.gmra.mrb[132].mxu0 %vm498_vm0, %v5583_v34 }
0x1575   : > { %v8833_v60 = vunpack.i.h.bf16 %v8831_v46  ;;  %v8832_v0 = vunpack.i.l.bf16 %v8831_v46 }
0x1577   : > { %v3404_v61 = vsel %vm3395_vm4, %v3387_v35, %v8832_v0  ;;  %v3405_v10 = vsel %vm3395_vm4, %v3388_v57, %v8833_v60 }
0x1578   : > { %v5584_v54 = vpack.c.bf16 %v3405_v10, %v3404_v61  ;;  %v8841_v39 = vpop.permute.xlu0 %8840 }
0x1579   : > { %v8843_v34 = vunpack.i.h.bf16 %v8841_v39  ;;  %v8842_v29 = vunpack.i.l.bf16 %v8841_v39 }
0x157a   : > { %8439 = vmatprep.mubr.msk.bf16.mxu0 %vm498_vm0, %v5584_v54 }
0x157b   : > { %v3375_v15 = vsel %vm1271_vm1, %v14960_v18, %v8843_v34  ;;  %v3374_v16 = vsel %vm1271_vm1, %v14961_v51, %v8842_v29  ;;  %v13612_v34 = vld [vmem:[#allocation11] ss:$0 sm:$0xff]  ;;  %v13615_v18 = vpop.permute.xlu1 %8875 }
0x157c   : > { %v8851_v21 = vpop.permute.xlu0 %8850  ;;  %8440 = vmatmul.mubr.msk.bf16.gmra.mrb[136].mxu0 %vm498_vm0, %v5585_v32 }
0x157d   : > { %v8853_v37 = vunpack.i.h.bf16 %v8851_v21  ;;  %v8852_v25 = vunpack.i.l.bf16 %v8851_v21 }
0x157f   : > { %v3391_v26 = vsel %vm3378_vm3, %v3374_v16, %v8852_v25  ;;  %v3392_v17 = vsel %vm3378_vm3, %v3375_v15, %v8853_v37  ;;  %v9703_v16 = vld [vmem:[%s10465_s22] sm:$0xff] }
0x1580   : > { %v8861_v43 = vpop.permute.xlu0 %8860 }
0x1581   : > { %v8863_v31 = vunpack.i.h.bf16 %v8861_v43  ;;  %v8862_v24 = vunpack.i.l.bf16 %v8861_v43 }
0x1583   : > { %v3408_v9 = vsel %vm3395_vm4, %v3391_v26, %v8862_v24  ;;  %v3409_v13 = vsel %vm3395_vm4, %v3392_v17, %v8863_v31 }
0x1584   : > { %v5586_v32 = vpack.c.bf16 %v3409_v13, %v3408_v9  ;;  %v13617_v15 = vpop.permute.xlu0 %8870  ;;  %v9704_v9 = vld [vmem:[%s10465_s22 + $0x10] sm:$0xff] }
0x1586   : > { %8443 = vmatprep.mubr.msk.bf16.mxu0 %vm498_vm0, %v5586_v32  ;;  %v9705_v32 = vld [vmem:[%s10465_s22 + $0x8] sm:$0xff] }
0x1587   : > { %8444 = vmatmul.mubr.msk.bf16.gmra.mrb[140].mxu0 %vm498_vm0, %v5587_v23 }
0x15fb   : > { %v8413_v53 = vpop.f32.mrb[112].mxu0 }
0x15fc   : > { %v5277_v6 = vpop.f32.mrb[113].mxu0 }
0x15fd   : > { %v8414_v4 = vpop.f32.mrb[114].mxu0 }
0x15fe   : > { %v8919_v62 = vpack.i.bf16 %v8414_v4, %v8413_v53  ;;  %v5280_v55 = vpop.f32.mrb[115].mxu0 }
0x15ff   : > { %v8924_v42 = vpack.i.bf16 %v5280_v55, %v5277_v6  ;;  %v13636_v55 = vpop.permute.xlu1 %8885 }
0x1600   : > { %8920 = vrot.lane.b32.xlu1 %v8919_v62, %s10099_s23 }
0x1601   : > { %8925 = vrot.lane.b32.xlu0 %v8924_v42, %s10099_s23 }
0x1603   : > { %v8417_v52 = vpop.f32.mrb[116].mxu0  ;;  %v13652_v63 = vpop.permute.xlu1 %8895 }
0x1604   : > { %8935 = vrot.lane.b32.xlu1 %v14962_v5, %s10098_s16  ;;  %v5293_v12 = vpop.f32.mrb[117].mxu0 }
0x1605   : > { %8930 = vrot.lane.b32.xlu0 %v14964_v22, %s10098_s16  ;;  %v8418_v23 = vpop.f32.mrb[118].mxu0 }
0x1606   : > { %v8939_v14 = vpack.i.bf16 %v8418_v23, %v8417_v52  ;;  %v5296_v30 = vpop.f32.mrb[119].mxu0  ;;  %v13638_v52 = vpop.permute.xlu0 %8880 }
0x1607   : > { %v8944_v47 = vpack.i.bf16 %v5296_v30, %v5293_v12  ;;  %v9706_v12 = vld [vmem:[%s10465_s22 + $0x18] sm:$0xff] }
0x1608   : > { %8940 = vrot.lane.b32.xlu1 %v8939_v14, %s10099_s23  ;;  %v9707_v14 = vld [vmem:[%s10465_s22 + $0x28] sm:$0xff] }
0x1609   : > { %8945 = vrot.lane.b32.xlu0 %v8944_v47, %s10099_s23 }
0x160a   : > { %v13658_v58 = vpop.permute.xlu0 %8890 }
0x160b   : > { %v8421_v50 = vpop.f32.mrb[120].mxu0 }
0x160c   : > { %8955 = vrot.lane.b32.xlu1 %v14967_v11, %s10097_s27  ;;  %v5309_v41 = vpop.f32.mrb[121].mxu0  ;;  %v9708_v11 = vld [vmem:[%s10465_s22 + $0x20] sm:$0xff] }
0x160d   : > { %8950 = vrot.lane.b32.xlu0 %v14970_v1, %s10097_s27  ;;  %v8422_v8 = vpop.f32.mrb[122].mxu0 }
0x160e   : > { %v8959_v45 = vpack.i.bf16 %v8422_v8, %v8421_v50  ;;  %v5312_v19 = vpop.f32.mrb[123].mxu0 }
0x160f   : > { %v8964_v59 = vpack.i.bf16 %v5312_v19, %v5309_v41 }
0x1610   : > { %8960 = vrot.lane.b32.xlu1 %v8959_v45, %s10099_s23 }
0x1611   : > { %8965 = vrot.lane.b32.xlu0 %v8964_v59, %s10099_s23  ;;  %v9710_v59 = vld [vmem:[%s10465_s22 + $0x30] sm:$0xff] }
0x1614   : > { %8975 = vrot.lane.b32.xlu1 %v14973_v27, %s10098_s16 }
0x1615   : > { %8970 = vrot.lane.b32.xlu0 %v14976_v48, %s10098_s16 }
0x1637   : > { %v8425_v44 = vpop.f32.mrb[124].mxu0 }
0x1638   : > { %v5325_v46 = vpop.f32.mrb[125].mxu0 }
0x1639   : > { %v8426_v56 = vpop.f32.mrb[126].mxu0 }
0x163a   : > { %v8984_v2 = vpack.i.bf16 %v8426_v56, %v8425_v44  ;;  %v5328_v36 = vpop.f32.mrb[127].mxu0  ;;  %v13682_v56 = vpop.permute.xlu0 %8900 }
0x163b   : > { %v8979_v49 = vpack.i.bf16 %v5328_v36, %v5325_v46  ;;  %v13680_v46 = vpop.permute.xlu1 %8905  ;;  %v8877_v36 = vunpack.i.l.bf16 %v13615_v18 }
0x163c   : > { %8985 = vrot.lane.b32.xlu1 %v8984_v2, %s10099_s23  ;;  %v8878_v2 = vunpack.i.h.bf16 %v13615_v18 }
0x163d   : > { %8980 = vrot.lane.b32.xlu0 %v8979_v49, %s10099_s23 }
0x163f   : > { %v8433_v60 = vpop.f32.mrb[128].mxu0  ;;  %v13704_v18 = vpop.permute.xlu1 %8915 }
0x1640   : > { %v5698_v0 = vpop.f32.mrb[129].mxu0  ;;  %v5707_v51 = vadd.f32 %v8433_v60, %v13612_v34 }
0x1641   : > { %v8434_v35 = vpop.f32.mrb[130].mxu0  ;;  %v5699_v43 = vadd.f32 %v13612_v34, %v5698_v0  ;;  %v9712_v0 = vld [vmem:[%s10465_s22 + $0x40] sm:$0xff] }
0x1642   : > { %v5701_v57 = vpop.f32.mrb[131].mxu0  ;;  %v5710_v26 = vadd.f32 %v8434_v35, %v13612_v34  ;;  %v13628_v13 = vadd.f32 %v9704_v9, %v5707_v51  ;;  %v9714_v51 = vld [vmem:[%s10465_s22 + $0x50] sm:$0xff] }
0x1643   : > { %v13621_v31 = vadd.f32 %v9703_v16, %v5699_v43  ;;  %v5702_v24 = vadd.f32 %v13612_v34, %v5701_v57  ;;  %v9713_v57 = vld [vmem:[%s10465_s22 + $0x58] sm:$0xff] }
0x1644   : > { %v13641_v7 = vadd.f32 %v9706_v12, %v5710_v26  ;;  %v5863_v50 = vsel %vm498_vm0, %v13628_v13, 0.0  ;;  %v13710_v26 = vpop.permute.xlu0 %8910 }
0x1645   : > { %v13631_v53 = vadd.f32 %v9705_v32, %v5702_v24  ;;  %v5857_v62 = vsel %vm498_vm0, %v13621_v31, 0.0  ;;  %v9715_v32 = vld [vmem:[%s10465_s22 + $0x68] sm:$0xff] }
0x1646   : > { %v5866_v19 = vsel %vm498_vm0, %v13641_v7, 0.0 }
0x1647   : > { %v8437_v61 = vpop.f32.mrb[132].mxu0  ;;  %v5860_v47 = vsel %vm498_vm0, %v13631_v53, 0.0 }
0x1648   : > { %v5714_v10 = vpop.f32.mrb[133].mxu0  ;;  %v5723_v20 = vadd.f32 %v8437_v61, %v13612_v34 }
0x1649   : > { %v8438_v54 = vpop.f32.mrb[134].mxu0  ;;  %v5715_v22 = vadd.f32 %v13612_v34, %v5714_v10 }
0x164a   : > { %v5717_v39 = vpop.f32.mrb[135].mxu0  ;;  %v5726_v23 = vadd.f32 %v8438_v54, %v13612_v34  ;;  %v13669_v33 = vadd.f32 %v9710_v59, %v5723_v20 }
0x164b   : > { %v5718_v6 = vadd.f32 %v13612_v34, %v5717_v39  ;;  %v13656_v41 = vadd.f32 %v9708_v11, %v5715_v22  ;;  %v8888_v39 = vunpack.i.h.bf16 %v13636_v55  ;;  %v8872_v22 = vunpack.i.l.bf16 %v13617_v15  ;;  %v9716_v11 = vld [vmem:[%s10465_s22 + $0x60] sm:$0xff] }
0x164c   : > { %v13661_v1 = vadd.f32 %v9709_v28, %v5726_v23  ;;  %v5875_v60 = vsel %vm498_vm0, %v13669_v33, 0.0  ;;  %v8897_v23 = vunpack.i.l.bf16 %v13652_v63 }
0x164d   : > { %v13646_v30 = vadd.f32 %v9707_v14, %v5718_v6  ;;  %v5869_v38 = vsel %vm498_vm0, %v13656_v41, 0.0  ;;  %v8883_v14 = vunpack.i.h.bf16 %v13638_v52 }
0x164e   : > { %v5878_v44 = vsel %vm498_vm0, %v13661_v1, 0.0 }
0x164f   : > { %v8441_v21 = vpop.f32.mrb[136].mxu0  ;;  %v5872_v45 = vsel %vm498_vm0, %v13646_v30, 0.0 }
0x1650   : > { %v5730_v29 = vpop.f32.mrb[137].mxu0  ;;  %v5739_v49 = vadd.f32 %v8441_v21, %v13612_v34  ;;  %v14977_v21 = vld [vmem:[#allocation73_spill] sm:$0xff] }
0x1651   : > { %v8442_v37 = vpop.f32.mrb[138].mxu0  ;;  %v5731_v27 = vadd.f32 %v13612_v34, %v5730_v29  ;;  %v8887_v29 = vunpack.i.l.bf16 %v13636_v55 }
0x1652   : > { %v5733_v25 = vpop.f32.mrb[139].mxu0  ;;  %v5742_v40 = vadd.f32 %v8442_v37, %v13612_v34  ;;  %v5535_v37 = vsel %vm1271_vm1, %v14977_v21, %v8878_v2  ;;  %v13707_v16 = vadd.f32 %v9714_v51, %v5739_v49  ;;  %v9718_v21 = vld [vmem:[%s10465_s22 + $0x70] sm:$0xff] }
0x1653   : > { %v5734_v8 = vadd.f32 %v13612_v34, %v5733_v25  ;;  %v13690_v35 = vadd.f32 %v9712_v0, %v5731_v27  ;;  %v14978_v25 = vld [vmem:[#allocation71_spill] sm:$0xff]  ;;  %v5551_v12 = vsel %vm3378_vm3, %v5535_v37, %v8888_v39  ;;  %v14982_v27 = vld [vmem:[#allocation74_spill] sm:$0xff] }
0x1654   : > { %v13693_v61 = vadd.f32 %v9713_v57, %v5742_v40  ;;  %v5534_v43 = vsel %vm1271_vm1, %v14978_v25, %v8877_v36  ;;  %v14983_v40 = vld [vmem:[#allocation72_spill] sm:$0xff]  ;;  %v8907_v57 = vunpack.i.l.bf16 %v13680_v46 }
0x1655   : > { %v13676_v48 = vadd.f32 %v9711_v3, %v5734_v8  ;;  %v5881_v55 = vsel %vm498_vm0, %v13690_v35, 0.0  ;;  %v5532_v3 = vsel %vm1271_vm1, %v14983_v40, %v8872_v22 }
0x1657   : > { %v5884_v54 = vsel %vm498_vm0, %v13676_v48, 0.0 }
0x165a   : > { %v13625_v17 = vpop.f32.mrb[140].mxu0 }
0x165b   : > { %v5746_v4 = vpop.f32.mrb[141].mxu0  ;;  %v5755_v20 = vadd.f32 %v13625_v17, %v13612_v34 }
0x165c   : > { %v8446_v42 = vpop.f32.mrb[142].mxu0  ;;  %5858 = vadd.xlane.f32.xlu0 %v5857_v62  ;;  %v5747_v24 = vadd.f32 %v13612_v34, %v5746_v4  ;;  %v5890_v62 = vsel %vm498_vm0, %v13693_v61, 0.0  ;;  %v8873_v4 = vunpack.i.h.bf16 %v13617_v15  ;;  %v5887_v15 = vsel %vm498_vm0, %v13707_v16, 0.0 }
0x165d   : > { %v5749_v5 = vpop.f32.mrb[143].mxu0  ;;  %v5758_v9 = vadd.f32 %v8446_v42, %v13612_v34  ;;  %v8898_v42 = vunpack.i.h.bf16 %v13652_v63  ;;  %v13753_v37 = vadd.f32 %v9718_v21, %v5755_v20  ;;  %v14988_v21 = vld [vmem:[#allocation81_spill] sm:$0xff] }
0x165e   : > { %v5750_v10 = vadd.f32 %v13612_v34, %v5749_v5  ;;  %v5550_v5 = vsel %vm3378_vm3, %v5534_v43, %v8887_v29  ;;  %v13732_v28 = vadd.f32 %v9716_v11, %v5747_v24  ;;  %v5533_v17 = vsel %vm1271_vm1, %v14982_v27, %v8873_v4 }
0x165f   : > { %v5549_v49 = vsel %vm3378_vm3, %v5533_v17, %v8883_v14  ;;  %v8902_v4 = vunpack.i.l.bf16 %v13682_v56  ;;  %v8917_v17 = vunpack.i.l.bf16 %v13704_v18 }
0x1660   : > { %5861 = vadd.xlane.f32.xlu1 %v5860_v47  ;;  %5864 = vadd.xlane.f32.xlu0 %v5863_v50  ;;  %v13714_v6 = vadd.f32 %v9715_v32, %v5750_v10  ;;  %v8882_v47 = vunpack.i.l.bf16 %v13638_v52  ;;  %v8908_v50 = vunpack.i.h.bf16 %v13680_v46  ;;  %14980 = vst [vmem:[#allocation59_spill] sm:$0xff] %v13732_v28  ;;  %v5893_v24 = vsel %vm498_vm0, %v13732_v28, 0.0  ;;  %v14984_v32 = vld [vmem:[#allocation77_spill] sm:$0xff] }
0x1661   : > { %v8892_v46 = vunpack.i.l.bf16 %v13658_v58 }
0x1662   : > { %14979 = vst [vmem:[#allocation33_spill] sm:$0xff] %v13714_v6  ;;  %v5896_v52 = vsel %vm498_vm0, %v13714_v6, 0.0  ;;  %v5548_v36 = vsel %vm3378_vm3, %v5532_v3, %v8882_v47 }
0x1664   : > { %5873 = vadd.xlane.f32.xlu1 %v5872_v45  ;;  %5867 = vadd.xlane.f32.xlu0 %v5866_v19  ;;  %v9717_v45 = vld [vmem:[%s10465_s22 + $0x78] sm:$0xff] }
0x1665   : > { %v13737_v19 = vadd.f32 %v9717_v45, %v5758_v9  ;;  %v8893_v9 = vunpack.i.h.bf16 %v13658_v58  ;;  %v8918_v58 = vunpack.i.h.bf16 %v13704_v18 }
0x1667   : > { %14981 = vst [vmem:[#allocation57_spill] sm:$0xff] %v13737_v19  ;;  %v5902_v51 = vsel %vm498_vm0, %v13737_v19, 0.0  ;;  %v5543_v18 = vsel %vm1271_vm1, %v14988_v21, %v8918_v58 }
0x1668   : > { %5879 = vadd.xlane.f32.xlu1 %v5878_v44  ;;  %5870 = vadd.xlane.f32.xlu0 %v5869_v38 }
0x166c   : > { %5885 = vadd.xlane.f32.xlu1 %v5884_v54  ;;  %5876 = vadd.xlane.f32.xlu0 %v5875_v60 }
0x1670   : > { %5891 = vadd.xlane.f32.xlu1 %v5890_v62  ;;  %5882 = vadd.xlane.f32.xlu0 %v5881_v55  ;;  %v5539_v62 = vsel %vm1271_vm1, %v14984_v32, %v8898_v42  ;;  %v14985_v55 = vld [vmem:[#allocation75_spill] sm:$0xff] }
0x1671   : > { %v5555_v14 = vsel %vm3378_vm3, %v5539_v62, %v8908_v50 }
0x1672   : > { %v8921_v8 = vpop.permute.xlu1 %8920 }
0x1673   : > { %v8923_v63 = vunpack.i.h.bf16 %v8921_v8  ;;  %v8922_v59 = vunpack.i.l.bf16 %v8921_v8  ;;  %v8926_v38 = vpop.permute.xlu0 %8925  ;;  %v14986_v8 = vld [vmem:[#allocation78_spill] sm:$0xff] }
0x1674   : > { %v8928_v44 = vunpack.i.h.bf16 %v8926_v38  ;;  %v8927_v2 = vunpack.i.l.bf16 %v8926_v38  ;;  %5897 = vadd.xlane.f32.xlu1 %v5896_v52  ;;  %5888 = vadd.xlane.f32.xlu0 %v5887_v15  ;;  %v14987_v15 = vld [vmem:[#allocation76_spill] sm:$0xff] }
0x1675   : > { %v5567_v60 = vsel %vm3395_vm4, %v5551_v12, %v8923_v63  ;;  %v5566_v0 = vsel %vm3395_vm4, %v5550_v5, %v8922_v59  ;;  %v5538_v5 = vsel %vm1271_vm1, %v14985_v55, %v8897_v23  ;;  %v8903_v12 = vunpack.i.h.bf16 %v13682_v56 }
0x1676   : > { %v5589_v10 = vpack.c.bf16 %v5567_v60, %v5566_v0  ;;  %v5564_v54 = vsel %vm3395_vm4, %v5548_v36, %v8927_v2  ;;  %v5565_v39 = vsel %vm3395_vm4, %v5549_v49, %v8928_v44  ;;  %v8936_v29 = vpop.permute.xlu1 %8935  ;;  %v5554_v22 = vsel %vm3378_vm3, %v5538_v5, %v8907_v57 }
0x1677   : > { %v5588_v25 = vpack.c.bf16 %v5565_v39, %v5564_v54  ;;  %v8931_v43 = vpop.permute.xlu0 %8930  ;;  %v5899_v23 = vsel %vm498_vm0, %v13753_v37, 0.0  ;;  %v5537_v56 = vsel %vm1271_vm1, %v14986_v8, %v8893_v9  ;;  %v5536_v45 = vsel %vm1271_vm1, %v14987_v15, %v8892_v46  ;;  %v14990_v9 = vld [vmem:[#allocation82_spill] sm:$0xff]  ;;  %v14991_v46 = vld [vmem:[#allocation80_spill] sm:$0xff] }
0x1678   : > { %5903 = vadd.xlane.f32.xlu1 %v5902_v51  ;;  %5894 = vadd.xlane.f32.xlu0 %v5893_v24  ;;  %v5552_v50 = vsel %vm3378_vm3, %v5536_v45, %v8902_v4  ;;  %v5553_v38 = vsel %vm3378_vm3, %v5537_v56, %v8903_v12  ;;  %v8913_v36 = vunpack.i.h.bf16 %v13710_v26  ;;  %v8912_v49 = vunpack.i.l.bf16 %v13710_v26 }
0x1679   : > { %8447 = vmatprep.mubr.msk.bf16.mxu0 %vm498_vm0, %v5588_v25  ;;  %v8938_v57 = vunpack.i.h.bf16 %v8936_v29  ;;  %v8933_v54 = vunpack.i.h.bf16 %v8931_v43  ;;  %v8932_v39 = vunpack.i.l.bf16 %v8931_v43  ;;  %v14989_v25 = vld [vmem:[#allocation79_spill] sm:$0xff] }
0x167a   : > { %v8941_v47 = vpop.permute.xlu1 %8940  ;;  %8448 = vmatmul.mubr.msk.bf16.gmra.mrb[144].mxu0 %vm498_vm0, %v5589_v10  ;;  %v8937_v10 = vunpack.i.l.bf16 %v8936_v29  ;;  %v5542_v51 = vsel %vm1271_vm1, %v14989_v25, %v8917_v17  ;;  %v5541_v26 = vsel %vm1271_vm1, %v14990_v9, %v8913_v36  ;;  %v5540_v32 = vsel %vm1271_vm1, %v14991_v46, %v8912_v49  ;;  %v14992_v17 = vld [vmem:[#allocation85_spill] sm:$0xff]  ;;  %v14994_v49 = vld [vmem:[#allocation86_spill] sm:$0xff] }
0x167b   : > { %v8943_v20 = vunpack.i.h.bf16 %v8941_v47  ;;  %v8942_v42 = vunpack.i.l.bf16 %v8941_v47  ;;  %v8946_v11 = vpop.permute.xlu0 %8945  ;;  %v5559_v55 = vsel %vm3378_vm3, %v5543_v18, %v8938_v57  ;;  %v14995_v57 = vld [vmem:[#allocation84_spill] sm:$0xff] }
0x167c   : > { %v8948_v63 = vunpack.i.h.bf16 %v8946_v11  ;;  %v8947_v59 = vunpack.i.l.bf16 %v8946_v11  ;;  %5900 = vadd.xlane.f32.xlu0 %v5899_v23  ;;  %v5558_v5 = vsel %vm3378_vm3, %v5542_v51, %v8937_v10 }
0x167d   : > { %v5571_v52 = vsel %vm3395_vm4, %v5555_v14, %v8943_v20  ;;  %v5570_v27 = vsel %vm3395_vm4, %v5554_v22, %v8942_v42  ;;  %v5556_v22 = vsel %vm3378_vm3, %v5540_v32, %v8932_v39  ;;  %v5557_v14 = vsel %vm3378_vm3, %v5541_v26, %v8933_v54 }
0x167e   : > { %v5591_v40 = vpack.c.bf16 %v5571_v52, %v5570_v27  ;;  %v5568_v3 = vsel %vm3395_vm4, %v5552_v50, %v8947_v59  ;;  %v5569_v44 = vsel %vm3395_vm4, %v5553_v38, %v8948_v63  ;;  %v8956_v2 = vpop.permute.xlu1 %8955 }
0x167f   : > { %v5590_v60 = vpack.c.bf16 %v5569_v44, %v5568_v3  ;;  %v8951_v0 = vpop.permute.xlu0 %8950  ;;  %v8958_v56 = vunpack.i.h.bf16 %v8956_v2  ;;  %v8957_v15 = vunpack.i.l.bf16 %v8956_v2  ;;  %v14993_v3 = vld [vmem:[#allocation83_spill] sm:$0xff] }
0x1680   : > { %v8953_v63 = vunpack.i.h.bf16 %v8951_v0  ;;  %v8952_v59 = vunpack.i.l.bf16 %v8951_v0 }
0x1681   : > { %8451 = vmatprep.mubr.msk.bf16.mxu0 %vm498_vm0, %v5590_v60  ;;  %v5546_v44 = vsel %vm1271_vm1, %v14993_v3, %v8957_v15  ;;  %v9722_v15 = vld [vmem:[%s10465_s22 + $0x98] sm:$0xff]  ;;  %v9723_v3 = vld [vmem:[%s10465_s22 + $0xa0] sm:$0xff] }
0x1682   : > { %v8961_v24 = vpop.permute.xlu1 %8960  ;;  %8452 = vmatmul.mubr.msk.bf16.gmra.mrb[148].mxu0 %vm498_vm0, %v5591_v40  ;;  %v5547_v40 = vsel %vm1271_vm1, %v14992_v17, %v8958_v56  ;;  %v5545_v60 = vsel %vm1271_vm1, %v14994_v49, %v8953_v63  ;;  %v5544_v2 = vsel %vm1271_vm1, %v14995_v57, %v8952_v59  ;;  %v9724_v57 = vld [vmem:[%s10465_s22 + $0xb0] sm:$0xff] }
0x1683   : > { %v8963_v29 = vunpack.i.h.bf16 %v8961_v24  ;;  %v8962_v62 = vunpack.i.l.bf16 %v8961_v24  ;;  %v8966_v43 = vpop.permute.xlu0 %8965 }
0x1684   : > { %v8968_v12 = vunpack.i.h.bf16 %v8966_v43  ;;  %v8967_v4 = vunpack.i.l.bf16 %v8966_v43 }
0x1685   : > { %v5575_v47 = vsel %vm3395_vm4, %v5559_v55, %v8963_v29  ;;  %v5574_v58 = vsel %vm3395_vm4, %v5558_v5, %v8962_v62 }
0x1686   : > { %v5593_v20 = vpack.c.bf16 %v5575_v47, %v5574_v58  ;;  %v5572_v42 = vsel %vm3395_vm4, %v5556_v22, %v8967_v4  ;;  %v5573_v11 = vsel %vm3395_vm4, %v5557_v14, %v8968_v12  ;;  %v8976_v8 = vpop.permute.xlu1 %8975  ;;  %v9719_v14 = vld [vmem:[%s10465_s22 + $0x80] sm:$0xff] }
0x1687   : > { %v5592_v23 = vpack.c.bf16 %v5573_v11, %v5572_v42  ;;  %v8971_v45 = vpop.permute.xlu0 %8970  ;;  %v8978_v50 = vunpack.i.h.bf16 %v8976_v8  ;;  %v8977_v38 = vunpack.i.l.bf16 %v8976_v8  ;;  %v9720_v42 = vld [vmem:[%s10465_s22 + $0x90] sm:$0xff] }
0x1688   : > { %v8973_v52 = vunpack.i.h.bf16 %v8971_v45  ;;  %v8972_v27 = vunpack.i.l.bf16 %v8971_v45 }
0x1689   : > { %8455 = vmatprep.mubr.msk.bf16.mxu0 %vm498_vm0, %v5592_v23  ;;  %v5563_v39 = vsel %vm3378_vm3, %v5547_v40, %v8978_v50  ;;  %v5562_v21 = vsel %vm3378_vm3, %v5546_v44, %v8977_v38  ;;  %v9721_v23 = vld [vmem:[%s10465_s22 + $0x88] sm:$0xff] }
0x168a   : > { %8456 = vmatmul.mubr.msk.bf16.gmra.mrb[152].mxu0 %vm498_vm0, %v5593_v20  ;;  %v5560_v51 = vsel %vm3378_vm3, %v5544_v2, %v8972_v27  ;;  %v5561_v24 = vsel %vm3378_vm3, %v5545_v60, %v8973_v52 }
0x16ae   : > { %v8986_v36 = vpop.permute.xlu1 %8985 }
0x16af   : > { %v8988_v10 = vunpack.i.h.bf16 %v8986_v36  ;;  %v8987_v54 = vunpack.i.l.bf16 %v8986_v36  ;;  %v8981_v0 = vpop.permute.xlu0 %8980 }
0x16b0   : > { %v8983_v18 = vunpack.i.h.bf16 %v8981_v0  ;;  %v8982_v25 = vunpack.i.l.bf16 %v8981_v0 }
0x16b1   : > { %v5579_v9 = vsel %vm3395_vm4, %v5563_v39, %v8988_v10  ;;  %v5578_v26 = vsel %vm3395_vm4, %v5562_v21, %v8987_v54  ;;  %v9725_v10 = vld [vmem:[%s10465_s22 + $0xa8] sm:$0xff]  ;;  %v9726_v39 = vld [vmem:[%s10465_s22 + $0xb8] sm:$0xff] }
0x16b2   : > { %v5595_v46 = vpack.c.bf16 %v5579_v9, %v5578_v26  ;;  %v5576_v32 = vsel %vm3395_vm4, %v5560_v51, %v8982_v25  ;;  %v5577_v29 = vsel %vm3395_vm4, %v5561_v24, %v8983_v18 }
0x16b3   : > { %v5594_v62 = vpack.c.bf16 %v5577_v29, %v5576_v32  ;;  %v9727_v29 = vld [vmem:[%s10465_s22 + $0xc0] sm:$0xff] }
0x16b5   : > { %8459 = vmatprep.mubr.msk.bf16.mxu0 %vm498_vm0, %v5594_v62 }
0x16b6   : > { %8460 = vmatmul.mubr.msk.bf16.gmra.mrb[156].mxu0 %vm498_vm0, %v5595_v46 }
0x174d   : > { %v8449_v43 = vpop.f32.mrb[144].mxu0 }
0x174e   : > { %v5762_v55 = vpop.f32.mrb[145].mxu0  ;;  %v5771_v5 = vadd.f32 %v8449_v43, %v13612_v34 }
0x174f   : > { %v5763_v12 = vadd.f32 %v13612_v34, %v5762_v55  ;;  %v8450_v4 = vpop.f32.mrb[146].mxu0 }
0x1750   : > { %v5765_v22 = vpop.f32.mrb[147].mxu0  ;;  %v5774_v58 = vadd.f32 %v8450_v4, %v13612_v34  ;;  %v13833_v11 = vadd.f32 %v9720_v42, %v5771_v5 }
0x1751   : > { %v13828_v47 = vadd.f32 %v9719_v14, %v5763_v12  ;;  %v5766_v20 = vadd.f32 %v13612_v34, %v5765_v22  ;;  %v9728_v12 = vld [vmem:[%s10465_s22 + $0xd0] sm:$0xff]  ;;  %v9729_v22 = vld [vmem:[%s10465_s22 + $0xc8] sm:$0xff] }
0x1752   : > { %14997 = vst [vmem:[#allocation62_spill] sm:$0xff] %v13833_v11  ;;  %v13841_v45 = vadd.f32 %v9722_v15, %v5774_v58  ;;  %v5911_v17 = vsel %vm498_vm0, %v13833_v11, 0.0 }
0x1753   : > { %14996 = vst [vmem:[#allocation64_spill] sm:$0xff] %v13828_v47  ;;  %v13836_v8 = vadd.f32 %v9721_v23, %v5766_v20  ;;  %v5905_v56 = vsel %vm498_vm0, %v13828_v47, 0.0  ;;  %v9730_v20 = vld [vmem:[%s10465_s22 + $0xd8] sm:$0xff] }
0x1754   : > { %5906 = vadd.xlane.f32.xlu0 %v5905_v56  ;;  %14999 = vst [vmem:[#allocation67_spill] sm:$0xff] %v13841_v45  ;;  %v5914_v60 = vsel %vm498_vm0, %v13841_v45, 0.0 }
0x1755   : > { %14998 = vst [vmem:[#allocation69_spill] sm:$0xff] %v13836_v8  ;;  %v8453_v63 = vpop.f32.mrb[148].mxu0  ;;  %v5908_v59 = vsel %vm498_vm0, %v13836_v8, 0.0 }
0x1756   : > { %v5778_v50 = vpop.f32.mrb[149].mxu0  ;;  %5909 = vadd.xlane.f32.xlu1 %v5908_v59  ;;  %v5787_v38 = vadd.f32 %v8453_v63, %v13612_v34  ;;  %v5859_v63 = vpop.xlane.xlu0 %5858 }
0x1757   : > { %v5779_v52 = vadd.f32 %v13612_v34, %v5778_v50  ;;  %v8454_v27 = vpop.f32.mrb[150].mxu0 }
0x1758   : > { %v5781_v40 = vpop.f32.mrb[151].mxu0  ;;  %5912 = vadd.xlane.f32.xlu0 %v5911_v17  ;;  %v5790_v36 = vadd.f32 %v8454_v27, %v13612_v34  ;;  %v13857_v2 = vadd.f32 %v9724_v57, %v5787_v38  ;;  %v5862_v38 = vpop.xlane.xlu1 %5861 }
0x1759   : > { %v13850_v44 = vadd.f32 %v9723_v3, %v5779_v52  ;;  %v5782_v49 = vadd.f32 %v13612_v34, %v5781_v40  ;;  %v5953_v40 = vmul.f32 0.03125, %v5859_v63 }
0x175a   : > { %5915 = vadd.xlane.f32.xlu1 %v5914_v60  ;;  %15001 = vst [vmem:[#allocation87_spill] sm:$0xff] %v13857_v2  ;;  %v13865_v21 = vadd.f32 %v9726_v39, %v5790_v36  ;;  %v5923_v46 = vsel %vm498_vm0, %v13857_v2, 0.0  ;;  %v5865_v59 = vpop.xlane.xlu0 %5864  ;;  %v9731_v39 = vld [vmem:[%s10465_s22 + $0xe0] sm:$0xff] }
0x175b   : > { %15000 = vst [vmem:[#allocation89_spill] sm:$0xff] %v13850_v44  ;;  %v13860_v54 = vadd.f32 %v9725_v10, %v5782_v49  ;;  %v5917_v0 = vsel %vm498_vm0, %v13850_v44, 0.0 }
0x175c   : > { %5918 = vadd.xlane.f32.xlu0 %v5917_v0  ;;  %15003 = vst [vmem:[#allocation51_spill] sm:$0xff] %v13865_v21  ;;  %v5926_v5 = vsel %vm498_vm0, %v13865_v21, 0.0  ;;  %v5874_v27 = vpop.xlane.xlu1 %5873  ;;  %v5954_v0 = vmul.f32 0.03125, %v5862_v38 }
0x175d   : > { %15002 = vst [vmem:[#allocation52_spill] sm:$0xff] %v13860_v54  ;;  %v8457_v18 = vpop.f32.mrb[152].mxu0  ;;  %v5920_v25 = vsel %vm498_vm0, %v13860_v54, 0.0 }
0x175e   : > { %v5794_v51 = vpop.f32.mrb[153].mxu0  ;;  %5921 = vadd.xlane.f32.xlu1 %v5920_v25  ;;  %v5803_v24 = vadd.f32 %v8457_v18, %v13612_v34  ;;  %v5868_v50 = vpop.xlane.xlu0 %5867 }
0x175f   : > { %v5795_v9 = vadd.f32 %v13612_v34, %v5794_v51  ;;  %v8458_v26 = vpop.f32.mrb[154].mxu0 }
0x1760   : > { %v5797_v32 = vpop.f32.mrb[155].mxu0  ;;  %5924 = vadd.xlane.f32.xlu0 %v5923_v46  ;;  %v5806_v43 = vadd.f32 %v8458_v26, %v13612_v34  ;;  %v13881_v4 = vadd.f32 %v9728_v12, %v5803_v24  ;;  %v13905_v24 = vsub.f32 %v13621_v31, %v5953_v40  ;;  %v5955_v26 = vmul.f32 0.03125, %v5865_v59  ;;  %v9732_v46 = vld [vmem:[%s10465_s22 + $0xf0] sm:$0xff] }
0x1761   : > { %v13874_v62 = vadd.f32 %v9727_v29, %v5795_v9  ;;  %v5798_v55 = vadd.f32 %v13612_v34, %v5797_v32  ;;  %v5880_v9 = vpop.xlane.xlu1 %5879  ;;  %v9733_v29 = vld [vmem:[%s10465_s22 + $0xe8] sm:$0xff]  ;;  %v5956_v12 = vmul.f32 0.03125, %v5868_v50  ;;  %v5958_v50 = vmul.f32 0.03125, %v5874_v27 }
0x1762   : > { %5927 = vadd.xlane.f32.xlu1 %v5926_v5  ;;  %15005 = vst [vmem:[#allocation91_spill] sm:$0xff] %v13881_v4  ;;  %v13889_v42 = vadd.f32 %v9730_v20, %v5806_v43  ;;  %v5935_v56 = vsel %vm498_vm0, %v13881_v4, 0.0  ;;  %v5871_v52 = vpop.xlane.xlu0 %5870  ;;  %v13916_v5 = vsub.f32 %v13631_v53, %v5954_v0  ;;  %v6017_v63 = vmul.f32 %v13905_v24, %v13905_v24 }
0x1763   : > { %15004 = vst [vmem:[#allocation93_spill] sm:$0xff] %v13874_v62  ;;  %v13884_v14 = vadd.f32 %v9729_v22, %v5798_v55  ;;  %v5929_v58 = vsel %vm498_vm0, %v13874_v62, 0.0  ;;  %v13931_v38 = vsub.f32 %v13641_v7, %v5956_v12 }
0x1764   : > { %5930 = vadd.xlane.f32.xlu0 %v5929_v58  ;;  %15007 = vst [vmem:[#allocation28_spill] sm:$0xff] %v13889_v42  ;;  %v5938_v15 = vsel %vm498_vm0, %v13889_v42, 0.0  ;;  %v6018_v40 = vmul.f32 %v13916_v5, %v13916_v5 }
0x1765   : > { %15006 = vst [vmem:[#allocation29_spill] sm:$0xff] %v13884_v14  ;;  %v5932_v23 = vsel %vm498_vm0, %v13884_v14, 0.0  ;;  %v5886_v59 = vpop.xlane.xlu1 %5885 }
0x1766   : > { %5933 = vadd.xlane.f32.xlu1 %v5932_v23  ;;  %v5877_v57 = vpop.xlane.xlu0 %5876  ;;  %v13924_v23 = vsub.f32 %v13628_v13, %v5955_v26  ;;  %v6052_v0 = vsel %vm498_vm0, %v6018_v40, 0.0 }
0x1768   : > { %5936 = vadd.xlane.f32.xlu0 %v5935_v56  ;;  %v5957_v56 = vmul.f32 0.03125, %v5871_v52 }
0x176a   : > { %5939 = vadd.xlane.f32.xlu1 %v5938_v15  ;;  %v5883_v20 = vpop.xlane.xlu0 %5882  ;;  %v13938_v52 = vsub.f32 %v13656_v41, %v5957_v56 }
0x176e   : > { %v5889_v27 = vpop.xlane.xlu0 %5888 }
0x1789   : > { %v8461_v17 = vpop.f32.mrb[156].mxu0 }
0x178a   : > { %v5810_v3 = vpop.f32.mrb[157].mxu0  ;;  %v5819_v36 = vadd.f32 %v8461_v17, %v13612_v34 }
0x178b   : > { %v5811_v49 = vadd.f32 %v13612_v34, %v5810_v3  ;;  %v8462_v60 = vpop.f32.mrb[158].mxu0  ;;  %v5959_v3 = vmul.f32 0.03125, %v5877_v57 }
0x178c   : > { %v5813_v10 = vpop.f32.mrb[159].mxu0  ;;  %v5822_v25 = vadd.f32 %v8462_v60, %v13612_v34  ;;  %v13908_v32 = vadd.f32 %v9732_v46, %v5819_v36  ;;  %v6049_v36 = vsel %vm498_vm0, %v6017_v63, 0.0  ;;  %v13944_v60 = vsub.f32 %v13646_v30, %v5958_v50 }
0x178d   : > { %v13900_v18 = vadd.f32 %v9731_v39, %v5811_v49  ;;  %v5814_v51 = vadd.f32 %v13612_v34, %v5813_v10  ;;  %v9734_v34 = vld [vmem:[%s10465_s22 + $0xf8] sm:$0xff]  ;;  %v6019_v49 = vmul.f32 %v13924_v23, %v13924_v23  ;;  %v5960_v10 = vmul.f32 0.03125, %v5880_v9  ;;  %s14463_s22 = scalar_lea.vmem [#allocation17], %s7387_s25  ;;  %s7548_s25 = sshll.u32 %s10173_s15, 12 }
0x178e   : > { %15009 = vst [vmem:[#allocation53_spill] sm:$0xff] %v13908_v32  ;;  %v13919_v22 = vadd.f32 %v9734_v34, %v5822_v25  ;;  %v5947_v15 = vsel %vm498_vm0, %v13908_v32, 0.0  ;;  %v6020_v39 = vmul.f32 %v13931_v38, %v13931_v38  ;;  %v5892_v25 = vpop.xlane.xlu1 %5891  ;;  %v13950_v57 = vsub.f32 %v13669_v33, %v5959_v3  ;;  %v5895_v34 = vpop.xlane.xlu0 %5894  ;;  %s7222_s19 = sshll.u32 %s14463_s22, 4  ;;  %s14585_s21 = scalar_lea.hbm %s14648_s9, %s7548_s25  ;;  %s14590_s19 = int_to_ptr.vmem [resolvable:$true] %s7222_s19 }
0x178f   : > { %15008 = vst [vmem:[#allocation54_spill] sm:$0xff] %v13900_v18  ;;  %v13911_v43 = vadd.f32 %v9733_v29, %v5814_v51  ;;  %v5941_v55 = vsel %vm498_vm0, %v13900_v18, 0.0  ;;  %v5961_v51 = vmul.f32 0.03125, %v5883_v20  ;;  %v6055_v26 = vsel %vm498_vm0, %v6019_v49, 0.0  ;;  %s7208_s15 = scalar_lea.sflag [#allocation4], %s10459_s3  ;;  %s9989_s13 = scalar_lea.vmem %s14590_s19, 4096 }
0x1790   : > { %5942 = vadd.xlane.f32.xlu0 %v5941_v55  ;;  %15011 = vst [vmem:[#allocation95_spill] sm:$0xff] %v13919_v22  ;;  %v5950_v17 = vsel %vm498_vm0, %v13919_v22, 0.0  ;;  %v6021_v46 = vmul.f32 %v13938_v52, %v13938_v52  ;;  %v13956_v29 = vsub.f32 %v13661_v1, %v5960_v10  ;;  %v5962_v9 = vmul.f32 0.03125, %v5886_v59  ;;  %p9990_p12 = scmp.ne.s32.totalorder %s14590_s19, %s9989_s13  ;;  %p9996_p2 = scmp.lt.s32.totalorder %s14590_s19, %s9994_s20 }
0x1791   : > { %15010 = vst [vmem:[#allocation97_spill] sm:$0xff] %v13911_v43  ;;  %v5944_v58 = vsel %vm498_vm0, %v13911_v43, 0.0  ;;  %v6058_v55 = vsel %vm498_vm0, %v6020_v39, 0.0  ;;  %v6022_v12 = vmul.f32 %v13944_v60, %v13944_v60  ;;  %v5963_v20 = vmul.f32 0.03125, %v5889_v27  ;;  %p9997_p8 = scmp.lt.s32.totalorder %s9995_s28, %s9989_s13 }
0x1792   : > { %5945 = vadd.xlane.f32.xlu1 %v5944_v58  ;;  %v13962_v58 = vsub.f32 %v13690_v35, %v5961_v51  ;;  %v6061_v56 = vsel %vm498_vm0, %v6021_v46, 0.0  ;;  %v5898_v63 = vpop.xlane.xlu1 %5897  ;;  %v13968_v59 = vsub.f32 %v13676_v48, %v5962_v9  ;;  %v5964_v50 = vmul.f32 0.03125, %v5892_v25  ;;  %v5901_v10 = vpop.xlane.xlu0 %5900  ;;  %p9991_p1 = pnand %p9990_p12, %p15033_p13 }
0x1793   : > { %v6024_v40 = vmul.f32 %v13956_v29, %v13956_v29  ;;  %v13974_v3 = vsub.f32 %v13707_v16, %v5963_v20  ;;  %v5966_v39 = vmul.f32 0.03125, %v5898_v63  ;;  %v5967_v9 = vmul.f32 0.03125, %v5901_v10  ;;  %p9998_p10 = por %p9997_p8, %p9996_p2 }
0x1794   : > { %5948 = vadd.xlane.f32.xlu0 %v5947_v15  ;;  %v6023_v15 = vmul.f32 %v13950_v57, %v13950_v57  ;;  %v6025_v27 = vmul.f32 %v13962_v58, %v13962_v58  ;;  %v6026_v51 = vmul.f32 %v13968_v59, %v13968_v59  ;;  %p9992_p3 = pneg %p9991_p1 }
0x1795   : > { %v6070_v25 = vsel %vm498_vm0, %v6024_v40, 0.0  ;;  %v13998_v63 = vsub.f32 %v13753_v37, %v5967_v9  ;;  %v8993_v9 = vld [vmem:[#allocation13] sm:$0xff]  }
0x1796   : > { %5951 = vadd.xlane.f32.xlu1 %v5950_v17  ;;  %v6064_v17 = vsel %vm498_vm0, %v6022_v12, 0.0  ;;  %v6067_v49 = vsel %vm498_vm0, %v6023_v15, 0.0  ;;  %v6027_v12 = vmul.f32 %v13974_v3, %v13974_v3  ;;  %8463 = vmatprep.subr.bf16.mxu1 %v8993_v9  ;;  %p9999_p4 = pnand %p9998_p10, %p9992_p3 }
0x1797   : > { %v6031_v10 = vmul.f32 %v13998_v63, %v13998_v63  ;;  %8464 = vmatpush3.bf16.msra.mxu1 %v8993_v9 }
0x1798   : > { %6050 = vadd.xlane.f32.xlu0 %v6049_v36  ;;  %v5965_v36 = vmul.f32 0.03125, %v5895_v34  ;;  %v13992_v34 = vsub.f32 %v13714_v6, %v5966_v39 }
0x179a   : > { %6053 = vadd.xlane.f32.xlu1 %v6052_v0  ;;  %v13980_v0 = vsub.f32 %v13693_v61, %v5964_v50  ;;  %v13986_v46 = vsub.f32 %v13732_v28, %v5965_v36  ;;  %v6079_v50 = vsel %vm498_vm0, %v6027_v12, 0.0 }
0x179c   : > { %6056 = vadd.xlane.f32.xlu0 %v6055_v26  ;;  %v5904_v26 = vpop.xlane.xlu1 %5903  ;;  %v6028_v15 = vmul.f32 %v13980_v0, %v13980_v0 }
0x179d   : > { %v5968_v20 = vmul.f32 0.03125, %v5904_v26 }
0x179e   : > { %6059 = vadd.xlane.f32.xlu1 %v6058_v55  ;;  %v6073_v55 = vsel %vm498_vm0, %v6025_v27, 0.0  ;;  %v6082_v36 = vsel %vm498_vm0, %v6028_v15, 0.0 }
0x179f   : > { %v14004_v40 = vsub.f32 %v13737_v19, %v5968_v20 }
0x17a0   : > { %6062 = vadd.xlane.f32.xlu0 %v6061_v56  ;;  %v6076_v56 = vsel %vm498_vm0, %v6026_v51, 0.0  ;;  %v6091_v51 = vsel %vm498_vm0, %v6031_v10, 0.0 }
0x17a2   : > { %6065 = vadd.xlane.f32.xlu1 %v6064_v17  ;;  %v6029_v17 = vmul.f32 %v13986_v46, %v13986_v46 }
0x17a4   : > { %6068 = vadd.xlane.f32.xlu0 %v6067_v49  ;;  %v6030_v49 = vmul.f32 %v13992_v34, %v13992_v34  ;;  %v6085_v27 = vsel %vm498_vm0, %v6029_v17, 0.0 }
0x17a6   : > { %6071 = vadd.xlane.f32.xlu1 %v6070_v25  ;;  %v6088_v39 = vsel %vm498_vm0, %v6030_v49, 0.0  ;;  %v6032_v25 = vmul.f32 %v14004_v40, %v14004_v40 }
0x17a8   : > { %6074 = vadd.xlane.f32.xlu0 %v6073_v55  ;;  %v6094_v26 = vsel %vm498_vm0, %v6032_v25, 0.0  ;;  %v8994_v55 = vld [vmem:[#allocation13 + $0x8] sm:$0xff]  }
0x17a9   : > { %8465 = vmatprep.subr.bf16.mxu1 %v8994_v55 }
0x17aa   : > { %6077 = vadd.xlane.f32.xlu1 %v6076_v56  ;;  %8466 = vmatpush3.bf16.msra.mxu1 %v8994_v55 }
0x17ac   : > { %6080 = vadd.xlane.f32.xlu0 %v6079_v50 }
0x17ae   : > { %6083 = vadd.xlane.f32.xlu1 %v6082_v36 }
0x17b0   : > { %6086 = vadd.xlane.f32.xlu0 %v6085_v27 }
0x17b2   : > { %6089 = vadd.xlane.f32.xlu1 %v6088_v39 }
0x17b4   : > { %6092 = vadd.xlane.f32.xlu0 %v6091_v51 }
0x17b6   : > { %6095 = vadd.xlane.f32.xlu1 %v6094_v26 }
0x17e1   : > { %v5907_v12 = vpop.xlane.xlu0 %5906 }
0x17e2   : > { %v5969_v20 = vmul.f32 0.03125, %v5907_v12 }
0x17e3   : > { %v5910_v56 = vpop.xlane.xlu1 %5909 }
0x17e4   : > { %v14018_v15 = vsub.f32 %v13828_v47, %v5969_v20  ;;  %v5970_v50 = vmul.f32 0.03125, %v5910_v56 }
0x17e5   : > { %v5913_v17 = vpop.xlane.xlu0 %5912 }
0x17e6   : > { %v14021_v36 = vsub.f32 %v13836_v8, %v5970_v50  ;;  %v5971_v49 = vmul.f32 0.03125, %v5913_v17  ;;  %v6033_v27 = vmul.f32 %v14018_v15, %v14018_v15 }
0x17e7   : > { %v5916_v10 = vpop.xlane.xlu1 %5915 }
0x17e8   : > { %v14026_v39 = vsub.f32 %v13833_v11, %v5971_v49  ;;  %v5972_v25 = vmul.f32 0.03125, %v5916_v10  ;;  %v6097_v51 = vsel %vm498_vm0, %v6033_v27, 0.0  ;;  %v6034_v26 = vmul.f32 %v14021_v36, %v14021_v36 }
0x17e9   : > { %6098 = vadd.xlane.f32.xlu0 %v6097_v51  ;;  %v5919_v9 = vpop.xlane.xlu0 %5918 }
0x17ea   : > { %v14032_v55 = vsub.f32 %v13841_v45, %v5972_v25  ;;  %v5973_v12 = vmul.f32 0.03125, %v5919_v9  ;;  %v6100_v20 = vsel %vm498_vm0, %v6034_v26, 0.0  ;;  %v6035_v56 = vmul.f32 %v14026_v39, %v14026_v39 }
0x17eb   : > { %v5922_v50 = vpop.xlane.xlu1 %5921  ;;  %6101 = vadd.xlane.f32.xlu1 %v6100_v20 }
0x17ec   : > { %v14038_v17 = vsub.f32 %v13850_v44, %v5973_v12  ;;  %v5974_v49 = vmul.f32 0.03125, %v5922_v50  ;;  %v6103_v27 = vsel %vm498_vm0, %v6035_v56, 0.0  ;;  %v6036_v10 = vmul.f32 %v14032_v55, %v14032_v55 }
0x17ed   : > { %6104 = vadd.xlane.f32.xlu0 %v6103_v27  ;;  %v5925_v25 = vpop.xlane.xlu0 %5924 }
0x17ee   : > { %v14044_v51 = vsub.f32 %v13860_v54, %v5974_v49  ;;  %v5975_v26 = vmul.f32 0.03125, %v5925_v25  ;;  %v6106_v9 = vsel %vm498_vm0, %v6036_v10, 0.0  ;;  %v6037_v20 = vmul.f32 %v14038_v17, %v14038_v17 }
0x17ef   : > { %v5928_v8 = vpop.xlane.xlu1 %5927  ;;  %6107 = vadd.xlane.f32.xlu1 %v6106_v9 }
0x17f0   : > { %v14050_v12 = vsub.f32 %v13857_v2, %v5975_v26  ;;  %v5976_v56 = vmul.f32 0.03125, %v5928_v8  ;;  %v6109_v50 = vsel %vm498_vm0, %v6037_v20, 0.0  ;;  %v6038_v27 = vmul.f32 %v14044_v51, %v14044_v51 }
0x17f1   : > { %6110 = vadd.xlane.f32.xlu0 %v6109_v50  ;;  %v5931_v49 = vpop.xlane.xlu0 %5930 }
0x17f2   : > { %v14056_v25 = vsub.f32 %v13865_v21, %v5976_v56  ;;  %v5977_v10 = vmul.f32 0.03125, %v5931_v49  ;;  %v6112_v54 = vsel %vm498_vm0, %v6038_v27, 0.0  ;;  %v6039_v9 = vmul.f32 %v14050_v12, %v14050_v12 }
0x17f3   : > { %v5934_v44 = vpop.xlane.xlu1 %5933  ;;  %6113 = vadd.xlane.f32.xlu1 %v6112_v54 }
0x17f4   : > { %v14062_v8 = vsub.f32 %v13874_v62, %v5977_v10  ;;  %v5978_v26 = vmul.f32 0.03125, %v5934_v44  ;;  %v6115_v20 = vsel %vm498_vm0, %v6039_v9, 0.0  ;;  %v6040_v50 = vmul.f32 %v14056_v25, %v14056_v25 }
0x17f5   : > { %6116 = vadd.xlane.f32.xlu0 %v6115_v20  ;;  %v5937_v56 = vpop.xlane.xlu0 %5936 }
0x17f6   : > { %v14068_v49 = vsub.f32 %v13884_v14, %v5978_v26  ;;  %v5979_v27 = vmul.f32 0.03125, %v5937_v56  ;;  %v6118_v21 = vsel %vm498_vm0, %v6040_v50, 0.0  ;;  %v6041_v54 = vmul.f32 %v14062_v8, %v14062_v8 }
0x17f7   : > { %v5940_v2 = vpop.xlane.xlu1 %5939  ;;  %6119 = vadd.xlane.f32.xlu1 %v6118_v21 }
0x17f8   : > { %v14074_v44 = vsub.f32 %v13881_v4, %v5979_v27  ;;  %v5980_v10 = vmul.f32 0.03125, %v5940_v2  ;;  %v6121_v9 = vsel %vm498_vm0, %v6041_v54, 0.0  ;;  %v6042_v20 = vmul.f32 %v14068_v49, %v14068_v49 }
0x17f9   : > { %6122 = vadd.xlane.f32.xlu0 %v6121_v9 }
0x17fa   : > { %v14080_v26 = vsub.f32 %v13889_v42, %v5980_v10  ;;  %v6124_v50 = vsel %vm498_vm0, %v6042_v20, 0.0  ;;  %v6043_v56 = vmul.f32 %v14074_v44, %v14074_v44 }
0x17fb   : > { %6125 = vadd.xlane.f32.xlu1 %v6124_v50 }
0x17fc   : > { %v6127_v21 = vsel %vm498_vm0, %v6043_v56, 0.0  ;;  %v6044_v2 = vmul.f32 %v14080_v26, %v14080_v26 }
0x17fd   : > { %6128 = vadd.xlane.f32.xlu0 %v6127_v21 }
0x17fe   : > { %v6130_v27 = vsel %vm498_vm0, %v6044_v2, 0.0 }
0x17ff   : > { %6131 = vadd.xlane.f32.xlu1 %v6130_v27 }
0x181d   : > { %v5943_v54 = vpop.xlane.xlu0 %5942 }
0x181e   : > { %v5981_v9 = vmul.f32 0.03125, %v5943_v54 }
0x181f   : > { %v5946_v14 = vpop.xlane.xlu1 %5945 }
0x1820   : > { %v14090_v10 = vsub.f32 %v13900_v18, %v5981_v9  ;;  %v5982_v20 = vmul.f32 0.03125, %v5946_v14 }
0x1821   : > { %v5949_v42 = vpop.xlane.xlu0 %5948 }
0x1822   : > { %v14093_v62 = vsub.f32 %v13911_v43, %v5982_v20  ;;  %v5983_v50 = vmul.f32 0.03125, %v5949_v42  ;;  %v6045_v56 = vmul.f32 %v14090_v10, %v14090_v10 }
0x1823   : > { %v5952_v4 = vpop.xlane.xlu1 %5951 }
0x1824   : > { %v14098_v21 = vsub.f32 %v13908_v32, %v5983_v50  ;;  %v5984_v2 = vmul.f32 0.03125, %v5952_v4  ;;  %v6133_v27 = vsel %vm498_vm0, %v6045_v56, 0.0  ;;  %v6046_v54 = vmul.f32 %v14093_v62, %v14093_v62 }
0x1825   : > { %6134 = vadd.xlane.f32.xlu0 %v6133_v27  ;;  %v6051_v14 = vpop.xlane.xlu0 %6050 }
0x1826   : > { %v14104_v9 = vsub.f32 %v13919_v22, %v5984_v2  ;;  %v6145_v20 = vmul.f32 0.03125, %v6051_v14  ;;  %v6136_v42 = vsel %vm498_vm0, %v6046_v54, 0.0  ;;  %v6047_v43 = vmul.f32 %v14098_v21, %v14098_v21 }
0x1827   : > { %v6054_v18 = vpop.xlane.xlu1 %6053  ;;  %6137 = vadd.xlane.f32.xlu1 %v6136_v42 }
0x1828   : > { %v6177_v50 = vadd.f32 1e-06, %v6145_v20  ;;  %v6146_v4 = vmul.f32 0.03125, %v6054_v18  ;;  %v6139_v56 = vsel %vm498_vm0, %v6047_v43, 0.0  ;;  %v6048_v32 = vmul.f32 %v14104_v9, %v14104_v9 }
0x1829   : > { %6140 = vadd.xlane.f32.xlu0 %v6139_v56  ;;  %v6057_v27 = vpop.xlane.xlu0 %6056 }
0x182a   : > { %9575 = vrsqrt.f32 %v6177_v50  ;;  %v6178_v2 = vadd.f32 1e-06, %v6146_v4  ;;  %v6147_v22 = vmul.f32 0.03125, %v6057_v27  ;;  %v6142_v14 = vsel %vm498_vm0, %v6048_v32, 0.0 }
0x182b   : > { %6143 = vadd.xlane.f32.xlu1 %v6142_v14  ;;  %v6060_v54 = vpop.xlane.xlu1 %6059 }
0x182c   : > { %9577 = vrsqrt.f32 %v6178_v2  ;;  %v6179_v45 = vadd.f32 1e-06, %v6147_v22  ;;  %v6148_v47 = vmul.f32 0.03125, %v6060_v54 }
0x182d   : > { %v6063_v42 = vpop.xlane.xlu0 %6062 }
0x182e   : > { %9579 = vrsqrt.f32 %v6179_v45  ;;  %v6180_v18 = vadd.f32 1e-06, %v6148_v47  ;;  %v6149_v20 = vmul.f32 0.03125, %v6063_v42 }
0x182f   : > { %v6066_v43 = vpop.xlane.xlu1 %6065 }
0x1830   : > { %9581 = vrsqrt.f32 %v6180_v18  ;;  %v6181_v11 = vadd.f32 1e-06, %v6149_v20  ;;  %v6150_v6 = vmul.f32 0.03125, %v6066_v43  ;;  %v15012_v20 = vld [vmem:[#allocation24_spill] sm:$0xff] }
0x1831   : > { %v6069_v56 = vpop.xlane.xlu0 %6068 }
0x1832   : > { %9583 = vrsqrt.f32 %v6181_v11  ;;  %v6182_v50 = vadd.f32 1e-06, %v6150_v6  ;;  %v6151_v4 = vmul.f32 0.03125, %v6069_v56 }
0x1833   : > { %v6072_v27 = vpop.xlane.xlu1 %6071 }
0x1834   : > { %v9576_v19 = vpop.eup %9575  ;;  %9585 = vrsqrt.f32 %v6182_v50  ;;  %v6183_v32 = vadd.f32 1e-06, %v6151_v4  ;;  %v6152_v14 = vmul.f32 0.03125, %v6072_v27 }
0x1835   : > { %v6241_v22 = vmul.f32 %v9576_v19, %v13905_v24  ;;  %v6075_v2 = vpop.xlane.xlu0 %6074 }
0x1836   : > { %v9578_v54 = vpop.eup %9577  ;;  %9587 = vrsqrt.f32 %v6183_v32  ;;  %v6184_v47 = vadd.f32 1e-06, %v6152_v14  ;;  %v6153_v45 = vmul.f32 0.03125, %v6075_v2 }
0x1837   : > { %v6242_v42 = vmul.f32 %v9578_v54, %v13916_v5  ;;  %v6078_v18 = vpop.xlane.xlu1 %6077  ;;  %v6277_v43 = vmul.f32 %v15012_v20, %v6241_v22  ;;  %v15013_v54 = vld [vmem:[#allocation25_spill] sm:$0xff] }
0x1838   : > { %v9580_v11 = vpop.eup %9579  ;;  %9589 = vrsqrt.f32 %v6184_v47  ;;  %v6185_v6 = vadd.f32 1e-06, %v6153_v45  ;;  %v6154_v56 = vmul.f32 0.03125, %v6078_v18 }
0x1839   : > { %v6243_v50 = vmul.f32 %v9580_v11, %v13924_v23  ;;  %v6081_v4 = vpop.xlane.xlu0 %6080  ;;  %v6278_v27 = vmul.f32 %v15012_v20, %v6242_v42  ;;  %v6313_v22 = vadd.f32 %v15013_v54, %v6277_v43 }
0x183a   : > { %v9582_v19 = vpop.eup %9581  ;;  %9591 = vrsqrt.f32 %v6185_v6  ;;  %v6186_v24 = vadd.f32 1e-06, %v6154_v56  ;;  %v6155_v32 = vmul.f32 0.03125, %v6081_v4 }
0x183b   : > { %v6279_v14 = vmul.f32 %v15012_v20, %v6243_v50  ;;  %v6244_v5 = vmul.f32 %v9582_v19, %v13931_v38  ;;  %v6084_v2 = vpop.xlane.xlu1 %6083  ;;  %v6314_v47 = vadd.f32 %v15013_v54, %v6278_v27 }
0x183c   : > { %v9584_v45 = vpop.eup %9583  ;;  %9593 = vrsqrt.f32 %v6186_v24  ;;  %v6187_v18 = vadd.f32 1e-06, %v6155_v32  ;;  %v6156_v23 = vmul.f32 0.03125, %v6084_v2 }
0x183d   : > { %v6280_v11 = vmul.f32 %v15012_v20, %v6244_v5  ;;  %v6245_v42 = vmul.f32 %v9584_v45, %v13938_v52  ;;  %v6087_v6 = vpop.xlane.xlu0 %6086  ;;  %v6345_v56 = vpack.c.bf16 %v6314_v47, %v6313_v22  ;;  %v6315_v38 = vadd.f32 %v15013_v54, %v6279_v14 }
0x183e   : > { %v9586_v4 = vpop.eup %9585  ;;  %9595 = vrsqrt.f32 %v6187_v18  ;;  %v6188_v50 = vadd.f32 1e-06, %v6156_v23  ;;  %v6157_v28 = vmul.f32 0.03125, %v6087_v6 }
0x183f   : > { %v6316_v43 = vadd.f32 %v15013_v54, %v6280_v11  ;;  %v6246_v27 = vmul.f32 %v9586_v4, %v13944_v60  ;;  %v6090_v19 = vpop.xlane.xlu1 %6089  ;;  %8467 = vmatprep.mubr.msk.bf16.mxu1 %vm498_vm0, %v6345_v56  ;;  %v6281_v24 = vmul.f32 %v15012_v20, %v6245_v42 }
0x1840   : > { %v9588_v32 = vpop.eup %9587  ;;  %9597 = vrsqrt.f32 %v6188_v50  ;;  %v6189_v52 = vadd.f32 1e-06, %v6157_v28  ;;  %v6158_v5 = vmul.f32 0.03125, %v6090_v19 }
0x1841   : > { %v6247_v2 = vmul.f32 %v9588_v32, %v13950_v57  ;;  %v6093_v22 = vpop.xlane.xlu0 %6092  ;;  %v6346_v47 = vpack.c.bf16 %v6316_v43, %v6315_v38  ;;  %v6282_v45 = vmul.f32 %v15012_v20, %v6246_v27  ;;  %v6317_v42 = vadd.f32 %v15013_v54, %v6281_v24 }
0x1842   : > { %v9590_v14 = vpop.eup %9589  ;;  %9599 = vrsqrt.f32 %v6189_v52  ;;  %v6190_v18 = vadd.f32 1e-06, %v6158_v5  ;;  %v6159_v23 = vmul.f32 0.03125, %v6093_v22 }
0x1843   : > { %v6248_v60 = vmul.f32 %v9590_v14, %v13956_v29  ;;  %v6096_v11 = vpop.xlane.xlu1 %6095  ;;  %8468 = vmatmul.mubr.msk.bf16.vlgmr.msra.gmra.mrb[160].mxu1 %vm498_vm0, %v6346_v47  ;;  %v6318_v28 = vadd.f32 %v15013_v54, %v6282_v45  ;;  %v6283_v6 = vmul.f32 %v15012_v20, %v6247_v2 }
0x1844   : > { %v9592_v57 = vpop.eup %9591  ;;  %9601 = vrsqrt.f32 %v6190_v18  ;;  %v6191_v56 = vadd.f32 1e-06, %v6159_v23  ;;  %v6160_v4 = vmul.f32 0.03125, %v6096_v11 }
0x1845   : > { %v6249_v50 = vmul.f32 %v9592_v57, %v13962_v58  ;;  %v6347_v38 = vpack.c.bf16 %v6318_v28, %v6317_v42  ;;  %v6284_v43 = vmul.f32 %v15012_v20, %v6248_v60  ;;  %v6319_v24 = vadd.f32 %v15013_v54, %v6283_v6 }
0x1846   : > { %v9594_v27 = vpop.eup %9593  ;;  %9603 = vrsqrt.f32 %v6191_v56  ;;  %v6192_v29 = vadd.f32 1e-06, %v6160_v4 }
0x1847   : > { %v6250_v19 = vmul.f32 %v9594_v27, %v13968_v59  ;;  %8471 = vmatprep.mubr.msk.bf16.mxu1 %vm498_vm0, %v6347_v38  ;;  %v6320_v32 = vadd.f32 %v15013_v54, %v6284_v43  ;;  %v6285_v52 = vmul.f32 %v15012_v20, %v6249_v50 }
0x1848   : > { %v9596_v5 = vpop.eup %9595  ;;  %9605 = vrsqrt.f32 %v6192_v29 }
0x1849   : > { %v6251_v58 = vmul.f32 %v9596_v5, %v13974_v3  ;;  %v6348_v2 = vpack.c.bf16 %v6320_v32, %v6319_v24  ;;  %v6286_v22 = vmul.f32 %v15012_v20, %v6250_v19  ;;  %v6321_v59 = vadd.f32 %v15013_v54, %v6285_v52 }
0x184a   : > { %v9598_v47 = vpop.eup %9597 }
0x184b   : > { %v6252_v45 = vmul.f32 %v9598_v47, %v13980_v0  ;;  %8472 = vmatmul.mubr.msk.bf16.gmra.mrb[164].mxu1 %vm498_vm0, %v6348_v2  ;;  %v6322_v14 = vadd.f32 %v15013_v54, %v6286_v22  ;;  %v6287_v18 = vmul.f32 %v15012_v20, %v6251_v58 }
0x184c   : > { %v9600_v23 = vpop.eup %9599 }
0x184d   : > { %v6253_v60 = vmul.f32 %v9600_v23, %v13986_v46  ;;  %v6349_v11 = vpack.c.bf16 %v6322_v14, %v6321_v59  ;;  %v6288_v3 = vmul.f32 %v15012_v20, %v6252_v45  ;;  %v6323_v0 = vadd.f32 %v15013_v54, %v6287_v18 }
0x184e   : > { %v9602_v42 = vpop.eup %9601 }
0x184f   : > { %v6254_v28 = vmul.f32 %v9602_v42, %v13992_v34  ;;  %8475 = vmatprep.mubr.msk.bf16.mxu1 %vm498_vm0, %v6349_v11  ;;  %v6324_v6 = vadd.f32 %v15013_v54, %v6288_v3  ;;  %v6289_v57 = vmul.f32 %v15012_v20, %v6253_v60 }
0x1850   : > { %v9604_v56 = vpop.eup %9603 }
0x1851   : > { %v6255_v4 = vmul.f32 %v9604_v56, %v13998_v63  ;;  %v6350_v50 = vpack.c.bf16 %v6324_v6, %v6323_v0  ;;  %v6290_v46 = vmul.f32 %v15012_v20, %v6254_v28  ;;  %v6325_v34 = vadd.f32 %v15013_v54, %v6289_v57 }
0x1852   : > { %v9606_v38 = vpop.eup %9605 }
0x1853   : > { %v6256_v43 = vmul.f32 %v9606_v38, %v14004_v40  ;;  %8476 = vmatmul.mubr.msk.bf16.gmra.mrb[168].mxu1 %vm498_vm0, %v6350_v50  ;;  %v6326_v27 = vadd.f32 %v15013_v54, %v6290_v46  ;;  %v6291_v29 = vmul.f32 %v15012_v20, %v6255_v4 }
0x1855   : > { %v6351_v19 = vpack.c.bf16 %v6326_v27, %v6325_v34  ;;  %v6292_v24 = vmul.f32 %v15012_v20, %v6256_v43  ;;  %v6327_v63 = vadd.f32 %v15013_v54, %v6291_v29 }
0x1857   : > { %8479 = vmatprep.mubr.msk.bf16.mxu1 %vm498_vm0, %v6351_v19  ;;  %v6328_v32 = vadd.f32 %v15013_v54, %v6292_v24 }
0x1859   : > { %v6352_v52 = vpack.c.bf16 %v6328_v32, %v6327_v63 }
0x185b   : > { %8480 = vmatmul.mubr.msk.bf16.gmra.mrb[172].mxu1 %vm498_vm0, %v6352_v52 }
0x1876   : > { %v6099_v40 = vpop.xlane.xlu0 %6098 }
0x1877   : > { %v6161_v5 = vmul.f32 0.03125, %v6099_v40 }
0x1878   : > { %v6102_v58 = vpop.xlane.xlu1 %6101 }
0x1879   : > { %v6193_v2 = vadd.f32 1e-06, %v6161_v5  ;;  %v6162_v22 = vmul.f32 0.03125, %v6102_v58 }
0x187a   : > { %v6105_v47 = vpop.xlane.xlu0 %6104 }
0x187b   : > { %9607 = vrsqrt.f32 %v6193_v2  ;;  %v6194_v45 = vadd.f32 1e-06, %v6162_v22  ;;  %v6163_v59 = vmul.f32 0.03125, %v6105_v47 }
0x187c   : > { %v6108_v14 = vpop.xlane.xlu1 %6107 }
0x187d   : > { %9609 = vrsqrt.f32 %v6194_v45  ;;  %v6195_v18 = vadd.f32 1e-06, %v6163_v59  ;;  %v6164_v23 = vmul.f32 0.03125, %v6108_v14 }
0x187e   : > { %v6111_v60 = vpop.xlane.xlu0 %6110 }
0x187f   : > { %9611 = vrsqrt.f32 %v6195_v18  ;;  %v6196_v11 = vadd.f32 1e-06, %v6164_v23  ;;  %v6165_v3 = vmul.f32 0.03125, %v6111_v60 }
0x1880   : > { %v6114_v42 = vpop.xlane.xlu1 %6113 }
0x1881   : > { %9613 = vrsqrt.f32 %v6196_v11  ;;  %v6197_v28 = vadd.f32 1e-06, %v6165_v3  ;;  %v6166_v0 = vmul.f32 0.03125, %v6114_v42 }
0x1882   : > { %v6117_v6 = vpop.xlane.xlu0 %6116 }
0x1883   : > { %9615 = vrsqrt.f32 %v6197_v28  ;;  %v6198_v57 = vadd.f32 1e-06, %v6166_v0  ;;  %v6167_v56 = vmul.f32 0.03125, %v6117_v6 }
0x1884   : > { %v6120_v4 = vpop.xlane.xlu1 %6119 }
0x1885   : > { %v9608_v50 = vpop.eup %9607  ;;  %9617 = vrsqrt.f32 %v6198_v57  ;;  %v6199_v46 = vadd.f32 1e-06, %v6167_v56  ;;  %v6168_v38 = vmul.f32 0.03125, %v6120_v4 }
0x1886   : > { %v6257_v43 = vmul.f32 %v9608_v50, %v14018_v15  ;;  %v6123_v34 = vpop.xlane.xlu0 %6122 }
0x1887   : > { %v9610_v27 = vpop.eup %9609  ;;  %9619 = vrsqrt.f32 %v6199_v46  ;;  %v6200_v29 = vadd.f32 1e-06, %v6168_v38  ;;  %v6169_v19 = vmul.f32 0.03125, %v6123_v34 }
0x1888   : > { %v6258_v24 = vmul.f32 %v9610_v27, %v14021_v36  ;;  %v6126_v63 = vpop.xlane.xlu1 %6125  ;;  %v6293_v32 = vmul.f32 %v15012_v20, %v6257_v43 }
0x1889   : > { %v9612_v52 = vpop.eup %9611  ;;  %9621 = vrsqrt.f32 %v6200_v29  ;;  %v6201_v40 = vadd.f32 1e-06, %v6169_v19  ;;  %v6170_v5 = vmul.f32 0.03125, %v6126_v63 }
0x188a   : > { %v6259_v58 = vmul.f32 %v9612_v52, %v14026_v39  ;;  %v6129_v2 = vpop.xlane.xlu0 %6128  ;;  %v6294_v22 = vmul.f32 %v15012_v20, %v6258_v24  ;;  %v6329_v36 = vadd.f32 %v15013_v54, %v6293_v32 }
0x188b   : > { %v9614_v15 = vpop.eup %9613  ;;  %9623 = vrsqrt.f32 %v6201_v40  ;;  %v6202_v47 = vadd.f32 1e-06, %v6170_v5  ;;  %v6171_v45 = vmul.f32 0.03125, %v6129_v2 }
0x188c   : > { %v6260_v59 = vmul.f32 %v9614_v15, %v14032_v55  ;;  %v6132_v14 = vpop.xlane.xlu1 %6131  ;;  %v6330_v18 = vadd.f32 %v15013_v54, %v6294_v22  ;;  %v6295_v23 = vmul.f32 %v15012_v20, %v6259_v58 }
0x188d   : > { %v9616_v60 = vpop.eup %9615  ;;  %9625 = vrsqrt.f32 %v6202_v47  ;;  %v6203_v11 = vadd.f32 1e-06, %v6171_v45  ;;  %v6172_v39 = vmul.f32 0.03125, %v6132_v14 }
0x188e   : > { %v6261_v3 = vmul.f32 %v9616_v60, %v14038_v17  ;;  %v6353_v42 = vpack.c.bf16 %v6330_v18, %v6329_v36  ;;  %v6296_v28 = vmul.f32 %v15012_v20, %v6260_v59  ;;  %v6331_v57 = vadd.f32 %v15013_v54, %v6295_v23  ;;  %v8996_v60 = vld [vmem:[#allocation16 + $0x8] sm:$0xff]  }
0x188f   : > { %v9618_v0 = vpop.eup %9617  ;;  %9627 = vrsqrt.f32 %v6203_v11  ;;  %v6204_v6 = vadd.f32 1e-06, %v6172_v39  ;;  %v8997_v11 = vld [vmem:[#allocation16 + $0x10] sm:$0xff]  }
0x1890   : > { %v6262_v55 = vmul.f32 %v9618_v0, %v14044_v51  ;;  %8483 = vmatprep.mubr.msk.bf16.mxu1 %vm498_vm0, %v6353_v42  ;;  %v6332_v56 = vadd.f32 %v15013_v54, %v6296_v28  ;;  %v6297_v4 = vmul.f32 %v15012_v20, %v6261_v3 }
0x1891   : > { %v9620_v50 = vpop.eup %9619  ;;  %9629 = vrsqrt.f32 %v6204_v6  ;;  %v8998_v6 = vld [vmem:[#allocation16 + $0x18] sm:$0xff]  }
0x1892   : > { %v6263_v17 = vmul.f32 %v9620_v50, %v14050_v12  ;;  %v6354_v46 = vpack.c.bf16 %v6332_v56, %v6331_v57  ;;  %v6298_v38 = vmul.f32 %v15012_v20, %v6262_v55  ;;  %v6333_v51 = vadd.f32 %v15013_v54, %v6297_v4 }
0x1893   : > { %v9622_v43 = vpop.eup %9621 }
0x1894   : > { %v6264_v34 = vmul.f32 %v9622_v43, %v14056_v25  ;;  %8484 = vmatmul.mubr.msk.bf16.gmra.mrb[176].mxu1 %vm498_vm0, %v6354_v46  ;;  %v6334_v27 = vadd.f32 %v15013_v54, %v6298_v38  ;;  %v6299_v29 = vmul.f32 %v15012_v20, %v6263_v17 }
0x1895   : > { %v9624_v19 = vpop.eup %9623 }
0x1896   : > { %v6265_v24 = vmul.f32 %v9624_v19, %v14062_v8  ;;  %v6355_v63 = vpack.c.bf16 %v6334_v27, %v6333_v51  ;;  %v6300_v12 = vmul.f32 %v15012_v20, %v6264_v34  ;;  %v6335_v25 = vadd.f32 %v15013_v54, %v6299_v29 }
0x1897   : > { %v9626_v32 = vpop.eup %9625 }
0x1898   : > { %v6266_v52 = vmul.f32 %v9626_v32, %v14068_v49  ;;  %8487 = vmatprep.mubr.msk.bf16.mxu1 %vm498_vm0, %v6355_v63  ;;  %v6336_v40 = vadd.f32 %v15013_v54, %v6300_v12  ;;  %v6301_v5 = vmul.f32 %v15012_v20, %v6265_v24 }
0x1899   : > { %v9628_v58 = vpop.eup %9627 }
0x189a   : > { %v6267_v2 = vmul.f32 %v9628_v58, %v14074_v44  ;;  %v6356_v22 = vpack.c.bf16 %v6336_v40, %v6335_v25  ;;  %v6302_v8 = vmul.f32 %v15012_v20, %v6266_v52  ;;  %v6337_v49 = vadd.f32 %v15013_v54, %v6301_v5  ;;  %v14225_v58 = vld [vmem:[#allocation14] ss:$0 sm:$0xff] }
0x189b   : > { %v9630_v15 = vpop.eup %9629 }
0x189c   : > { %v6268_v47 = vmul.f32 %v9630_v15, %v14080_v26  ;;  %8488 = vmatmul.mubr.msk.bf16.gmra.mrb[180].mxu1 %vm498_vm0, %v6356_v22  ;;  %v6338_v45 = vadd.f32 %v15013_v54, %v6302_v8  ;;  %v6303_v59 = vmul.f32 %v15012_v20, %v6267_v2  ;;  %v8995_v26 = vld [vmem:[#allocation16] sm:$0xff]  }
0x189d   : > { %8499 = vmatprep.subr.bf16.mxu0 %v8995_v26 }
0x189e   : > { %v6357_v14 = vpack.c.bf16 %v6338_v45, %v6337_v49  ;;  %v6304_v36 = vmul.f32 %v15012_v20, %v6268_v47  ;;  %v6339_v44 = vadd.f32 %v15013_v54, %v6303_v59  ;;  %8500 = vmatpush3.bf16.msra.mxu0 %v8995_v26 }
0x189f   : > { %8501 = vmatprep.subr.bf16.mxu0 %v8996_v60 }
0x18a0   : > { %8491 = vmatprep.mubr.msk.bf16.mxu1 %vm498_vm0, %v6357_v14  ;;  %v6340_v18 = vadd.f32 %v15013_v54, %v6304_v36 }
0x18a2   : > { %v6358_v23 = vpack.c.bf16 %v6340_v18, %v6339_v44  ;;  %8502 = vmatpush3.bf16.msra.mxu0 %v8996_v60 }
0x18a3   : > { %8503 = vmatprep.subr.bf16.mxu0 %v8997_v11 }
0x18a4   : > { %8492 = vmatmul.mubr.msk.bf16.gmra.mrb[184].mxu1 %vm498_vm0, %v6358_v23 }
0x18a6   : > { %8504 = vmatpush3.bf16.msra.mxu0 %v8997_v11 }
0x18a7   : > { %8505 = vmatprep.subr.bf16.mxu0 %v8998_v6 }
0x18aa   : > { %8506 = vmatpush3.bf16.msra.mxu0 %v8998_v6 }
0x18b2   : > { %v6135_v39 = vpop.xlane.xlu0 %6134 }
0x18b3   : > { %v6173_v3 = vmul.f32 0.03125, %v6135_v39 }
0x18b4   : > { %v6138_v42 = vpop.xlane.xlu1 %6137 }
0x18b5   : > { %v6205_v28 = vadd.f32 1e-06, %v6173_v3  ;;  %v6174_v0 = vmul.f32 0.03125, %v6138_v42 }
0x18b6   : > { %v6141_v55 = vpop.xlane.xlu0 %6140 }
0x18b7   : > { %9631 = vrsqrt.f32 %v6205_v28  ;;  %v6206_v57 = vadd.f32 1e-06, %v6174_v0  ;;  %v6175_v56 = vmul.f32 0.03125, %v6141_v55 }
0x18b8   : > { %v6144_v4 = vpop.xlane.xlu1 %6143 }
0x18b9   : > { %9633 = vrsqrt.f32 %v6206_v57  ;;  %v6207_v50 = vadd.f32 1e-06, %v6175_v56  ;;  %v6176_v17 = vmul.f32 0.03125, %v6144_v4 }
0x18bb   : > { %9635 = vrsqrt.f32 %v6207_v50  ;;  %v6208_v46 = vadd.f32 1e-06, %v6176_v17 }
0x18bd   : > { %9637 = vrsqrt.f32 %v6208_v46 }
0x18c1   : > { %v9632_v38 = vpop.eup %9631 }
0x18c2   : > { %v6269_v43 = vmul.f32 %v9632_v38, %v14090_v10 }
0x18c3   : > { %v9634_v34 = vpop.eup %9633 }
0x18c4   : > { %v6270_v51 = vmul.f32 %v9634_v34, %v14093_v62  ;;  %v6305_v27 = vmul.f32 %v15012_v20, %v6269_v43 }
0x18c5   : > { %v9636_v29 = vpop.eup %9635 }
0x18c6   : > { %v6271_v19 = vmul.f32 %v9636_v29, %v14098_v21  ;;  %v6306_v24 = vmul.f32 %v15012_v20, %v6270_v51  ;;  %v6341_v32 = vadd.f32 %v15013_v54, %v6305_v27 }
0x18c7   : > { %v9638_v63 = vpop.eup %9637 }
0x18c8   : > { %v6272_v12 = vmul.f32 %v9638_v63, %v14104_v9  ;;  %v6342_v52 = vadd.f32 %v15013_v54, %v6306_v24  ;;  %v6307_v25 = vmul.f32 %v15012_v20, %v6271_v19 }
0x18ca   : > { %v6359_v10 = vpack.c.bf16 %v6342_v52, %v6341_v32  ;;  %v6308_v40 = vmul.f32 %v15012_v20, %v6272_v12  ;;  %v6343_v62 = vadd.f32 %v15013_v54, %v6307_v25 }
0x18cc   : > { %8495 = vmatprep.mubr.msk.bf16.mxu1 %vm498_vm0, %v6359_v10  ;;  %v6344_v21 = vadd.f32 %v15013_v54, %v6308_v40 }
0x18ce   : > { %v6360_v5 = vpack.c.bf16 %v6344_v21, %v6343_v62 }
0x18d0   : > { %8496 = vmatmul.mubr.msk.bf16.gmra.mrb[188].mxu1 %vm498_vm0, %v6360_v5 }
0x1916   : > { %v8469_v9 = vpop.f32.mrb[160].mxu1 }
0x1917   : > { %v6475_v2 = vadd.f32 %v8469_v9, %v14225_v58  ;;  %v6466_v22 = vpop.f32.mrb[161].mxu1 }
0x1918   : > { %v6467_v8 = vadd.f32 %v14225_v58, %v6466_v22  ;;  %v8470_v15 = vpop.f32.mrb[162].mxu1 }
0x1919   : > { %v6627_v47 = vmul.f32 0.044715, %v6475_v2  ;;  %v6478_v20 = vadd.f32 %v8470_v15, %v14225_v58  ;;  %v6469_v49 = vpop.f32.mrb[163].mxu1  ;;  %v14231_v39 = vmul.f32 0.5, %v6475_v2 }
0x191a   : > { %v6625_v45 = vmul.f32 0.044715, %v6467_v8  ;;  %v6470_v59 = vadd.f32 %v14225_v58, %v6469_v49  ;;  %v14237_v4 = vmul.f32 0.5, %v6467_v8 }
0x191b   : > { %v6659_v54 = vmul.f32 %v6627_v47, %v6475_v2  ;;  %v6628_v14 = vmul.f32 0.044715, %v6478_v20  ;;  %v14246_v25 = vmul.f32 0.5, %v6478_v20 }
0x191c   : > { %v6657_v36 = vmul.f32 %v6625_v45, %v6467_v8  ;;  %v6626_v44 = vmul.f32 0.044715, %v6470_v59  ;;  %v14250_v9 = vmul.f32 0.5, %v6470_v59 }
0x191d   : > { %v6691_v18 = vmul.f32 %v6659_v54, %v6475_v2  ;;  %v6660_v23 = vmul.f32 %v6628_v14, %v6478_v20 }
0x191e   : > { %v6689_v26 = vmul.f32 %v6657_v36, %v6467_v8  ;;  %v6658_v60 = vmul.f32 %v6626_v44, %v6470_v59  ;;  %v8473_v11 = vpop.f32.mrb[164].mxu1 }
0x191f   : > { %v6723_v3 = vadd.f32 %v6691_v18, %v6475_v2  ;;  %v6692_v42 = vmul.f32 %v6660_v23, %v6478_v20  ;;  %v14234_v28 = vadd.f32 %v8473_v11, %v14225_v58  ;;  %v6482_v0 = vpop.f32.mrb[165].mxu1 }
0x1920   : > { %v6721_v6 = vadd.f32 %v6689_v26, %v6467_v8  ;;  %v6690_v55 = vmul.f32 %v6658_v60, %v6470_v59  ;;  %v6483_v57 = vadd.f32 %v14225_v58, %v6482_v0  ;;  %v8474_v56 = vpop.f32.mrb[166].mxu1 }
0x1921   : > { %v6755_v50 = vmul.f32 0.7978846, %v6723_v3  ;;  %v6724_v17 = vadd.f32 %v6692_v42, %v6478_v20  ;;  %v6631_v46 = vmul.f32 0.044715, %v14234_v28  ;;  %v14241_v38 = vadd.f32 %v8474_v56, %v14225_v58  ;;  %v6485_v43 = vpop.f32.mrb[167].mxu1 }
0x1922   : > { %v6753_v34 = vmul.f32 0.7978846, %v6721_v6  ;;  %v6722_v51 = vadd.f32 %v6690_v55, %v6470_v59  ;;  %v6629_v27 = vmul.f32 0.044715, %v6483_v57  ;;  %v6486_v29 = vadd.f32 %v14225_v58, %v6485_v43 }
0x1923   : > { %9639 = vtanh.f32 %v6755_v50  ;;  %v6756_v19 = vmul.f32 0.7978846, %v6724_v17  ;;  %v6663_v24 = vmul.f32 %v6631_v46, %v14234_v28  ;;  %v6632_v63 = vmul.f32 0.044715, %v14241_v38 }
0x1924   : > { %9641 = vtanh.f32 %v6753_v34  ;;  %v6754_v12 = vmul.f32 0.7978846, %v6722_v51  ;;  %v6661_v32 = vmul.f32 %v6629_v27, %v6483_v57  ;;  %v6630_v52 = vmul.f32 0.044715, %v6486_v29 }
0x1925   : > { %9643 = vtanh.f32 %v6756_v19  ;;  %v6695_v10 = vmul.f32 %v6663_v24, %v14234_v28  ;;  %v6664_v40 = vmul.f32 %v6632_v63, %v14241_v38  ;;  %v14252_v2 = vmul.f32 0.5, %v6483_v57 }
0x1926   : > { %v6693_v62 = vmul.f32 %v6661_v32, %v6483_v57  ;;  %v6662_v21 = vmul.f32 %v6630_v52, %v6486_v29  ;;  %v8477_v5 = vpop.f32.mrb[168].mxu1  ;;  %9645 = vtanh.f32 %v6754_v12  ;;  %v14262_v14 = vmul.f32 0.5, %v6486_v29 }
0x1927   : > { %v6727_v22 = vadd.f32 %v6695_v10, %v14234_v28  ;;  %v6696_v8 = vmul.f32 %v6664_v40, %v14241_v38  ;;  %v14257_v15 = vadd.f32 %v8477_v5, %v14225_v58  ;;  %v6498_v47 = vpop.f32.mrb[169].mxu1  ;;  %v14280_v43 = vmul.f32 0.5, %v14234_v28 }
0x1928   : > { %v6725_v20 = vadd.f32 %v6693_v62, %v6483_v57  ;;  %v6694_v49 = vmul.f32 %v6662_v21, %v6486_v29  ;;  %v14260_v45 = vadd.f32 %v14225_v58, %v6498_v47  ;;  %v8478_v54 = vpop.f32.mrb[170].mxu1 }
0x1929   : > { %v6759_v59 = vmul.f32 0.7978846, %v6727_v22  ;;  %v6728_v36 = vadd.f32 %v6696_v8, %v14241_v38  ;;  %v6635_v44 = vmul.f32 0.044715, %v14257_v15  ;;  %v14267_v18 = vadd.f32 %v8478_v54, %v14225_v58  ;;  %v6501_v23 = vpop.f32.mrb[171].mxu1 }
0x192a   : > { %v6757_v26 = vmul.f32 0.7978846, %v6725_v20  ;;  %v6726_v60 = vadd.f32 %v6694_v49, %v6486_v29  ;;  %v6633_v11 = vmul.f32 0.044715, %v14260_v45  ;;  %v14271_v3 = vadd.f32 %v14225_v58, %v6501_v23 }
0x192b   : > { %9647 = vtanh.f32 %v6759_v59  ;;  %v6760_v42 = vmul.f32 0.7978846, %v6728_v36  ;;  %v6667_v0 = vmul.f32 %v6635_v44, %v14257_v15  ;;  %v6636_v6 = vmul.f32 0.044715, %v14267_v18 }
0x192c   : > { %9649 = vtanh.f32 %v6757_v26  ;;  %v6758_v55 = vmul.f32 0.7978846, %v6726_v60  ;;  %v6665_v57 = vmul.f32 %v6633_v11, %v14260_v45  ;;  %v6634_v56 = vmul.f32 0.044715, %v14271_v3 }
0x192d   : > { %v9640_v50 = vpop.eup %9639  ;;  %9651 = vtanh.f32 %v6760_v42  ;;  %v6699_v17 = vmul.f32 %v6667_v0, %v14257_v15  ;;  %v6668_v46 = vmul.f32 %v6636_v6, %v14267_v18 }
0x192e   : > { %v9642_v34 = vpop.eup %9641  ;;  %v6819_v51 = vadd.f32 1.0, %v9640_v50  ;;  %9653 = vtanh.f32 %v6758_v55  ;;  %v6697_v27 = vmul.f32 %v6665_v57, %v14260_v45  ;;  %v6666_v29 = vmul.f32 %v6634_v56, %v14271_v3  ;;  %v8481_v19 = vpop.f32.mrb[172].mxu1 }
0x192f   : > { %v9644_v24 = vpop.eup %9643  ;;  %v6731_v63 = vadd.f32 %v6699_v17, %v14257_v15  ;;  %v6700_v12 = vmul.f32 %v6668_v46, %v14267_v18  ;;  %v14287_v32 = vadd.f32 %v8481_v19, %v14225_v58  ;;  %v6514_v52 = vpop.f32.mrb[173].mxu1  ;;  %v6817_v10 = vadd.f32 1.0, %v9642_v34 }
0x1930   : > { %v14290_v28 = vmul.f32 %v6819_v51, %v14231_v39  ;;  %v6820_v40 = vadd.f32 1.0, %v9644_v24  ;;  %v6729_v62 = vadd.f32 %v6697_v27, %v14260_v45  ;;  %v6698_v21 = vmul.f32 %v6666_v29, %v14271_v3  ;;  %v8482_v5 = vpop.f32.mrb[174].mxu1  ;;  %v9646_v22 = vpop.eup %9645 }
0x1931   : > { %v6763_v8 = vmul.f32 0.7978846, %v6731_v63  ;;  %v6732_v47 = vadd.f32 %v6700_v12, %v14267_v18  ;;  %v6639_v20 = vmul.f32 0.044715, %v14287_v32  ;;  %v14297_v49 = vadd.f32 %v14225_v58, %v6514_v52  ;;  %v6517_v54 = vpop.f32.mrb[175].mxu1 }
0x1932   : > { %v6852_v39 = vmul.f32 %v6820_v40, %v14246_v25  ;;  %v6761_v59 = vmul.f32 0.7978846, %v6729_v62  ;;  %v6730_v36 = vadd.f32 %v6698_v21, %v14271_v3  ;;  %v14302_v44 = vadd.f32 %v8482_v5, %v14225_v58 }
0x1933   : > { %9655 = vtanh.f32 %v6763_v8  ;;  %v6764_v23 = vmul.f32 0.7978846, %v6732_v47  ;;  %v6671_v26 = vmul.f32 %v6639_v20, %v14287_v32  ;;  %v6637_v60 = vmul.f32 0.044715, %v14297_v49 }
0x1934   : > { %v6882_v11 = vpack.c.bf16 %v6852_v39, %v14290_v28  ;;  %9657 = vtanh.f32 %v6761_v59  ;;  %v6762_v42 = vmul.f32 0.7978846, %v6730_v36  ;;  %v6640_v0 = vmul.f32 0.044715, %v14302_v44 }
0x1935   : > { %v9648_v6 = vpop.eup %9647  ;;  %9659 = vtanh.f32 %v6764_v23  ;;  %v6703_v25 = vmul.f32 %v6671_v26, %v14287_v32  ;;  %v6669_v55 = vmul.f32 %v6637_v60, %v14297_v49  ;;  %v14311_v57 = vadd.f32 %v14225_v58, %v6517_v54 }
0x1936   : > { %v9650_v56 = vpop.eup %9649  ;;  %9661 = vtanh.f32 %v6762_v42  ;;  %v6672_v50 = vmul.f32 %v6640_v0, %v14302_v44  ;;  %v6818_v17 = vadd.f32 1.0, %v9646_v22  ;;  %v6849_v46 = vmul.f32 %v6817_v10, %v14237_v4 }
0x1937   : > { %v9652_v34 = vpop.eup %9651  ;;  %v6735_v51 = vadd.f32 %v6703_v25, %v14287_v32  ;;  %v6701_v27 = vmul.f32 %v6669_v55, %v14297_v49  ;;  %v6638_v29 = vmul.f32 0.044715, %v14311_v57  ;;  %v6821_v19 = vadd.f32 1.0, %v9650_v56 }
0x1938   : > { %v9654_v24 = vpop.eup %9653  ;;  %v6704_v63 = vmul.f32 %v6672_v50, %v14302_v44  ;;  %v6850_v12 = vmul.f32 %v6818_v17, %v14250_v9  ;;  %v6823_v52 = vadd.f32 1.0, %v9648_v6  ;;  %v6824_v28 = vadd.f32 1.0, %v9652_v34 }
0x1939   : > { %v6767_v40 = vmul.f32 0.7978846, %v6735_v51  ;;  %v6733_v62 = vadd.f32 %v6701_v27, %v14297_v49  ;;  %v6670_v4 = vmul.f32 %v6638_v29, %v14311_v57  ;;  %v6822_v10 = vadd.f32 1.0, %v9654_v24 }
0x193a   : > { %v6736_v21 = vadd.f32 %v6704_v63, %v14302_v44  ;;  %v6881_v5 = vpack.c.bf16 %v6850_v12, %v6849_v46  ;;  %v6853_v22 = vmul.f32 %v6821_v19, %v14252_v2  ;;  %v6600_v8 = vmul.f32 0.5, %v14241_v38 }
0x193b   : > { %9663 = vtanh.f32 %v6767_v40  ;;  %v6765_v47 = vmul.f32 0.7978846, %v6733_v62  ;;  %v6702_v20 = vmul.f32 %v6670_v4, %v14311_v57  ;;  %v6854_v9 = vmul.f32 %v6822_v10, %v14262_v14 }
0x193c   : > { %v6768_v54 = vmul.f32 0.7978846, %v6736_v21  ;;  %8507 = vmatprep.mubr.msk.bf16.mxu0 %vm6933_vm5, %v6881_v5  ;;  %v6855_v39 = vmul.f32 %v6823_v52, %v14280_v43  ;;  %v6856_v59 = vmul.f32 %v6824_v28, %v6600_v8  ;;  %v6603_v43 = vmul.f32 0.5, %v14257_v15 }
0x193d   : > { %v9656_v36 = vpop.eup %9655  ;;  %9665 = vtanh.f32 %v6765_v47  ;;  %v6734_v23 = vadd.f32 %v6702_v20, %v14311_v57  ;;  %8508 = vmatmul.mubr.msk.bf16.vlgmr.msra.gmra.mrb[160].mxu0 %vm6933_vm5, %v6882_v11  ;;  %v6883_v2 = vpack.c.bf16 %v6854_v9, %v6853_v22  ;;  %v6604_v25 = vmul.f32 0.5, %v14267_v18 }
0x193e   : > { %v9658_v38 = vpop.eup %9657  ;;  %9667 = vtanh.f32 %v6768_v54  ;;  %v6884_v26 = vpack.c.bf16 %v6856_v59, %v6855_v39  ;;  %v6827_v60 = vadd.f32 1.0, %v9656_v36  ;;  %v6601_v56 = vmul.f32 0.5, %v14260_v45 }
0x193f   : > { %v9660_v42 = vpop.eup %9659  ;;  %v6766_v0 = vmul.f32 0.7978846, %v6734_v23  ;;  %8511 = vmatprep.mubr.msk.bf16.mxu0 %vm6933_vm5, %v6883_v2  ;;  %v6825_v14 = vadd.f32 1.0, %v9658_v38  ;;  %v6602_v11 = vmul.f32 0.5, %v14271_v3  ;;  %v6607_v63 = vmul.f32 0.5, %v14287_v32 }
0x1940   : > { %v9662_v6 = vpop.eup %9661  ;;  %v6828_v55 = vadd.f32 1.0, %v9660_v42  ;;  %v6859_v17 = vmul.f32 %v6827_v60, %v6603_v43  ;;  %v6608_v45 = vmul.f32 0.5, %v14302_v44  ;;  %v6605_v62 = vmul.f32 0.5, %v14297_v49 }
0x1941   : > { %9669 = vtanh.f32 %v6766_v0  ;;  %v6826_v50 = vadd.f32 1.0, %v9662_v6  ;;  %v6857_v34 = vmul.f32 %v6825_v14, %v6601_v56  ;;  %v6606_v4 = vmul.f32 0.5, %v14311_v57 }
0x1942   : > { %v6860_v46 = vmul.f32 %v6828_v55, %v6604_v25 }
0x1943   : > { %v6858_v51 = vmul.f32 %v6826_v50, %v6602_v11 }
0x1944   : > { %v6886_v27 = vpack.c.bf16 %v6860_v46, %v6859_v17 }
0x1945   : > { %v9664_v29 = vpop.eup %9663  ;;  %8512 = vmatmul.mubr.msk.bf16.gmra.mrb[164].mxu0 %vm6933_vm5, %v6884_v26  ;;  %v6885_v19 = vpack.c.bf16 %v6858_v51, %v6857_v34 }
0x1946   : > { %v6831_v15 = vadd.f32 1.0, %v9664_v29 }
0x1947   : > { %v9666_v24 = vpop.eup %9665  ;;  %8515 = vmatprep.mubr.msk.bf16.mxu0 %vm6933_vm5, %v6885_v19 }
0x1948   : > { %v9668_v18 = vpop.eup %9667  ;;  %v6829_v12 = vadd.f32 1.0, %v9666_v24  ;;  %v6863_v28 = vmul.f32 %v6831_v15, %v6607_v63 }
0x1949   : > { %v6832_v3 = vadd.f32 1.0, %v9668_v18 }
0x194a   : > { %v6861_v5 = vmul.f32 %v6829_v12, %v6605_v62 }
0x194b   : > { %v9670_v52 = vpop.eup %9669  ;;  %v6864_v40 = vmul.f32 %v6832_v3, %v6608_v45 }
0x194c   : > { %v6830_v10 = vadd.f32 1.0, %v9670_v52 }
0x194d   : > { %8516 = vmatmul.mubr.msk.bf16.gmra.mrb[168].mxu0 %vm6933_vm5, %v6886_v27  ;;  %v6888_v21 = vpack.c.bf16 %v6864_v40, %v6863_v28 }
0x194e   : > { %v6862_v22 = vmul.f32 %v6830_v10, %v6606_v4 }
0x1950   : > { %v6887_v8 = vpack.c.bf16 %v6862_v22, %v6861_v5 }
0x1952   : > { %8519 = vmatprep.mubr.msk.bf16.mxu0 %vm6933_vm5, %v6887_v8 }
0x1955   : > { %8520 = vmatmul.mubr.msk.bf16.gmra.mrb[172].mxu0 %vm6933_vm5, %v6888_v21 }
0x1967   : > { %v8485_v32 = vpop.f32.mrb[176].mxu1 }
0x1968   : > { %v14346_v44 = vadd.f32 %v8485_v32, %v14225_v58  ;;  %v6530_v47 = vpop.f32.mrb[177].mxu1 }
0x1969   : > { %v14349_v49 = vadd.f32 %v14225_v58, %v6530_v47  ;;  %v8486_v57 = vpop.f32.mrb[178].mxu1 }
0x196a   : > { %v6643_v20 = vmul.f32 0.044715, %v14346_v44  ;;  %v14353_v9 = vadd.f32 %v8486_v57, %v14225_v58  ;;  %v6533_v54 = vpop.f32.mrb[179].mxu1 }
0x196b   : > { %v6641_v39 = vmul.f32 0.044715, %v14349_v49  ;;  %v14357_v59 = vadd.f32 %v14225_v58, %v6533_v54 }
0x196c   : > { %v6675_v36 = vmul.f32 %v6643_v20, %v14346_v44  ;;  %v6644_v23 = vmul.f32 0.044715, %v14353_v9 }
0x196d   : > { %v6673_v2 = vmul.f32 %v6641_v39, %v14349_v49  ;;  %v6642_v38 = vmul.f32 0.044715, %v14357_v59 }
0x196e   : > { %v6707_v26 = vmul.f32 %v6675_v36, %v14346_v44  ;;  %v6676_v60 = vmul.f32 %v6644_v23, %v14353_v9 }
0x196f   : > { %v6705_v42 = vmul.f32 %v6673_v2, %v14349_v49  ;;  %v6674_v0 = vmul.f32 %v6642_v38, %v14357_v59  ;;  %v8489_v14 = vpop.f32.mrb[180].mxu1 }
0x1970   : > { %v6739_v6 = vadd.f32 %v6707_v26, %v14346_v44  ;;  %v6708_v43 = vmul.f32 %v6676_v60, %v14353_v9  ;;  %v14370_v25 = vadd.f32 %v8489_v14, %v14225_v58  ;;  %v6546_v55 = vpop.f32.mrb[181].mxu1 }
0x1971   : > { %v6737_v56 = vadd.f32 %v6705_v42, %v14349_v49  ;;  %v6706_v11 = vmul.f32 %v6674_v0, %v14357_v59  ;;  %v14375_v50 = vadd.f32 %v14225_v58, %v6546_v55  ;;  %v8490_v17 = vpop.f32.mrb[182].mxu1 }
0x1972   : > { %v6771_v46 = vmul.f32 0.7978846, %v6739_v6  ;;  %v6740_v34 = vadd.f32 %v6708_v43, %v14353_v9  ;;  %v6647_v51 = vmul.f32 0.044715, %v14370_v25  ;;  %v14380_v27 = vadd.f32 %v8490_v17, %v14225_v58  ;;  %v6549_v29 = vpop.f32.mrb[183].mxu1 }
0x1973   : > { %v6769_v19 = vmul.f32 0.7978846, %v6737_v56  ;;  %v6738_v24 = vadd.f32 %v6706_v11, %v14357_v59  ;;  %v6645_v15 = vmul.f32 0.044715, %v14375_v50  ;;  %v14385_v18 = vadd.f32 %v14225_v58, %v6549_v29 }
0x1974   : > { %9671 = vtanh.f32 %v6771_v46  ;;  %v6772_v63 = vmul.f32 0.7978846, %v6740_v34  ;;  %v6679_v45 = vmul.f32 %v6647_v51, %v14370_v25  ;;  %v6648_v3 = vmul.f32 0.044715, %v14380_v27 }
0x1975   : > { %9673 = vtanh.f32 %v6769_v19  ;;  %v6770_v12 = vmul.f32 0.7978846, %v6738_v24  ;;  %v6677_v52 = vmul.f32 %v6645_v15, %v14375_v50  ;;  %v6646_v28 = vmul.f32 0.044715, %v14385_v18 }
0x1976   : > { %9675 = vtanh.f32 %v6772_v63  ;;  %v6711_v40 = vmul.f32 %v6679_v45, %v14370_v25  ;;  %v6680_v62 = vmul.f32 %v6648_v3, %v14380_v27  ;;  %v6611_v51 = vmul.f32 0.5, %v14346_v44 }
0x1977   : > { %9677 = vtanh.f32 %v6770_v12  ;;  %v6709_v4 = vmul.f32 %v6677_v52, %v14375_v50  ;;  %v6678_v10 = vmul.f32 %v6646_v28, %v14385_v18  ;;  %v8493_v21 = vpop.f32.mrb[184].mxu1  ;;  %v6609_v12 = vmul.f32 0.5, %v14349_v49 }
0x1978   : > { %v6743_v5 = vadd.f32 %v6711_v40, %v14370_v25  ;;  %v6712_v22 = vmul.f32 %v6680_v62, %v14380_v27  ;;  %v14398_v8 = vadd.f32 %v8493_v21, %v14225_v58  ;;  %v6562_v32 = vpop.f32.mrb[185].mxu1  ;;  %v6612_v62 = vmul.f32 0.5, %v14353_v9 }
0x1979   : > { %v6741_v47 = vadd.f32 %v6709_v4, %v14375_v50  ;;  %v6710_v57 = vmul.f32 %v6678_v10, %v14385_v18  ;;  %v14403_v20 = vadd.f32 %v14225_v58, %v6562_v32  ;;  %v8494_v54 = vpop.f32.mrb[186].mxu1 }
0x197a   : > { %v6775_v39 = vmul.f32 0.7978846, %v6743_v5  ;;  %v6744_v36 = vadd.f32 %v6712_v22, %v14380_v27  ;;  %v6651_v23 = vmul.f32 0.044715, %v14398_v8  ;;  %v14408_v2 = vadd.f32 %v8494_v54, %v14225_v58  ;;  %v6565_v38 = vpop.f32.mrb[187].mxu1 }
0x197b   : > { %v6773_v26 = vmul.f32 0.7978846, %v6741_v47  ;;  %v6742_v60 = vadd.f32 %v6710_v57, %v14385_v18  ;;  %v6649_v42 = vmul.f32 0.044715, %v14403_v20  ;;  %v14413_v0 = vadd.f32 %v14225_v58, %v6565_v38 }
0x197c   : > { %9679 = vtanh.f32 %v6775_v39  ;;  %v6776_v14 = vmul.f32 0.7978846, %v6744_v36  ;;  %v6683_v6 = vmul.f32 %v6651_v23, %v14398_v8  ;;  %v6652_v43 = vmul.f32 0.044715, %v14408_v2 }
0x197d   : > { %9681 = vtanh.f32 %v6773_v26  ;;  %v6774_v55 = vmul.f32 0.7978846, %v6742_v60  ;;  %v6681_v56 = vmul.f32 %v6649_v42, %v14403_v20  ;;  %v6650_v11 = vmul.f32 0.044715, %v14413_v0 }
0x197e   : > { %v9672_v17 = vpop.eup %9671  ;;  %9683 = vtanh.f32 %v6776_v14  ;;  %v6715_v46 = vmul.f32 %v6683_v6, %v14398_v8  ;;  %v6684_v34 = vmul.f32 %v6652_v43, %v14408_v2  ;;  %v6610_v5 = vmul.f32 0.5, %v14357_v59 }
0x197f   : > { %v9674_v29 = vpop.eup %9673  ;;  %9685 = vtanh.f32 %v6774_v55  ;;  %v6713_v19 = vmul.f32 %v6681_v56, %v14403_v20  ;;  %v6682_v24 = vmul.f32 %v6650_v11, %v14413_v0  ;;  %v6835_v15 = vadd.f32 1.0, %v9672_v17 }
0x1980   : > { %v9676_v63 = vpop.eup %9675  ;;  %v6747_v45 = vadd.f32 %v6715_v46, %v14398_v8  ;;  %v6716_v3 = vmul.f32 %v6684_v34, %v14408_v2  ;;  %v6833_v52 = vadd.f32 1.0, %v9674_v29  ;;  %v6615_v43 = vmul.f32 0.5, %v14370_v25 }
0x1981   : > { %v9678_v28 = vpop.eup %9677  ;;  %v6745_v40 = vadd.f32 %v6713_v19, %v14403_v20  ;;  %v6714_v44 = vmul.f32 %v6682_v24, %v14413_v0  ;;  %v6836_v4 = vadd.f32 1.0, %v9676_v63  ;;  %v6867_v57 = vmul.f32 %v6835_v15, %v6611_v51 }
0x1982   : > { %v6779_v10 = vmul.f32 0.7978846, %v6747_v45  ;;  %v6748_v21 = vadd.f32 %v6716_v3, %v14408_v2  ;;  %v6834_v22 = vadd.f32 1.0, %v9678_v28  ;;  %v6865_v39 = vmul.f32 %v6833_v52, %v6609_v12 }
0x1983   : > { %v6777_v32 = vmul.f32 0.7978846, %v6745_v40  ;;  %v6746_v47 = vadd.f32 %v6714_v44, %v14413_v0  ;;  %v6868_v49 = vmul.f32 %v6836_v4, %v6612_v62  ;;  %v6616_v55 = vmul.f32 0.5, %v14380_v27 }
0x1984   : > { %9687 = vtanh.f32 %v6779_v10  ;;  %v6780_v54 = vmul.f32 0.7978846, %v6748_v21  ;;  %v6866_v36 = vmul.f32 %v6834_v22, %v6610_v5  ;;  %v6613_v11 = vmul.f32 0.5, %v14375_v50 }
0x1985   : > { %9689 = vtanh.f32 %v6777_v32  ;;  %v6778_v23 = vmul.f32 0.7978846, %v6746_v47  ;;  %v6890_v38 = vpack.c.bf16 %v6868_v49, %v6867_v57  ;;  %v6614_v17 = vmul.f32 0.5, %v14385_v18 }
0x1986   : > { %v9680_v9 = vpop.eup %9679  ;;  %9691 = vtanh.f32 %v6780_v54  ;;  %v6889_v26 = vpack.c.bf16 %v6866_v36, %v6865_v39  ;;  %v6619_v50 = vmul.f32 0.5, %v14398_v8  ;;  %v6620_v18 = vmul.f32 0.5, %v14408_v2 }
0x1987   : > { %v9682_v60 = vpop.eup %9681  ;;  %9693 = vtanh.f32 %v6778_v23  ;;  %v6839_v42 = vadd.f32 1.0, %v9680_v9  ;;  %v6617_v28 = vmul.f32 0.5, %v14403_v20  ;;  %v6618_v40 = vmul.f32 0.5, %v14413_v0 }
0x1988   : > { %v9684_v59 = vpop.eup %9683  ;;  %8523 = vmatprep.mubr.msk.bf16.mxu0 %vm6933_vm5, %v6889_v26  ;;  %v6837_v14 = vadd.f32 1.0, %v9682_v60 }
0x1989   : > { %v9686_v6 = vpop.eup %9685  ;;  %8524 = vmatmul.mubr.msk.bf16.gmra.mrb[176].mxu0 %vm6933_vm5, %v6890_v38  ;;  %v6840_v56 = vadd.f32 1.0, %v9684_v59  ;;  %v6871_v34 = vmul.f32 %v6839_v42, %v6615_v43 }
0x198a   : > { %v6838_v46 = vadd.f32 1.0, %v9686_v6  ;;  %v6869_v29 = vmul.f32 %v6837_v14, %v6613_v11 }
0x198b   : > { %v6872_v51 = vmul.f32 %v6840_v56, %v6616_v55 }
0x198c   : > { %v6870_v19 = vmul.f32 %v6838_v46, %v6614_v17 }
0x198d   : > { %v6892_v24 = vpack.c.bf16 %v6872_v51, %v6871_v34 }
0x198e   : > { %v9688_v15 = vpop.eup %9687  ;;  %v6891_v63 = vpack.c.bf16 %v6870_v19, %v6869_v29 }
0x198f   : > { %v9690_v45 = vpop.eup %9689  ;;  %v6843_v3 = vadd.f32 1.0, %v9688_v15 }
0x1990   : > { %v9692_v12 = vpop.eup %9691  ;;  %8527 = vmatprep.mubr.msk.bf16.mxu0 %vm6933_vm5, %v6891_v63  ;;  %v6841_v25 = vadd.f32 1.0, %v9690_v45 }
0x1991   : > { %v9694_v27 = vpop.eup %9693  ;;  %8528 = vmatmul.mubr.msk.bf16.gmra.mrb[180].mxu0 %vm6933_vm5, %v6892_v24  ;;  %v6844_v52 = vadd.f32 1.0, %v9692_v12  ;;  %v6875_v62 = vmul.f32 %v6843_v3, %v6619_v50 }
0x1992   : > { %v6842_v44 = vadd.f32 1.0, %v9694_v27  ;;  %v6873_v10 = vmul.f32 %v6841_v25, %v6617_v28 }
0x1993   : > { %v6876_v4 = vmul.f32 %v6844_v52, %v6620_v18 }
0x1994   : > { %v6874_v21 = vmul.f32 %v6842_v44, %v6618_v40 }
0x1995   : > { %v6894_v5 = vpack.c.bf16 %v6876_v4, %v6875_v62  ;;  %v14453_v4 = vld [vmem:[#allocation11 + $0x1] ss:$0 sm:$0xff] }
0x1996   : > { %v6893_v22 = vpack.c.bf16 %v6874_v21, %v6873_v10 }
0x1998   : > { %8531 = vmatprep.mubr.msk.bf16.mxu0 %vm6933_vm5, %v6893_v22 }
0x1999   : > { %8532 = vmatmul.mubr.msk.bf16.gmra.mrb[184].mxu0 %vm6933_vm5, %v6894_v5 }
0x19a3   : > { %v8497_v32 = vpop.f32.mrb[188].mxu1 }
0x19a4   : > { %v6587_v8 = vadd.f32 %v8497_v32, %v14225_v58  ;;  %v6578_v2 = vpop.f32.mrb[189].mxu1 }
0x19a5   : > { %v6579_v47 = vadd.f32 %v14225_v58, %v6578_v2  ;;  %v8498_v20 = vpop.f32.mrb[190].mxu1 }
0x19a6   : > { %v6655_v57 = vmul.f32 0.044715, %v6587_v8  ;;  %v6590_v0 = vadd.f32 %v8498_v20, %v14225_v58  ;;  %v6581_v49 = vpop.f32.mrb[191].mxu1  ;;  %v6623_v45 = vmul.f32 0.5, %v6587_v8 }
0x19a7   : > { %v6653_v54 = vmul.f32 0.044715, %v6579_v47  ;;  %v6582_v39 = vadd.f32 %v14225_v58, %v6581_v49  ;;  %v6621_v25 = vmul.f32 0.5, %v6579_v47 }
0x19a8   : > { %v6687_v36 = vmul.f32 %v6655_v57, %v6587_v8  ;;  %v6656_v23 = vmul.f32 0.044715, %v6590_v0  ;;  %v6624_v3 = vmul.f32 0.5, %v6590_v0 }
0x19a9   : > { %v6685_v38 = vmul.f32 %v6653_v54, %v6579_v47  ;;  %v6654_v9 = vmul.f32 0.044715, %v6582_v39  ;;  %v6622_v27 = vmul.f32 0.5, %v6582_v39 }
0x19aa   : > { %v6719_v26 = vmul.f32 %v6687_v36, %v6587_v8  ;;  %v6688_v60 = vmul.f32 %v6656_v23, %v6590_v0 }
0x19ab   : > { %v6717_v42 = vmul.f32 %v6685_v38, %v6579_v47  ;;  %v6686_v59 = vmul.f32 %v6654_v9, %v6582_v39 }
0x19ac   : > { %v6751_v14 = vadd.f32 %v6719_v26, %v6587_v8  ;;  %v6720_v6 = vmul.f32 %v6688_v60, %v6590_v0 }
0x19ad   : > { %v6749_v43 = vadd.f32 %v6717_v42, %v6579_v47  ;;  %v6718_v55 = vmul.f32 %v6686_v59, %v6582_v39 }
0x19ae   : > { %v6783_v56 = vmul.f32 0.7978846, %v6751_v14  ;;  %v6752_v11 = vadd.f32 %v6720_v6, %v6590_v0 }
0x19af   : > { %v6781_v17 = vmul.f32 0.7978846, %v6749_v43  ;;  %v6750_v46 = vadd.f32 %v6718_v55, %v6582_v39 }
0x19b0   : > { %9695 = vtanh.f32 %v6783_v56  ;;  %v6784_v34 = vmul.f32 0.7978846, %v6752_v11 }
0x19b1   : > { %9697 = vtanh.f32 %v6781_v17  ;;  %v6782_v58 = vmul.f32 0.7978846, %v6750_v46 }
0x19b2   : > { %9699 = vtanh.f32 %v6784_v34 }
0x19b3   : > { %9701 = vtanh.f32 %v6782_v58 }
0x19ba   : > { %v9696_v51 = vpop.eup %9695 }
0x19bb   : > { %v9698_v29 = vpop.eup %9697  ;;  %v6847_v19 = vadd.f32 1.0, %v9696_v51 }
0x19bc   : > { %v9700_v24 = vpop.eup %9699  ;;  %v6845_v15 = vadd.f32 1.0, %v9698_v29  ;;  %v15014_v29 = vld [vmem:[#allocation59_spill] sm:$0xff] }
0x19bd   : > { %v9702_v63 = vpop.eup %9701  ;;  %v6848_v12 = vadd.f32 1.0, %v9700_v24  ;;  %v6879_v18 = vmul.f32 %v6847_v19, %v6623_v45  ;;  %v15015_v24 = vld [vmem:[#allocation57_spill] sm:$0xff] }
0x19be   : > { %v6846_v50 = vadd.f32 1.0, %v9702_v63  ;;  %v6877_v28 = vmul.f32 %v6845_v15, %v6621_v25  ;;  %v15016_v63 = vld [vmem:[#allocation33_spill] sm:$0xff] }
0x19bf   : > { %v6880_v52 = vmul.f32 %v6848_v12, %v6624_v3 }
0x19c0   : > { %v6878_v40 = vmul.f32 %v6846_v50, %v6622_v27  ;;  %v15017_v50 = vld [vmem:[#allocation62_spill] sm:$0xff] }
0x19c1   : > { %v6896_v44 = vpack.c.bf16 %v6880_v52, %v6879_v18 }
0x19c2   : > { %v6895_v62 = vpack.c.bf16 %v6878_v40, %v6877_v28  ;;  %v15018_v40 = vld [vmem:[#allocation64_spill] sm:$0xff] }
0x19c4   : > { %8535 = vmatprep.mubr.msk.bf16.mxu0 %vm6933_vm5, %v6895_v62 }
0x19c5   : > { %8536 = vmatmul.mubr.msk.bf16.gmra.mrb[188].mxu0 %vm6933_vm5, %v6896_v44 }
0x1a10   : > { %v8509_v10 = vpop.f32.mrb[160].mxu0 }
0x1a11   : > { %v7025_v21 = vadd.f32 %v8509_v10, %v14453_v4  ;;  %v7016_v5 = vpop.f32.mrb[161].mxu0  ;;  %v15019_v10 = vld [vmem:[#allocation67_spill] sm:$0xff] }
0x1a12   : > { %v7017_v22 = vadd.f32 %v14453_v4, %v7016_v5  ;;  %v8510_v32 = vpop.f32.mrb[162].mxu0  ;;  %v15020_v5 = vld [vmem:[#allocation69_spill] sm:$0xff] }
0x1a13   : > { %v7145_v8 = vadd.f32 %v7025_v21, %v13628_v13  ;;  %v7028_v2 = vadd.f32 %v8510_v32, %v14453_v4  ;;  %v7019_v47 = vpop.f32.mrb[163].mxu0 }
0x1a14   : > { %v7143_v20 = vadd.f32 %v7017_v22, %v13621_v31  ;;  %v7020_v57 = vadd.f32 %v14453_v4, %v7019_v47 }
0x1a15   : > { %7177 = vst.msk [vmem:[%s14463_s22 + $0x10] sm:$0xff] %vm498_vm0, %v7145_v8  ;;  %v7146_v0 = vadd.f32 %v7028_v2, %v13641_v7 }
0x1a16   : > { %7175 = vst.msk [vmem:[%s14463_s22] sm:$0xff] %vm498_vm0, %v7143_v20  ;;  %v7144_v13 = vadd.f32 %v7020_v57, %v13631_v53  ;;  %v15021_v57 = vld [vmem:[#allocation87_spill] sm:$0xff] }
0x1a17   : > { %7178 = vst.msk [vmem:[%s14463_s22 + $0x18] sm:$0xff] %vm498_vm0, %v7146_v0 }
0x1a18   : > { %7176 = vst.msk [vmem:[%s14463_s22 + $0x8] sm:$0xff] %vm498_vm0, %v7144_v13  ;;  %v8513_v31 = vpop.f32.mrb[164].mxu0 }
0x1a19   : > { %v7041_v49 = vadd.f32 %v8513_v31, %v14453_v4  ;;  %v7032_v54 = vpop.f32.mrb[165].mxu0 }
0x1a1a   : > { %v7033_v39 = vadd.f32 %v14453_v4, %v7032_v54  ;;  %v8514_v36 = vpop.f32.mrb[166].mxu0 }
0x1a1b   : > { %v7149_v7 = vadd.f32 %v7041_v49, %v13669_v33  ;;  %v7044_v23 = vadd.f32 %v8514_v36, %v14453_v4  ;;  %v7035_v38 = vpop.f32.mrb[167].mxu0  ;;  %v15022_v49 = vld [vmem:[#allocation89_spill] sm:$0xff]  ;;  %v15023_v36 = vld [vmem:[#allocation51_spill] sm:$0xff] }
0x1a1c   : > { %v7147_v53 = vadd.f32 %v7033_v39, %v13656_v41  ;;  %v7036_v9 = vadd.f32 %v14453_v4, %v7035_v38 }
0x1a1d   : > { %7181 = vst.msk [vmem:[%s14463_s22 + $0x30] sm:$0xff] %vm498_vm0, %v7149_v7  ;;  %v7150_v26 = vadd.f32 %v7044_v23, %v13661_v1  ;;  %v15024_v23 = vld [vmem:[#allocation52_spill] sm:$0xff] }
0x1a1e   : > { %7179 = vst.msk [vmem:[%s14463_s22 + $0x20] sm:$0xff] %vm498_vm0, %v7147_v53  ;;  %v7148_v60 = vadd.f32 %v7036_v9, %v13646_v30 }
0x1a1f   : > { %7182 = vst.msk [vmem:[%s14463_s22 + $0x38] sm:$0xff] %vm498_vm0, %v7150_v26 }
0x1a20   : > { %7180 = vst.msk [vmem:[%s14463_s22 + $0x28] sm:$0xff] %vm498_vm0, %v7148_v60  ;;  %v8517_v33 = vpop.f32.mrb[168].mxu0 }
0x1a21   : > { %v7057_v41 = vadd.f32 %v8517_v33, %v14453_v4  ;;  %v7048_v42 = vpop.f32.mrb[169].mxu0 }
0x1a22   : > { %v7049_v59 = vadd.f32 %v14453_v4, %v7048_v42  ;;  %v8518_v14 = vpop.f32.mrb[170].mxu0 }
0x1a23   : > { %v7153_v1 = vadd.f32 %v7057_v41, %v13707_v16  ;;  %v7060_v6 = vadd.f32 %v8518_v14, %v14453_v4  ;;  %v7051_v43 = vpop.f32.mrb[171].mxu0  ;;  %v15025_v41 = vld [vmem:[#allocation91_spill] sm:$0xff] }
0x1a24   : > { %v7151_v30 = vadd.f32 %v7049_v59, %v13690_v35  ;;  %v7052_v55 = vadd.f32 %v14453_v4, %v7051_v43 }
0x1a25   : > { %7185 = vst.msk [vmem:[%s14463_s22 + $0x50] sm:$0xff] %vm498_vm0, %v7153_v1  ;;  %v7154_v56 = vadd.f32 %v7060_v6, %v13693_v61  ;;  %v15026_v1 = vld [vmem:[#allocation93_spill] sm:$0xff] }
0x1a26   : > { %7183 = vst.msk [vmem:[%s14463_s22 + $0x40] sm:$0xff] %vm498_vm0, %v7151_v30  ;;  %v7152_v11 = vadd.f32 %v7052_v55, %v13676_v48  ;;  %v15027_v30 = vld [vmem:[#allocation28_spill] sm:$0xff] }
0x1a27   : > { %7186 = vst.msk [vmem:[%s14463_s22 + $0x58] sm:$0xff] %vm498_vm0, %v7154_v56  ;;  %v15028_v56 = vld [vmem:[#allocation29_spill] sm:$0xff] }
0x1a28   : > { %7184 = vst.msk [vmem:[%s14463_s22 + $0x48] sm:$0xff] %vm498_vm0, %v7152_v11  ;;  %v8521_v16 = vpop.f32.mrb[172].mxu0 }
0x1a29   : > { %v7073_v35 = vadd.f32 %v8521_v16, %v14453_v4  ;;  %v7064_v17 = vpop.f32.mrb[173].mxu0 }
0x1a2a   : > { %v7065_v46 = vadd.f32 %v14453_v4, %v7064_v17  ;;  %v8522_v34 = vpop.f32.mrb[174].mxu0 }
0x1a2b   : > { %v7157_v61 = vadd.f32 %v7073_v35, %v13753_v37  ;;  %v7076_v58 = vadd.f32 %v8522_v34, %v14453_v4  ;;  %v7067_v51 = vpop.f32.mrb[175].mxu0 }
0x1a2c   : > { %v7155_v48 = vadd.f32 %v7065_v46, %v15014_v29  ;;  %v7068_v19 = vadd.f32 %v14453_v4, %v7067_v51 }
0x1a2d   : > { %7189 = vst.msk [vmem:[%s14463_s22 + $0x70] sm:$0xff] %vm498_vm0, %v7157_v61  ;;  %v7158_v15 = vadd.f32 %v7076_v58, %v15015_v24  ;;  %v15029_v61 = vld [vmem:[#allocation53_spill] sm:$0xff] }
0x1a2e   : > { %7187 = vst.msk [vmem:[%s14463_s22 + $0x60] sm:$0xff] %vm498_vm0, %v7155_v48  ;;  %v7156_v45 = vadd.f32 %v7068_v19, %v15016_v63  ;;  %v15030_v48 = vld [vmem:[#allocation54_spill] sm:$0xff] }
0x1a2f   : > { %7190 = vst.msk [vmem:[%s14463_s22 + $0x78] sm:$0xff] %vm498_vm0, %v7158_v15  ;;  %v15031_v15 = vld [vmem:[#allocation95_spill] sm:$0xff] }
0x1a30   : > { %7188 = vst.msk [vmem:[%s14463_s22 + $0x68] sm:$0xff] %vm498_vm0, %v7156_v45  ;;  %v15032_v45 = vld [vmem:[#allocation97_spill] sm:$0xff] }
0x1a5c   : > { %v8525_v37 = vpop.f32.mrb[176].mxu0 }
0x1a5d   : > { %v7089_v3 = vadd.f32 %v8525_v37, %v14453_v4  ;;  %v7080_v12 = vpop.f32.mrb[177].mxu0 }
0x1a5e   : > { %v7081_v25 = vadd.f32 %v14453_v4, %v7080_v12  ;;  %v8526_v27 = vpop.f32.mrb[178].mxu0 }
0x1a5f   : > { %v7161_v18 = vadd.f32 %v7089_v3, %v15017_v50  ;;  %v7092_v52 = vadd.f32 %v8526_v27, %v14453_v4  ;;  %v7083_v28 = vpop.f32.mrb[179].mxu0 }
0x1a60   : > { %v7159_v44 = vadd.f32 %v7081_v25, %v15018_v40  ;;  %v7084_v62 = vadd.f32 %v14453_v4, %v7083_v28 }
0x1a61   : > { %7193 = vst.msk [vmem:[%s14463_s22 + $0x90] sm:$0xff] %vm498_vm0, %v7161_v18  ;;  %v7162_v21 = vadd.f32 %v7092_v52, %v15019_v10 }
0x1a62   : > { %7191 = vst.msk [vmem:[%s14463_s22 + $0x80] sm:$0xff] %vm498_vm0, %v7159_v44  ;;  %v7160_v22 = vadd.f32 %v7084_v62, %v15020_v5 }
0x1a63   : > { %7194 = vst.msk [vmem:[%s14463_s22 + $0x98] sm:$0xff] %vm498_vm0, %v7162_v21 }
0x1a64   : > { %7192 = vst.msk [vmem:[%s14463_s22 + $0x88] sm:$0xff] %vm498_vm0, %v7160_v22  ;;  %v8529_v32 = vpop.f32.mrb[180].mxu0 }
0x1a65   : > { %v7105_v8 = vadd.f32 %v8529_v32, %v14453_v4  ;;  %v7096_v2 = vpop.f32.mrb[181].mxu0 }
0x1a66   : > { %v7097_v47 = vadd.f32 %v14453_v4, %v7096_v2  ;;  %v8530_v20 = vpop.f32.mrb[182].mxu0 }
0x1a67   : > { %v7165_v0 = vadd.f32 %v7105_v8, %v15021_v57  ;;  %v7108_v13 = vadd.f32 %v8530_v20, %v14453_v4  ;;  %v7099_v31 = vpop.f32.mrb[183].mxu0 }
0x1a68   : > { %v7163_v54 = vadd.f32 %v7097_v47, %v15022_v49  ;;  %v7100_v39 = vadd.f32 %v14453_v4, %v7099_v31 }
0x1a69   : > { %7197 = vst.msk [vmem:[%s14463_s22 + $0xb0] sm:$0xff] %vm498_vm0, %v7165_v0  ;;  %v7166_v7 = vadd.f32 %v7108_v13, %v15023_v36 }
0x1a6a   : > { %7195 = vst.msk [vmem:[%s14463_s22 + $0xa0] sm:$0xff] %vm498_vm0, %v7163_v54  ;;  %v7164_v38 = vadd.f32 %v7100_v39, %v15024_v23 }
0x1a6b   : > { %7198 = vst.msk [vmem:[%s14463_s22 + $0xb8] sm:$0xff] %vm498_vm0, %v7166_v7 }
0x1a6c   : > { %7196 = vst.msk [vmem:[%s14463_s22 + $0xa8] sm:$0xff] %vm498_vm0, %v7164_v38  ;;  %v8533_v53 = vpop.f32.mrb[184].mxu0 }
0x1a6d   : > { %v7121_v9 = vadd.f32 %v8533_v53, %v14453_v4  ;;  %v7112_v26 = vpop.f32.mrb[185].mxu0 }
0x1a6e   : > { %v7113_v60 = vadd.f32 %v14453_v4, %v7112_v26  ;;  %v8534_v33 = vpop.f32.mrb[186].mxu0 }
0x1a6f   : > { %v7169_v42 = vadd.f32 %v7121_v9, %v15025_v41  ;;  %v7124_v59 = vadd.f32 %v8534_v33, %v14453_v4  ;;  %v7115_v14 = vpop.f32.mrb[187].mxu0 }
0x1a70   : > { %v7167_v6 = vadd.f32 %v7113_v60, %v15026_v1  ;;  %v7116_v43 = vadd.f32 %v14453_v4, %v7115_v14 }
0x1a71   : > { %7201 = vst.msk [vmem:[%s14463_s22 + $0xd0] sm:$0xff] %vm498_vm0, %v7169_v42  ;;  %v7170_v55 = vadd.f32 %v7124_v59, %v15027_v30 }
0x1a72   : > { %7199 = vst.msk [vmem:[%s14463_s22 + $0xc0] sm:$0xff] %vm498_vm0, %v7167_v6  ;;  %v7168_v11 = vadd.f32 %v7116_v43, %v15028_v56 }
0x1a73   : > { %7202 = vst.msk [vmem:[%s14463_s22 + $0xd8] sm:$0xff] %vm498_vm0, %v7170_v55 }
0x1a74   : > { %7200 = vst.msk [vmem:[%s14463_s22 + $0xc8] sm:$0xff] %vm498_vm0, %v7168_v11 }
0x1a98   : > { %v8537_v16 = vpop.f32.mrb[188].mxu0 }
0x1a99   : > { %v7137_v35 = vadd.f32 %v8537_v16, %v14453_v4  ;;  %v7128_v17 = vpop.f32.mrb[189].mxu0 }
0x1a9a   : > { %v7129_v46 = vadd.f32 %v14453_v4, %v7128_v17  ;;  %v8538_v34 = vpop.f32.mrb[190].mxu0 }
0x1a9b   : > { %v7173_v58 = vadd.f32 %v7137_v35, %v15029_v61  ;;  %v7140_v51 = vadd.f32 %v8538_v34, %v14453_v4  ;;  %v7131_v29 = vpop.f32.mrb[191].mxu0 }
0x1a9c   : > { %v7171_v19 = vadd.f32 %v7129_v46, %v15030_v48  ;;  %v7132_v24 = vadd.f32 %v14453_v4, %v7131_v29 }
0x1a9d   : > { %7205 = vst.msk [vmem:[%s14463_s22 + $0xf0] sm:$0xff] %vm498_vm0, %v7173_v58  ;;  %v7174_v63 = vadd.f32 %v7140_v51, %v15031_v15 }
0x1a9e   : > { %7203 = vst.msk [vmem:[%s14463_s22 + $0xe0] sm:$0xff] %vm498_vm0, %v7171_v19  ;;  %v7172_v37 = vadd.f32 %v7132_v24, %v15032_v45 }
0x1a9f   : > { %7206 = vst.msk [vmem:[%s14463_s22 + $0xf8] sm:$0xff] %vm498_vm0, %v7174_v63 }
0x1aa0   : > { %7204 = vst.msk [vmem:[%s14463_s22 + $0xe8] sm:$0xff] %vm498_vm0, %v7172_v37 }
0x1aa1   : > { %10002 = shalt.err (!%p9999_p4)
}
0x1aa2   : > { %s10003_s24 = scalar_lea.hbm %s14585_s21, 4096  ;;  %s10007_s22 = scalar_lea.hbm %s14648_s9, 8192 }
0x1aa3   : > { %p10004_p11 = scmp.ne.s32.totalorder %s14585_s21, %s10003_s24  ;;  %p10008_p7 = scmp.lt.u32.totalorder %s14585_s21, %s14648_s9 }
0x1aa4   : > { %p10009_p6 = scmp.lt.u32.totalorder %s10007_s22, %s10003_s24  ;;  %p10011_p12 = scmp.lt.u32.totalorder %s10003_s24, %s14585_s21 }
0x1aa5   : > { %p10005_p0 = pnand %p10004_p11, %p15033_p13 }
0x1aa6   : > { %p10010_p9 = por %p10009_p6, %p10008_p7 }
0x1aa7   : > { %p10006_p5 = pneg %p10005_p0 }
0x1aa8   : > { %p10012_p1 = por %p10011_p12, %p10010_p9 }
0x1aaa   : > { %p10013_p3 = pnand %p10012_p1, %p10006_p5 }
0x1aac   : > { %10016 = shalt.err (!%p10013_p3)
}
0x1aad   : > { %s10101_s18 = smov 128  }
0x1aae   : > { %8637 = dma.vmem_to_hbm [thread:$0]  (%p15033_p13), %s14590_s19, 4096, %s14585_s21, %s7208_s15, %s10101_s18, %s10101_s18, %s10097_s27  }
0x1aaf PF: > { %s7237_s13 = sand.u32 1, %s10059_s30   ;;  %p15034_p2 = scmp.ne.s32.totalorder %s14750_s5, 0 }
0x1ab0   : > { %p15035_p8 = scmp.ge.s32.totalorder %s10071_s12, 2  ;;  %s7238_s17 = scalar_lea.sflag [#allocation4], %s7237_s13 }
0x1ab2   : > { %p8669_p10 = pnand %p15035_p8, %p15034_p2 }
0x1ab4   : > { %10054 = dma.done.wait (!%p8669_p10), %s7238_s17, 4096  }
0x1ab5   : > { %10056 = vsyncadd (!%p8669_p10), %s7238_s17, 4294963200  ;;  %p26_p4 = scmp.ge.s32.totalorder %s10380_s29, 4   ;;  %s15036_s30 = smov %s10063_s10 }
0x1ab6   : > { %s15037_s10 = smov %s10067_s11  ;;  %s15038_s11 = smov %s10391_s26 }
0x1ab7   : > { %s15039_s12 = smov %s10380_s29  ;;  %28 = sbr.rel (!%p26_p4) target bundleno = 13 (0xd), region = 133 }
0x1abe   :  { %7243 = vsyncpa [#allocation3], 1 }
0x1abf   :  { %7245 = vsyncpa [#allocation3 + $0x1], 1 }
0x1ac0   :  { %7246 = vsyncpa [#allocation6], 1 }
0x1ac1   :  { %7247 = vsyncpa [#allocation9], 1 }
0x1ac2   :  { %7248 = vsyncpa [#allocation12], 1 }
0x1ac3   :  { %7249 = vsyncpa [#allocation15], 1 }
0x1ac4   :  { %7250 = vsyncpa [#allocation4], 1 }
0x1ac5   :  { %7252 = vsyncpa [#allocation4 + $0x1], 1 }

</bundles_post_ra>
